<compile_context>
chip_gen: v7x
topology: tpu7x:2x2x1
jax: 0.10.0
libtpu: 0.0.40
codegen_flags: <defaults>
</compile_context>

<pallas_src>
from functools import partial

import jax
import jax.numpy as jnp
from jax.experimental import pallas as pl
from jax.experimental.pallas import tpu as pltpu


def _fused_conv_relu_kernel(x_ref, w_ref, b_ref, o_ref, *, H, W, Wp, KH, KW, Cin, Cout):
    """Fused multi-size conv + bias + ReLU for one batch sample.

    x_ref: (1, Cin, Lf)       zero-padded input, spatial flattened row-major with
                              padded row width Wp;  Lf >= H*Wp + (KH-1)*Wp + (KW-1)
    w_ref: (Cout, KH*KW*Cin)  per-tap (Cout, Cin) weight slabs, tap-major
    b_ref: (Cout, 1)          bias
    o_ref: (1, Cout, H*W)     output (lane-dense store, spatial on lanes)
    """
    NB = H * Wp                               # padded-grid output columns
    xf = x_ref[0]                             # (Cin, Lf) -- lives in a few vregs

    acc = jnp.zeros((Cout, NB), dtype=jnp.float32)
    for ky in range(KH):
        for kx in range(KW):
            t = ky * KW + kx
            d = ky * Wp + kx                  # flat offset of this tap
            xs = xf[:, d:d + NB]              # (Cin, NB): lane-axis-only static slice
            w_t = w_ref[:, t * Cin:(t + 1) * Cin]          # (Cout, Cin)
            acc = acc + jnp.dot(w_t, xs, preferred_element_type=jnp.float32)

    # Drop the (Wp - W) garbage columns of every output row -> (Cout, H*W), lane dense.
    valid = jnp.concatenate([acc[:, h * Wp:h * Wp + W] for h in range(H)], axis=1)
    out = jnp.maximum(valid + b_ref[...], 0.0)             # fused bias + ReLU
    o_ref[0] = out.astype(o_ref.dtype)


def fused_conv_relu_nchw(x, w_packed, b_packed, *, KH, KW, pad):
    """x: (N, Cin, H, W) NCHW -> (N, Cout, H, W). Single pallas_call for all convs."""
    N, Cin, H, W = x.shape
    Cout = w_packed.shape[0]
    Hp, Wp = H + 2 * pad, W + 2 * pad
    NB = H * Wp
    need = NB + (KH - 1) * Wp + (KW - 1)      # max flat index touched + 1
    extra_rows = -(-max(0, need - Hp * Wp) // Wp)
    # One pad for all three convs (pad=5 each side, plus a few zero rows at the bottom
    # so every tap's flat lane-slice stays in bounds), then flatten padded spatial.
    xp = jnp.pad(x, ((0, 0), (0, 0), (pad, pad + extra_rows), (pad, pad)))
    Lf = (Hp + extra_rows) * Wp
    xf = xp.reshape(N, Cin, Lf)

    kernel = partial(_fused_conv_relu_kernel, H=H, W=W, Wp=Wp, KH=KH, KW=KW,
                     Cin=Cin, Cout=Cout)
    out = pl.pallas_call(
        kernel,
        out_shape=jax.ShapeDtypeStruct((N, Cout, H * W), x.dtype),
        grid=(N,),
        in_specs=[
            pl.BlockSpec((1, Cin, Lf), lambda n: (n, 0, 0)),          # per-sample input
            pl.BlockSpec((Cout, KH * KW * Cin), lambda n: (0, 0)),     # fused weights
            pl.BlockSpec((Cout, 1), lambda n: (0, 0)),                 # fused bias
        ],
        out_specs=pl.BlockSpec((1, Cout, H * W), lambda n: (n, 0, 0)),
        compiler_params=pltpu.CompilerParams(
            dimension_semantics=("parallel",)),   # lets v7x shard batch across 2 TCs
    )(xf, w_packed, b_packed)
    return out.reshape(N, Cout, H, W)


class ConvolutionModulePallas:
    """Pallas port of ConvolutionModule_mod (deterministic synthetic weights)."""

    KMAX = 11
    PAD = 5

    def __init__(self, input_channels, output_channels, key):
        keys = jax.random.split(key, 6)

        def init_conv(kw, kb, ksize):
            # Match nn.Conv2d's default U(-1/sqrt(fan_in), 1/sqrt(fan_in)) init,
            # with JAX RNG (synthetic, deterministic). Layout HWIO.
            fan_in = input_channels * ksize * ksize
            bound = 1.0 / (fan_in ** 0.5)
            w = jax.random.uniform(
                kw, (ksize, ksize, input_channels, output_channels),
                jnp.float32, minval=-bound, maxval=bound)
            b = jax.random.uniform(
                kb, (output_channels,), jnp.float32, minval=-bound, maxval=bound)
            return w, b

        self.w3, self.b3 = init_conv(keys[0], keys[1], 3)
        self.w5, self.b5 = init_conv(keys[2], keys[3], 5)
        self.w11, self.b11 = init_conv(keys[4], keys[5], 11)
        self.cout_total = 3 * output_channels

        # --- Fuse the three convs: zero-embed 3x3 / 5x5 into 11x11, concat Cout ---
        def embed(w):
            k = w.shape[0]
            off = (self.KMAX - k) // 2
            full = jnp.zeros(
                (self.KMAX, self.KMAX, input_channels, output_channels), jnp.float32)
            return full.at[off:off + k, off:off + k].set(w)

        w_all = jnp.concatenate([embed(self.w3), embed(self.w5), self.w11], axis=-1)
        # (KH, KW, Cin, 3*Cout) -> (3*Cout, KH*KW*Cin): tap-major, (Cout, Cin) per tap.
        self.w_packed = (
            w_all.reshape(self.KMAX * self.KMAX, input_channels, self.cout_total)
            .transpose(2, 0, 1)
            .reshape(self.cout_total, self.KMAX * self.KMAX * input_channels))
        self.b_packed = jnp.concatenate(
            [self.b3, self.b5, self.b11]).reshape(self.cout_total, 1)

    def __call__(self, x_nchw):
        return fused_conv_relu_nchw(x_nchw, self.w_packed, self.b_packed,
                                    KH=self.KMAX, KW=self.KMAX, pad=self.PAD)


def _reference_forward(mod, x_nchw):
    """Pure-JAX (XLA conv) reference, mirroring the PyTorch module exactly."""
    dn = jax.lax.conv_dimension_numbers(
        x_nchw.shape, mod.w3.shape, ("NCHW", "HWIO", "NCHW"))

    def conv(w, b, p):
        y = jax.lax.conv_general_dilated(
            x_nchw, w, window_strides=(1, 1), padding=[(p, p), (p, p)],
            dimension_numbers=dn)
        return jnp.maximum(y + b.reshape(1, -1, 1, 1), 0.0)

    return jnp.concatenate(
        [conv(mod.w3, mod.b3, 1), conv(mod.w5, mod.b5, 2), conv(mod.w11, mod.b11, 5)],
        axis=1)


if __name__ == "__main__":
    key = jax.random.PRNGKey(0)
    k_x, k_params = jax.random.split(key)

    # PyTorch-style NCHW input: batch=2, input_channels=4, spatial 16x16.
    x = jax.random.normal(k_x, (2, 4, 16, 16), dtype=jnp.float32)

    module = ConvolutionModulePallas(input_channels=4, output_channels=4, key=k_params)

    out = jax.block_until_ready(module(x))
    assert out.shape == (2, 12, 16, 16), out.shape

    ref = jax.block_until_ready(_reference_forward(module, x))
    assert jnp.allclose(out, ref, rtol=1e-4, atol=1e-4), (
        float(jnp.max(jnp.abs(out - ref))))

    print("KERNEL_OK")
</pallas_src>

<mosaic_0001>
module attributes {stable_mosaic.version = 11 : i64} {
  func.func @_fused_conv_relu_kernel(%arg0: i32, %arg1: memref<1x4x702xf32, #tpu.memory_space<vmem>>, %arg2: memref<12x484xf32, #tpu.memory_space<vmem>>, %arg3: memref<12x1xf32, #tpu.memory_space<vmem>>, %arg4: memref<1x12x256xf32, #tpu.memory_space<vmem>>) attributes {dimension_semantics = [#tpu.dimension_semantics<parallel>], iteration_bounds = array<i64: 2>, scalar_prefetch = 0 : i64, scratch_operands = 0 : i64, tpu.core_type = #tpu.core_type<tc>, window_params = [{transform_indices = @transform_0, window_bounds = array<i64: 1, 4, 702>}, {pipeline_mode = #tpu.pipeline_mode<synchronous>, transform_indices = @transform_1, window_bounds = array<i64: 12, 484>}, {pipeline_mode = #tpu.pipeline_mode<synchronous>, transform_indices = @transform_2, window_bounds = array<i64: 12, 1>}, {transform_indices = @transform_3, window_bounds = array<i64: 1, 12, 256>}]} {
    %c0 = arith.constant 0 : index
    %c0_0 = arith.constant 0 : index
    %c0_1 = arith.constant 0 : index
    %0 = vector.load %arg1[%c0, %c0_0, %c0_1] : memref<1x4x702xf32, #tpu.memory_space<vmem>>, vector<1x4x702xf32>
    %1 = vector.shape_cast %0 : vector<1x4x702xf32> to vector<4x702xf32>
    %cst = arith.constant 0.000000e+00 : f32
    %2 = vector.broadcast %cst : f32 to vector<12x416xf32>
    %3 = vector.extract_strided_slice %1 {offsets = [0, 0], sizes = [4, 416], strides = [1, 1]} : vector<4x702xf32> to vector<4x416xf32>
    %c0_2 = arith.constant 0 : index
    %c0_3 = arith.constant 0 : index
    %4 = vector.load %arg2[%c0_2, %c0_3] : memref<12x484xf32, #tpu.memory_space<vmem>>, vector<12x4xf32>
    %cst_4 = arith.constant dense<0.000000e+00> : vector<12x416xf32>
    %5 = tpu.matmul %4, %3, %cst_4 {dimension_numbers = #tpu.dot_dimension_numbers<[1], [0], [0], [1], [0, 0, 1, 1], [], []>} : vector<12x4xf32>, vector<4x416xf32>, vector<12x416xf32> -> vector<12x416xf32>
    %6 = arith.addf %2, %5 : vector<12x416xf32>
    %7 = vector.extract_strided_slice %1 {offsets = [0, 1], sizes = [4, 416], strides = [1, 1]} : vector<4x702xf32> to vector<4x416xf32>
    %c0_5 = arith.constant 0 : index
    %c4 = arith.constant 4 : index
    %8 = vector.load %arg2[%c0_5, %c4] : memref<12x484xf32, #tpu.memory_space<vmem>>, vector<12x4xf32>
    %cst_6 = arith.constant dense<0.000000e+00> : vector<12x416xf32>
    %9 = tpu.matmul %8, %7, %cst_6 {dimension_numbers = #tpu.dot_dimension_numbers<[1], [0], [0], [1], [0, 0, 1, 1], [], []>} : vector<12x4xf32>, vector<4x416xf32>, vector<12x416xf32> -> vector<12x416xf32>
    %10 = arith.addf %6, %9 : vector<12x416xf32>
    %11 = vector.extract_strided_slice %1 {offsets = [0, 2], sizes = [4, 416], strides = [1, 1]} : vector<4x702xf32> to vector<4x416xf32>
    %c0_7 = arith.constant 0 : index
    %c8 = arith.constant 8 : index
    %12 = vector.load %arg2[%c0_7, %c8] : memref<12x484xf32, #tpu.memory_space<vmem>>, vector<12x4xf32>
    %cst_8 = arith.constant dense<0.000000e+00> : vector<12x416xf32>
    %13 = tpu.matmul %12, %11, %cst_8 {dimension_numbers = #tpu.dot_dimension_numbers<[1], [0], [0], [1], [0, 0, 1, 1], [], []>} : vector<12x4xf32>, vector<4x416xf32>, vector<12x416xf32> -> vector<12x416xf32>
    %14 = arith.addf %10, %13 : vector<12x416xf32>
    %15 = vector.extract_strided_slice %1 {offsets = [0, 3], sizes = [4, 416], strides = [1, 1]} : vector<4x702xf32> to vector<4x416xf32>
    %c0_9 = arith.constant 0 : index
    %c12 = arith.constant 12 : index
    %16 = vector.load %arg2[%c0_9, %c12] : memref<12x484xf32, #tpu.memory_space<vmem>>, vector<12x4xf32>
    %cst_10 = arith.constant dense<0.000000e+00> : vector<12x416xf32>
    %17 = tpu.matmul %16, %15, %cst_10 {dimension_numbers = #tpu.dot_dimension_numbers<[1], [0], [0], [1], [0, 0, 1, 1], [], []>} : vector<12x4xf32>, vector<4x416xf32>, vector<12x416xf32> -> vector<12x416xf32>
    %18 = arith.addf %14, %17 : vector<12x416xf32>
    %19 = vector.extract_strided_slice %1 {offsets = [0, 4], sizes = [4, 416], strides = [1, 1]} : vector<4x702xf32> to vector<4x416xf32>
    %c0_11 = arith.constant 0 : index
    %c16 = arith.constant 16 : index
    %20 = vector.load %arg2[%c0_11, %c16] : memref<12x484xf32, #tpu.memory_space<vmem>>, vector<12x4xf32>
    %cst_12 = arith.constant dense<0.000000e+00> : vector<12x416xf32>
    %21 = tpu.matmul %20, %19, %cst_12 {dimension_numbers = #tpu.dot_dimension_numbers<[1], [0], [0], [1], [0, 0, 1, 1], [], []>} : vector<12x4xf32>, vector<4x416xf32>, vector<12x416xf32> -> vector<12x416xf32>
    %22 = arith.addf %18, %21 : vector<12x416xf32>
    %23 = vector.extract_strided_slice %1 {offsets = [0, 5], sizes = [4, 416], strides = [1, 1]} : vector<4x702xf32> to vector<4x416xf32>
    %c0_13 = arith.constant 0 : index
    %c20 = arith.constant 20 : index
    %24 = vector.load %arg2[%c0_13, %c20] : memref<12x484xf32, #tpu.memory_space<vmem>>, vector<12x4xf32>
    %cst_14 = arith.constant dense<0.000000e+00> : vector<12x416xf32>
    %25 = tpu.matmul %24, %23, %cst_14 {dimension_numbers = #tpu.dot_dimension_numbers<[1], [0], [0], [1], [0, 0, 1, 1], [], []>} : vector<12x4xf32>, vector<4x416xf32>, vector<12x416xf32> -> vector<12x416xf32>
    %26 = arith.addf %22, %25 : vector<12x416xf32>
    %27 = vector.extract_strided_slice %1 {offsets = [0, 6], sizes = [4, 416], strides = [1, 1]} : vector<4x702xf32> to vector<4x416xf32>
    %c0_15 = arith.constant 0 : index
    %c24 = arith.constant 24 : index
    %28 = vector.load %arg2[%c0_15, %c24] : memref<12x484xf32, #tpu.memory_space<vmem>>, vector<12x4xf32>
    %cst_16 = arith.constant dense<0.000000e+00> : vector<12x416xf32>
    %29 = tpu.matmul %28, %27, %cst_16 {dimension_numbers = #tpu.dot_dimension_numbers<[1], [0], [0], [1], [0, 0, 1, 1], [], []>} : vector<12x4xf32>, vector<4x416xf32>, vector<12x416xf32> -> vector<12x416xf32>
    %30 = arith.addf %26, %29 : vector<12x416xf32>
    %31 = vector.extract_strided_slice %1 {offsets = [0, 7], sizes = [4, 416], strides = [1, 1]} : vector<4x702xf32> to vector<4x416xf32>
    %c0_17 = arith.constant 0 : index
    %c28 = arith.constant 28 : index
    %32 = vector.load %arg2[%c0_17, %c28] : memref<12x484xf32, #tpu.memory_space<vmem>>, vector<12x4xf32>
    %cst_18 = arith.constant dense<0.000000e+00> : vector<12x416xf32>
    %33 = tpu.matmul %32, %31, %cst_18 {dimension_numbers = #tpu.dot_dimension_numbers<[1], [0], [0], [1], [0, 0, 1, 1], [], []>} : vector<12x4xf32>, vector<4x416xf32>, vector<12x416xf32> -> vector<12x416xf32>
    %34 = arith.addf %30, %33 : vector<12x416xf32>
    %35 = vector.extract_strided_slice %1 {offsets = [0, 8], sizes = [4, 416], strides = [1, 1]} : vector<4x702xf32> to vector<4x416xf32>
    %c0_19 = arith.constant 0 : index
    %c32 = arith.constant 32 : index
    %36 = vector.load %arg2[%c0_19, %c32] : memref<12x484xf32, #tpu.memory_space<vmem>>, vector<12x4xf32>
    %cst_20 = arith.constant dense<0.000000e+00> : vector<12x416xf32>
    %37 = tpu.matmul %36, %35, %cst_20 {dimension_numbers = #tpu.dot_dimension_numbers<[1], [0], [0], [1], [0, 0, 1, 1], [], []>} : vector<12x4xf32>, vector<4x416xf32>, vector<12x416xf32> -> vector<12x416xf32>
    %38 = arith.addf %34, %37 : vector<12x416xf32>
    %39 = vector.extract_strided_slice %1 {offsets = [0, 9], sizes = [4, 416], strides = [1, 1]} : vector<4x702xf32> to vector<4x416xf32>
    %c0_21 = arith.constant 0 : index
    %c36 = arith.constant 36 : index
    %40 = vector.load %arg2[%c0_21, %c36] : memref<12x484xf32, #tpu.memory_space<vmem>>, vector<12x4xf32>
    %cst_22 = arith.constant dense<0.000000e+00> : vector<12x416xf32>
    %41 = tpu.matmul %40, %39, %cst_22 {dimension_numbers = #tpu.dot_dimension_numbers<[1], [0], [0], [1], [0, 0, 1, 1], [], []>} : vector<12x4xf32>, vector<4x416xf32>, vector<12x416xf32> -> vector<12x416xf32>
    %42 = arith.addf %38, %41 : vector<12x416xf32>
    %43 = vector.extract_strided_slice %1 {offsets = [0, 10], sizes = [4, 416], strides = [1, 1]} : vector<4x702xf32> to vector<4x416xf32>
    %c0_23 = arith.constant 0 : index
    %c40 = arith.constant 40 : index
    %44 = vector.load %arg2[%c0_23, %c40] : memref<12x484xf32, #tpu.memory_space<vmem>>, vector<12x4xf32>
    %cst_24 = arith.constant dense<0.000000e+00> : vector<12x416xf32>
    %45 = tpu.matmul %44, %43, %cst_24 {dimension_numbers = #tpu.dot_dimension_numbers<[1], [0], [0], [1], [0, 0, 1, 1], [], []>} : vector<12x4xf32>, vector<4x416xf32>, vector<12x416xf32> -> vector<12x416xf32>
    %46 = arith.addf %42, %45 : vector<12x416xf32>
    %47 = vector.extract_strided_slice %1 {offsets = [0, 26], sizes = [4, 416], strides = [1, 1]} : vector<4x702xf32> to vector<4x416xf32>
    %c0_25 = arith.constant 0 : index
    %c44 = arith.constant 44 : index
    %48 = vector.load %arg2[%c0_25, %c44] : memref<12x484xf32, #tpu.memory_space<vmem>>, vector<12x4xf32>
    %cst_26 = arith.constant dense<0.000000e+00> : vector<12x416xf32>
    %49 = tpu.matmul %48, %47, %cst_26 {dimension_numbers = #tpu.dot_dimension_numbers<[1], [0], [0], [1], [0, 0, 1, 1], [], []>} : vector<12x4xf32>, vector<4x416xf32>, vector<12x416xf32> -> vector<12x416xf32>
    %50 = arith.addf %46, %49 : vector<12x416xf32>
    %51 = vector.extract_strided_slice %1 {offsets = [0, 27], sizes = [4, 416], strides = [1, 1]} : vector<4x702xf32> to vector<4x416xf32>
    %c0_27 = arith.constant 0 : index
    %c48 = arith.constant 48 : index
    %52 = vector.load %arg2[%c0_27, %c48] : memref<12x484xf32, #tpu.memory_space<vmem>>, vector<12x4xf32>
    %cst_28 = arith.constant dense<0.000000e+00> : vector<12x416xf32>
    %53 = tpu.matmul %52, %51, %cst_28 {dimension_numbers = #tpu.dot_dimension_numbers<[1], [0], [0], [1], [0, 0, 1, 1], [], []>} : vector<12x4xf32>, vector<4x416xf32>, vector<12x416xf32> -> vector<12x416xf32>
    %54 = arith.addf %50, %53 : vector<12x416xf32>
    %55 = vector.extract_strided_slice %1 {offsets = [0, 28], sizes = [4, 416], strides = [1, 1]} : vector<4x702xf32> to vector<4x416xf32>
    %c0_29 = arith.constant 0 : index
    %c52 = arith.constant 52 : index
    %56 = vector.load %arg2[%c0_29, %c52] : memref<12x484xf32, #tpu.memory_space<vmem>>, vector<12x4xf32>
    %cst_30 = arith.constant dense<0.000000e+00> : vector<12x416xf32>
    %57 = tpu.matmul %56, %55, %cst_30 {dimension_numbers = #tpu.dot_dimension_numbers<[1], [0], [0], [1], [0, 0, 1, 1], [], []>} : vector<12x4xf32>, vector<4x416xf32>, vector<12x416xf32> -> vector<12x416xf32>
    %58 = arith.addf %54, %57 : vector<12x416xf32>
    %59 = vector.extract_strided_slice %1 {offsets = [0, 29], sizes = [4, 416], strides = [1, 1]} : vector<4x702xf32> to vector<4x416xf32>
    %c0_31 = arith.constant 0 : index
    %c56 = arith.constant 56 : index
    %60 = vector.load %arg2[%c0_31, %c56] : memref<12x484xf32, #tpu.memory_space<vmem>>, vector<12x4xf32>
    %cst_32 = arith.constant dense<0.000000e+00> : vector<12x416xf32>
    %61 = tpu.matmul %60, %59, %cst_32 {dimension_numbers = #tpu.dot_dimension_numbers<[1], [0], [0], [1], [0, 0, 1, 1], [], []>} : vector<12x4xf32>, vector<4x416xf32>, vector<12x416xf32> -> vector<12x416xf32>
    %62 = arith.addf %58, %61 : vector<12x416xf32>
    %63 = vector.extract_strided_slice %1 {offsets = [0, 30], sizes = [4, 416], strides = [1, 1]} : vector<4x702xf32> to vector<4x416xf32>
    %c0_33 = arith.constant 0 : index
    %c60 = arith.constant 60 : index
    %64 = vector.load %arg2[%c0_33, %c60] : memref<12x484xf32, #tpu.memory_space<vmem>>, vector<12x4xf32>
    %cst_34 = arith.constant dense<0.000000e+00> : vector<12x416xf32>
    %65 = tpu.matmul %64, %63, %cst_34 {dimension_numbers = #tpu.dot_dimension_numbers<[1], [0], [0], [1], [0, 0, 1, 1], [], []>} : vector<12x4xf32>, vector<4x416xf32>, vector<12x416xf32> -> vector<12x416xf32>
    %66 = arith.addf %62, %65 : vector<12x416xf32>
    %67 = vector.extract_strided_slice %1 {offsets = [0, 31], sizes = [4, 416], strides = [1, 1]} : vector<4x702xf32> to vector<4x416xf32>
    %c0_35 = arith.constant 0 : index
    %c64 = arith.constant 64 : index
    %68 = vector.load %arg2[%c0_35, %c64] : memref<12x484xf32, #tpu.memory_space<vmem>>, vector<12x4xf32>
    %cst_36 = arith.constant dense<0.000000e+00> : vector<12x416xf32>
    %69 = tpu.matmul %68, %67, %cst_36 {dimension_numbers = #tpu.dot_dimension_numbers<[1], [0], [0], [1], [0, 0, 1, 1], [], []>} : vector<12x4xf32>, vector<4x416xf32>, vector<12x416xf32> -> vector<12x416xf32>
    %70 = arith.addf %66, %69 : vector<12x416xf32>
    %71 = vector.extract_strided_slice %1 {offsets = [0, 32], sizes = [4, 416], strides = [1, 1]} : vector<4x702xf32> to vector<4x416xf32>
    %c0_37 = arith.constant 0 : index
    %c68 = arith.constant 68 : index
    %72 = vector.load %arg2[%c0_37, %c68] : memref<12x484xf32, #tpu.memory_space<vmem>>, vector<12x4xf32>
    %cst_38 = arith.constant dense<0.000000e+00> : vector<12x416xf32>
    %73 = tpu.matmul %72, %71, %cst_38 {dimension_numbers = #tpu.dot_dimension_numbers<[1], [0], [0], [1], [0, 0, 1, 1], [], []>} : vector<12x4xf32>, vector<4x416xf32>, vector<12x416xf32> -> vector<12x416xf32>
    %74 = arith.addf %70, %73 : vector<12x416xf32>
    %75 = vector.extract_strided_slice %1 {offsets = [0, 33], sizes = [4, 416], strides = [1, 1]} : vector<4x702xf32> to vector<4x416xf32>
    %c0_39 = arith.constant 0 : index
    %c72 = arith.constant 72 : index
    %76 = vector.load %arg2[%c0_39, %c72] : memref<12x484xf32, #tpu.memory_space<vmem>>, vector<12x4xf32>
    %cst_40 = arith.constant dense<0.000000e+00> : vector<12x416xf32>
    %77 = tpu.matmul %76, %75, %cst_40 {dimension_numbers = #tpu.dot_dimension_numbers<[1], [0], [0], [1], [0, 0, 1, 1], [], []>} : vector<12x4xf32>, vector<4x416xf32>, vector<12x416xf32> -> vector<12x416xf32>
    %78 = arith.addf %74, %77 : vector<12x416xf32>
    %79 = vector.extract_strided_slice %1 {offsets = [0, 34], sizes = [4, 416], strides = [1, 1]} : vector<4x702xf32> to vector<4x416xf32>
    %c0_41 = arith.constant 0 : index
    %c76 = arith.constant 76 : index
    %80 = vector.load %arg2[%c0_41, %c76] : memref<12x484xf32, #tpu.memory_space<vmem>>, vector<12x4xf32>
    %cst_42 = arith.constant dense<0.000000e+00> : vector<12x416xf32>
    %81 = tpu.matmul %80, %79, %cst_42 {dimension_numbers = #tpu.dot_dimension_numbers<[1], [0], [0], [1], [0, 0, 1, 1], [], []>} : vector<12x4xf32>, vector<4x416xf32>, vector<12x416xf32> -> vector<12x416xf32>
    %82 = arith.addf %78, %81 : vector<12x416xf32>
    %83 = vector.extract_strided_slice %1 {offsets = [0, 35], sizes = [4, 416], strides = [1, 1]} : vector<4x702xf32> to vector<4x416xf32>
    %c0_43 = arith.constant 0 : index
    %c80 = arith.constant 80 : index
    %84 = vector.load %arg2[%c0_43, %c80] : memref<12x484xf32, #tpu.memory_space<vmem>>, vector<12x4xf32>
    %cst_44 = arith.constant dense<0.000000e+00> : vector<12x416xf32>
    %85 = tpu.matmul %84, %83, %cst_44 {dimension_numbers = #tpu.dot_dimension_numbers<[1], [0], [0], [1], [0, 0, 1, 1], [], []>} : vector<12x4xf32>, vector<4x416xf32>, vector<12x416xf32> -> vector<12x416xf32>
    %86 = arith.addf %82, %85 : vector<12x416xf32>
    %87 = vector.extract_strided_slice %1 {offsets = [0, 36], sizes = [4, 416], strides = [1, 1]} : vector<4x702xf32> to vector<4x416xf32>
    %c0_45 = arith.constant 0 : index
    %c84 = arith.constant 84 : index
    %88 = vector.load %arg2[%c0_45, %c84] : memref<12x484xf32, #tpu.memory_space<vmem>>, vector<12x4xf32>
    %cst_46 = arith.constant dense<0.000000e+00> : vector<12x416xf32>
    %89 = tpu.matmul %88, %87, %cst_46 {dimension_numbers = #tpu.dot_dimension_numbers<[1], [0], [0], [1], [0, 0, 1, 1], [], []>} : vector<12x4xf32>, vector<4x416xf32>, vector<12x416xf32> -> vector<12x416xf32>
    %90 = arith.addf %86, %89 : vector<12x416xf32>
    %91 = vector.extract_strided_slice %1 {offsets = [0, 52], sizes = [4, 416], strides = [1, 1]} : vector<4x702xf32> to vector<4x416xf32>
    %c0_47 = arith.constant 0 : index
    %c88 = arith.constant 88 : index
    %92 = vector.load %arg2[%c0_47, %c88] : memref<12x484xf32, #tpu.memory_space<vmem>>, vector<12x4xf32>
    %cst_48 = arith.constant dense<0.000000e+00> : vector<12x416xf32>
    %93 = tpu.matmul %92, %91, %cst_48 {dimension_numbers = #tpu.dot_dimension_numbers<[1], [0], [0], [1], [0, 0, 1, 1], [], []>} : vector<12x4xf32>, vector<4x416xf32>, vector<12x416xf32> -> vector<12x416xf32>
    %94 = arith.addf %90, %93 : vector<12x416xf32>
    %95 = vector.extract_strided_slice %1 {offsets = [0, 53], sizes = [4, 416], strides = [1, 1]} : vector<4x702xf32> to vector<4x416xf32>
    %c0_49 = arith.constant 0 : index
    %c92 = arith.constant 92 : index
    %96 = vector.load %arg2[%c0_49, %c92] : memref<12x484xf32, #tpu.memory_space<vmem>>, vector<12x4xf32>
    %cst_50 = arith.constant dense<0.000000e+00> : vector<12x416xf32>
    %97 = tpu.matmul %96, %95, %cst_50 {dimension_numbers = #tpu.dot_dimension_numbers<[1], [0], [0], [1], [0, 0, 1, 1], [], []>} : vector<12x4xf32>, vector<4x416xf32>, vector<12x416xf32> -> vector<12x416xf32>
    %98 = arith.addf %94, %97 : vector<12x416xf32>
    %99 = vector.extract_strided_slice %1 {offsets = [0, 54], sizes = [4, 416], strides = [1, 1]} : vector<4x702xf32> to vector<4x416xf32>
    %c0_51 = arith.constant 0 : index
    %c96 = arith.constant 96 : index
    %100 = vector.load %arg2[%c0_51, %c96] : memref<12x484xf32, #tpu.memory_space<vmem>>, vector<12x4xf32>
    %cst_52 = arith.constant dense<0.000000e+00> : vector<12x416xf32>
    %101 = tpu.matmul %100, %99, %cst_52 {dimension_numbers = #tpu.dot_dimension_numbers<[1], [0], [0], [1], [0, 0, 1, 1], [], []>} : vector<12x4xf32>, vector<4x416xf32>, vector<12x416xf32> -> vector<12x416xf32>
    %102 = arith.addf %98, %101 : vector<12x416xf32>
    %103 = vector.extract_strided_slice %1 {offsets = [0, 55], sizes = [4, 416], strides = [1, 1]} : vector<4x702xf32> to vector<4x416xf32>
    %c0_53 = arith.constant 0 : index
    %c100 = arith.constant 100 : index
    %104 = vector.load %arg2[%c0_53, %c100] : memref<12x484xf32, #tpu.memory_space<vmem>>, vector<12x4xf32>
    %cst_54 = arith.constant dense<0.000000e+00> : vector<12x416xf32>
    %105 = tpu.matmul %104, %103, %cst_54 {dimension_numbers = #tpu.dot_dimension_numbers<[1], [0], [0], [1], [0, 0, 1, 1], [], []>} : vector<12x4xf32>, vector<4x416xf32>, vector<12x416xf32> -> vector<12x416xf32>
    %106 = arith.addf %102, %105 : vector<12x416xf32>
    %107 = vector.extract_strided_slice %1 {offsets = [0, 56], sizes = [4, 416], strides = [1, 1]} : vector<4x702xf32> to vector<4x416xf32>
    %c0_55 = arith.constant 0 : index
    %c104 = arith.constant 104 : index
    %108 = vector.load %arg2[%c0_55, %c104] : memref<12x484xf32, #tpu.memory_space<vmem>>, vector<12x4xf32>
    %cst_56 = arith.constant dense<0.000000e+00> : vector<12x416xf32>
    %109 = tpu.matmul %108, %107, %cst_56 {dimension_numbers = #tpu.dot_dimension_numbers<[1], [0], [0], [1], [0, 0, 1, 1], [], []>} : vector<12x4xf32>, vector<4x416xf32>, vector<12x416xf32> -> vector<12x416xf32>
    %110 = arith.addf %106, %109 : vector<12x416xf32>
    %111 = vector.extract_strided_slice %1 {offsets = [0, 57], sizes = [4, 416], strides = [1, 1]} : vector<4x702xf32> to vector<4x416xf32>
    %c0_57 = arith.constant 0 : index
    %c108 = arith.constant 108 : index
    %112 = vector.load %arg2[%c0_57, %c108] : memref<12x484xf32, #tpu.memory_space<vmem>>, vector<12x4xf32>
    %cst_58 = arith.constant dense<0.000000e+00> : vector<12x416xf32>
    %113 = tpu.matmul %112, %111, %cst_58 {dimension_numbers = #tpu.dot_dimension_numbers<[1], [0], [0], [1], [0, 0, 1, 1], [], []>} : vector<12x4xf32>, vector<4x416xf32>, vector<12x416xf32> -> vector<12x416xf32>
    %114 = arith.addf %110, %113 : vector<12x416xf32>
    %115 = vector.extract_strided_slice %1 {offsets = [0, 58], sizes = [4, 416], strides = [1, 1]} : vector<4x702xf32> to vector<4x416xf32>
    %c0_59 = arith.constant 0 : index
    %c112 = arith.constant 112 : index
    %116 = vector.load %arg2[%c0_59, %c112] : memref<12x484xf32, #tpu.memory_space<vmem>>, vector<12x4xf32>
    %cst_60 = arith.constant dense<0.000000e+00> : vector<12x416xf32>
    %117 = tpu.matmul %116, %115, %cst_60 {dimension_numbers = #tpu.dot_dimension_numbers<[1], [0], [0], [1], [0, 0, 1, 1], [], []>} : vector<12x4xf32>, vector<4x416xf32>, vector<12x416xf32> -> vector<12x416xf32>
    %118 = arith.addf %114, %117 : vector<12x416xf32>
    %119 = vector.extract_strided_slice %1 {offsets = [0, 59], sizes = [4, 416], strides = [1, 1]} : vector<4x702xf32> to vector<4x416xf32>
    %c0_61 = arith.constant 0 : index
    %c116 = arith.constant 116 : index
    %120 = vector.load %arg2[%c0_61, %c116] : memref<12x484xf32, #tpu.memory_space<vmem>>, vector<12x4xf32>
    %cst_62 = arith.constant dense<0.000000e+00> : vector<12x416xf32>
    %121 = tpu.matmul %120, %119, %cst_62 {dimension_numbers = #tpu.dot_dimension_numbers<[1], [0], [0], [1], [0, 0, 1, 1], [], []>} : vector<12x4xf32>, vector<4x416xf32>, vector<12x416xf32> -> vector<12x416xf32>
    %122 = arith.addf %118, %121 : vector<12x416xf32>
    %123 = vector.extract_strided_slice %1 {offsets = [0, 60], sizes = [4, 416], strides = [1, 1]} : vector<4x702xf32> to vector<4x416xf32>
    %c0_63 = arith.constant 0 : index
    %c120 = arith.constant 120 : index
    %124 = vector.load %arg2[%c0_63, %c120] : memref<12x484xf32, #tpu.memory_space<vmem>>, vector<12x4xf32>
    %cst_64 = arith.constant dense<0.000000e+00> : vector<12x416xf32>
    %125 = tpu.matmul %124, %123, %cst_64 {dimension_numbers = #tpu.dot_dimension_numbers<[1], [0], [0], [1], [0, 0, 1, 1], [], []>} : vector<12x4xf32>, vector<4x416xf32>, vector<12x416xf32> -> vector<12x416xf32>
    %126 = arith.addf %122, %125 : vector<12x416xf32>
    %127 = vector.extract_strided_slice %1 {offsets = [0, 61], sizes = [4, 416], strides = [1, 1]} : vector<4x702xf32> to vector<4x416xf32>
    %c0_65 = arith.constant 0 : index
    %c124 = arith.constant 124 : index
    %128 = vector.load %arg2[%c0_65, %c124] : memref<12x484xf32, #tpu.memory_space<vmem>>, vector<12x4xf32>
    %cst_66 = arith.constant dense<0.000000e+00> : vector<12x416xf32>
    %129 = tpu.matmul %128, %127, %cst_66 {dimension_numbers = #tpu.dot_dimension_numbers<[1], [0], [0], [1], [0, 0, 1, 1], [], []>} : vector<12x4xf32>, vector<4x416xf32>, vector<12x416xf32> -> vector<12x416xf32>
    %130 = arith.addf %126, %129 : vector<12x416xf32>
    %131 = vector.extract_strided_slice %1 {offsets = [0, 62], sizes = [4, 416], strides = [1, 1]} : vector<4x702xf32> to vector<4x416xf32>
    %c0_67 = arith.constant 0 : index
    %c128 = arith.constant 128 : index
    %132 = vector.load %arg2[%c0_67, %c128] : memref<12x484xf32, #tpu.memory_space<vmem>>, vector<12x4xf32>
    %cst_68 = arith.constant dense<0.000000e+00> : vector<12x416xf32>
    %133 = tpu.matmul %132, %131, %cst_68 {dimension_numbers = #tpu.dot_dimension_numbers<[1], [0], [0], [1], [0, 0, 1, 1], [], []>} : vector<12x4xf32>, vector<4x416xf32>, vector<12x416xf32> -> vector<12x416xf32>
    %134 = arith.addf %130, %133 : vector<12x416xf32>
    %135 = vector.extract_strided_slice %1 {offsets = [0, 78], sizes = [4, 416], strides = [1, 1]} : vector<4x702xf32> to vector<4x416xf32>
    %c0_69 = arith.constant 0 : index
    %c132 = arith.constant 132 : index
    %136 = vector.load %arg2[%c0_69, %c132] : memref<12x484xf32, #tpu.memory_space<vmem>>, vector<12x4xf32>
    %cst_70 = arith.constant dense<0.000000e+00> : vector<12x416xf32>
    %137 = tpu.matmul %136, %135, %cst_70 {dimension_numbers = #tpu.dot_dimension_numbers<[1], [0], [0], [1], [0, 0, 1, 1], [], []>} : vector<12x4xf32>, vector<4x416xf32>, vector<12x416xf32> -> vector<12x416xf32>
    %138 = arith.addf %134, %137 : vector<12x416xf32>
    %139 = vector.extract_strided_slice %1 {offsets = [0, 79], sizes = [4, 416], strides = [1, 1]} : vector<4x702xf32> to vector<4x416xf32>
    %c0_71 = arith.constant 0 : index
    %c136 = arith.constant 136 : index
    %140 = vector.load %arg2[%c0_71, %c136] : memref<12x484xf32, #tpu.memory_space<vmem>>, vector<12x4xf32>
    %cst_72 = arith.constant dense<0.000000e+00> : vector<12x416xf32>
    %141 = tpu.matmul %140, %139, %cst_72 {dimension_numbers = #tpu.dot_dimension_numbers<[1], [0], [0], [1], [0, 0, 1, 1], [], []>} : vector<12x4xf32>, vector<4x416xf32>, vector<12x416xf32> -> vector<12x416xf32>
    %142 = arith.addf %138, %141 : vector<12x416xf32>
    %143 = vector.extract_strided_slice %1 {offsets = [0, 80], sizes = [4, 416], strides = [1, 1]} : vector<4x702xf32> to vector<4x416xf32>
    %c0_73 = arith.constant 0 : index
    %c140 = arith.constant 140 : index
    %144 = vector.load %arg2[%c0_73, %c140] : memref<12x484xf32, #tpu.memory_space<vmem>>, vector<12x4xf32>
    %cst_74 = arith.constant dense<0.000000e+00> : vector<12x416xf32>
    %145 = tpu.matmul %144, %143, %cst_74 {dimension_numbers = #tpu.dot_dimension_numbers<[1], [0], [0], [1], [0, 0, 1, 1], [], []>} : vector<12x4xf32>, vector<4x416xf32>, vector<12x416xf32> -> vector<12x416xf32>
    %146 = arith.addf %142, %145 : vector<12x416xf32>
    %147 = vector.extract_strided_slice %1 {offsets = [0, 81], sizes = [4, 416], strides = [1, 1]} : vector<4x702xf32> to vector<4x416xf32>
    %c0_75 = arith.constant 0 : index
    %c144 = arith.constant 144 : index
    %148 = vector.load %arg2[%c0_75, %c144] : memref<12x484xf32, #tpu.memory_space<vmem>>, vector<12x4xf32>
    %cst_76 = arith.constant dense<0.000000e+00> : vector<12x416xf32>
    %149 = tpu.matmul %148, %147, %cst_76 {dimension_numbers = #tpu.dot_dimension_numbers<[1], [0], [0], [1], [0, 0, 1, 1], [], []>} : vector<12x4xf32>, vector<4x416xf32>, vector<12x416xf32> -> vector<12x416xf32>
    %150 = arith.addf %146, %149 : vector<12x416xf32>
    %151 = vector.extract_strided_slice %1 {offsets = [0, 82], sizes = [4, 416], strides = [1, 1]} : vector<4x702xf32> to vector<4x416xf32>
    %c0_77 = arith.constant 0 : index
    %c148 = arith.constant 148 : index
    %152 = vector.load %arg2[%c0_77, %c148] : memref<12x484xf32, #tpu.memory_space<vmem>>, vector<12x4xf32>
    %cst_78 = arith.constant dense<0.000000e+00> : vector<12x416xf32>
    %153 = tpu.matmul %152, %151, %cst_78 {dimension_numbers = #tpu.dot_dimension_numbers<[1], [0], [0], [1], [0, 0, 1, 1], [], []>} : vector<12x4xf32>, vector<4x416xf32>, vector<12x416xf32> -> vector<12x416xf32>
    %154 = arith.addf %150, %153 : vector<12x416xf32>
    %155 = vector.extract_strided_slice %1 {offsets = [0, 83], sizes = [4, 416], strides = [1, 1]} : vector<4x702xf32> to vector<4x416xf32>
    %c0_79 = arith.constant 0 : index
    %c152 = arith.constant 152 : index
    %156 = vector.load %arg2[%c0_79, %c152] : memref<12x484xf32, #tpu.memory_space<vmem>>, vector<12x4xf32>
    %cst_80 = arith.constant dense<0.000000e+00> : vector<12x416xf32>
    %157 = tpu.matmul %156, %155, %cst_80 {dimension_numbers = #tpu.dot_dimension_numbers<[1], [0], [0], [1], [0, 0, 1, 1], [], []>} : vector<12x4xf32>, vector<4x416xf32>, vector<12x416xf32> -> vector<12x416xf32>
    %158 = arith.addf %154, %157 : vector<12x416xf32>
    %159 = vector.extract_strided_slice %1 {offsets = [0, 84], sizes = [4, 416], strides = [1, 1]} : vector<4x702xf32> to vector<4x416xf32>
    %c0_81 = arith.constant 0 : index
    %c156 = arith.constant 156 : index
    %160 = vector.load %arg2[%c0_81, %c156] : memref<12x484xf32, #tpu.memory_space<vmem>>, vector<12x4xf32>
    %cst_82 = arith.constant dense<0.000000e+00> : vector<12x416xf32>
    %161 = tpu.matmul %160, %159, %cst_82 {dimension_numbers = #tpu.dot_dimension_numbers<[1], [0], [0], [1], [0, 0, 1, 1], [], []>} : vector<12x4xf32>, vector<4x416xf32>, vector<12x416xf32> -> vector<12x416xf32>
    %162 = arith.addf %158, %161 : vector<12x416xf32>
    %163 = vector.extract_strided_slice %1 {offsets = [0, 85], sizes = [4, 416], strides = [1, 1]} : vector<4x702xf32> to vector<4x416xf32>
    %c0_83 = arith.constant 0 : index
    %c160 = arith.constant 160 : index
    %164 = vector.load %arg2[%c0_83, %c160] : memref<12x484xf32, #tpu.memory_space<vmem>>, vector<12x4xf32>
    %cst_84 = arith.constant dense<0.000000e+00> : vector<12x416xf32>
    %165 = tpu.matmul %164, %163, %cst_84 {dimension_numbers = #tpu.dot_dimension_numbers<[1], [0], [0], [1], [0, 0, 1, 1], [], []>} : vector<12x4xf32>, vector<4x416xf32>, vector<12x416xf32> -> vector<12x416xf32>
    %166 = arith.addf %162, %165 : vector<12x416xf32>
    %167 = vector.extract_strided_slice %1 {offsets = [0, 86], sizes = [4, 416], strides = [1, 1]} : vector<4x702xf32> to vector<4x416xf32>
    %c0_85 = arith.constant 0 : index
    %c164 = arith.constant 164 : index
    %168 = vector.load %arg2[%c0_85, %c164] : memref<12x484xf32, #tpu.memory_space<vmem>>, vector<12x4xf32>
    %cst_86 = arith.constant dense<0.000000e+00> : vector<12x416xf32>
    %169 = tpu.matmul %168, %167, %cst_86 {dimension_numbers = #tpu.dot_dimension_numbers<[1], [0], [0], [1], [0, 0, 1, 1], [], []>} : vector<12x4xf32>, vector<4x416xf32>, vector<12x416xf32> -> vector<12x416xf32>
    %170 = arith.addf %166, %169 : vector<12x416xf32>
    %171 = vector.extract_strided_slice %1 {offsets = [0, 87], sizes = [4, 416], strides = [1, 1]} : vector<4x702xf32> to vector<4x416xf32>
    %c0_87 = arith.constant 0 : index
    %c168 = arith.constant 168 : index
    %172 = vector.load %arg2[%c0_87, %c168] : memref<12x484xf32, #tpu.memory_space<vmem>>, vector<12x4xf32>
    %cst_88 = arith.constant dense<0.000000e+00> : vector<12x416xf32>
    %173 = tpu.matmul %172, %171, %cst_88 {dimension_numbers = #tpu.dot_dimension_numbers<[1], [0], [0], [1], [0, 0, 1, 1], [], []>} : vector<12x4xf32>, vector<4x416xf32>, vector<12x416xf32> -> vector<12x416xf32>
    %174 = arith.addf %170, %173 : vector<12x416xf32>
    %175 = vector.extract_strided_slice %1 {offsets = [0, 88], sizes = [4, 416], strides = [1, 1]} : vector<4x702xf32> to vector<4x416xf32>
    %c0_89 = arith.constant 0 : index
    %c172 = arith.constant 172 : index
    %176 = vector.load %arg2[%c0_89, %c172] : memref<12x484xf32, #tpu.memory_space<vmem>>, vector<12x4xf32>
    %cst_90 = arith.constant dense<0.000000e+00> : vector<12x416xf32>
    %177 = tpu.matmul %176, %175, %cst_90 {dimension_numbers = #tpu.dot_dimension_numbers<[1], [0], [0], [1], [0, 0, 1, 1], [], []>} : vector<12x4xf32>, vector<4x416xf32>, vector<12x416xf32> -> vector<12x416xf32>
    %178 = arith.addf %174, %177 : vector<12x416xf32>
    %179 = vector.extract_strided_slice %1 {offsets = [0, 104], sizes = [4, 416], strides = [1, 1]} : vector<4x702xf32> to vector<4x416xf32>
    %c0_91 = arith.constant 0 : index
    %c176 = arith.constant 176 : index
    %180 = vector.load %arg2[%c0_91, %c176] : memref<12x484xf32, #tpu.memory_space<vmem>>, vector<12x4xf32>
    %cst_92 = arith.constant dense<0.000000e+00> : vector<12x416xf32>
    %181 = tpu.matmul %180, %179, %cst_92 {dimension_numbers = #tpu.dot_dimension_numbers<[1], [0], [0], [1], [0, 0, 1, 1], [], []>} : vector<12x4xf32>, vector<4x416xf32>, vector<12x416xf32> -> vector<12x416xf32>
    %182 = arith.addf %178, %181 : vector<12x416xf32>
    %183 = vector.extract_strided_slice %1 {offsets = [0, 105], sizes = [4, 416], strides = [1, 1]} : vector<4x702xf32> to vector<4x416xf32>
    %c0_93 = arith.constant 0 : index
    %c180 = arith.constant 180 : index
    %184 = vector.load %arg2[%c0_93, %c180] : memref<12x484xf32, #tpu.memory_space<vmem>>, vector<12x4xf32>
    %cst_94 = arith.constant dense<0.000000e+00> : vector<12x416xf32>
    %185 = tpu.matmul %184, %183, %cst_94 {dimension_numbers = #tpu.dot_dimension_numbers<[1], [0], [0], [1], [0, 0, 1, 1], [], []>} : vector<12x4xf32>, vector<4x416xf32>, vector<12x416xf32> -> vector<12x416xf32>
    %186 = arith.addf %182, %185 : vector<12x416xf32>
    %187 = vector.extract_strided_slice %1 {offsets = [0, 106], sizes = [4, 416], strides = [1, 1]} : vector<4x702xf32> to vector<4x416xf32>
    %c0_95 = arith.constant 0 : index
    %c184 = arith.constant 184 : index
    %188 = vector.load %arg2[%c0_95, %c184] : memref<12x484xf32, #tpu.memory_space<vmem>>, vector<12x4xf32>
    %cst_96 = arith.constant dense<0.000000e+00> : vector<12x416xf32>
    %189 = tpu.matmul %188, %187, %cst_96 {dimension_numbers = #tpu.dot_dimension_numbers<[1], [0], [0], [1], [0, 0, 1, 1], [], []>} : vector<12x4xf32>, vector<4x416xf32>, vector<12x416xf32> -> vector<12x416xf32>
    %190 = arith.addf %186, %189 : vector<12x416xf32>
    %191 = vector.extract_strided_slice %1 {offsets = [0, 107], sizes = [4, 416], strides = [1, 1]} : vector<4x702xf32> to vector<4x416xf32>
    %c0_97 = arith.constant 0 : index
    %c188 = arith.constant 188 : index
    %192 = vector.load %arg2[%c0_97, %c188] : memref<12x484xf32, #tpu.memory_space<vmem>>, vector<12x4xf32>
    %cst_98 = arith.constant dense<0.000000e+00> : vector<12x416xf32>
    %193 = tpu.matmul %192, %191, %cst_98 {dimension_numbers = #tpu.dot_dimension_numbers<[1], [0], [0], [1], [0, 0, 1, 1], [], []>} : vector<12x4xf32>, vector<4x416xf32>, vector<12x416xf32> -> vector<12x416xf32>
    %194 = arith.addf %190, %193 : vector<12x416xf32>
    %195 = vector.extract_strided_slice %1 {offsets = [0, 108], sizes = [4, 416], strides = [1, 1]} : vector<4x702xf32> to vector<4x416xf32>
    %c0_99 = arith.constant 0 : index
    %c192 = arith.constant 192 : index
    %196 = vector.load %arg2[%c0_99, %c192] : memref<12x484xf32, #tpu.memory_space<vmem>>, vector<12x4xf32>
    %cst_100 = arith.constant dense<0.000000e+00> : vector<12x416xf32>
    %197 = tpu.matmul %196, %195, %cst_100 {dimension_numbers = #tpu.dot_dimension_numbers<[1], [0], [0], [1], [0, 0, 1, 1], [], []>} : vector<12x4xf32>, vector<4x416xf32>, vector<12x416xf32> -> vector<12x416xf32>
    %198 = arith.addf %194, %197 : vector<12x416xf32>
    %199 = vector.extract_strided_slice %1 {offsets = [0, 109], sizes = [4, 416], strides = [1, 1]} : vector<4x702xf32> to vector<4x416xf32>
    %c0_101 = arith.constant 0 : index
    %c196 = arith.constant 196 : index
    %200 = vector.load %arg2[%c0_101, %c196] : memref<12x484xf32, #tpu.memory_space<vmem>>, vector<12x4xf32>
    %cst_102 = arith.constant dense<0.000000e+00> : vector<12x416xf32>
    %201 = tpu.matmul %200, %199, %cst_102 {dimension_numbers = #tpu.dot_dimension_numbers<[1], [0], [0], [1], [0, 0, 1, 1], [], []>} : vector<12x4xf32>, vector<4x416xf32>, vector<12x416xf32> -> vector<12x416xf32>
    %202 = arith.addf %198, %201 : vector<12x416xf32>
    %203 = vector.extract_strided_slice %1 {offsets = [0, 110], sizes = [4, 416], strides = [1, 1]} : vector<4x702xf32> to vector<4x416xf32>
    %c0_103 = arith.constant 0 : index
    %c200 = arith.constant 200 : index
    %204 = vector.load %arg2[%c0_103, %c200] : memref<12x484xf32, #tpu.memory_space<vmem>>, vector<12x4xf32>
    %cst_104 = arith.constant dense<0.000000e+00> : vector<12x416xf32>
    %205 = tpu.matmul %204, %203, %cst_104 {dimension_numbers = #tpu.dot_dimension_numbers<[1], [0], [0], [1], [0, 0, 1, 1], [], []>} : vector<12x4xf32>, vector<4x416xf32>, vector<12x416xf32> -> vector<12x416xf32>
    %206 = arith.addf %202, %205 : vector<12x416xf32>
    %207 = vector.extract_strided_slice %1 {offsets = [0, 111], sizes = [4, 416], strides = [1, 1]} : vector<4x702xf32> to vector<4x416xf32>
    %c0_105 = arith.constant 0 : index
    %c204 = arith.constant 204 : index
    %208 = vector.load %arg2[%c0_105, %c204] : memref<12x484xf32, #tpu.memory_space<vmem>>, vector<12x4xf32>
    %cst_106 = arith.constant dense<0.000000e+00> : vector<12x416xf32>
    %209 = tpu.matmul %208, %207, %cst_106 {dimension_numbers = #tpu.dot_dimension_numbers<[1], [0], [0], [1], [0, 0, 1, 1], [], []>} : vector<12x4xf32>, vector<4x416xf32>, vector<12x416xf32> -> vector<12x416xf32>
    %210 = arith.addf %206, %209 : vector<12x416xf32>
    %211 = vector.extract_strided_slice %1 {offsets = [0, 112], sizes = [4, 416], strides = [1, 1]} : vector<4x702xf32> to vector<4x416xf32>
    %c0_107 = arith.constant 0 : index
    %c208 = arith.constant 208 : index
    %212 = vector.load %arg2[%c0_107, %c208] : memref<12x484xf32, #tpu.memory_space<vmem>>, vector<12x4xf32>
    %cst_108 = arith.constant dense<0.000000e+00> : vector<12x416xf32>
    %213 = tpu.matmul %212, %211, %cst_108 {dimension_numbers = #tpu.dot_dimension_numbers<[1], [0], [0], [1], [0, 0, 1, 1], [], []>} : vector<12x4xf32>, vector<4x416xf32>, vector<12x416xf32> -> vector<12x416xf32>
    %214 = arith.addf %210, %213 : vector<12x416xf32>
    %215 = vector.extract_strided_slice %1 {offsets = [0, 113], sizes = [4, 416], strides = [1, 1]} : vector<4x702xf32> to vector<4x416xf32>
    %c0_109 = arith.constant 0 : index
    %c212 = arith.constant 212 : index
    %216 = vector.load %arg2[%c0_109, %c212] : memref<12x484xf32, #tpu.memory_space<vmem>>, vector<12x4xf32>
    %cst_110 = arith.constant dense<0.000000e+00> : vector<12x416xf32>
    %217 = tpu.matmul %216, %215, %cst_110 {dimension_numbers = #tpu.dot_dimension_numbers<[1], [0], [0], [1], [0, 0, 1, 1], [], []>} : vector<12x4xf32>, vector<4x416xf32>, vector<12x416xf32> -> vector<12x416xf32>
    %218 = arith.addf %214, %217 : vector<12x416xf32>
    %219 = vector.extract_strided_slice %1 {offsets = [0, 114], sizes = [4, 416], strides = [1, 1]} : vector<4x702xf32> to vector<4x416xf32>
    %c0_111 = arith.constant 0 : index
    %c216 = arith.constant 216 : index
    %220 = vector.load %arg2[%c0_111, %c216] : memref<12x484xf32, #tpu.memory_space<vmem>>, vector<12x4xf32>
    %cst_112 = arith.constant dense<0.000000e+00> : vector<12x416xf32>
    %221 = tpu.matmul %220, %219, %cst_112 {dimension_numbers = #tpu.dot_dimension_numbers<[1], [0], [0], [1], [0, 0, 1, 1], [], []>} : vector<12x4xf32>, vector<4x416xf32>, vector<12x416xf32> -> vector<12x416xf32>
    %222 = arith.addf %218, %221 : vector<12x416xf32>
    %223 = vector.extract_strided_slice %1 {offsets = [0, 130], sizes = [4, 416], strides = [1, 1]} : vector<4x702xf32> to vector<4x416xf32>
    %c0_113 = arith.constant 0 : index
    %c220 = arith.constant 220 : index
    %224 = vector.load %arg2[%c0_113, %c220] : memref<12x484xf32, #tpu.memory_space<vmem>>, vector<12x4xf32>
    %cst_114 = arith.constant dense<0.000000e+00> : vector<12x416xf32>
    %225 = tpu.matmul %224, %223, %cst_114 {dimension_numbers = #tpu.dot_dimension_numbers<[1], [0], [0], [1], [0, 0, 1, 1], [], []>} : vector<12x4xf32>, vector<4x416xf32>, vector<12x416xf32> -> vector<12x416xf32>
    %226 = arith.addf %222, %225 : vector<12x416xf32>
    %227 = vector.extract_strided_slice %1 {offsets = [0, 131], sizes = [4, 416], strides = [1, 1]} : vector<4x702xf32> to vector<4x416xf32>
    %c0_115 = arith.constant 0 : index
    %c224 = arith.constant 224 : index
    %228 = vector.load %arg2[%c0_115, %c224] : memref<12x484xf32, #tpu.memory_space<vmem>>, vector<12x4xf32>
    %cst_116 = arith.constant dense<0.000000e+00> : vector<12x416xf32>
    %229 = tpu.matmul %228, %227, %cst_116 {dimension_numbers = #tpu.dot_dimension_numbers<[1], [0], [0], [1], [0, 0, 1, 1], [], []>} : vector<12x4xf32>, vector<4x416xf32>, vector<12x416xf32> -> vector<12x416xf32>
    %230 = arith.addf %226, %229 : vector<12x416xf32>
    %231 = vector.extract_strided_slice %1 {offsets = [0, 132], sizes = [4, 416], strides = [1, 1]} : vector<4x702xf32> to vector<4x416xf32>
    %c0_117 = arith.constant 0 : index
    %c228 = arith.constant 228 : index
    %232 = vector.load %arg2[%c0_117, %c228] : memref<12x484xf32, #tpu.memory_space<vmem>>, vector<12x4xf32>
    %cst_118 = arith.constant dense<0.000000e+00> : vector<12x416xf32>
    %233 = tpu.matmul %232, %231, %cst_118 {dimension_numbers = #tpu.dot_dimension_numbers<[1], [0], [0], [1], [0, 0, 1, 1], [], []>} : vector<12x4xf32>, vector<4x416xf32>, vector<12x416xf32> -> vector<12x416xf32>
    %234 = arith.addf %230, %233 : vector<12x416xf32>
    %235 = vector.extract_strided_slice %1 {offsets = [0, 133], sizes = [4, 416], strides = [1, 1]} : vector<4x702xf32> to vector<4x416xf32>
    %c0_119 = arith.constant 0 : index
    %c232 = arith.constant 232 : index
    %236 = vector.load %arg2[%c0_119, %c232] : memref<12x484xf32, #tpu.memory_space<vmem>>, vector<12x4xf32>
    %cst_120 = arith.constant dense<0.000000e+00> : vector<12x416xf32>
    %237 = tpu.matmul %236, %235, %cst_120 {dimension_numbers = #tpu.dot_dimension_numbers<[1], [0], [0], [1], [0, 0, 1, 1], [], []>} : vector<12x4xf32>, vector<4x416xf32>, vector<12x416xf32> -> vector<12x416xf32>
    %238 = arith.addf %234, %237 : vector<12x416xf32>
    %239 = vector.extract_strided_slice %1 {offsets = [0, 134], sizes = [4, 416], strides = [1, 1]} : vector<4x702xf32> to vector<4x416xf32>
    %c0_121 = arith.constant 0 : index
    %c236 = arith.constant 236 : index
    %240 = vector.load %arg2[%c0_121, %c236] : memref<12x484xf32, #tpu.memory_space<vmem>>, vector<12x4xf32>
    %cst_122 = arith.constant dense<0.000000e+00> : vector<12x416xf32>
    %241 = tpu.matmul %240, %239, %cst_122 {dimension_numbers = #tpu.dot_dimension_numbers<[1], [0], [0], [1], [0, 0, 1, 1], [], []>} : vector<12x4xf32>, vector<4x416xf32>, vector<12x416xf32> -> vector<12x416xf32>
    %242 = arith.addf %238, %241 : vector<12x416xf32>
    %243 = vector.extract_strided_slice %1 {offsets = [0, 135], sizes = [4, 416], strides = [1, 1]} : vector<4x702xf32> to vector<4x416xf32>
    %c0_123 = arith.constant 0 : index
    %c240 = arith.constant 240 : index
    %244 = vector.load %arg2[%c0_123, %c240] : memref<12x484xf32, #tpu.memory_space<vmem>>, vector<12x4xf32>
    %cst_124 = arith.constant dense<0.000000e+00> : vector<12x416xf32>
    %245 = tpu.matmul %244, %243, %cst_124 {dimension_numbers = #tpu.dot_dimension_numbers<[1], [0], [0], [1], [0, 0, 1, 1], [], []>} : vector<12x4xf32>, vector<4x416xf32>, vector<12x416xf32> -> vector<12x416xf32>
    %246 = arith.addf %242, %245 : vector<12x416xf32>
    %247 = vector.extract_strided_slice %1 {offsets = [0, 136], sizes = [4, 416], strides = [1, 1]} : vector<4x702xf32> to vector<4x416xf32>
    %c0_125 = arith.constant 0 : index
    %c244 = arith.constant 244 : index
    %248 = vector.load %arg2[%c0_125, %c244] : memref<12x484xf32, #tpu.memory_space<vmem>>, vector<12x4xf32>
    %cst_126 = arith.constant dense<0.000000e+00> : vector<12x416xf32>
    %249 = tpu.matmul %248, %247, %cst_126 {dimension_numbers = #tpu.dot_dimension_numbers<[1], [0], [0], [1], [0, 0, 1, 1], [], []>} : vector<12x4xf32>, vector<4x416xf32>, vector<12x416xf32> -> vector<12x416xf32>
    %250 = arith.addf %246, %249 : vector<12x416xf32>
    %251 = vector.extract_strided_slice %1 {offsets = [0, 137], sizes = [4, 416], strides = [1, 1]} : vector<4x702xf32> to vector<4x416xf32>
    %c0_127 = arith.constant 0 : index
    %c248 = arith.constant 248 : index
    %252 = vector.load %arg2[%c0_127, %c248] : memref<12x484xf32, #tpu.memory_space<vmem>>, vector<12x4xf32>
    %cst_128 = arith.constant dense<0.000000e+00> : vector<12x416xf32>
    %253 = tpu.matmul %252, %251, %cst_128 {dimension_numbers = #tpu.dot_dimension_numbers<[1], [0], [0], [1], [0, 0, 1, 1], [], []>} : vector<12x4xf32>, vector<4x416xf32>, vector<12x416xf32> -> vector<12x416xf32>
    %254 = arith.addf %250, %253 : vector<12x416xf32>
    %255 = vector.extract_strided_slice %1 {offsets = [0, 138], sizes = [4, 416], strides = [1, 1]} : vector<4x702xf32> to vector<4x416xf32>
    %c0_129 = arith.constant 0 : index
    %c252 = arith.constant 252 : index
    %256 = vector.load %arg2[%c0_129, %c252] : memref<12x484xf32, #tpu.memory_space<vmem>>, vector<12x4xf32>
    %cst_130 = arith.constant dense<0.000000e+00> : vector<12x416xf32>
    %257 = tpu.matmul %256, %255, %cst_130 {dimension_numbers = #tpu.dot_dimension_numbers<[1], [0], [0], [1], [0, 0, 1, 1], [], []>} : vector<12x4xf32>, vector<4x416xf32>, vector<12x416xf32> -> vector<12x416xf32>
    %258 = arith.addf %254, %257 : vector<12x416xf32>
    %259 = vector.extract_strided_slice %1 {offsets = [0, 139], sizes = [4, 416], strides = [1, 1]} : vector<4x702xf32> to vector<4x416xf32>
    %c0_131 = arith.constant 0 : index
    %c256 = arith.constant 256 : index
    %260 = vector.load %arg2[%c0_131, %c256] : memref<12x484xf32, #tpu.memory_space<vmem>>, vector<12x4xf32>
    %cst_132 = arith.constant dense<0.000000e+00> : vector<12x416xf32>
    %261 = tpu.matmul %260, %259, %cst_132 {dimension_numbers = #tpu.dot_dimension_numbers<[1], [0], [0], [1], [0, 0, 1, 1], [], []>} : vector<12x4xf32>, vector<4x416xf32>, vector<12x416xf32> -> vector<12x416xf32>
    %262 = arith.addf %258, %261 : vector<12x416xf32>
    %263 = vector.extract_strided_slice %1 {offsets = [0, 140], sizes = [4, 416], strides = [1, 1]} : vector<4x702xf32> to vector<4x416xf32>
    %c0_133 = arith.constant 0 : index
    %c260 = arith.constant 260 : index
    %264 = vector.load %arg2[%c0_133, %c260] : memref<12x484xf32, #tpu.memory_space<vmem>>, vector<12x4xf32>
    %cst_134 = arith.constant dense<0.000000e+00> : vector<12x416xf32>
    %265 = tpu.matmul %264, %263, %cst_134 {dimension_numbers = #tpu.dot_dimension_numbers<[1], [0], [0], [1], [0, 0, 1, 1], [], []>} : vector<12x4xf32>, vector<4x416xf32>, vector<12x416xf32> -> vector<12x416xf32>
    %266 = arith.addf %262, %265 : vector<12x416xf32>
    %267 = vector.extract_strided_slice %1 {offsets = [0, 156], sizes = [4, 416], strides = [1, 1]} : vector<4x702xf32> to vector<4x416xf32>
    %c0_135 = arith.constant 0 : index
    %c264 = arith.constant 264 : index
    %268 = vector.load %arg2[%c0_135, %c264] : memref<12x484xf32, #tpu.memory_space<vmem>>, vector<12x4xf32>
    %cst_136 = arith.constant dense<0.000000e+00> : vector<12x416xf32>
    %269 = tpu.matmul %268, %267, %cst_136 {dimension_numbers = #tpu.dot_dimension_numbers<[1], [0], [0], [1], [0, 0, 1, 1], [], []>} : vector<12x4xf32>, vector<4x416xf32>, vector<12x416xf32> -> vector<12x416xf32>
    %270 = arith.addf %266, %269 : vector<12x416xf32>
    %271 = vector.extract_strided_slice %1 {offsets = [0, 157], sizes = [4, 416], strides = [1, 1]} : vector<4x702xf32> to vector<4x416xf32>
    %c0_137 = arith.constant 0 : index
    %c268 = arith.constant 268 : index
    %272 = vector.load %arg2[%c0_137, %c268] : memref<12x484xf32, #tpu.memory_space<vmem>>, vector<12x4xf32>
    %cst_138 = arith.constant dense<0.000000e+00> : vector<12x416xf32>
    %273 = tpu.matmul %272, %271, %cst_138 {dimension_numbers = #tpu.dot_dimension_numbers<[1], [0], [0], [1], [0, 0, 1, 1], [], []>} : vector<12x4xf32>, vector<4x416xf32>, vector<12x416xf32> -> vector<12x416xf32>
    %274 = arith.addf %270, %273 : vector<12x416xf32>
    %275 = vector.extract_strided_slice %1 {offsets = [0, 158], sizes = [4, 416], strides = [1, 1]} : vector<4x702xf32> to vector<4x416xf32>
    %c0_139 = arith.constant 0 : index
    %c272 = arith.constant 272 : index
    %276 = vector.load %arg2[%c0_139, %c272] : memref<12x484xf32, #tpu.memory_space<vmem>>, vector<12x4xf32>
    %cst_140 = arith.constant dense<0.000000e+00> : vector<12x416xf32>
    %277 = tpu.matmul %276, %275, %cst_140 {dimension_numbers = #tpu.dot_dimension_numbers<[1], [0], [0], [1], [0, 0, 1, 1], [], []>} : vector<12x4xf32>, vector<4x416xf32>, vector<12x416xf32> -> vector<12x416xf32>
    %278 = arith.addf %274, %277 : vector<12x416xf32>
    %279 = vector.extract_strided_slice %1 {offsets = [0, 159], sizes = [4, 416], strides = [1, 1]} : vector<4x702xf32> to vector<4x416xf32>
    %c0_141 = arith.constant 0 : index
    %c276 = arith.constant 276 : index
    %280 = vector.load %arg2[%c0_141, %c276] : memref<12x484xf32, #tpu.memory_space<vmem>>, vector<12x4xf32>
    %cst_142 = arith.constant dense<0.000000e+00> : vector<12x416xf32>
    %281 = tpu.matmul %280, %279, %cst_142 {dimension_numbers = #tpu.dot_dimension_numbers<[1], [0], [0], [1], [0, 0, 1, 1], [], []>} : vector<12x4xf32>, vector<4x416xf32>, vector<12x416xf32> -> vector<12x416xf32>
    %282 = arith.addf %278, %281 : vector<12x416xf32>
    %283 = vector.extract_strided_slice %1 {offsets = [0, 160], sizes = [4, 416], strides = [1, 1]} : vector<4x702xf32> to vector<4x416xf32>
    %c0_143 = arith.constant 0 : index
    %c280 = arith.constant 280 : index
    %284 = vector.load %arg2[%c0_143, %c280] : memref<12x484xf32, #tpu.memory_space<vmem>>, vector<12x4xf32>
    %cst_144 = arith.constant dense<0.000000e+00> : vector<12x416xf32>
    %285 = tpu.matmul %284, %283, %cst_144 {dimension_numbers = #tpu.dot_dimension_numbers<[1], [0], [0], [1], [0, 0, 1, 1], [], []>} : vector<12x4xf32>, vector<4x416xf32>, vector<12x416xf32> -> vector<12x416xf32>
    %286 = arith.addf %282, %285 : vector<12x416xf32>
    %287 = vector.extract_strided_slice %1 {offsets = [0, 161], sizes = [4, 416], strides = [1, 1]} : vector<4x702xf32> to vector<4x416xf32>
    %c0_145 = arith.constant 0 : index
    %c284 = arith.constant 284 : index
    %288 = vector.load %arg2[%c0_145, %c284] : memref<12x484xf32, #tpu.memory_space<vmem>>, vector<12x4xf32>
    %cst_146 = arith.constant dense<0.000000e+00> : vector<12x416xf32>
    %289 = tpu.matmul %288, %287, %cst_146 {dimension_numbers = #tpu.dot_dimension_numbers<[1], [0], [0], [1], [0, 0, 1, 1], [], []>} : vector<12x4xf32>, vector<4x416xf32>, vector<12x416xf32> -> vector<12x416xf32>
    %290 = arith.addf %286, %289 : vector<12x416xf32>
    %291 = vector.extract_strided_slice %1 {offsets = [0, 162], sizes = [4, 416], strides = [1, 1]} : vector<4x702xf32> to vector<4x416xf32>
    %c0_147 = arith.constant 0 : index
    %c288 = arith.constant 288 : index
    %292 = vector.load %arg2[%c0_147, %c288] : memref<12x484xf32, #tpu.memory_space<vmem>>, vector<12x4xf32>
    %cst_148 = arith.constant dense<0.000000e+00> : vector<12x416xf32>
    %293 = tpu.matmul %292, %291, %cst_148 {dimension_numbers = #tpu.dot_dimension_numbers<[1], [0], [0], [1], [0, 0, 1, 1], [], []>} : vector<12x4xf32>, vector<4x416xf32>, vector<12x416xf32> -> vector<12x416xf32>
    %294 = arith.addf %290, %293 : vector<12x416xf32>
    %295 = vector.extract_strided_slice %1 {offsets = [0, 163], sizes = [4, 416], strides = [1, 1]} : vector<4x702xf32> to vector<4x416xf32>
    %c0_149 = arith.constant 0 : index
    %c292 = arith.constant 292 : index
    %296 = vector.load %arg2[%c0_149, %c292] : memref<12x484xf32, #tpu.memory_space<vmem>>, vector<12x4xf32>
    %cst_150 = arith.constant dense<0.000000e+00> : vector<12x416xf32>
    %297 = tpu.matmul %296, %295, %cst_150 {dimension_numbers = #tpu.dot_dimension_numbers<[1], [0], [0], [1], [0, 0, 1, 1], [], []>} : vector<12x4xf32>, vector<4x416xf32>, vector<12x416xf32> -> vector<12x416xf32>
    %298 = arith.addf %294, %297 : vector<12x416xf32>
    %299 = vector.extract_strided_slice %1 {offsets = [0, 164], sizes = [4, 416], strides = [1, 1]} : vector<4x702xf32> to vector<4x416xf32>
    %c0_151 = arith.constant 0 : index
    %c296 = arith.constant 296 : index
    %300 = vector.load %arg2[%c0_151, %c296] : memref<12x484xf32, #tpu.memory_space<vmem>>, vector<12x4xf32>
    %cst_152 = arith.constant dense<0.000000e+00> : vector<12x416xf32>
    %301 = tpu.matmul %300, %299, %cst_152 {dimension_numbers = #tpu.dot_dimension_numbers<[1], [0], [0], [1], [0, 0, 1, 1], [], []>} : vector<12x4xf32>, vector<4x416xf32>, vector<12x416xf32> -> vector<12x416xf32>
    %302 = arith.addf %298, %301 : vector<12x416xf32>
    %303 = vector.extract_strided_slice %1 {offsets = [0, 165], sizes = [4, 416], strides = [1, 1]} : vector<4x702xf32> to vector<4x416xf32>
    %c0_153 = arith.constant 0 : index
    %c300 = arith.constant 300 : index
    %304 = vector.load %arg2[%c0_153, %c300] : memref<12x484xf32, #tpu.memory_space<vmem>>, vector<12x4xf32>
    %cst_154 = arith.constant dense<0.000000e+00> : vector<12x416xf32>
    %305 = tpu.matmul %304, %303, %cst_154 {dimension_numbers = #tpu.dot_dimension_numbers<[1], [0], [0], [1], [0, 0, 1, 1], [], []>} : vector<12x4xf32>, vector<4x416xf32>, vector<12x416xf32> -> vector<12x416xf32>
    %306 = arith.addf %302, %305 : vector<12x416xf32>
    %307 = vector.extract_strided_slice %1 {offsets = [0, 166], sizes = [4, 416], strides = [1, 1]} : vector<4x702xf32> to vector<4x416xf32>
    %c0_155 = arith.constant 0 : index
    %c304 = arith.constant 304 : index
    %308 = vector.load %arg2[%c0_155, %c304] : memref<12x484xf32, #tpu.memory_space<vmem>>, vector<12x4xf32>
    %cst_156 = arith.constant dense<0.000000e+00> : vector<12x416xf32>
    %309 = tpu.matmul %308, %307, %cst_156 {dimension_numbers = #tpu.dot_dimension_numbers<[1], [0], [0], [1], [0, 0, 1, 1], [], []>} : vector<12x4xf32>, vector<4x416xf32>, vector<12x416xf32> -> vector<12x416xf32>
    %310 = arith.addf %306, %309 : vector<12x416xf32>
    %311 = vector.extract_strided_slice %1 {offsets = [0, 182], sizes = [4, 416], strides = [1, 1]} : vector<4x702xf32> to vector<4x416xf32>
    %c0_157 = arith.constant 0 : index
    %c308 = arith.constant 308 : index
    %312 = vector.load %arg2[%c0_157, %c308] : memref<12x484xf32, #tpu.memory_space<vmem>>, vector<12x4xf32>
    %cst_158 = arith.constant dense<0.000000e+00> : vector<12x416xf32>
    %313 = tpu.matmul %312, %311, %cst_158 {dimension_numbers = #tpu.dot_dimension_numbers<[1], [0], [0], [1], [0, 0, 1, 1], [], []>} : vector<12x4xf32>, vector<4x416xf32>, vector<12x416xf32> -> vector<12x416xf32>
    %314 = arith.addf %310, %313 : vector<12x416xf32>
    %315 = vector.extract_strided_slice %1 {offsets = [0, 183], sizes = [4, 416], strides = [1, 1]} : vector<4x702xf32> to vector<4x416xf32>
    %c0_159 = arith.constant 0 : index
    %c312 = arith.constant 312 : index
    %316 = vector.load %arg2[%c0_159, %c312] : memref<12x484xf32, #tpu.memory_space<vmem>>, vector<12x4xf32>
    %cst_160 = arith.constant dense<0.000000e+00> : vector<12x416xf32>
    %317 = tpu.matmul %316, %315, %cst_160 {dimension_numbers = #tpu.dot_dimension_numbers<[1], [0], [0], [1], [0, 0, 1, 1], [], []>} : vector<12x4xf32>, vector<4x416xf32>, vector<12x416xf32> -> vector<12x416xf32>
    %318 = arith.addf %314, %317 : vector<12x416xf32>
    %319 = vector.extract_strided_slice %1 {offsets = [0, 184], sizes = [4, 416], strides = [1, 1]} : vector<4x702xf32> to vector<4x416xf32>
    %c0_161 = arith.constant 0 : index
    %c316 = arith.constant 316 : index
    %320 = vector.load %arg2[%c0_161, %c316] : memref<12x484xf32, #tpu.memory_space<vmem>>, vector<12x4xf32>
    %cst_162 = arith.constant dense<0.000000e+00> : vector<12x416xf32>
    %321 = tpu.matmul %320, %319, %cst_162 {dimension_numbers = #tpu.dot_dimension_numbers<[1], [0], [0], [1], [0, 0, 1, 1], [], []>} : vector<12x4xf32>, vector<4x416xf32>, vector<12x416xf32> -> vector<12x416xf32>
    %322 = arith.addf %318, %321 : vector<12x416xf32>
    %323 = vector.extract_strided_slice %1 {offsets = [0, 185], sizes = [4, 416], strides = [1, 1]} : vector<4x702xf32> to vector<4x416xf32>
    %c0_163 = arith.constant 0 : index
    %c320 = arith.constant 320 : index
    %324 = vector.load %arg2[%c0_163, %c320] : memref<12x484xf32, #tpu.memory_space<vmem>>, vector<12x4xf32>
    %cst_164 = arith.constant dense<0.000000e+00> : vector<12x416xf32>
    %325 = tpu.matmul %324, %323, %cst_164 {dimension_numbers = #tpu.dot_dimension_numbers<[1], [0], [0], [1], [0, 0, 1, 1], [], []>} : vector<12x4xf32>, vector<4x416xf32>, vector<12x416xf32> -> vector<12x416xf32>
    %326 = arith.addf %322, %325 : vector<12x416xf32>
    %327 = vector.extract_strided_slice %1 {offsets = [0, 186], sizes = [4, 416], strides = [1, 1]} : vector<4x702xf32> to vector<4x416xf32>
    %c0_165 = arith.constant 0 : index
    %c324 = arith.constant 324 : index
    %328 = vector.load %arg2[%c0_165, %c324] : memref<12x484xf32, #tpu.memory_space<vmem>>, vector<12x4xf32>
    %cst_166 = arith.constant dense<0.000000e+00> : vector<12x416xf32>
    %329 = tpu.matmul %328, %327, %cst_166 {dimension_numbers = #tpu.dot_dimension_numbers<[1], [0], [0], [1], [0, 0, 1, 1], [], []>} : vector<12x4xf32>, vector<4x416xf32>, vector<12x416xf32> -> vector<12x416xf32>
    %330 = arith.addf %326, %329 : vector<12x416xf32>
    %331 = vector.extract_strided_slice %1 {offsets = [0, 187], sizes = [4, 416], strides = [1, 1]} : vector<4x702xf32> to vector<4x416xf32>
    %c0_167 = arith.constant 0 : index
    %c328 = arith.constant 328 : index
    %332 = vector.load %arg2[%c0_167, %c328] : memref<12x484xf32, #tpu.memory_space<vmem>>, vector<12x4xf32>
    %cst_168 = arith.constant dense<0.000000e+00> : vector<12x416xf32>
    %333 = tpu.matmul %332, %331, %cst_168 {dimension_numbers = #tpu.dot_dimension_numbers<[1], [0], [0], [1], [0, 0, 1, 1], [], []>} : vector<12x4xf32>, vector<4x416xf32>, vector<12x416xf32> -> vector<12x416xf32>
    %334 = arith.addf %330, %333 : vector<12x416xf32>
    %335 = vector.extract_strided_slice %1 {offsets = [0, 188], sizes = [4, 416], strides = [1, 1]} : vector<4x702xf32> to vector<4x416xf32>
    %c0_169 = arith.constant 0 : index
    %c332 = arith.constant 332 : index
    %336 = vector.load %arg2[%c0_169, %c332] : memref<12x484xf32, #tpu.memory_space<vmem>>, vector<12x4xf32>
    %cst_170 = arith.constant dense<0.000000e+00> : vector<12x416xf32>
    %337 = tpu.matmul %336, %335, %cst_170 {dimension_numbers = #tpu.dot_dimension_numbers<[1], [0], [0], [1], [0, 0, 1, 1], [], []>} : vector<12x4xf32>, vector<4x416xf32>, vector<12x416xf32> -> vector<12x416xf32>
    %338 = arith.addf %334, %337 : vector<12x416xf32>
    %339 = vector.extract_strided_slice %1 {offsets = [0, 189], sizes = [4, 416], strides = [1, 1]} : vector<4x702xf32> to vector<4x416xf32>
    %c0_171 = arith.constant 0 : index
    %c336 = arith.constant 336 : index
    %340 = vector.load %arg2[%c0_171, %c336] : memref<12x484xf32, #tpu.memory_space<vmem>>, vector<12x4xf32>
    %cst_172 = arith.constant dense<0.000000e+00> : vector<12x416xf32>
    %341 = tpu.matmul %340, %339, %cst_172 {dimension_numbers = #tpu.dot_dimension_numbers<[1], [0], [0], [1], [0, 0, 1, 1], [], []>} : vector<12x4xf32>, vector<4x416xf32>, vector<12x416xf32> -> vector<12x416xf32>
    %342 = arith.addf %338, %341 : vector<12x416xf32>
    %343 = vector.extract_strided_slice %1 {offsets = [0, 190], sizes = [4, 416], strides = [1, 1]} : vector<4x702xf32> to vector<4x416xf32>
    %c0_173 = arith.constant 0 : index
    %c340 = arith.constant 340 : index
    %344 = vector.load %arg2[%c0_173, %c340] : memref<12x484xf32, #tpu.memory_space<vmem>>, vector<12x4xf32>
    %cst_174 = arith.constant dense<0.000000e+00> : vector<12x416xf32>
    %345 = tpu.matmul %344, %343, %cst_174 {dimension_numbers = #tpu.dot_dimension_numbers<[1], [0], [0], [1], [0, 0, 1, 1], [], []>} : vector<12x4xf32>, vector<4x416xf32>, vector<12x416xf32> -> vector<12x416xf32>
    %346 = arith.addf %342, %345 : vector<12x416xf32>
    %347 = vector.extract_strided_slice %1 {offsets = [0, 191], sizes = [4, 416], strides = [1, 1]} : vector<4x702xf32> to vector<4x416xf32>
    %c0_175 = arith.constant 0 : index
    %c344 = arith.constant 344 : index
    %348 = vector.load %arg2[%c0_175, %c344] : memref<12x484xf32, #tpu.memory_space<vmem>>, vector<12x4xf32>
    %cst_176 = arith.constant dense<0.000000e+00> : vector<12x416xf32>
    %349 = tpu.matmul %348, %347, %cst_176 {dimension_numbers = #tpu.dot_dimension_numbers<[1], [0], [0], [1], [0, 0, 1, 1], [], []>} : vector<12x4xf32>, vector<4x416xf32>, vector<12x416xf32> -> vector<12x416xf32>
    %350 = arith.addf %346, %349 : vector<12x416xf32>
    %351 = vector.extract_strided_slice %1 {offsets = [0, 192], sizes = [4, 416], strides = [1, 1]} : vector<4x702xf32> to vector<4x416xf32>
    %c0_177 = arith.constant 0 : index
    %c348 = arith.constant 348 : index
    %352 = vector.load %arg2[%c0_177, %c348] : memref<12x484xf32, #tpu.memory_space<vmem>>, vector<12x4xf32>
    %cst_178 = arith.constant dense<0.000000e+00> : vector<12x416xf32>
    %353 = tpu.matmul %352, %351, %cst_178 {dimension_numbers = #tpu.dot_dimension_numbers<[1], [0], [0], [1], [0, 0, 1, 1], [], []>} : vector<12x4xf32>, vector<4x416xf32>, vector<12x416xf32> -> vector<12x416xf32>
    %354 = arith.addf %350, %353 : vector<12x416xf32>
    %355 = vector.extract_strided_slice %1 {offsets = [0, 208], sizes = [4, 416], strides = [1, 1]} : vector<4x702xf32> to vector<4x416xf32>
    %c0_179 = arith.constant 0 : index
    %c352 = arith.constant 352 : index
    %356 = vector.load %arg2[%c0_179, %c352] : memref<12x484xf32, #tpu.memory_space<vmem>>, vector<12x4xf32>
    %cst_180 = arith.constant dense<0.000000e+00> : vector<12x416xf32>
    %357 = tpu.matmul %356, %355, %cst_180 {dimension_numbers = #tpu.dot_dimension_numbers<[1], [0], [0], [1], [0, 0, 1, 1], [], []>} : vector<12x4xf32>, vector<4x416xf32>, vector<12x416xf32> -> vector<12x416xf32>
    %358 = arith.addf %354, %357 : vector<12x416xf32>
    %359 = vector.extract_strided_slice %1 {offsets = [0, 209], sizes = [4, 416], strides = [1, 1]} : vector<4x702xf32> to vector<4x416xf32>
    %c0_181 = arith.constant 0 : index
    %c356 = arith.constant 356 : index
    %360 = vector.load %arg2[%c0_181, %c356] : memref<12x484xf32, #tpu.memory_space<vmem>>, vector<12x4xf32>
    %cst_182 = arith.constant dense<0.000000e+00> : vector<12x416xf32>
    %361 = tpu.matmul %360, %359, %cst_182 {dimension_numbers = #tpu.dot_dimension_numbers<[1], [0], [0], [1], [0, 0, 1, 1], [], []>} : vector<12x4xf32>, vector<4x416xf32>, vector<12x416xf32> -> vector<12x416xf32>
    %362 = arith.addf %358, %361 : vector<12x416xf32>
    %363 = vector.extract_strided_slice %1 {offsets = [0, 210], sizes = [4, 416], strides = [1, 1]} : vector<4x702xf32> to vector<4x416xf32>
    %c0_183 = arith.constant 0 : index
    %c360 = arith.constant 360 : index
    %364 = vector.load %arg2[%c0_183, %c360] : memref<12x484xf32, #tpu.memory_space<vmem>>, vector<12x4xf32>
    %cst_184 = arith.constant dense<0.000000e+00> : vector<12x416xf32>
    %365 = tpu.matmul %364, %363, %cst_184 {dimension_numbers = #tpu.dot_dimension_numbers<[1], [0], [0], [1], [0, 0, 1, 1], [], []>} : vector<12x4xf32>, vector<4x416xf32>, vector<12x416xf32> -> vector<12x416xf32>
    %366 = arith.addf %362, %365 : vector<12x416xf32>
    %367 = vector.extract_strided_slice %1 {offsets = [0, 211], sizes = [4, 416], strides = [1, 1]} : vector<4x702xf32> to vector<4x416xf32>
    %c0_185 = arith.constant 0 : index
    %c364 = arith.constant 364 : index
    %368 = vector.load %arg2[%c0_185, %c364] : memref<12x484xf32, #tpu.memory_space<vmem>>, vector<12x4xf32>
    %cst_186 = arith.constant dense<0.000000e+00> : vector<12x416xf32>
    %369 = tpu.matmul %368, %367, %cst_186 {dimension_numbers = #tpu.dot_dimension_numbers<[1], [0], [0], [1], [0, 0, 1, 1], [], []>} : vector<12x4xf32>, vector<4x416xf32>, vector<12x416xf32> -> vector<12x416xf32>
    %370 = arith.addf %366, %369 : vector<12x416xf32>
    %371 = vector.extract_strided_slice %1 {offsets = [0, 212], sizes = [4, 416], strides = [1, 1]} : vector<4x702xf32> to vector<4x416xf32>
    %c0_187 = arith.constant 0 : index
    %c368 = arith.constant 368 : index
    %372 = vector.load %arg2[%c0_187, %c368] : memref<12x484xf32, #tpu.memory_space<vmem>>, vector<12x4xf32>
    %cst_188 = arith.constant dense<0.000000e+00> : vector<12x416xf32>
    %373 = tpu.matmul %372, %371, %cst_188 {dimension_numbers = #tpu.dot_dimension_numbers<[1], [0], [0], [1], [0, 0, 1, 1], [], []>} : vector<12x4xf32>, vector<4x416xf32>, vector<12x416xf32> -> vector<12x416xf32>
    %374 = arith.addf %370, %373 : vector<12x416xf32>
    %375 = vector.extract_strided_slice %1 {offsets = [0, 213], sizes = [4, 416], strides = [1, 1]} : vector<4x702xf32> to vector<4x416xf32>
    %c0_189 = arith.constant 0 : index
    %c372 = arith.constant 372 : index
    %376 = vector.load %arg2[%c0_189, %c372] : memref<12x484xf32, #tpu.memory_space<vmem>>, vector<12x4xf32>
    %cst_190 = arith.constant dense<0.000000e+00> : vector<12x416xf32>
    %377 = tpu.matmul %376, %375, %cst_190 {dimension_numbers = #tpu.dot_dimension_numbers<[1], [0], [0], [1], [0, 0, 1, 1], [], []>} : vector<12x4xf32>, vector<4x416xf32>, vector<12x416xf32> -> vector<12x416xf32>
    %378 = arith.addf %374, %377 : vector<12x416xf32>
    %379 = vector.extract_strided_slice %1 {offsets = [0, 214], sizes = [4, 416], strides = [1, 1]} : vector<4x702xf32> to vector<4x416xf32>
    %c0_191 = arith.constant 0 : index
    %c376 = arith.constant 376 : index
    %380 = vector.load %arg2[%c0_191, %c376] : memref<12x484xf32, #tpu.memory_space<vmem>>, vector<12x4xf32>
    %cst_192 = arith.constant dense<0.000000e+00> : vector<12x416xf32>
    %381 = tpu.matmul %380, %379, %cst_192 {dimension_numbers = #tpu.dot_dimension_numbers<[1], [0], [0], [1], [0, 0, 1, 1], [], []>} : vector<12x4xf32>, vector<4x416xf32>, vector<12x416xf32> -> vector<12x416xf32>
    %382 = arith.addf %378, %381 : vector<12x416xf32>
    %383 = vector.extract_strided_slice %1 {offsets = [0, 215], sizes = [4, 416], strides = [1, 1]} : vector<4x702xf32> to vector<4x416xf32>
    %c0_193 = arith.constant 0 : index
    %c380 = arith.constant 380 : index
    %384 = vector.load %arg2[%c0_193, %c380] : memref<12x484xf32, #tpu.memory_space<vmem>>, vector<12x4xf32>
    %cst_194 = arith.constant dense<0.000000e+00> : vector<12x416xf32>
    %385 = tpu.matmul %384, %383, %cst_194 {dimension_numbers = #tpu.dot_dimension_numbers<[1], [0], [0], [1], [0, 0, 1, 1], [], []>} : vector<12x4xf32>, vector<4x416xf32>, vector<12x416xf32> -> vector<12x416xf32>
    %386 = arith.addf %382, %385 : vector<12x416xf32>
    %387 = vector.extract_strided_slice %1 {offsets = [0, 216], sizes = [4, 416], strides = [1, 1]} : vector<4x702xf32> to vector<4x416xf32>
    %c0_195 = arith.constant 0 : index
    %c384 = arith.constant 384 : index
    %388 = vector.load %arg2[%c0_195, %c384] : memref<12x484xf32, #tpu.memory_space<vmem>>, vector<12x4xf32>
    %cst_196 = arith.constant dense<0.000000e+00> : vector<12x416xf32>
    %389 = tpu.matmul %388, %387, %cst_196 {dimension_numbers = #tpu.dot_dimension_numbers<[1], [0], [0], [1], [0, 0, 1, 1], [], []>} : vector<12x4xf32>, vector<4x416xf32>, vector<12x416xf32> -> vector<12x416xf32>
    %390 = arith.addf %386, %389 : vector<12x416xf32>
    %391 = vector.extract_strided_slice %1 {offsets = [0, 217], sizes = [4, 416], strides = [1, 1]} : vector<4x702xf32> to vector<4x416xf32>
    %c0_197 = arith.constant 0 : index
    %c388 = arith.constant 388 : index
    %392 = vector.load %arg2[%c0_197, %c388] : memref<12x484xf32, #tpu.memory_space<vmem>>, vector<12x4xf32>
    %cst_198 = arith.constant dense<0.000000e+00> : vector<12x416xf32>
    %393 = tpu.matmul %392, %391, %cst_198 {dimension_numbers = #tpu.dot_dimension_numbers<[1], [0], [0], [1], [0, 0, 1, 1], [], []>} : vector<12x4xf32>, vector<4x416xf32>, vector<12x416xf32> -> vector<12x416xf32>
    %394 = arith.addf %390, %393 : vector<12x416xf32>
    %395 = vector.extract_strided_slice %1 {offsets = [0, 218], sizes = [4, 416], strides = [1, 1]} : vector<4x702xf32> to vector<4x416xf32>
    %c0_199 = arith.constant 0 : index
    %c392 = arith.constant 392 : index
    %396 = vector.load %arg2[%c0_199, %c392] : memref<12x484xf32, #tpu.memory_space<vmem>>, vector<12x4xf32>
    %cst_200 = arith.constant dense<0.000000e+00> : vector<12x416xf32>
    %397 = tpu.matmul %396, %395, %cst_200 {dimension_numbers = #tpu.dot_dimension_numbers<[1], [0], [0], [1], [0, 0, 1, 1], [], []>} : vector<12x4xf32>, vector<4x416xf32>, vector<12x416xf32> -> vector<12x416xf32>
    %398 = arith.addf %394, %397 : vector<12x416xf32>
    %399 = vector.extract_strided_slice %1 {offsets = [0, 234], sizes = [4, 416], strides = [1, 1]} : vector<4x702xf32> to vector<4x416xf32>
    %c0_201 = arith.constant 0 : index
    %c396 = arith.constant 396 : index
    %400 = vector.load %arg2[%c0_201, %c396] : memref<12x484xf32, #tpu.memory_space<vmem>>, vector<12x4xf32>
    %cst_202 = arith.constant dense<0.000000e+00> : vector<12x416xf32>
    %401 = tpu.matmul %400, %399, %cst_202 {dimension_numbers = #tpu.dot_dimension_numbers<[1], [0], [0], [1], [0, 0, 1, 1], [], []>} : vector<12x4xf32>, vector<4x416xf32>, vector<12x416xf32> -> vector<12x416xf32>
    %402 = arith.addf %398, %401 : vector<12x416xf32>
    %403 = vector.extract_strided_slice %1 {offsets = [0, 235], sizes = [4, 416], strides = [1, 1]} : vector<4x702xf32> to vector<4x416xf32>
    %c0_203 = arith.constant 0 : index
    %c400 = arith.constant 400 : index
    %404 = vector.load %arg2[%c0_203, %c400] : memref<12x484xf32, #tpu.memory_space<vmem>>, vector<12x4xf32>
    %cst_204 = arith.constant dense<0.000000e+00> : vector<12x416xf32>
    %405 = tpu.matmul %404, %403, %cst_204 {dimension_numbers = #tpu.dot_dimension_numbers<[1], [0], [0], [1], [0, 0, 1, 1], [], []>} : vector<12x4xf32>, vector<4x416xf32>, vector<12x416xf32> -> vector<12x416xf32>
    %406 = arith.addf %402, %405 : vector<12x416xf32>
    %407 = vector.extract_strided_slice %1 {offsets = [0, 236], sizes = [4, 416], strides = [1, 1]} : vector<4x702xf32> to vector<4x416xf32>
    %c0_205 = arith.constant 0 : index
    %c404 = arith.constant 404 : index
    %408 = vector.load %arg2[%c0_205, %c404] : memref<12x484xf32, #tpu.memory_space<vmem>>, vector<12x4xf32>
    %cst_206 = arith.constant dense<0.000000e+00> : vector<12x416xf32>
    %409 = tpu.matmul %408, %407, %cst_206 {dimension_numbers = #tpu.dot_dimension_numbers<[1], [0], [0], [1], [0, 0, 1, 1], [], []>} : vector<12x4xf32>, vector<4x416xf32>, vector<12x416xf32> -> vector<12x416xf32>
    %410 = arith.addf %406, %409 : vector<12x416xf32>
    %411 = vector.extract_strided_slice %1 {offsets = [0, 237], sizes = [4, 416], strides = [1, 1]} : vector<4x702xf32> to vector<4x416xf32>
    %c0_207 = arith.constant 0 : index
    %c408 = arith.constant 408 : index
    %412 = vector.load %arg2[%c0_207, %c408] : memref<12x484xf32, #tpu.memory_space<vmem>>, vector<12x4xf32>
    %cst_208 = arith.constant dense<0.000000e+00> : vector<12x416xf32>
    %413 = tpu.matmul %412, %411, %cst_208 {dimension_numbers = #tpu.dot_dimension_numbers<[1], [0], [0], [1], [0, 0, 1, 1], [], []>} : vector<12x4xf32>, vector<4x416xf32>, vector<12x416xf32> -> vector<12x416xf32>
    %414 = arith.addf %410, %413 : vector<12x416xf32>
    %415 = vector.extract_strided_slice %1 {offsets = [0, 238], sizes = [4, 416], strides = [1, 1]} : vector<4x702xf32> to vector<4x416xf32>
    %c0_209 = arith.constant 0 : index
    %c412 = arith.constant 412 : index
    %416 = vector.load %arg2[%c0_209, %c412] : memref<12x484xf32, #tpu.memory_space<vmem>>, vector<12x4xf32>
    %cst_210 = arith.constant dense<0.000000e+00> : vector<12x416xf32>
    %417 = tpu.matmul %416, %415, %cst_210 {dimension_numbers = #tpu.dot_dimension_numbers<[1], [0], [0], [1], [0, 0, 1, 1], [], []>} : vector<12x4xf32>, vector<4x416xf32>, vector<12x416xf32> -> vector<12x416xf32>
    %418 = arith.addf %414, %417 : vector<12x416xf32>
    %419 = vector.extract_strided_slice %1 {offsets = [0, 239], sizes = [4, 416], strides = [1, 1]} : vector<4x702xf32> to vector<4x416xf32>
    %c0_211 = arith.constant 0 : index
    %c416 = arith.constant 416 : index
    %420 = vector.load %arg2[%c0_211, %c416] : memref<12x484xf32, #tpu.memory_space<vmem>>, vector<12x4xf32>
    %cst_212 = arith.constant dense<0.000000e+00> : vector<12x416xf32>
    %421 = tpu.matmul %420, %419, %cst_212 {dimension_numbers = #tpu.dot_dimension_numbers<[1], [0], [0], [1], [0, 0, 1, 1], [], []>} : vector<12x4xf32>, vector<4x416xf32>, vector<12x416xf32> -> vector<12x416xf32>
    %422 = arith.addf %418, %421 : vector<12x416xf32>
    %423 = vector.extract_strided_slice %1 {offsets = [0, 240], sizes = [4, 416], strides = [1, 1]} : vector<4x702xf32> to vector<4x416xf32>
    %c0_213 = arith.constant 0 : index
    %c420 = arith.constant 420 : index
    %424 = vector.load %arg2[%c0_213, %c420] : memref<12x484xf32, #tpu.memory_space<vmem>>, vector<12x4xf32>
    %cst_214 = arith.constant dense<0.000000e+00> : vector<12x416xf32>
    %425 = tpu.matmul %424, %423, %cst_214 {dimension_numbers = #tpu.dot_dimension_numbers<[1], [0], [0], [1], [0, 0, 1, 1], [], []>} : vector<12x4xf32>, vector<4x416xf32>, vector<12x416xf32> -> vector<12x416xf32>
    %426 = arith.addf %422, %425 : vector<12x416xf32>
    %427 = vector.extract_strided_slice %1 {offsets = [0, 241], sizes = [4, 416], strides = [1, 1]} : vector<4x702xf32> to vector<4x416xf32>
    %c0_215 = arith.constant 0 : index
    %c424 = arith.constant 424 : index
    %428 = vector.load %arg2[%c0_215, %c424] : memref<12x484xf32, #tpu.memory_space<vmem>>, vector<12x4xf32>
    %cst_216 = arith.constant dense<0.000000e+00> : vector<12x416xf32>
    %429 = tpu.matmul %428, %427, %cst_216 {dimension_numbers = #tpu.dot_dimension_numbers<[1], [0], [0], [1], [0, 0, 1, 1], [], []>} : vector<12x4xf32>, vector<4x416xf32>, vector<12x416xf32> -> vector<12x416xf32>
    %430 = arith.addf %426, %429 : vector<12x416xf32>
    %431 = vector.extract_strided_slice %1 {offsets = [0, 242], sizes = [4, 416], strides = [1, 1]} : vector<4x702xf32> to vector<4x416xf32>
    %c0_217 = arith.constant 0 : index
    %c428 = arith.constant 428 : index
    %432 = vector.load %arg2[%c0_217, %c428] : memref<12x484xf32, #tpu.memory_space<vmem>>, vector<12x4xf32>
    %cst_218 = arith.constant dense<0.000000e+00> : vector<12x416xf32>
    %433 = tpu.matmul %432, %431, %cst_218 {dimension_numbers = #tpu.dot_dimension_numbers<[1], [0], [0], [1], [0, 0, 1, 1], [], []>} : vector<12x4xf32>, vector<4x416xf32>, vector<12x416xf32> -> vector<12x416xf32>
    %434 = arith.addf %430, %433 : vector<12x416xf32>
    %435 = vector.extract_strided_slice %1 {offsets = [0, 243], sizes = [4, 416], strides = [1, 1]} : vector<4x702xf32> to vector<4x416xf32>
    %c0_219 = arith.constant 0 : index
    %c432 = arith.constant 432 : index
    %436 = vector.load %arg2[%c0_219, %c432] : memref<12x484xf32, #tpu.memory_space<vmem>>, vector<12x4xf32>
    %cst_220 = arith.constant dense<0.000000e+00> : vector<12x416xf32>
    %437 = tpu.matmul %436, %435, %cst_220 {dimension_numbers = #tpu.dot_dimension_numbers<[1], [0], [0], [1], [0, 0, 1, 1], [], []>} : vector<12x4xf32>, vector<4x416xf32>, vector<12x416xf32> -> vector<12x416xf32>
    %438 = arith.addf %434, %437 : vector<12x416xf32>
    %439 = vector.extract_strided_slice %1 {offsets = [0, 244], sizes = [4, 416], strides = [1, 1]} : vector<4x702xf32> to vector<4x416xf32>
    %c0_221 = arith.constant 0 : index
    %c436 = arith.constant 436 : index
    %440 = vector.load %arg2[%c0_221, %c436] : memref<12x484xf32, #tpu.memory_space<vmem>>, vector<12x4xf32>
    %cst_222 = arith.constant dense<0.000000e+00> : vector<12x416xf32>
    %441 = tpu.matmul %440, %439, %cst_222 {dimension_numbers = #tpu.dot_dimension_numbers<[1], [0], [0], [1], [0, 0, 1, 1], [], []>} : vector<12x4xf32>, vector<4x416xf32>, vector<12x416xf32> -> vector<12x416xf32>
    %442 = arith.addf %438, %441 : vector<12x416xf32>
    %443 = vector.extract_strided_slice %1 {offsets = [0, 260], sizes = [4, 416], strides = [1, 1]} : vector<4x702xf32> to vector<4x416xf32>
    %c0_223 = arith.constant 0 : index
    %c440 = arith.constant 440 : index
    %444 = vector.load %arg2[%c0_223, %c440] : memref<12x484xf32, #tpu.memory_space<vmem>>, vector<12x4xf32>
    %cst_224 = arith.constant dense<0.000000e+00> : vector<12x416xf32>
    %445 = tpu.matmul %444, %443, %cst_224 {dimension_numbers = #tpu.dot_dimension_numbers<[1], [0], [0], [1], [0, 0, 1, 1], [], []>} : vector<12x4xf32>, vector<4x416xf32>, vector<12x416xf32> -> vector<12x416xf32>
    %446 = arith.addf %442, %445 : vector<12x416xf32>
    %447 = vector.extract_strided_slice %1 {offsets = [0, 261], sizes = [4, 416], strides = [1, 1]} : vector<4x702xf32> to vector<4x416xf32>
    %c0_225 = arith.constant 0 : index
    %c444 = arith.constant 444 : index
    %448 = vector.load %arg2[%c0_225, %c444] : memref<12x484xf32, #tpu.memory_space<vmem>>, vector<12x4xf32>
    %cst_226 = arith.constant dense<0.000000e+00> : vector<12x416xf32>
    %449 = tpu.matmul %448, %447, %cst_226 {dimension_numbers = #tpu.dot_dimension_numbers<[1], [0], [0], [1], [0, 0, 1, 1], [], []>} : vector<12x4xf32>, vector<4x416xf32>, vector<12x416xf32> -> vector<12x416xf32>
    %450 = arith.addf %446, %449 : vector<12x416xf32>
    %451 = vector.extract_strided_slice %1 {offsets = [0, 262], sizes = [4, 416], strides = [1, 1]} : vector<4x702xf32> to vector<4x416xf32>
    %c0_227 = arith.constant 0 : index
    %c448 = arith.constant 448 : index
    %452 = vector.load %arg2[%c0_227, %c448] : memref<12x484xf32, #tpu.memory_space<vmem>>, vector<12x4xf32>
    %cst_228 = arith.constant dense<0.000000e+00> : vector<12x416xf32>
    %453 = tpu.matmul %452, %451, %cst_228 {dimension_numbers = #tpu.dot_dimension_numbers<[1], [0], [0], [1], [0, 0, 1, 1], [], []>} : vector<12x4xf32>, vector<4x416xf32>, vector<12x416xf32> -> vector<12x416xf32>
    %454 = arith.addf %450, %453 : vector<12x416xf32>
    %455 = vector.extract_strided_slice %1 {offsets = [0, 263], sizes = [4, 416], strides = [1, 1]} : vector<4x702xf32> to vector<4x416xf32>
    %c0_229 = arith.constant 0 : index
    %c452 = arith.constant 452 : index
    %456 = vector.load %arg2[%c0_229, %c452] : memref<12x484xf32, #tpu.memory_space<vmem>>, vector<12x4xf32>
    %cst_230 = arith.constant dense<0.000000e+00> : vector<12x416xf32>
    %457 = tpu.matmul %456, %455, %cst_230 {dimension_numbers = #tpu.dot_dimension_numbers<[1], [0], [0], [1], [0, 0, 1, 1], [], []>} : vector<12x4xf32>, vector<4x416xf32>, vector<12x416xf32> -> vector<12x416xf32>
    %458 = arith.addf %454, %457 : vector<12x416xf32>
    %459 = vector.extract_strided_slice %1 {offsets = [0, 264], sizes = [4, 416], strides = [1, 1]} : vector<4x702xf32> to vector<4x416xf32>
    %c0_231 = arith.constant 0 : index
    %c456 = arith.constant 456 : index
    %460 = vector.load %arg2[%c0_231, %c456] : memref<12x484xf32, #tpu.memory_space<vmem>>, vector<12x4xf32>
    %cst_232 = arith.constant dense<0.000000e+00> : vector<12x416xf32>
    %461 = tpu.matmul %460, %459, %cst_232 {dimension_numbers = #tpu.dot_dimension_numbers<[1], [0], [0], [1], [0, 0, 1, 1], [], []>} : vector<12x4xf32>, vector<4x416xf32>, vector<12x416xf32> -> vector<12x416xf32>
    %462 = arith.addf %458, %461 : vector<12x416xf32>
    %463 = vector.extract_strided_slice %1 {offsets = [0, 265], sizes = [4, 416], strides = [1, 1]} : vector<4x702xf32> to vector<4x416xf32>
    %c0_233 = arith.constant 0 : index
    %c460 = arith.constant 460 : index
    %464 = vector.load %arg2[%c0_233, %c460] : memref<12x484xf32, #tpu.memory_space<vmem>>, vector<12x4xf32>
    %cst_234 = arith.constant dense<0.000000e+00> : vector<12x416xf32>
    %465 = tpu.matmul %464, %463, %cst_234 {dimension_numbers = #tpu.dot_dimension_numbers<[1], [0], [0], [1], [0, 0, 1, 1], [], []>} : vector<12x4xf32>, vector<4x416xf32>, vector<12x416xf32> -> vector<12x416xf32>
    %466 = arith.addf %462, %465 : vector<12x416xf32>
    %467 = vector.extract_strided_slice %1 {offsets = [0, 266], sizes = [4, 416], strides = [1, 1]} : vector<4x702xf32> to vector<4x416xf32>
    %c0_235 = arith.constant 0 : index
    %c464 = arith.constant 464 : index
    %468 = vector.load %arg2[%c0_235, %c464] : memref<12x484xf32, #tpu.memory_space<vmem>>, vector<12x4xf32>
    %cst_236 = arith.constant dense<0.000000e+00> : vector<12x416xf32>
    %469 = tpu.matmul %468, %467, %cst_236 {dimension_numbers = #tpu.dot_dimension_numbers<[1], [0], [0], [1], [0, 0, 1, 1], [], []>} : vector<12x4xf32>, vector<4x416xf32>, vector<12x416xf32> -> vector<12x416xf32>
    %470 = arith.addf %466, %469 : vector<12x416xf32>
    %471 = vector.extract_strided_slice %1 {offsets = [0, 267], sizes = [4, 416], strides = [1, 1]} : vector<4x702xf32> to vector<4x416xf32>
    %c0_237 = arith.constant 0 : index
    %c468 = arith.constant 468 : index
    %472 = vector.load %arg2[%c0_237, %c468] : memref<12x484xf32, #tpu.memory_space<vmem>>, vector<12x4xf32>
    %cst_238 = arith.constant dense<0.000000e+00> : vector<12x416xf32>
    %473 = tpu.matmul %472, %471, %cst_238 {dimension_numbers = #tpu.dot_dimension_numbers<[1], [0], [0], [1], [0, 0, 1, 1], [], []>} : vector<12x4xf32>, vector<4x416xf32>, vector<12x416xf32> -> vector<12x416xf32>
    %474 = arith.addf %470, %473 : vector<12x416xf32>
    %475 = vector.extract_strided_slice %1 {offsets = [0, 268], sizes = [4, 416], strides = [1, 1]} : vector<4x702xf32> to vector<4x416xf32>
    %c0_239 = arith.constant 0 : index
    %c472 = arith.constant 472 : index
    %476 = vector.load %arg2[%c0_239, %c472] : memref<12x484xf32, #tpu.memory_space<vmem>>, vector<12x4xf32>
    %cst_240 = arith.constant dense<0.000000e+00> : vector<12x416xf32>
    %477 = tpu.matmul %476, %475, %cst_240 {dimension_numbers = #tpu.dot_dimension_numbers<[1], [0], [0], [1], [0, 0, 1, 1], [], []>} : vector<12x4xf32>, vector<4x416xf32>, vector<12x416xf32> -> vector<12x416xf32>
    %478 = arith.addf %474, %477 : vector<12x416xf32>
    %479 = vector.extract_strided_slice %1 {offsets = [0, 269], sizes = [4, 416], strides = [1, 1]} : vector<4x702xf32> to vector<4x416xf32>
    %c0_241 = arith.constant 0 : index
    %c476 = arith.constant 476 : index
    %480 = vector.load %arg2[%c0_241, %c476] : memref<12x484xf32, #tpu.memory_space<vmem>>, vector<12x4xf32>
    %cst_242 = arith.constant dense<0.000000e+00> : vector<12x416xf32>
    %481 = tpu.matmul %480, %479, %cst_242 {dimension_numbers = #tpu.dot_dimension_numbers<[1], [0], [0], [1], [0, 0, 1, 1], [], []>} : vector<12x4xf32>, vector<4x416xf32>, vector<12x416xf32> -> vector<12x416xf32>
    %482 = arith.addf %478, %481 : vector<12x416xf32>
    %483 = vector.extract_strided_slice %1 {offsets = [0, 270], sizes = [4, 416], strides = [1, 1]} : vector<4x702xf32> to vector<4x416xf32>
    %c0_243 = arith.constant 0 : index
    %c480 = arith.constant 480 : index
    %484 = vector.load %arg2[%c0_243, %c480] : memref<12x484xf32, #tpu.memory_space<vmem>>, vector<12x4xf32>
    %cst_244 = arith.constant dense<0.000000e+00> : vector<12x416xf32>
    %485 = tpu.matmul %484, %483, %cst_244 {dimension_numbers = #tpu.dot_dimension_numbers<[1], [0], [0], [1], [0, 0, 1, 1], [], []>} : vector<12x4xf32>, vector<4x416xf32>, vector<12x416xf32> -> vector<12x416xf32>
    %486 = arith.addf %482, %485 : vector<12x416xf32>
    %487 = vector.extract_strided_slice %486 {offsets = [0, 0], sizes = [12, 16], strides = [1, 1]} : vector<12x416xf32> to vector<12x16xf32>
    %488 = vector.extract_strided_slice %486 {offsets = [0, 26], sizes = [12, 16], strides = [1, 1]} : vector<12x416xf32> to vector<12x16xf32>
    %489 = vector.extract_strided_slice %486 {offsets = [0, 52], sizes = [12, 16], strides = [1, 1]} : vector<12x416xf32> to vector<12x16xf32>
    %490 = vector.extract_strided_slice %486 {offsets = [0, 78], sizes = [12, 16], strides = [1, 1]} : vector<12x416xf32> to vector<12x16xf32>
    %491 = vector.extract_strided_slice %486 {offsets = [0, 104], sizes = [12, 16], strides = [1, 1]} : vector<12x416xf32> to vector<12x16xf32>
    %492 = vector.extract_strided_slice %486 {offsets = [0, 130], sizes = [12, 16], strides = [1, 1]} : vector<12x416xf32> to vector<12x16xf32>
    %493 = vector.extract_strided_slice %486 {offsets = [0, 156], sizes = [12, 16], strides = [1, 1]} : vector<12x416xf32> to vector<12x16xf32>
    %494 = vector.extract_strided_slice %486 {offsets = [0, 182], sizes = [12, 16], strides = [1, 1]} : vector<12x416xf32> to vector<12x16xf32>
    %495 = vector.extract_strided_slice %486 {offsets = [0, 208], sizes = [12, 16], strides = [1, 1]} : vector<12x416xf32> to vector<12x16xf32>
    %496 = vector.extract_strided_slice %486 {offsets = [0, 234], sizes = [12, 16], strides = [1, 1]} : vector<12x416xf32> to vector<12x16xf32>
    %497 = vector.extract_strided_slice %486 {offsets = [0, 260], sizes = [12, 16], strides = [1, 1]} : vector<12x416xf32> to vector<12x16xf32>
    %498 = vector.extract_strided_slice %486 {offsets = [0, 286], sizes = [12, 16], strides = [1, 1]} : vector<12x416xf32> to vector<12x16xf32>
    %499 = vector.extract_strided_slice %486 {offsets = [0, 312], sizes = [12, 16], strides = [1, 1]} : vector<12x416xf32> to vector<12x16xf32>
    %500 = vector.extract_strided_slice %486 {offsets = [0, 338], sizes = [12, 16], strides = [1, 1]} : vector<12x416xf32> to vector<12x16xf32>
    %501 = vector.extract_strided_slice %486 {offsets = [0, 364], sizes = [12, 16], strides = [1, 1]} : vector<12x416xf32> to vector<12x16xf32>
    %502 = vector.extract_strided_slice %486 {offsets = [0, 390], sizes = [12, 16], strides = [1, 1]} : vector<12x416xf32> to vector<12x16xf32>
    %503 = tpu.concatenate %487, %488, %489, %490, %491, %492, %493, %494, %495, %496, %497, %498, %499, %500, %501, %502 in 1 : vector<12x16xf32>, vector<12x16xf32>, vector<12x16xf32>, vector<12x16xf32>, vector<12x16xf32>, vector<12x16xf32>, vector<12x16xf32>, vector<12x16xf32>, vector<12x16xf32>, vector<12x16xf32>, vector<12x16xf32>, vector<12x16xf32>, vector<12x16xf32>, vector<12x16xf32>, vector<12x16xf32>, vector<12x16xf32> -> vector<12x256xf32>
    %c0_245 = arith.constant 0 : index
    %c0_246 = arith.constant 0 : index
    %504 = vector.load %arg3[%c0_245, %c0_246] : memref<12x1xf32, #tpu.memory_space<vmem>>, vector<12x1xf32>
    %505 = vector.broadcast %504 : vector<12x1xf32> to vector<12x256xf32>
    %506 = arith.addf %503, %505 : vector<12x256xf32>
    %cst_247 = arith.constant 0.000000e+00 : f32
    %507 = vector.broadcast %cst_247 : f32 to vector<12x256xf32>
    %508 = arith.maximumf %506, %507 : vector<12x256xf32>
    %c0_248 = arith.constant 0 : index
    %c0_249 = arith.constant 0 : index
    %c0_250 = arith.constant 0 : index
    %509 = vector.load %arg4[%c0_248, %c0_249, %c0_250] : memref<1x12x256xf32, #tpu.memory_space<vmem>>, vector<1x12x256xf32>
    %510 = vector.shape_cast %509 : vector<1x12x256xf32> to vector<12x256xf32>
    %511 = vector.shape_cast %508 : vector<12x256xf32> to vector<1x12x256xf32>
    tpu.vector_store %arg4[%c0_248, %c0_249, %c0_250], %511 {strides = array<i32>} : memref<1x12x256xf32, #tpu.memory_space<vmem>>, vector<1x12x256xf32>,
    return
  }
  func.func @transform_0(%arg0: i32) -> (i32, i32, i32) {
    %c0_i32 = arith.constant 0 : i32
    %c0_i32_0 = arith.constant 0 : i32
    %c0_i32_1 = arith.constant 0 : i32
    return %arg0, %c0_i32, %c0_i32_0 : i32, i32, i32
  }
  func.func @transform_1(%arg0: i32) -> (i32, i32) {
    %c0_i32 = arith.constant 0 : i32
    %c0_i32_0 = arith.constant 0 : i32
    %c0_i32_1 = arith.constant 0 : i32
    return %c0_i32, %c0_i32_0 : i32, i32
  }
  func.func @transform_2(%arg0: i32) -> (i32, i32) {
    %c0_i32 = arith.constant 0 : i32
    %c0_i32_0 = arith.constant 0 : i32
    %c0_i32_1 = arith.constant 0 : i32
    return %c0_i32, %c0_i32_0 : i32, i32
  }
  func.func @transform_3(%arg0: i32) -> (i32, i32, i32) {
    %c0_i32 = arith.constant 0 : i32
    %c0_i32_0 = arith.constant 0 : i32
    %c0_i32_1 = arith.constant 0 : i32
    return %arg0, %c0_i32, %c0_i32_0 : i32, i32, i32
  }
}

</mosaic_0001>

<bundles_post_ra>
// kernel: tpu_custom_call.1
= control target key start
LH: loop header
LB: loop body
LE: loop exit
PB: predicated region body
PF: predicated region fallthrough
CT: control target
= control target key end

     0   :  { %s29839_s0 = inlined_call_operand.hbm [shape: f32[2,4,702], index: 0, kind: input, shape index: {}]   ;;  %s29840_s1 = inlined_call_operand.hbm [shape: f32[12,484], index: 1, kind: input, shape index: {}]   ;;  %s29841_s2 = inlined_call_operand.vmem [shape: f32[12,1], index: 2, kind: input, shape index: {}]   ;;  %s29842_s3 = inlined_call_operand.vmem [shape: f32[2,12,256], index: 3, kind: output, shape index: {}]  }
   0x1   :  { %30094 = sst [smem:[#allocation111_spill]] %s29839_s0 }
   0x2   :  { %30095 = sst [smem:[#allocation112_spill]] %s29840_s1 }
   0x3   :  { %30096 = sst [smem:[#allocation113_spill]] %s29841_s2 }
   0x4   :  { %30097 = sst [smem:[#allocation114_spill]] %s29842_s3 }
   0x5   :  { %8 = vsyncpa [#allocation3], 0 }
   0x6   :  { %10 = vsyncpa [#allocation3 + $0x1], 0 }
   0x7   :  { %11 = vsyncpa [#allocation5], 0  ;;  %s25491_s12 = smov 0   ;;  %s25493_s13 = smov 0  }
   0x8   :  { %s25495_s14 = smov 0   ;;  %s25497_s15 = smov 0  }
   0x9 LB: > { %30098 = sst [smem:[#allocation8_spill]] %s25372_s13  ;;  %s25510_s16 = sadd.s32 4294967295, %s25380_s15   ;;  %s25380_s15 = sphi %s25497_s15, %s30433_s15   ;;  %s25376_s14 = sphi %s25495_s14, %s30436_s14   ;;  %s25372_s13 = sphi %s25493_s13, %s30435_s13   ;;  %s25368_s12 = sphi %s25491_s12, %s30434_s12  }
   0xa   : > { %30099 = sst [smem:[#allocation9_spill]] %s25376_s14  ;;  %p37_p0 = scmp.ne.s32.totalorder %s25372_s13, %s25368_s12 }
   0xb   : > { %30100 = sst [smem:[#allocation10_spill]] %s25510_s16  ;;  %p29843_p1 = scmp.eq.s32.totalorder %s25510_s16, 0 }
   0xc   : > { %p23191_p2 = scmp.ge.s32.totalorder %s25380_s15, 1  ;;  %p116_p3 = scmp.lt.s32.totalorder %s25380_s15, 3 }
   0xd   : > { %p25518_p4 = por %p29843_p1, %p37_p0  ;;  %s25382_s19 = smov [#allocation4]  }
   0xe   : > { %p25522_p5 = pnand %p23191_p2, %p116_p3  ;;  %s128_s20 = sshll.u32 %s25382_s19, 4  ;;  %s129_s20 = int_to_ptr.vmem [resolvable:$true] %s128_s20 }
   0xf   : > { %s30101_s17 = scalar_select %p25518_p4, 1, 0 }
  0x10   : > { %s30102_s18 = scalar_select %p25522_p5, 1, 0 }
  0x11   : > { %p25139_p6 = pneg %p25522_p5  ;;  %s25535_s22 = sadd.s32 1, %s25380_s15  }
  0x12   : > { %30104 = sst [smem:[#allocation11_spill]] %s25535_s22  ;;  %s24_s23 = sadd.s32 1, %s25376_s14 }
  0x13   : > { %p25530_p7 = pnand %p25139_p6, %p29843_p1  ;;  %s21_s24 = ssub.s32 %s25380_s15, %s25535_s22 }
  0x14   : > { %s30105_s1 = sld [smem:[#allocation112_spill]] }
  0x15   : > { %p25286_p9 = pneg %p25530_p7 }
  0x1a   : > { %s25284_s27 = scalar_lea.hbm %s30105_s1, 1024 }
  0x1b   : > { %p25285_p8 = scmp.ne.s32.totalorder %s30105_s1, %s25284_s27  ;;  %p25291_p12 = scmp.lt.u32.totalorder %s25284_s27, %s30105_s1 }
  0x1d   : > { %p25287_p10 = pnand %p25286_p9, %p25285_p8 }
  0x1f   : > { %p25288_p11 = pneg %p25287_p10 }
  0x21   : > { %p25293_p13 = pnand %p25291_p12, %p25288_p11 }
  0x23   : > { %25296 = shalt.err (!%p25293_p13)
}
  0x24   : > { %s25297_s5 = scalar_lea.vmem %s129_s20, 1024  ;;  %p25305_p6 = scmp.lt.s32.totalorder %s129_s20, %s129_s20 }
  0x25   : > { %p25298_p0 = scmp.ne.s32.totalorder %s129_s20, %s25297_s5  ;;  %p25306_p1 = scmp.lt.s32.totalorder %s25297_s5, %s25297_s5 }
  0x27   : > { %p25300_p2 = pnand %p25298_p0, %p25286_p9  ;;  %p25307_p4 = por %p25306_p1, %p25305_p6 }
  0x29   : > { %p25301_p3 = pneg %p25300_p2 }
  0x2b   : > { %p25308_p5 = pnand %p25307_p4, %p25301_p3 }
  0x2d   : > { %25311 = shalt.err (!%p25308_p5)
}
  0x2e   : > { %s25383_s6 = smov 512   ;;  %s25384_s7 = smov 32  }
  0x2f   : > { %25142 = dma.hbm_to_vmem [thread:$0]  (!%p25530_p7), %s30105_s1, 1024, %s129_s20, [#allocation5], %s25383_s6, %s25383_s6, %s25384_s7  }
  0x30   : > { %p22_p8 = scmp.eq.s32.totalorder %s21_s24, 0  ;;  %p31_p9 = scmp.ne.s32.totalorder %s25376_s14, %s25372_s13 }
  0x31   : > { %p32_p1 = scmp.eq.s32.totalorder %s25380_s15, 0  ;;  %p25148_p4 = scmp.lt.s32.totalorder %s25380_s15, 2 }
  0x32   : > { %s25561_s10 = scalar_select %p22_p8, %s25376_s14, %s24_s23  }
  0x33   : > { %p33_p5 = por %p32_p1, %p31_p9  ;;  %s145_s11 = sand.u32 1, %s25376_s14  }
  0x34   : > { %30106 = sst [smem:[#allocation12_spill]] %s25561_s10  ;;  %s25130_s12 = smul.u32 24, %s145_s11 }
  0x35   : > { %s25131_s19 = smul.u32 384, %s25380_s15  ;;  %p25565_p10 = pnand %p25148_p4, %p33_p5 }
  0x36   : > { %s30108_s0 = sld [smem:[#allocation111_spill]]  ;;  %s149_s23 = scalar_lea.vmem [#allocation2], %s25130_s12 }
  0x37   : > { %s157_s24 = sshll.u32 %s149_s23, 4  ;;  %s146_s15 = scalar_lea.sflag [#allocation3], %s145_s11  ;;  %s25574_s24 = int_to_ptr.vmem [resolvable:$true] %s157_s24 }
  0x38   : > { %p25314_p11 = pneg %p25565_p10 }
  0x3c   : > { %s25572_s20 = scalar_lea.hbm %s30108_s0, %s25131_s19  ;;  %s25317_s30 = scalar_lea.hbm %s30108_s0, 768 }
  0x3d   : > { %s25312_s27 = scalar_lea.hbm %s25572_s20, 384  ;;  %p25318_p0 = scmp.lt.u32.totalorder %s25572_s20, %s30108_s0 }
  0x3e   : > { %p25313_p7 = scmp.ne.s32.totalorder %s25572_s20, %s25312_s27  ;;  %p25319_p2 = scmp.lt.u32.totalorder %s25317_s30, %s25312_s27 }
  0x3f   : > { %p25321_p6 = scmp.lt.u32.totalorder %s25312_s27, %s25572_s20 }
  0x40   : > { %p25315_p12 = pnand %p25314_p11, %p25313_p7  ;;  %p25320_p3 = por %p25319_p2, %p25318_p0 }
  0x42   : > { %p25316_p13 = pneg %p25315_p12  ;;  %p25322_p8 = por %p25321_p6, %p25320_p3 }
  0x44   : > { %p25323_p9 = pnand %p25322_p8, %p25316_p13 }
  0x46   : > { %25326 = shalt.err (!%p25323_p9)
}
  0x47   : > { %s25327_s6 = scalar_lea.vmem %s25574_s24, 384  ;;  %s25385_s7 = smov [#allocation2]  }
  0x48   : > { %p25328_p1 = scmp.ne.s32.totalorder %s25574_s24, %s25327_s6  ;;  %s25332_s8 = sshll.u32 %s25385_s7, 4  ;;  %s25333_s8 = int_to_ptr.vmem [resolvable:$false] %s25332_s8 }
  0x49   : > { %s25334_s9 = scalar_lea.vmem %s25333_s8, 768  ;;  %p25335_p7 = scmp.lt.s32.totalorder %s25574_s24, %s25333_s8 }
  0x4a   : > { %p25330_p4 = pnand %p25328_p1, %p25314_p11  ;;  %p25336_p12 = scmp.lt.s32.totalorder %s25334_s9, %s25327_s6 }
  0x4c   : > { %p25331_p5 = pneg %p25330_p4  ;;  %p25337_p0 = por %p25336_p12, %p25335_p7 }
  0x4e   : > { %p25338_p2 = pnand %p25337_p0, %p25331_p5 }
  0x50   : > { %25341 = shalt.err (!%p25338_p2)
}
  0x51   : > { %25146 = dma.hbm_to_vmem [thread:$0]  (!%p25565_p10), %s25572_s20, 384, %s25574_s24, %s146_s15  }
  0x52   : > { %p30109_p13 = scmp.ne.s32.totalorder %s30102_s18, 0 }
  0x54   : > { %166 = sbr.rel (%p30109_p13) target bundleno = 1800 (0x708), region = 32 }
  0x5b   : > { %s168_s11 = sand.u32 1, %s25372_s13   ;;  %p30110_p11 = scmp.ne.s32.totalorder %s30101_s17, 0 }
  0x5c   : > { %s25132_s12 = smul.u32 24, %s168_s11  ;;  %s169_s19 = scalar_lea.sflag [#allocation3], %s168_s11 }
  0x5e   : > { %s25604_s26 = scalar_lea.vmem [#allocation2], %s25132_s12 }
  0x5f   : > { %25359 = dma.done.wait (%p30110_p11), %s169_s19, 384  }
  0x60   : > { %25361 = vsyncadd (%p30110_p11), %s169_s19, 4294966912  ;;  %p30111_p3 = scmp.eq.s32.totalorder %s25510_s16, 0 }
  0x62   : > { %25363 = dma.done.wait (%p30111_p3), [#allocation5], 1024   ;;  %p30112_p10 = pmov %p30111_p3 }
  0x63   : > { %v29939_v0 = vmov 0.0   ;;  %v25617_v1 = vld [vmem:[%s25604_s26 + $0x8] sm:$0xff]  ;;  %v25620_v2 = vld [vmem:[%s25604_s26] sm:$0xff]  ;;  %s25387_s18 = smov 127   ;;  %v25628_v4 = vld [vmem:[#allocation4] sm:$0xff]  ;;  %s30046_s17 = smov 124  }
  0x64   : > { %25365 = vsyncadd (%p30112_p10), [#allocation5], 4294966272  ;;  %309 = vmatprep.mubr.f32.mxu0 %v29939_v0  ;;  %386 = vmatprep.mubr.f32.mxu1 %v29939_v0  ;;  %v25626_v3 = vcombine.high %v25620_v2, %v25620_v2  ;;  %v25635_v5 = vcombine.high %v25617_v1, %v25617_v1  ;;  %v25637_v6 = vld [vmem:[#allocation4 + $0x20] sm:$0xf]  ;;  %s29862_s25 = smov 126   ;;  %s30043_s21 = smov 120  }
  0x65   : > { %223 = vrot.lane.b32.xlu0 %v25617_v1, %s25387_s18  ;;  %219 = vrot.lane.b32.xlu1 %v25620_v2, %s25387_s18  ;;  %v566_v7 = vld [vmem:[#allocation4 + $0x20] sm:$0xf]  ;;  %s29860_s20 = smov 125   ;;  %s30064_s23 = smov 116   ;;  %vm227_vm0 = vcmask 1039360   ;;  %vm236_vm1 = vcmask 1043456  }
  0x66   : > { %v760_v8 = vld [vmem:[#allocation4 + $0x20] sm:$0xf]  ;;  %s30035_s24 = smov 112   ;;  %s29858_s15 = smov 123   ;;  %vm231_vm2 = vcmask 31744   ;;  %vm581_vm3 = vcmask 1031168  }
  0x67   : > { %v954_v9 = vld [vmem:[#allocation4 + $0x20] sm:$0xf]  ;;  %s30031_s27 = smov 108   ;;  %s29856_s28 = smov 122   ;;  %vm775_vm4 = vcmask 1022976   ;;  %vm969_vm5 = vcmask 1014784  }
  0x68   : > { %v1148_v10 = vld [vmem:[#allocation4 + $0x20] sm:$0xf]  ;;  %s30019_s29 = smov 104   ;;  %s29851_s30 = smov 121   ;;  %vm1163_vm6 = vcmask 1006592   ;;  %vm1357_vm7 = vcmask 998400  }
  0x69   : > { %211 = vrot.lane.b32.xlu1 %v25628_v4, %s30046_s17  ;;  %221 = vrot.lane.b32.xlu0 %v25626_v3, %s25387_s18  ;;  %v1342_v11 = vld [vmem:[#allocation4 + $0x20] sm:$0xf]  ;;  %s30037_s4 = smov 100   ;;  %s30026_s5 = smov 96   ;;  %vm1551_vm8 = vcmask 990208   ;;  %vm1745_vm9 = vcmask 982016  }
  0x6a   : > { %v1536_v12 = vld [vmem:[#allocation4 + $0x20] sm:$0xf]  ;;  %s29848_s6 = smov 119   ;;  %s30005_s7 = smov 92   ;;  %vm1939_vm10 = vcmask 973824   ;;  %vm2133_vm11 = vcmask 965632  }
  0x6b   : > { %v1730_v13 = vld [vmem:[#allocation4 + $0x20] sm:$0xf]  ;;  %s29846_s8 = smov 118   ;;  %s29990_s9 = smov 88   ;;  %vm2327_vm12 = vcmask 834560   ;;  %vm2521_vm13 = vcmask 826368  }
  0x6c   : > { %v1924_v14 = vld [vmem:[#allocation4 + $0x20] sm:$0xf]  ;;  %s25405_s11 = smov 102   ;;  %s29986_s12 = smov 84   ;;  %vm2715_vm14 = vcmask 818176   ;;  %vm2909_vm15 = vcmask 809984  }
  0x6d   : > { %213 = vrot.lane.b32.xlu1 %v25637_v6, %s30046_s17  ;;  %225 = vrot.lane.b32.xlu0 %v25635_v5, %s25387_s18  ;;  %v2118_v15 = vld [vmem:[#allocation4 + $0x20] sm:$0xf]  ;;  %s25407_s19 = smov 101   ;;  %s29979_s18 = smov 80  }
  0x6e   : > { %v2312_v25 = vld [vmem:[#allocation4 + $0x20] sm:$0xf]  ;;  %s30222_s0 = smov 120   ;;  %s30225_s1 = smov 99  }
  0x6f   : > { %v2506_v35 = vld [vmem:[#allocation4 + $0x20] sm:$0xf]  ;;  %s30226_s10 = smov 98   ;;  %s30233_s14 = smov 97  }
  0x70   : > { %v2700_v45 = vld [vmem:[#allocation4 + $0x20] sm:$0xf]  ;;  %s30234_s13 = smov 96   ;;  %s30235_s22 = smov 104  }
  0x71   : > { %577 = vrot.lane.b32.xlu1 %v25617_v1, %s29862_s25  ;;  %575 = vrot.lane.b32.xlu0 %v25626_v3, %s29862_s25  ;;  %v2894_v55 = vld [vmem:[#allocation4 + $0x20] sm:$0xf]  ;;  %s30238_s3 = smov 94   ;;  %s25459_s16 = smov 91  }
  0x72   : > { %s30246_s2 = smov 74  }
  0x75   : > { %569 = vrot.lane.b32.xlu1 %v25628_v4, %s30043_s21  ;;  %573 = vrot.lane.b32.xlu0 %v25620_v2, %s29862_s25 }
  0x79   : > { %571 = vrot.lane.b32.xlu1 %v566_v7, %s30043_s21  ;;  %579 = vrot.lane.b32.xlu0 %v25635_v5, %s29862_s25  ;;  %v3088_v7 = vld [vmem:[#allocation4 + $0x20] sm:$0xf]  ;;  %s29865_s25 = smov 93  }
  0x7d   : > { %771 = vrot.lane.b32.xlu1 %v25617_v1, %s29860_s20  ;;  %769 = vrot.lane.b32.xlu0 %v25626_v3, %s29860_s20 }
  0x81   : > { %763 = vrot.lane.b32.xlu1 %v25628_v4, %s30064_s23  ;;  %767 = vrot.lane.b32.xlu0 %v25620_v2, %s29860_s20 }
  0x85   : > { %765 = vrot.lane.b32.xlu1 %v760_v8, %s30064_s23  ;;  %773 = vrot.lane.b32.xlu0 %v25635_v5, %s29860_s20  ;;  %s29864_s20 = smov 94  }
  0x89   : > { %965 = vrot.lane.b32.xlu1 %v25617_v1, %s30046_s17  ;;  %963 = vrot.lane.b32.xlu0 %v25626_v3, %s30046_s17 }
  0x8d   : > { %957 = vrot.lane.b32.xlu1 %v25628_v4, %s30035_s24  ;;  %961 = vrot.lane.b32.xlu0 %v25620_v2, %s30046_s17 }
  0x91   : > { %959 = vrot.lane.b32.xlu1 %v954_v9, %s30035_s24  ;;  %967 = vrot.lane.b32.xlu0 %v25635_v5, %s30046_s17 }
  0x95   : > { %1159 = vrot.lane.b32.xlu1 %v25617_v1, %s29858_s15  ;;  %1157 = vrot.lane.b32.xlu0 %v25626_v3, %s29858_s15 }
  0x99   : > { %1151 = vrot.lane.b32.xlu1 %v25628_v4, %s30031_s27  ;;  %1155 = vrot.lane.b32.xlu0 %v25620_v2, %s29858_s15 }
  0x9d   : > { %1153 = vrot.lane.b32.xlu1 %v1148_v10, %s30031_s27  ;;  %1161 = vrot.lane.b32.xlu0 %v25635_v5, %s29858_s15  ;;  %s29868_s15 = smov 56  }
  0xa1   : > { %1353 = vrot.lane.b32.xlu1 %v25617_v1, %s29856_s28  ;;  %1351 = vrot.lane.b32.xlu0 %v25626_v3, %s29856_s28 }
  0xa5   : > { %1345 = vrot.lane.b32.xlu1 %v25628_v4, %s30019_s29  ;;  %1349 = vrot.lane.b32.xlu0 %v25620_v2, %s29856_s28 }
  0xa9   : > { %1347 = vrot.lane.b32.xlu1 %v1342_v11, %s30019_s29  ;;  %1355 = vrot.lane.b32.xlu0 %v25635_v5, %s29856_s28  ;;  %s29861_s28 = smov 95  }
  0xad   : > { %1547 = vrot.lane.b32.xlu1 %v25617_v1, %s29851_s30  ;;  %1545 = vrot.lane.b32.xlu0 %v25626_v3, %s29851_s30 }
  0xb1   : > { %1539 = vrot.lane.b32.xlu1 %v25628_v4, %s30037_s4  ;;  %1543 = vrot.lane.b32.xlu0 %v25620_v2, %s29851_s30 }
  0xb5   : > { %1541 = vrot.lane.b32.xlu1 %v1536_v12, %s30037_s4  ;;  %1549 = vrot.lane.b32.xlu0 %v25635_v5, %s29851_s30  ;;  %s29855_s30 = smov 97  }
  0xb9   : > { %1741 = vrot.lane.b32.xlu1 %v25617_v1, %s30043_s21  ;;  %1739 = vrot.lane.b32.xlu0 %v25626_v3, %s30043_s21 }
  0xbd   : > { %1733 = vrot.lane.b32.xlu1 %v25628_v4, %s30026_s5  ;;  %1737 = vrot.lane.b32.xlu0 %v25620_v2, %s30043_s21 }
  0xc1   : > { %1735 = vrot.lane.b32.xlu1 %v1730_v13, %s30026_s5  ;;  %1743 = vrot.lane.b32.xlu0 %v25635_v5, %s30043_s21 }
  0xc5   : > { %1935 = vrot.lane.b32.xlu1 %v25617_v1, %s29848_s6  ;;  %1933 = vrot.lane.b32.xlu0 %v25626_v3, %s29848_s6 }
  0xc9   : > { %1927 = vrot.lane.b32.xlu1 %v25628_v4, %s30005_s7  ;;  %1931 = vrot.lane.b32.xlu0 %v25620_v2, %s29848_s6 }
  0xcd   : > { %1929 = vrot.lane.b32.xlu1 %v1924_v14, %s30005_s7  ;;  %1937 = vrot.lane.b32.xlu0 %v25635_v5, %s29848_s6  ;;  %s29853_s6 = smov 98  }
  0xd1   : > { %2129 = vrot.lane.b32.xlu1 %v25617_v1, %s29846_s8  ;;  %2127 = vrot.lane.b32.xlu0 %v25626_v3, %s29846_s8 }
  0xd5   : > { %2121 = vrot.lane.b32.xlu1 %v25628_v4, %s29990_s9  ;;  %2125 = vrot.lane.b32.xlu0 %v25620_v2, %s29846_s8 }
  0xd7   : > { %v224_v16 = vpop.permute.xlu0 %223  ;;  %v220_v17 = vpop.permute.xlu1 %219 }
  0xd9   : > { %2123 = vrot.lane.b32.xlu1 %v2118_v15, %s29990_s9  ;;  %2131 = vrot.lane.b32.xlu0 %v25635_v5, %s29846_s8  ;;  %s29883_s8 = smov 72  }
  0xdb   : > { %v212_v18 = vpop.permute.xlu1 %211  ;;  %v222_v19 = vpop.permute.xlu0 %221 }
  0xdc   : > { %v229_v20 = vsel %vm227_vm0, %v222_v19, %v224_v16  ;;  %v228_v21 = vsel %vm227_vm0, %v220_v17, %v222_v19  ;;  %v3282_v17 = vld [vmem:[#allocation4 + $0x20] sm:$0xf] }
  0xdd   : > { %2323 = vrot.lane.b32.xlu1 %v25617_v1, %s25405_s11  ;;  %2321 = vrot.lane.b32.xlu0 %v25626_v3, %s25405_s11 }
  0xde   : > { %23199 = vmatprep.subr.msk.mxu0 %vm236_vm1, %v229_v20 }
  0xdf   : > { %23200 = vmatpush1.msk.msra.mxu0 %vm236_vm1, %v228_v21  ;;  %v214_v22 = vpop.permute.xlu1 %213  ;;  %v226_v23 = vpop.permute.xlu0 %225 }
  0xe0   : > { %23201 = vmatmul.mubr.msk.f32.vlgmr.msra.gmra.mrb[0].mxu0 %vm231_vm2, %v212_v18  ;;  %23203 = vmatprep.subr.msk.mxu1 %vm236_vm1, %v226_v23  ;;  %v230_v24 = vsel %vm227_vm0, %v224_v16, %v226_v23  ;;  %vm3103_vm0 = vcmask 801792  }
  0xe1   : > { %2315 = vrot.lane.b32.xlu1 %v25628_v4, %s29986_s12  ;;  %2319 = vrot.lane.b32.xlu0 %v25620_v2, %s25405_s11 }
  0xe2   : > { %23204 = vmatpush1.msk.msra.mxu1 %vm236_vm1, %v230_v24  ;;  %315 = vmatprep.mubr.f32.mxu0 %v29939_v0 }
  0xe3   : > { %23205 = vmatmul.mubr.msk.f32.vlgmr.msra.gmra.mrb[0].mxu1 %vm231_vm2, %v212_v18  ;;  %v578_v26 = vpop.permute.xlu1 %577  ;;  %23207 = vmatprep.subr.msk.mxu0 %vm236_vm1, %v25626_v3  ;;  %v576_v27 = vpop.permute.xlu0 %575 }
  0xe4   : > { %23202 = vmatmul.mubr.msk.f32.gmra.mrb[2].mxu0 %vm231_vm2, %v214_v22  ;;  %392 = vmatprep.mubr.f32.mxu1 %v29939_v0  ;;  %v25761_v28 = vsel %vm581_vm3, %v576_v27, %v578_v26 }
  0xe5   : > { %23208 = vmatpush1.msk.msra.mxu0 %vm236_vm1, %v25620_v2  ;;  %2317 = vrot.lane.b32.xlu1 %v2312_v25, %s29986_s12 }
  0xe6   : > { %2325 = vrot.lane.b32.xlu0 %v25635_v5, %s25405_s11  ;;  %23215 = vmatprep.subr.msk.mxu0 %vm236_vm1, %v25761_v28  ;;  %s29961_s11 = smov 76  }
  0xe7   : > { %23206 = vmatmul.mubr.msk.f32.gmra.mrb[2].mxu1 %vm231_vm2, %v214_v22  ;;  %475 = vmatprep.mubr.f32.mxu0 %v29939_v0  ;;  %v570_v29 = vpop.permute.xlu1 %569  ;;  %v574_v30 = vpop.permute.xlu0 %573 }
  0xe8   : > { %23209 = vmatmul.mubr.msk.f32.vlgmr.msra.gmra.mrb[0].mxu0 %vm231_vm2, %v25628_v4  ;;  %v582_v31 = vsel %vm581_vm3, %v574_v30, %v576_v27  ;;  %23211 = vmatprep.subr.msk.mxu1 %vm236_vm1, %v25635_v5  ;;  %v3476_v27 = vld [vmem:[#allocation4 + $0x20] sm:$0xf] }
  0xe9   : > { %2517 = vrot.lane.b32.xlu1 %v25617_v1, %s25407_s19  ;;  %23212 = vmatpush1.msk.msra.mxu1 %vm236_vm1, %v25617_v1 }
  0xea   : > { %2515 = vrot.lane.b32.xlu0 %v25626_v3, %s25407_s19  ;;  %552 = vmatprep.mubr.f32.mxu1 %v29939_v0 }
  0xeb   : > { %23216 = vmatpush1.msk.msra.mxu0 %vm236_vm1, %v582_v31  ;;  %481 = vmatprep.mubr.f32.mxu0 %v29939_v0  ;;  %v572_v32 = vpop.permute.xlu1 %571  ;;  %v25783_v33 = vpop.permute.xlu0 %579 }
  0xec   : > { %23213 = vmatmul.mubr.msk.f32.vlgmr.msra.gmra.mrb[0].mxu1 %vm231_vm2, %v25628_v4  ;;  %23210 = vmatmul.mubr.msk.f32.gmra.mrb[2].mxu0 %vm231_vm2, %v25637_v6  ;;  %v25791_v34 = vsel %vm581_vm3, %v578_v26, %v25783_v33 }
  0xed   : > { %23219 = vmatprep.subr.msk.mxu1 %vm236_vm1, %v25783_v33  ;;  %2509 = vrot.lane.b32.xlu1 %v25628_v4, %s29979_s18 }
  0xee   : > { %2513 = vrot.lane.b32.xlu0 %v25620_v2, %s25407_s19  ;;  %558 = vmatprep.mubr.f32.mxu1 %v29939_v0 }
  0xef   : > { %23220 = vmatpush1.msk.msra.mxu1 %vm236_vm1, %v25791_v34  ;;  %661 = vmatprep.mubr.f32.mxu0 %v29939_v0  ;;  %v772_v36 = vpop.permute.xlu1 %771  ;;  %v770_v37 = vpop.permute.xlu0 %769 }
  0xf0   : > { %23214 = vmatmul.mubr.msk.f32.gmra.mrb[2].mxu1 %vm231_vm2, %v25637_v6  ;;  %23217 = vmatmul.mubr.msk.f32.vlgmr.msra.gmra.mrb[0].mxu0 %vm231_vm2, %v570_v29  ;;  %v25806_v38 = vsel %vm775_vm4, %v770_v37, %v772_v36 }
  0xf1   : > { %2511 = vrot.lane.b32.xlu1 %v2506_v35, %s29979_s18  ;;  %738 = vmatprep.mubr.f32.mxu1 %v29939_v0 }
  0xf2   : > { %2519 = vrot.lane.b32.xlu0 %v25635_v5, %s25407_s19  ;;  %23223 = vmatprep.subr.msk.mxu0 %vm236_vm1, %v25806_v38  ;;  %s29850_s19 = smov 99  }
  0xf3   : > { %667 = vmatprep.mubr.f32.mxu0 %v29939_v0  ;;  %v764_v39 = vpop.permute.xlu1 %763  ;;  %v768_v40 = vpop.permute.xlu0 %767 }
  0xf4   : > { %23221 = vmatmul.mubr.msk.f32.vlgmr.msra.gmra.mrb[0].mxu1 %vm231_vm2, %v570_v29  ;;  %23218 = vmatmul.mubr.msk.f32.gmra.mrb[2].mxu0 %vm231_vm2, %v572_v32  ;;  %v776_v41 = vsel %vm775_vm4, %v768_v40, %v770_v37 }
  0xf5   : > { %2711 = vrot.lane.b32.xlu1 %v25617_v1, %s30037_s4  ;;  %744 = vmatprep.mubr.f32.mxu1 %v29939_v0 }
  0xf6   : > { %2709 = vrot.lane.b32.xlu0 %v25626_v3, %s30037_s4  ;;  %23224 = vmatpush1.msk.msra.mxu0 %vm236_vm1, %v776_v41  ;;  %v3670_v41 = vld [vmem:[#allocation4 + $0x20] sm:$0xf] }
  0xf7   : > { %855 = vmatprep.mubr.f32.mxu0 %v29939_v0  ;;  %v766_v42 = vpop.permute.xlu1 %765  ;;  %v25824_v43 = vpop.permute.xlu0 %773 }
  0xf8   : > { %23222 = vmatmul.mubr.msk.f32.gmra.mrb[2].mxu1 %vm231_vm2, %v572_v32  ;;  %23225 = vmatmul.mubr.msk.f32.vlgmr.msra.gmra.mrb[0].mxu0 %vm231_vm2, %v764_v39  ;;  %v25830_v44 = vsel %vm775_vm4, %v772_v36, %v25824_v43 }
  0xf9   : > { %23227 = vmatprep.subr.msk.mxu1 %vm236_vm1, %v25824_v43  ;;  %2703 = vrot.lane.b32.xlu1 %v25628_v4, %s29961_s11 }
  0xfa   : > { %2707 = vrot.lane.b32.xlu0 %v25620_v2, %s30037_s4  ;;  %23228 = vmatpush1.msk.msra.mxu1 %vm236_vm1, %v25830_v44 }
  0xfb   : > { %932 = vmatprep.mubr.f32.mxu1 %v29939_v0  ;;  %861 = vmatprep.mubr.f32.mxu0 %v29939_v0  ;;  %v966_v46 = vpop.permute.xlu1 %965  ;;  %v964_v47 = vpop.permute.xlu0 %963 }
  0xfc   : > { %23229 = vmatmul.mubr.msk.f32.vlgmr.msra.gmra.mrb[0].mxu1 %vm231_vm2, %v764_v39  ;;  %23226 = vmatmul.mubr.msk.f32.gmra.mrb[2].mxu0 %vm231_vm2, %v766_v42  ;;  %v25845_v48 = vsel %vm969_vm5, %v964_v47, %v966_v46 }
  0xfd   : > { %2705 = vrot.lane.b32.xlu1 %v2700_v45, %s29961_s11  ;;  %938 = vmatprep.mubr.f32.mxu1 %v29939_v0 }
  0xfe   : > { %2713 = vrot.lane.b32.xlu0 %v25635_v5, %s30037_s4  ;;  %23231 = vmatprep.subr.msk.mxu0 %vm236_vm1, %v25845_v48 }
  0xff   : > { %v958_v49 = vpop.permute.xlu1 %957  ;;  %v962_v50 = vpop.permute.xlu0 %961  ;;  %1049 = vmatprep.mubr.f32.mxu0 %v29939_v0 }
 0x100   : > { %23230 = vmatmul.mubr.msk.f32.gmra.mrb[2].mxu1 %vm231_vm2, %v766_v42  ;;  %v970_v51 = vsel %vm969_vm5, %v962_v50, %v964_v47 }
 0x101   : > { %2905 = vrot.lane.b32.xlu1 %v25617_v1, %s29850_s19  ;;  %23232 = vmatpush1.msk.msra.mxu0 %vm236_vm1, %v970_v51 }
 0x102   : > { %2903 = vrot.lane.b32.xlu0 %v25626_v3, %s29850_s19  ;;  %23233 = vmatmul.mubr.msk.f32.vlgmr.msra.gmra.mrb[0].mxu0 %vm231_vm2, %v958_v49 }
 0x103   : > { %v960_v52 = vpop.permute.xlu1 %959  ;;  %v25862_v53 = vpop.permute.xlu0 %967  ;;  %1126 = vmatprep.mubr.f32.mxu1 %v29939_v0  ;;  %1055 = vmatprep.mubr.f32.mxu0 %v29939_v0 }
 0x104   : > { %23235 = vmatprep.subr.msk.mxu1 %vm236_vm1, %v25862_v53  ;;  %v25870_v54 = vsel %vm969_vm5, %v966_v46, %v25862_v53 }
 0x105   : > { %2897 = vrot.lane.b32.xlu1 %v25628_v4, %s29883_s8  ;;  %23236 = vmatpush1.msk.msra.mxu1 %vm236_vm1, %v25870_v54 }
 0x106   : > { %2901 = vrot.lane.b32.xlu0 %v25620_v2, %s29850_s19  ;;  %23237 = vmatmul.mubr.msk.f32.vlgmr.msra.gmra.mrb[0].mxu1 %vm231_vm2, %v958_v49 }
 0x107   : > { %v1160_v56 = vpop.permute.xlu1 %1159  ;;  %23234 = vmatmul.mubr.msk.f32.gmra.mrb[2].mxu0 %vm231_vm2, %v960_v52  ;;  %v1158_v57 = vpop.permute.xlu0 %1157  ;;  %1132 = vmatprep.mubr.f32.mxu1 %v29939_v0 }
 0x108   : > { %v25882_v58 = vsel %vm1163_vm6, %v1158_v57, %v1160_v56  ;;  %1243 = vmatprep.mubr.f32.mxu0 %v29939_v0 }
 0x109   : > { %2899 = vrot.lane.b32.xlu1 %v2894_v55, %s29883_s8  ;;  %23239 = vmatprep.subr.msk.mxu0 %vm236_vm1, %v25882_v58 }
 0x10a   : > { %2907 = vrot.lane.b32.xlu0 %v25635_v5, %s29850_s19  ;;  %23238 = vmatmul.mubr.msk.f32.gmra.mrb[2].mxu1 %vm231_vm2, %v960_v52  ;;  %s29973_s19 = smov 68  }
 0x10b   : > { %v1152_v59 = vpop.permute.xlu1 %1151  ;;  %v1156_v60 = vpop.permute.xlu0 %1155  ;;  %1320 = vmatprep.mubr.f32.mxu1 %v29939_v0 }
 0x10c   : > { %v1164_v61 = vsel %vm1163_vm6, %v1156_v60, %v1158_v57 }
 0x10d   : > { %3099 = vrot.lane.b32.xlu1 %v25617_v1, %s29853_s6  ;;  %23240 = vmatpush1.msk.msra.mxu0 %vm236_vm1, %v1164_v61 }
 0x10e   : > { %3097 = vrot.lane.b32.xlu0 %v25626_v3, %s29853_s6  ;;  %23241 = vmatmul.mubr.msk.f32.vlgmr.msra.gmra.mrb[0].mxu0 %vm231_vm2, %v1152_v59 }
 0x10f   : > { %v1154_v62 = vpop.permute.xlu1 %1153  ;;  %v25899_v63 = vpop.permute.xlu0 %1161  ;;  %1249 = vmatprep.mubr.f32.mxu0 %v29939_v0 }
 0x110   : > { %23243 = vmatprep.subr.msk.mxu1 %vm236_vm1, %v25899_v63  ;;  %v25906_v6 = vsel %vm1163_vm6, %v1160_v56, %v25899_v63  ;;  %v3864_v56 = vld [vmem:[#allocation4 + $0x20] sm:$0xf] }
 0x111   : > { %3091 = vrot.lane.b32.xlu1 %v25628_v4, %s29973_s19  ;;  %23244 = vmatpush1.msk.msra.mxu1 %vm236_vm1, %v25906_v6 }
 0x112   : > { %3095 = vrot.lane.b32.xlu0 %v25620_v2, %s29853_s6  ;;  %23245 = vmatmul.mubr.msk.f32.vlgmr.msra.gmra.mrb[0].mxu1 %vm231_vm2, %v1152_v59 }
 0x113   : > { %v1354_v8 = vpop.permute.xlu1 %1353  ;;  %23242 = vmatmul.mubr.msk.f32.gmra.mrb[2].mxu0 %vm231_vm2, %v1154_v62  ;;  %v1352_v9 = vpop.permute.xlu0 %1351  ;;  %1326 = vmatprep.mubr.f32.mxu1 %v29939_v0 }
 0x114   : > { %v25918_v10 = vsel %vm1357_vm7, %v1352_v9, %v1354_v8  ;;  %1437 = vmatprep.mubr.f32.mxu0 %v29939_v0 }
 0x115   : > { %3093 = vrot.lane.b32.xlu1 %v3088_v7, %s29973_s19  ;;  %23247 = vmatprep.subr.msk.mxu0 %vm236_vm1, %v25918_v10 }
 0x116   : > { %3101 = vrot.lane.b32.xlu0 %v25635_v5, %s29853_s6  ;;  %23246 = vmatmul.mubr.msk.f32.gmra.mrb[2].mxu1 %vm231_vm2, %v1154_v62  ;;  %s29874_s6 = smov 64  }
 0x117   : > { %v1346_v11 = vpop.permute.xlu1 %1345  ;;  %v1350_v12 = vpop.permute.xlu0 %1349  ;;  %1514 = vmatprep.mubr.f32.mxu1 %v29939_v0 }
 0x118   : > { %v1358_v13 = vsel %vm1357_vm7, %v1350_v12, %v1352_v9  ;;  %v4058_v12 = vld [vmem:[#allocation4 + $0x20] sm:$0xf] }
 0x119   : > { %3293 = vrot.lane.b32.xlu1 %v25617_v1, %s29855_s30  ;;  %23248 = vmatpush1.msk.msra.mxu0 %vm236_vm1, %v1358_v13 }
 0x11a   : > { %3291 = vrot.lane.b32.xlu0 %v25626_v3, %s29855_s30  ;;  %23249 = vmatmul.mubr.msk.f32.vlgmr.msra.gmra.mrb[0].mxu0 %vm231_vm2, %v1346_v11 }
 0x11b   : > { %v1348_v14 = vpop.permute.xlu1 %1347  ;;  %v25935_v15 = vpop.permute.xlu0 %1355  ;;  %1443 = vmatprep.mubr.f32.mxu0 %v29939_v0 }
 0x11c   : > { %23251 = vmatprep.subr.msk.mxu1 %vm236_vm1, %v25935_v15  ;;  %v25942_v16 = vsel %vm1357_vm7, %v1354_v8, %v25935_v15 }
 0x11d   : > { %3285 = vrot.lane.b32.xlu1 %v25628_v4, %s29874_s6  ;;  %23252 = vmatpush1.msk.msra.mxu1 %vm236_vm1, %v25942_v16 }
 0x11e   : > { %3289 = vrot.lane.b32.xlu0 %v25620_v2, %s29855_s30  ;;  %23253 = vmatmul.mubr.msk.f32.vlgmr.msra.gmra.mrb[0].mxu1 %vm231_vm2, %v1346_v11 }
 0x11f   : > { %v1548_v18 = vpop.permute.xlu1 %1547  ;;  %23250 = vmatmul.mubr.msk.f32.gmra.mrb[2].mxu0 %vm231_vm2, %v1348_v14  ;;  %v1546_v19 = vpop.permute.xlu0 %1545  ;;  %1520 = vmatprep.mubr.f32.mxu1 %v29939_v0 }
 0x120   : > { %v25954_v20 = vsel %vm1551_vm8, %v1546_v19, %v1548_v18  ;;  %1631 = vmatprep.mubr.f32.mxu0 %v29939_v0 }
 0x121   : > { %3287 = vrot.lane.b32.xlu1 %v3282_v17, %s29874_s6  ;;  %23255 = vmatprep.subr.msk.mxu0 %vm236_vm1, %v25954_v20  ;;  %s29877_s6 = smov 73  }
 0x122   : > { %3295 = vrot.lane.b32.xlu0 %v25635_v5, %s29855_s30  ;;  %23254 = vmatmul.mubr.msk.f32.gmra.mrb[2].mxu1 %vm231_vm2, %v1348_v14  ;;  %s29870_s30 = smov 60  }
 0x123   : > { %v1540_v21 = vpop.permute.xlu1 %1539  ;;  %v1544_v22 = vpop.permute.xlu0 %1543  ;;  %1708 = vmatprep.mubr.f32.mxu1 %v29939_v0 }
 0x124   : > { %v1552_v23 = vsel %vm1551_vm8, %v1544_v22, %v1546_v19 }
 0x125   : > { %3487 = vrot.lane.b32.xlu1 %v25617_v1, %s30026_s5  ;;  %23256 = vmatpush1.msk.msra.mxu0 %vm236_vm1, %v1552_v23 }
 0x126   : > { %3485 = vrot.lane.b32.xlu0 %v25626_v3, %s30026_s5  ;;  %23257 = vmatmul.mubr.msk.f32.vlgmr.msra.gmra.mrb[0].mxu0 %vm231_vm2, %v1540_v21 }
 0x127   : > { %v1542_v24 = vpop.permute.xlu1 %1541  ;;  %v25971_v25 = vpop.permute.xlu0 %1549  ;;  %1637 = vmatprep.mubr.f32.mxu0 %v29939_v0 }
 0x128   : > { %23259 = vmatprep.subr.msk.mxu1 %vm236_vm1, %v25971_v25  ;;  %v25978_v26 = vsel %vm1551_vm8, %v1548_v18, %v25971_v25 }
 0x129   : > { %3479 = vrot.lane.b32.xlu1 %v25628_v4, %s29870_s30  ;;  %23260 = vmatpush1.msk.msra.mxu1 %vm236_vm1, %v25978_v26 }
 0x12a   : > { %3483 = vrot.lane.b32.xlu0 %v25620_v2, %s30026_s5  ;;  %23261 = vmatmul.mubr.msk.f32.vlgmr.msra.gmra.mrb[0].mxu1 %vm231_vm2, %v1540_v21 }
 0x12b   : > { %v1742_v29 = vpop.permute.xlu1 %1741  ;;  %23258 = vmatmul.mubr.msk.f32.gmra.mrb[2].mxu0 %vm231_vm2, %v1542_v24  ;;  %v1740_v30 = vpop.permute.xlu0 %1739  ;;  %1714 = vmatprep.mubr.f32.mxu1 %v29939_v0 }
 0x12c   : > { %v25990_v31 = vsel %vm1745_vm9, %v1740_v30, %v1742_v29  ;;  %1825 = vmatprep.mubr.f32.mxu0 %v29939_v0 }
 0x12d   : > { %3481 = vrot.lane.b32.xlu1 %v3476_v27, %s29870_s30  ;;  %23263 = vmatprep.subr.msk.mxu0 %vm236_vm1, %v25990_v31  ;;  %v4252_v27 = vld [vmem:[#allocation4 + $0x20] sm:$0xf]  ;;  %s29872_s30 = smov 36  }
 0x12e   : > { %3489 = vrot.lane.b32.xlu0 %v25635_v5, %s30026_s5  ;;  %23262 = vmatmul.mubr.msk.f32.gmra.mrb[2].mxu1 %vm231_vm2, %v1542_v24 }
 0x12f   : > { %v1734_v32 = vpop.permute.xlu1 %1733  ;;  %v1738_v35 = vpop.permute.xlu0 %1737  ;;  %1902 = vmatprep.mubr.f32.mxu1 %v29939_v0 }
 0x130   : > { %v1746_v36 = vsel %vm1745_vm9, %v1738_v35, %v1740_v30 }
 0x131   : > { %3681 = vrot.lane.b32.xlu1 %v25617_v1, %s29861_s28  ;;  %23264 = vmatpush1.msk.msra.mxu0 %vm236_vm1, %v1746_v36 }
 0x132   : > { %3679 = vrot.lane.b32.xlu0 %v25626_v3, %s29861_s28  ;;  %23265 = vmatmul.mubr.msk.f32.vlgmr.msra.gmra.mrb[0].mxu0 %vm231_vm2, %v1734_v32 }
 0x133   : > { %v1736_v37 = vpop.permute.xlu1 %1735  ;;  %v26007_v39 = vpop.permute.xlu0 %1743  ;;  %1831 = vmatprep.mubr.f32.mxu0 %v29939_v0 }
 0x134   : > { %23267 = vmatprep.subr.msk.mxu1 %vm236_vm1, %v26007_v39  ;;  %v26014_v40 = vsel %vm1745_vm9, %v1742_v29, %v26007_v39 }
 0x135   : > { %3673 = vrot.lane.b32.xlu1 %v25628_v4, %s29868_s15  ;;  %23268 = vmatpush1.msk.msra.mxu1 %vm236_vm1, %v26014_v40 }
 0x136   : > { %3677 = vrot.lane.b32.xlu0 %v25620_v2, %s29861_s28  ;;  %23269 = vmatmul.mubr.msk.f32.vlgmr.msra.gmra.mrb[0].mxu1 %vm231_vm2, %v1734_v32 }
 0x137   : > { %v1936_v42 = vpop.permute.xlu1 %1935  ;;  %23266 = vmatmul.mubr.msk.f32.gmra.mrb[2].mxu0 %vm231_vm2, %v1736_v37  ;;  %v1934_v45 = vpop.permute.xlu0 %1933  ;;  %1908 = vmatprep.mubr.f32.mxu1 %v29939_v0 }
 0x138   : > { %v26026_v46 = vsel %vm1939_vm10, %v1934_v45, %v1936_v42  ;;  %2019 = vmatprep.mubr.f32.mxu0 %v29939_v0 }
 0x139   : > { %3675 = vrot.lane.b32.xlu1 %v3670_v41, %s29868_s15  ;;  %23271 = vmatprep.subr.msk.mxu0 %vm236_vm1, %v26026_v46  ;;  %s25425_s15 = smov 75  }
 0x13a   : > { %3683 = vrot.lane.b32.xlu0 %v25635_v5, %s29861_s28  ;;  %23270 = vmatmul.mubr.msk.f32.gmra.mrb[2].mxu1 %vm231_vm2, %v1736_v37  ;;  %s29866_s28 = smov 52  }
 0x13b   : > { %v1928_v47 = vpop.permute.xlu1 %1927  ;;  %v1932_v49 = vpop.permute.xlu0 %1931  ;;  %2096 = vmatprep.mubr.f32.mxu1 %v29939_v0 }
 0x13c   : > { %v1940_v50 = vsel %vm1939_vm10, %v1932_v49, %v1934_v45 }
 0x13d   : > { %3875 = vrot.lane.b32.xlu1 %v25617_v1, %s29864_s20  ;;  %23272 = vmatpush1.msk.msra.mxu0 %vm236_vm1, %v1940_v50 }
 0x13e   : > { %3873 = vrot.lane.b32.xlu0 %v25626_v3, %s29864_s20  ;;  %23273 = vmatmul.mubr.msk.f32.vlgmr.msra.gmra.mrb[0].mxu0 %vm231_vm2, %v1928_v47 }
 0x13f   : > { %v1930_v51 = vpop.permute.xlu1 %1929  ;;  %v26043_v52 = vpop.permute.xlu0 %1937  ;;  %2025 = vmatprep.mubr.f32.mxu0 %v29939_v0 }
 0x140   : > { %23275 = vmatprep.subr.msk.mxu1 %vm236_vm1, %v26043_v52  ;;  %v26050_v55 = vsel %vm1939_vm10, %v1936_v42, %v26043_v52 }
 0x141   : > { %30113 = vst [vmem:[#allocation13_spill] sm:$0xff] %v26050_v55  ;;  %3867 = vrot.lane.b32.xlu1 %v25628_v4, %s29866_s28  ;;  %23276 = vmatpush1.msk.msra.mxu1 %vm236_vm1, %v26050_v55 }
 0x142   : > { %3871 = vrot.lane.b32.xlu0 %v25620_v2, %s29864_s20  ;;  %23277 = vmatmul.mubr.msk.f32.vlgmr.msra.gmra.mrb[0].mxu1 %vm231_vm2, %v1928_v47  ;;  %v4446_v47 = vld [vmem:[#allocation4 + $0x20] sm:$0xf] }
 0x143   : > { %v2130_v57 = vpop.permute.xlu1 %2129  ;;  %23274 = vmatmul.mubr.msk.f32.gmra.mrb[2].mxu0 %vm231_vm2, %v1930_v51  ;;  %v2128_v59 = vpop.permute.xlu0 %2127  ;;  %2102 = vmatprep.mubr.f32.mxu1 %v29939_v0 }
 0x144   : > { %v26062_v60 = vsel %vm2133_vm11, %v2128_v59, %v2130_v57  ;;  %2213 = vmatprep.mubr.f32.mxu0 %v29939_v0 }
 0x145   : > { %3869 = vrot.lane.b32.xlu1 %v3864_v56, %s29866_s28  ;;  %23279 = vmatprep.subr.msk.mxu0 %vm236_vm1, %v26062_v60  ;;  %s30012_s28 = smov 40  }
 0x146   : > { %3877 = vrot.lane.b32.xlu0 %v25635_v5, %s29864_s20  ;;  %23278 = vmatmul.mubr.msk.f32.gmra.mrb[2].mxu1 %vm231_vm2, %v1930_v51  ;;  %s30014_s20 = smov 48  }
 0x147   : > { %v2122_v61 = vpop.permute.xlu1 %2121  ;;  %v2126_v62 = vpop.permute.xlu0 %2125  ;;  %2290 = vmatprep.mubr.f32.mxu1 %v29939_v0 }
 0x148   : > { %v2134_v7 = vsel %vm2133_vm11, %v2126_v62, %v2128_v59 }
 0x149   : > { %4069 = vrot.lane.b32.xlu1 %v25617_v1, %s29865_s25  ;;  %23280 = vmatpush1.msk.msra.mxu0 %vm236_vm1, %v2134_v7  ;;  %v4640_v7 = vld [vmem:[#allocation4 + $0x20] sm:$0xf] }
 0x14a   : > { %4067 = vrot.lane.b32.xlu0 %v25626_v3, %s29865_s25  ;;  %23281 = vmatmul.mubr.msk.f32.vlgmr.msra.gmra.mrb[0].mxu0 %vm231_vm2, %v2122_v61 }
 0x14b   : > { %v2124_v8 = vpop.permute.xlu1 %2123  ;;  %v26079_v9 = vpop.permute.xlu0 %2131  ;;  %2219 = vmatprep.mubr.f32.mxu0 %v29939_v0 }
 0x14c   : > { %23283 = vmatprep.subr.msk.mxu1 %vm236_vm1, %v26079_v9  ;;  %v26086_v11 = vsel %vm2133_vm11, %v2130_v57, %v26079_v9 }
 0x14d   : > { %30114 = vst [vmem:[#allocation14_spill] sm:$0xff] %v26086_v11  ;;  %4061 = vrot.lane.b32.xlu1 %v25628_v4, %s30014_s20  ;;  %23284 = vmatpush1.msk.msra.mxu1 %vm236_vm1, %v26086_v11 }
 0x14e   : > { %4065 = vrot.lane.b32.xlu0 %v25620_v2, %s29865_s25  ;;  %23285 = vmatmul.mubr.msk.f32.vlgmr.msra.gmra.mrb[0].mxu1 %vm231_vm2, %v2122_v61 }
 0x14f   : > { %v2324_v13 = vpop.permute.xlu1 %2323  ;;  %23282 = vmatmul.mubr.msk.f32.gmra.mrb[2].mxu0 %vm231_vm2, %v2124_v8  ;;  %v2322_v14 = vpop.permute.xlu0 %2321  ;;  %2296 = vmatprep.mubr.f32.mxu1 %v29939_v0 }
 0x150   : > { %v2329_v17 = vsel %vm2327_vm12, %v2322_v14, %v2324_v13  ;;  %2407 = vmatprep.mubr.f32.mxu0 %v29939_v0 }
 0x151   : > { %4063 = vrot.lane.b32.xlu1 %v4058_v12, %s30014_s20  ;;  %23287 = vmatprep.subr.msk.mxu0 %vm236_vm1, %v2329_v17  ;;  %v26194_v17 = vld [vmem:[%s25604_s26 + $0x8] sm:$0xff] }
 0x152   : > { %4071 = vrot.lane.b32.xlu0 %v25635_v5, %s29865_s25  ;;  %23286 = vmatmul.mubr.msk.f32.gmra.mrb[2].mxu1 %vm231_vm2, %v2124_v8  ;;  %s30009_s25 = smov 44  }
 0x153   : > { %v2316_v18 = vpop.permute.xlu1 %2315  ;;  %v2320_v19 = vpop.permute.xlu0 %2319  ;;  %2484 = vmatprep.mubr.f32.mxu1 %v29939_v0 }
 0x154   : > { %v2328_v21 = vsel %vm2327_vm12, %v2320_v19, %v2322_v14 }
 0x155   : > { %4263 = vrot.lane.b32.xlu1 %v25617_v1, %s30005_s7  ;;  %23288 = vmatpush1.msk.msra.mxu0 %vm236_vm1, %v2328_v21 }
 0x156   : > { %4261 = vrot.lane.b32.xlu0 %v25626_v3, %s30005_s7  ;;  %23289 = vmatmul.mubr.msk.f32.vlgmr.msra.gmra.mrb[0].mxu0 %vm231_vm2, %v2316_v18 }
 0x157   : > { %v2318_v22 = vpop.permute.xlu1 %2317  ;;  %2413 = vmatprep.mubr.f32.mxu0 %v29939_v0 }
 0x158   : > { %v2326_v23 = vpop.permute.xlu0 %2325 }
 0x159   : > { %v2330_v24 = vsel %vm2327_vm12, %v2324_v13, %v2326_v23  ;;  %23291 = vmatprep.subr.msk.mxu1 %vm236_vm1, %v2326_v23  ;;  %4255 = vrot.lane.b32.xlu1 %v25628_v4, %s30009_s25  ;;  %v26216_v23 = vld [vmem:[%s25604_s26] sm:$0xff]  ;;  %vm29882_vm12 = vcmask 793600  }
 0x15a   : > { %4259 = vrot.lane.b32.xlu0 %v25620_v2, %s30005_s7  ;;  %23292 = vmatpush1.msk.msra.mxu1 %vm236_vm1, %v2330_v24  ;;  %v4834_v24 = vld [vmem:[#allocation4 + $0x20] sm:$0xf] }
 0x15b   : > { %23293 = vmatmul.mubr.msk.f32.vlgmr.msra.gmra.mrb[0].mxu1 %vm231_vm2, %v2316_v18  ;;  %v2518_v29 = vpop.permute.xlu1 %2517  ;;  %23290 = vmatmul.mubr.msk.f32.gmra.mrb[2].mxu0 %vm231_vm2, %v2318_v22  ;;  %v26201_v18 = vld [vmem:[#allocation4] sm:$0xff] }
 0x15c   : > { %v2516_v30 = vpop.permute.xlu0 %2515  ;;  %2490 = vmatprep.mubr.f32.mxu1 %v29939_v0  ;;  %2601 = vmatprep.mubr.f32.mxu0 %v29939_v0 }
 0x15d   : > { %4257 = vrot.lane.b32.xlu1 %v4252_v27, %s30009_s25  ;;  %v2523_v32 = vsel %vm2521_vm13, %v2516_v30, %v2518_v29 }
 0x15e   : > { %4265 = vrot.lane.b32.xlu0 %v25635_v5, %s30005_s7  ;;  %23295 = vmatprep.subr.msk.mxu0 %vm236_vm1, %v2523_v32 }
 0x15f   : > { %23294 = vmatmul.mubr.msk.f32.gmra.mrb[2].mxu1 %vm231_vm2, %v2318_v22  ;;  %v2510_v35 = vpop.permute.xlu1 %2509 }
 0x160   : > { %v2514_v36 = vpop.permute.xlu0 %2513  ;;  %2678 = vmatprep.mubr.f32.mxu1 %v29939_v0 }
 0x161   : > { %v2522_v37 = vsel %vm2521_vm13, %v2514_v36, %v2516_v30  ;;  %4457 = vrot.lane.b32.xlu1 %v25617_v1, %s29961_s11 }
 0x162   : > { %4455 = vrot.lane.b32.xlu0 %v25626_v3, %s29961_s11  ;;  %23296 = vmatpush1.msk.msra.mxu0 %vm236_vm1, %v2522_v37 }
 0x163   : > { %v2512_v41 = vpop.permute.xlu1 %2511  ;;  %23297 = vmatmul.mubr.msk.f32.vlgmr.msra.gmra.mrb[0].mxu0 %vm231_vm2, %v2510_v35 }
 0x164   : > { %v2520_v42 = vpop.permute.xlu0 %2519  ;;  %2607 = vmatprep.mubr.f32.mxu0 %v29939_v0 }
 0x165   : > { %v2524_v45 = vsel %vm2521_vm13, %v2518_v29, %v2520_v42  ;;  %23299 = vmatprep.subr.msk.mxu1 %vm236_vm1, %v2520_v42  ;;  %4449 = vrot.lane.b32.xlu1 %v25628_v4, %s30012_s28  ;;  %vm29886_vm13 = vcmask 785408  }
 0x166   : > { %4453 = vrot.lane.b32.xlu0 %v25620_v2, %s29961_s11  ;;  %23300 = vmatpush1.msk.msra.mxu1 %vm236_vm1, %v2524_v45  ;;  %v5028_v45 = vld [vmem:[#allocation4 + $0x20] sm:$0xf] }
 0x167   : > { %23301 = vmatmul.mubr.msk.f32.vlgmr.msra.gmra.mrb[0].mxu1 %vm231_vm2, %v2510_v35  ;;  %v2712_v49 = vpop.permute.xlu1 %2711  ;;  %23298 = vmatmul.mubr.msk.f32.gmra.mrb[2].mxu0 %vm231_vm2, %v2512_v41 }
 0x168   : > { %v2710_v50 = vpop.permute.xlu0 %2709  ;;  %2684 = vmatprep.mubr.f32.mxu1 %v29939_v0  ;;  %2795 = vmatprep.mubr.f32.mxu0 %v29939_v0 }
 0x169   : > { %4451 = vrot.lane.b32.xlu1 %v4446_v47, %s30012_s28  ;;  %v26152_v51 = vsel %vm2715_vm14, %v2710_v50, %v2712_v49 }
 0x16a   : > { %4459 = vrot.lane.b32.xlu0 %v25635_v5, %s29961_s11  ;;  %23303 = vmatprep.subr.msk.mxu0 %vm236_vm1, %v26152_v51 }
 0x16b   : > { %23302 = vmatmul.mubr.msk.f32.gmra.mrb[2].mxu1 %vm231_vm2, %v2512_v41  ;;  %v2704_v56 = vpop.permute.xlu1 %2703 }
 0x16c   : > { %v2708_v57 = vpop.permute.xlu0 %2707  ;;  %2872 = vmatprep.mubr.f32.mxu1 %v29939_v0 }
 0x16d   : > { %v2716_v59 = vsel %vm2715_vm14, %v2708_v57, %v2710_v50  ;;  %4651 = vrot.lane.b32.xlu1 %v25617_v1, %s25425_s15 }
 0x16e   : > { %4649 = vrot.lane.b32.xlu0 %v25626_v3, %s25425_s15  ;;  %23304 = vmatpush1.msk.msra.mxu0 %vm236_vm1, %v2716_v59 }
 0x16f   : > { %v2706_v61 = vpop.permute.xlu1 %2705  ;;  %23305 = vmatmul.mubr.msk.f32.vlgmr.msra.gmra.mrb[0].mxu0 %vm231_vm2, %v2704_v56 }
 0x170   : > { %v26165_v62 = vpop.permute.xlu0 %2713  ;;  %2801 = vmatprep.mubr.f32.mxu0 %v29939_v0 }
 0x171   : > { %23307 = vmatprep.subr.msk.mxu1 %vm236_vm1, %v26165_v62  ;;  %4643 = vrot.lane.b32.xlu1 %v25628_v4, %s29872_s30  ;;  %v26174_v1 = vsel %vm2715_vm14, %v2712_v49, %v26165_v62 }
 0x172   : > { %4647 = vrot.lane.b32.xlu0 %v25620_v2, %s25425_s15  ;;  %23308 = vmatpush1.msk.msra.mxu1 %vm236_vm1, %v26174_v1 }
 0x173   : > { %23309 = vmatmul.mubr.msk.f32.vlgmr.msra.gmra.mrb[0].mxu1 %vm231_vm2, %v2704_v56  ;;  %v2906_v8 = vpop.permute.xlu1 %2905  ;;  %23306 = vmatmul.mubr.msk.f32.gmra.mrb[2].mxu0 %vm231_vm2, %v2706_v61 }
 0x174   : > { %v2904_v12 = vpop.permute.xlu0 %2903  ;;  %2878 = vmatprep.mubr.f32.mxu1 %v29939_v0  ;;  %2989 = vmatprep.mubr.f32.mxu0 %v29939_v0 }
 0x175   : > { %4645 = vrot.lane.b32.xlu1 %v4640_v7, %s29872_s30  ;;  %v26185_v2 = vsel %vm2909_vm15, %v2904_v12, %v2906_v8  ;;  %s29876_s30 = smov 74  }
 0x176   : > { %4653 = vrot.lane.b32.xlu0 %v25635_v5, %s25425_s15  ;;  %23311 = vmatprep.subr.msk.mxu0 %vm236_vm1, %v26185_v2  ;;  %s29880_s15 = smov 32  }
 0x177   : > { %23310 = vmatmul.mubr.msk.f32.gmra.mrb[2].mxu1 %vm231_vm2, %v2706_v61  ;;  %v2898_v4 = vpop.permute.xlu1 %2897 }
 0x178   : > { %v2902_v13 = vpop.permute.xlu0 %2901  ;;  %3066 = vmatprep.mubr.f32.mxu1 %v29939_v0 }
 0x179   : > { %v2910_v14 = vsel %vm2909_vm15, %v2902_v13, %v2904_v12  ;;  %4845 = vrot.lane.b32.xlu1 %v26194_v17, %s29876_s30  ;;  %v5222_v12 = vld [vmem:[#allocation4 + $0x20] sm:$0xf] }
 0x17a   : > { %4843 = vrot.lane.b32.xlu0 %v25626_v3, %s29876_s30  ;;  %23312 = vmatpush1.msk.msra.mxu0 %vm236_vm1, %v2910_v14 }
 0x17b   : > { %v2900_v19 = vpop.permute.xlu1 %2899  ;;  %23313 = vmatmul.mubr.msk.f32.vlgmr.msra.gmra.mrb[0].mxu0 %vm231_vm2, %v2898_v4 }
 0x17c   : > { %v26204_v21 = vpop.permute.xlu0 %2907  ;;  %2995 = vmatprep.mubr.f32.mxu0 %v29939_v0 }
 0x17d   : > { %23315 = vmatprep.subr.msk.mxu1 %vm236_vm1, %v26204_v21  ;;  %4837 = vrot.lane.b32.xlu1 %v26201_v18, %s29880_s15  ;;  %v26213_v22 = vsel %vm2909_vm15, %v2906_v8, %v26204_v21 }
 0x17e   : > { %4841 = vrot.lane.b32.xlu0 %v26216_v23, %s29876_s30  ;;  %23316 = vmatpush1.msk.msra.mxu1 %vm236_vm1, %v26213_v22 }
 0x17f   : > { %23317 = vmatmul.mubr.msk.f32.vlgmr.msra.gmra.mrb[0].mxu1 %vm231_vm2, %v2898_v4  ;;  %v3100_v27 = vpop.permute.xlu1 %3099  ;;  %23314 = vmatmul.mubr.msk.f32.gmra.mrb[2].mxu0 %vm231_vm2, %v2900_v19 }
 0x180   : > { %v3098_v29 = vpop.permute.xlu0 %3097  ;;  %3072 = vmatprep.mubr.f32.mxu1 %v29939_v0  ;;  %3183 = vmatprep.mubr.f32.mxu0 %v29939_v0 }
 0x181   : > { %4839 = vrot.lane.b32.xlu1 %v4834_v24, %s29880_s15  ;;  %v26228_v30 = vsel %vm3103_vm0, %v3098_v29, %v3100_v27  ;;  %s29887_s15 = smov 20  }
 0x182   : > { %4847 = vrot.lane.b32.xlu0 %v25635_v5, %s29876_s30  ;;  %23319 = vmatprep.subr.msk.mxu0 %vm236_vm1, %v26228_v30  ;;  %s29878_s30 = smov 28  }
 0x183   : > { %23318 = vmatmul.mubr.msk.f32.gmra.mrb[2].mxu1 %vm231_vm2, %v2900_v19  ;;  %v3092_v32 = vpop.permute.xlu1 %3091 }
 0x184   : > { %v3096_v35 = vpop.permute.xlu0 %3095  ;;  %3260 = vmatprep.mubr.f32.mxu1 %v29939_v0 }
 0x185   : > { %v3104_v36 = vsel %vm3103_vm0, %v3096_v35, %v3098_v29  ;;  %5039 = vrot.lane.b32.xlu1 %v26194_v17, %s29877_s6 }
 0x186   : > { %5037 = vrot.lane.b32.xlu0 %v25626_v3, %s29877_s6  ;;  %23320 = vmatpush1.msk.msra.mxu0 %vm236_vm1, %v3104_v36  ;;  %v5416_v36 = vld [vmem:[#allocation4 + $0x20] sm:$0xf] }
 0x187   : > { %v3094_v37 = vpop.permute.xlu1 %3093  ;;  %23321 = vmatmul.mubr.msk.f32.vlgmr.msra.gmra.mrb[0].mxu0 %vm231_vm2, %v3092_v32 }
 0x188   : > { %v26243_v41 = vpop.permute.xlu0 %3101  ;;  %3189 = vmatprep.mubr.f32.mxu0 %v29939_v0 }
 0x189   : > { %23323 = vmatprep.subr.msk.mxu1 %vm236_vm1, %v26243_v41  ;;  %5031 = vrot.lane.b32.xlu1 %v26201_v18, %s29878_s30  ;;  %v26252_v42 = vsel %vm3103_vm0, %v3100_v27, %v26243_v41 }
 0x18a   : > { %5035 = vrot.lane.b32.xlu0 %v26216_v23, %s29877_s6  ;;  %23324 = vmatpush1.msk.msra.mxu1 %vm236_vm1, %v26252_v42 }
 0x18b   : > { %23325 = vmatmul.mubr.msk.f32.vlgmr.msra.gmra.mrb[0].mxu1 %vm231_vm2, %v3092_v32  ;;  %v3294_v47 = vpop.permute.xlu1 %3293  ;;  %23322 = vmatmul.mubr.msk.f32.gmra.mrb[2].mxu0 %vm231_vm2, %v3094_v37 }
 0x18c   : > { %v3292_v49 = vpop.permute.xlu0 %3291  ;;  %3266 = vmatprep.mubr.f32.mxu1 %v29939_v0  ;;  %3377 = vmatprep.mubr.f32.mxu0 %v29939_v0 }
 0x18d   : > { %5033 = vrot.lane.b32.xlu1 %v5028_v45, %s29878_s30  ;;  %v26264_v50 = vsel %vm29882_vm12, %v3292_v49, %v3294_v47  ;;  %s29885_s30 = smov 71  }
 0x18e   : > { %5041 = vrot.lane.b32.xlu0 %v25635_v5, %s29877_s6  ;;  %23327 = vmatprep.subr.msk.mxu0 %vm236_vm1, %v26264_v50  ;;  %s30028_s6 = smov 24  }
 0x18f   : > { %23326 = vmatmul.mubr.msk.f32.gmra.mrb[2].mxu1 %vm231_vm2, %v3094_v37  ;;  %v3286_v56 = vpop.permute.xlu1 %3285 }
 0x190   : > { %v3290_v57 = vpop.permute.xlu0 %3289  ;;  %3454 = vmatprep.mubr.f32.mxu1 %v29939_v0 }
 0x191   : > { %v3298_v59 = vsel %vm29882_vm12, %v3290_v57, %v3292_v49  ;;  %5233 = vrot.lane.b32.xlu1 %v26194_v17, %s29883_s8 }
 0x192   : > { %5231 = vrot.lane.b32.xlu0 %v25626_v3, %s29883_s8  ;;  %23328 = vmatpush1.msk.msra.mxu0 %vm236_vm1, %v3298_v59 }
 0x193   : > { %v3288_v61 = vpop.permute.xlu1 %3287  ;;  %23329 = vmatmul.mubr.msk.f32.vlgmr.msra.gmra.mrb[0].mxu0 %vm231_vm2, %v3286_v56 }
 0x194   : > { %v26279_v7 = vpop.permute.xlu0 %3295  ;;  %3383 = vmatprep.mubr.f32.mxu0 %v29939_v0 }
 0x195   : > { %23331 = vmatprep.subr.msk.mxu1 %vm236_vm1, %v26279_v7  ;;  %5225 = vrot.lane.b32.xlu1 %v26201_v18, %s30028_s6  ;;  %v26288_v8 = vsel %vm29882_vm12, %v3294_v47, %v26279_v7  ;;  %vm29890_vm12 = vcmask 777216  }
 0x196   : > { %5229 = vrot.lane.b32.xlu0 %v26216_v23, %s29883_s8  ;;  %23332 = vmatpush1.msk.msra.mxu1 %vm236_vm1, %v26288_v8 }
 0x197   : > { %23333 = vmatmul.mubr.msk.f32.vlgmr.msra.gmra.mrb[0].mxu1 %vm231_vm2, %v3286_v56  ;;  %v3488_v4 = vpop.permute.xlu1 %3487  ;;  %23330 = vmatmul.mubr.msk.f32.gmra.mrb[2].mxu0 %vm231_vm2, %v3288_v61 }
 0x198   : > { %v3486_v13 = vpop.permute.xlu0 %3485  ;;  %3460 = vmatprep.mubr.f32.mxu1 %v29939_v0  ;;  %3571 = vmatprep.mubr.f32.mxu0 %v29939_v0 }
 0x199   : > { %5227 = vrot.lane.b32.xlu1 %v5222_v12, %s30028_s6  ;;  %v26300_v14 = vsel %vm29886_vm13, %v3486_v13, %v3488_v4 }
 0x19a   : > { %5235 = vrot.lane.b32.xlu0 %v25635_v5, %s29883_s8  ;;  %23335 = vmatprep.subr.msk.mxu0 %vm236_vm1, %v26300_v14  ;;  %s29889_s8 = smov 70  }
 0x19b   : > { %23334 = vmatmul.mubr.msk.f32.gmra.mrb[2].mxu1 %vm231_vm2, %v3288_v61  ;;  %v3480_v19 = vpop.permute.xlu1 %3479 }
 0x19c   : > { %v3484_v24 = vpop.permute.xlu0 %3483  ;;  %3648 = vmatprep.mubr.f32.mxu1 %v29939_v0 }
 0x19d   : > { %v3492_v27 = vsel %vm29886_vm13, %v3484_v24, %v3486_v13  ;;  %5427 = vrot.lane.b32.xlu1 %v26194_v17, %s29885_s30 }
 0x19e   : > { %5425 = vrot.lane.b32.xlu0 %v25626_v3, %s29885_s30  ;;  %23336 = vmatpush1.msk.msra.mxu0 %vm236_vm1, %v3492_v27 }
 0x19f   : > { %v3482_v29 = vpop.permute.xlu1 %3481  ;;  %23337 = vmatmul.mubr.msk.f32.vlgmr.msra.gmra.mrb[0].mxu0 %vm231_vm2, %v3480_v19 }
 0x1a0   : > { %v26315_v32 = vpop.permute.xlu0 %3489  ;;  %3577 = vmatprep.mubr.f32.mxu0 %v29939_v0 }
 0x1a1   : > { %23339 = vmatprep.subr.msk.mxu1 %vm236_vm1, %v26315_v32  ;;  %5419 = vrot.lane.b32.xlu1 %v26201_v18, %s29887_s15  ;;  %v26324_v35 = vsel %vm29886_vm13, %v3488_v4, %v26315_v32  ;;  %v5610_v4 = vld [vmem:[#allocation4 + $0x20] sm:$0xf]  ;;  %vm29892_vm13 = vcmask 769024  }
 0x1a2   : > { %5423 = vrot.lane.b32.xlu0 %v26216_v23, %s29885_s30  ;;  %23340 = vmatpush1.msk.msra.mxu1 %vm236_vm1, %v26324_v35 }
 0x1a3   : > { %23341 = vmatmul.mubr.msk.f32.vlgmr.msra.gmra.mrb[0].mxu1 %vm231_vm2, %v3480_v19  ;;  %v3682_v37 = vpop.permute.xlu1 %3681  ;;  %23338 = vmatmul.mubr.msk.f32.gmra.mrb[2].mxu0 %vm231_vm2, %v3482_v29 }
 0x1a4   : > { %v3680_v45 = vpop.permute.xlu0 %3679  ;;  %3654 = vmatprep.mubr.f32.mxu1 %v29939_v0  ;;  %3765 = vmatprep.mubr.f32.mxu0 %v29939_v0 }
 0x1a5   : > { %5421 = vrot.lane.b32.xlu1 %v5416_v36, %s29887_s15  ;;  %v26336_v47 = vsel %vm29890_vm12, %v3680_v45, %v3682_v37  ;;  %s29891_s15 = smov 69  }
 0x1a6   : > { %5429 = vrot.lane.b32.xlu0 %v25635_v5, %s29885_s30  ;;  %23343 = vmatprep.subr.msk.mxu0 %vm236_vm1, %v26336_v47  ;;  %s29901_s30 = smov 16  }
 0x1a7   : > { %23342 = vmatmul.mubr.msk.f32.gmra.mrb[2].mxu1 %vm231_vm2, %v3482_v29  ;;  %v3674_v49 = vpop.permute.xlu1 %3673 }
 0x1a8   : > { %v3678_v56 = vpop.permute.xlu0 %3677  ;;  %3842 = vmatprep.mubr.f32.mxu1 %v29939_v0 }
 0x1a9   : > { %v3686_v57 = vsel %vm29890_vm12, %v3678_v56, %v3680_v45  ;;  %5621 = vrot.lane.b32.xlu1 %v26194_v17, %s29889_s8  ;;  %v5804_v56 = vld [vmem:[#allocation4 + $0x20] sm:$0xf] }
 0x1aa   : > { %5619 = vrot.lane.b32.xlu0 %v25626_v3, %s29889_s8  ;;  %23344 = vmatpush1.msk.msra.mxu0 %vm236_vm1, %v3686_v57 }
 0x1ab   : > { %v3676_v59 = vpop.permute.xlu1 %3675  ;;  %23345 = vmatmul.mubr.msk.f32.vlgmr.msra.gmra.mrb[0].mxu0 %vm231_vm2, %v3674_v49 }
 0x1ac   : > { %v26351_v61 = vpop.permute.xlu0 %3683  ;;  %3771 = vmatprep.mubr.f32.mxu0 %v29939_v0 }
 0x1ad   : > { %23347 = vmatprep.subr.msk.mxu1 %vm236_vm1, %v26351_v61  ;;  %5613 = vrot.lane.b32.xlu1 %v26201_v18, %s29901_s30  ;;  %v26360_v12 = vsel %vm29890_vm12, %v3682_v37, %v26351_v61  ;;  %vm29899_vm12 = vcmask 760832  }
 0x1ae   : > { %5617 = vrot.lane.b32.xlu0 %v26216_v23, %s29889_s8  ;;  %23348 = vmatpush1.msk.msra.mxu1 %vm236_vm1, %v26360_v12 }
 0x1af   : > { %23349 = vmatmul.mubr.msk.f32.vlgmr.msra.gmra.mrb[0].mxu1 %vm231_vm2, %v3674_v49  ;;  %v3876_v13 = vpop.permute.xlu1 %3875  ;;  %23346 = vmatmul.mubr.msk.f32.gmra.mrb[2].mxu0 %vm231_vm2, %v3676_v59 }
 0x1b0   : > { %v3874_v19 = vpop.permute.xlu0 %3873  ;;  %3848 = vmatprep.mubr.f32.mxu1 %v29939_v0  ;;  %3959 = vmatprep.mubr.f32.mxu0 %v29939_v0 }
 0x1b1   : > { %5615 = vrot.lane.b32.xlu1 %v5610_v4, %s29901_s30  ;;  %v26372_v24 = vsel %vm29892_vm13, %v3874_v19, %v3876_v13  ;;  %s29907_s30 = smov 66  }
 0x1b2   : > { %5623 = vrot.lane.b32.xlu0 %v25635_v5, %s29889_s8  ;;  %23351 = vmatprep.subr.msk.mxu0 %vm236_vm1, %v26372_v24  ;;  %s29894_s8 = smov 12  }
 0x1b3   : > { %23350 = vmatmul.mubr.msk.f32.gmra.mrb[2].mxu1 %vm231_vm2, %v3676_v59  ;;  %v3868_v27 = vpop.permute.xlu1 %3867 }
 0x1b4   : > { %v3872_v29 = vpop.permute.xlu0 %3871  ;;  %4036 = vmatprep.mubr.f32.mxu1 %v29939_v0 }
 0x1b5   : > { %v3880_v36 = vsel %vm29892_vm13, %v3872_v29, %v3874_v19  ;;  %5815 = vrot.lane.b32.xlu1 %v26194_v17, %s29891_s15 }
 0x1b6   : > { %5813 = vrot.lane.b32.xlu0 %v25626_v3, %s29891_s15  ;;  %23352 = vmatpush1.msk.msra.mxu0 %vm236_vm1, %v3880_v36 }
 0x1b7   : > { %v3870_v37 = vpop.permute.xlu1 %3869  ;;  %23353 = vmatmul.mubr.msk.f32.vlgmr.msra.gmra.mrb[0].mxu0 %vm231_vm2, %v3868_v27 }
 0x1b8   : > { %v26387_v45 = vpop.permute.xlu0 %3877  ;;  %3965 = vmatprep.mubr.f32.mxu0 %v29939_v0 }
 0x1b9   : > { %30115 = vst [vmem:[#allocation15_spill] sm:$0xff] %v26387_v45  ;;  %23355 = vmatprep.subr.msk.mxu1 %vm236_vm1, %v26387_v45  ;;  %5807 = vrot.lane.b32.xlu1 %v26201_v18, %s29894_s8  ;;  %v26396_v49 = vsel %vm29892_vm13, %v3876_v13, %v26387_v45  ;;  %vm29903_vm13 = vcmask 752640  }
 0x1ba   : > { %5811 = vrot.lane.b32.xlu0 %v26216_v23, %s29891_s15  ;;  %23356 = vmatpush1.msk.msra.mxu1 %vm236_vm1, %v26396_v49 }
 0x1bb   : > { %23357 = vmatmul.mubr.msk.f32.vlgmr.msra.gmra.mrb[0].mxu1 %vm231_vm2, %v3868_v27  ;;  %v4070_v57 = vpop.permute.xlu1 %4069  ;;  %23354 = vmatmul.mubr.msk.f32.gmra.mrb[2].mxu0 %vm231_vm2, %v3870_v37 }
 0x1bc   : > { %v4068_v59 = vpop.permute.xlu0 %4067  ;;  %4042 = vmatprep.mubr.f32.mxu1 %v29939_v0  ;;  %4153 = vmatprep.mubr.f32.mxu0 %v29939_v0 }
 0x1bd   : > { %5809 = vrot.lane.b32.xlu1 %v5804_v56, %s29894_s8  ;;  %v26408_v4 = vsel %vm29899_vm12, %v4068_v59, %v4070_v57  ;;  %v5998_v56 = vld [vmem:[#allocation4 + $0x20] sm:$0xf]  ;;  %s29904_s8 = smov 67  }
 0x1be   : > { %30116 = vst [vmem:[#allocation16_spill] sm:$0xff] %v26408_v4  ;;  %5817 = vrot.lane.b32.xlu0 %v25635_v5, %s29891_s15  ;;  %23359 = vmatprep.subr.msk.mxu0 %vm236_vm1, %v26408_v4  ;;  %s29897_s15 = smov 8  }
 0x1bf   : > { %23358 = vmatmul.mubr.msk.f32.gmra.mrb[2].mxu1 %vm231_vm2, %v3870_v37  ;;  %v4062_v13 = vpop.permute.xlu1 %4061 }
 0x1c0   : > { %v4066_v19 = vpop.permute.xlu0 %4065  ;;  %4230 = vmatprep.mubr.f32.mxu1 %v29939_v0 }
 0x1c1   : > { %v4074_v27 = vsel %vm29899_vm12, %v4066_v19, %v4068_v59  ;;  %6009 = vrot.lane.b32.xlu1 %v26194_v17, %s29973_s19 }
 0x1c2   : > { %6007 = vrot.lane.b32.xlu0 %v25626_v3, %s29973_s19  ;;  %23360 = vmatpush1.msk.msra.mxu0 %vm236_vm1, %v4074_v27 }
 0x1c3   : > { %v4064_v29 = vpop.permute.xlu1 %4063  ;;  %23361 = vmatmul.mubr.msk.f32.vlgmr.msra.gmra.mrb[0].mxu0 %vm231_vm2, %v4062_v13 }
 0x1c4   : > { %v26423_v36 = vpop.permute.xlu0 %4071  ;;  %4159 = vmatprep.mubr.f32.mxu0 %v29939_v0 }
 0x1c5   : > { %30117 = vst [vmem:[#allocation17_spill] sm:$0xff] %v26423_v36  ;;  %23363 = vmatprep.subr.msk.mxu1 %vm236_vm1, %v26423_v36  ;;  %6001 = vrot.lane.b32.xlu1 %v26201_v18, %s29897_s15  ;;  %v26432_v37 = vsel %vm29899_vm12, %v4070_v57, %v26423_v36  ;;  %vm4461_vm12 = vcmask 621568  }
 0x1c6   : > { %30118 = vst [vmem:[#allocation18_spill] sm:$0xff] %v26432_v37  ;;  %6005 = vrot.lane.b32.xlu0 %v26216_v23, %s29973_s19  ;;  %23364 = vmatpush1.msk.msra.mxu1 %vm236_vm1, %v26432_v37 }
 0x1c7   : > { %23365 = vmatmul.mubr.msk.f32.vlgmr.msra.gmra.mrb[0].mxu1 %vm231_vm2, %v4062_v13  ;;  %v4264_v59 = vpop.permute.xlu1 %4263  ;;  %23362 = vmatmul.mubr.msk.f32.gmra.mrb[2].mxu0 %vm231_vm2, %v4064_v29 }
 0x1c8   : > { %v4262_v19 = vpop.permute.xlu0 %4261  ;;  %4236 = vmatprep.mubr.f32.mxu1 %v29939_v0  ;;  %4347 = vmatprep.mubr.f32.mxu0 %v29939_v0 }
 0x1c9   : > { %6003 = vrot.lane.b32.xlu1 %v5998_v56, %s29897_s15  ;;  %v26444_v57 = vsel %vm29903_vm13, %v4262_v19, %v4264_v59  ;;  %s30056_s15 = smov 4  }
 0x1ca   : > { %30119 = vst [vmem:[#allocation19_spill] sm:$0xff] %v26444_v57  ;;  %6011 = vrot.lane.b32.xlu0 %v25635_v5, %s29973_s19  ;;  %23367 = vmatprep.subr.msk.mxu0 %vm236_vm1, %v26444_v57 }
 0x1cb   : > { %23366 = vmatmul.mubr.msk.f32.gmra.mrb[2].mxu1 %vm231_vm2, %v4064_v29  ;;  %v4256_v13 = vpop.permute.xlu1 %4255 }
 0x1cc   : > { %v4260_v27 = vpop.permute.xlu0 %4259  ;;  %4424 = vmatprep.mubr.f32.mxu1 %v29939_v0 }
 0x1cd   : > { %v4268_v36 = vsel %vm29903_vm13, %v4260_v27, %v4262_v19  ;;  %6203 = vrot.lane.b32.xlu1 %v26194_v17, %s29904_s8 }
 0x1ce   : > { %6201 = vrot.lane.b32.xlu0 %v25626_v3, %s29904_s8  ;;  %23368 = vmatpush1.msk.msra.mxu0 %vm236_vm1, %v4268_v36  ;;  %v6192_v36 = vld [vmem:[#allocation4 + $0x20] sm:$0xf] }
 0x1cf   : > { %v4258_v56 = vpop.permute.xlu1 %4257  ;;  %23369 = vmatmul.mubr.msk.f32.vlgmr.msra.gmra.mrb[0].mxu0 %vm231_vm2, %v4256_v13 }
 0x1d0   : > { %v26459_v57 = vpop.permute.xlu0 %4265  ;;  %4353 = vmatprep.mubr.f32.mxu0 %v29939_v0 }
 0x1d1   : > { %30120 = vst [vmem:[#allocation20_spill] sm:$0xff] %v26459_v57  ;;  %23371 = vmatprep.subr.msk.mxu1 %vm236_vm1, %v26459_v57  ;;  %6195 = vrot.lane.b32.xlu1 %v26201_v18, %s30056_s15  ;;  %v26468_v29 = vsel %vm29903_vm13, %v4264_v59, %v26459_v57  ;;  %vm4655_vm13 = vcmask 613376  }
 0x1d2   : > { %30121 = vst [vmem:[#allocation21_spill] sm:$0xff] %v26468_v29  ;;  %6199 = vrot.lane.b32.xlu0 %v26216_v23, %s29904_s8  ;;  %23372 = vmatpush1.msk.msra.mxu1 %vm236_vm1, %v26468_v29  ;;  %v6576_v29 = vld [vmem:[#allocation4 + $0x28] sm:$0xf] }
 0x1d3   : > { %23373 = vmatmul.mubr.msk.f32.vlgmr.msra.gmra.mrb[0].mxu1 %vm231_vm2, %v4256_v13  ;;  %v4458_v19 = vpop.permute.xlu1 %4457  ;;  %23370 = vmatmul.mubr.msk.f32.gmra.mrb[2].mxu0 %vm231_vm2, %v4258_v56 }
 0x1d4   : > { %v4456_v27 = vpop.permute.xlu0 %4455  ;;  %4430 = vmatprep.mubr.f32.mxu1 %v29939_v0  ;;  %4541 = vmatprep.mubr.f32.mxu0 %v29939_v0 }
 0x1d5   : > { %6197 = vrot.lane.b32.xlu1 %v6192_v36, %s30056_s15  ;;  %v4463_v18 = vsel %vm4461_vm12, %v4456_v27, %v4458_v19 }
 0x1d6   : > { %6205 = vrot.lane.b32.xlu0 %v25635_v5, %s29904_s8  ;;  %23375 = vmatprep.subr.msk.mxu0 %vm236_vm1, %v4463_v18  ;;  %s25442_s8 = smov 50  }
 0x1d7   : > { %23374 = vmatmul.mubr.msk.f32.gmra.mrb[2].mxu1 %vm231_vm2, %v4258_v56  ;;  %v4450_v59 = vpop.permute.xlu1 %4449 }
 0x1d8   : > { %v4454_v13 = vpop.permute.xlu0 %4453  ;;  %4618 = vmatprep.mubr.f32.mxu1 %v29939_v0 }
 0x1d9   : > { %v4462_v57 = vsel %vm4461_vm12, %v4454_v13, %v4456_v27  ;;  %6391 = vrot.lane.b32.xlu1 %v26194_v17, %s29907_s30  ;;  %v26508_v13 = vld [vmem:[#allocation4 + $0x8] sm:$0xff] }
 0x1da   : > { %6389 = vrot.lane.b32.xlu0 %v25626_v3, %s29907_s30  ;;  %23376 = vmatpush1.msk.msra.mxu0 %vm236_vm1, %v4462_v57 }
 0x1db   : > { %v4452_v36 = vpop.permute.xlu1 %4451  ;;  %23377 = vmatmul.mubr.msk.f32.vlgmr.msra.gmra.mrb[0].mxu0 %vm231_vm2, %v4450_v59 }
 0x1dc   : > { %v4460_v18 = vpop.permute.xlu0 %4459  ;;  %4547 = vmatprep.mubr.f32.mxu0 %v29939_v0 }
 0x1dd   : > { %v4464_v56 = vsel %vm4461_vm12, %v4458_v19, %v4460_v18  ;;  %23379 = vmatprep.subr.msk.mxu1 %vm236_vm1, %v4460_v18  ;;  %6393 = vrot.lane.b32.xlu1 %v25635_v5, %s29907_s30  ;;  %vm29912_vm12 = vcmask 605184  }
 0x1de   : > { %6387 = vrot.lane.b32.xlu0 %v26216_v23, %s29907_s30  ;;  %23380 = vmatpush1.msk.msra.mxu1 %vm236_vm1, %v4464_v56  ;;  %s25443_s30 = smov 49  }
 0x1df   : > { %23381 = vmatmul.mubr.msk.f32.vlgmr.msra.gmra.mrb[0].mxu1 %vm231_vm2, %v4450_v59  ;;  %v4652_v57 = vpop.permute.xlu1 %4651  ;;  %23378 = vmatmul.mubr.msk.f32.gmra.mrb[2].mxu0 %vm231_vm2, %v4452_v36 }
 0x1e0   : > { %v4650_v27 = vpop.permute.xlu0 %4649  ;;  %4624 = vmatprep.mubr.f32.mxu1 %v29939_v0  ;;  %4735 = vmatprep.mubr.f32.mxu0 %v29939_v0 }
 0x1e1   : > { %6587 = vrot.lane.b32.xlu1 %v26194_v17, %s25442_s8  ;;  %v4657_v19 = vsel %vm4655_vm13, %v4650_v27, %v4652_v57 }
 0x1e2   : > { %6585 = vrot.lane.b32.xlu0 %v25626_v3, %s25442_s8  ;;  %23383 = vmatprep.subr.msk.mxu0 %vm236_vm1, %v4657_v19 }
 0x1e3   : > { %23382 = vmatmul.mubr.msk.f32.gmra.mrb[2].mxu1 %vm231_vm2, %v4452_v36  ;;  %v4644_v59 = vpop.permute.xlu1 %4643 }
 0x1e4   : > { %v4648_v18 = vpop.permute.xlu0 %4647  ;;  %4812 = vmatprep.mubr.f32.mxu1 %v29939_v0 }
 0x1e5   : > { %v4656_v56 = vsel %vm4655_vm13, %v4648_v18, %v4650_v27  ;;  %6579 = vrot.lane.b32.xlu1 %v26508_v13, %s30046_s17 }
 0x1e6   : > { %6583 = vrot.lane.b32.xlu0 %v26216_v23, %s25442_s8  ;;  %23384 = vmatpush1.msk.msra.mxu0 %vm236_vm1, %v4656_v56 }
 0x1e7   : > { %v4646_v4 = vpop.permute.xlu1 %4645  ;;  %23385 = vmatmul.mubr.msk.f32.vlgmr.msra.gmra.mrb[0].mxu0 %vm231_vm2, %v4644_v59 }
 0x1e8   : > { %v4654_v19 = vpop.permute.xlu0 %4653  ;;  %4741 = vmatprep.mubr.f32.mxu0 %v29939_v0 }
 0x1e9   : > { %v4658_v36 = vsel %vm4655_vm13, %v4652_v57, %v4654_v19  ;;  %23387 = vmatprep.subr.msk.mxu1 %vm236_vm1, %v4654_v19  ;;  %6581 = vrot.lane.b32.xlu1 %v6576_v29, %s30046_s17  ;;  %v6770_v19 = vld [vmem:[#allocation4 + $0x28] sm:$0xf]  ;;  %vm29916_vm13 = vcmask 596992  }
 0x1ea   : > { %6589 = vrot.lane.b32.xlu0 %v25635_v5, %s25442_s8  ;;  %23388 = vmatpush1.msk.msra.mxu1 %vm236_vm1, %v4658_v36  ;;  %s29935_s8 = smov 46  }
 0x1eb   : > { %23389 = vmatmul.mubr.msk.f32.vlgmr.msra.gmra.mrb[0].mxu1 %vm231_vm2, %v4644_v59  ;;  %v4846_v27 = vpop.permute.xlu1 %4845  ;;  %23386 = vmatmul.mubr.msk.f32.gmra.mrb[2].mxu0 %vm231_vm2, %v4646_v4 }
 0x1ec   : > { %v4844_v18 = vpop.permute.xlu0 %4843  ;;  %4818 = vmatprep.mubr.f32.mxu1 %v29939_v0  ;;  %4929 = vmatprep.mubr.f32.mxu0 %v29939_v0 }
 0x1ed   : > { %6781 = vrot.lane.b32.xlu1 %v26194_v17, %s25443_s30  ;;  %v26530_v29 = vsel %vm29912_vm12, %v4844_v18, %v4846_v27 }
 0x1ee   : > { %30122 = vst [vmem:[#allocation22_spill] sm:$0xff] %v26530_v29  ;;  %6779 = vrot.lane.b32.xlu0 %v25626_v3, %s25443_s30  ;;  %23391 = vmatprep.subr.msk.mxu0 %vm236_vm1, %v26530_v29 }
 0x1ef   : > { %23390 = vmatmul.mubr.msk.f32.gmra.mrb[2].mxu1 %vm231_vm2, %v4646_v4  ;;  %v4838_v57 = vpop.permute.xlu1 %4837 }
 0x1f0   : > { %v4842_v59 = vpop.permute.xlu0 %4841  ;;  %5006 = vmatprep.mubr.f32.mxu1 %v29939_v0 }
 0x1f1   : > { %v4850_v56 = vsel %vm29912_vm12, %v4842_v59, %v4844_v18  ;;  %6773 = vrot.lane.b32.xlu1 %v26508_v13, %s30043_s21 }
 0x1f2   : > { %6777 = vrot.lane.b32.xlu0 %v26216_v23, %s25443_s30  ;;  %23392 = vmatpush1.msk.msra.mxu0 %vm236_vm1, %v4850_v56 }
 0x1f3   : > { %v4840_v36 = vpop.permute.xlu1 %4839  ;;  %23393 = vmatmul.mubr.msk.f32.vlgmr.msra.gmra.mrb[0].mxu0 %vm231_vm2, %v4838_v57 }
 0x1f4   : > { %v26543_v29 = vpop.permute.xlu0 %4847  ;;  %4935 = vmatprep.mubr.f32.mxu0 %v29939_v0 }
 0x1f5   : > { %30123 = vst [vmem:[#allocation23_spill] sm:$0xff] %v26543_v29  ;;  %23395 = vmatprep.subr.msk.mxu1 %vm236_vm1, %v26543_v29  ;;  %6775 = vrot.lane.b32.xlu1 %v6770_v19, %s30043_s21  ;;  %v26551_v4 = vsel %vm29912_vm12, %v4846_v27, %v26543_v29  ;;  %v6964_v29 = vld [vmem:[#allocation4 + $0x28] sm:$0xf]  ;;  %vm29920_vm12 = vcmask 588800  }
 0x1f6   : > { %30124 = vst [vmem:[#allocation24_spill] sm:$0xff] %v26551_v4  ;;  %6783 = vrot.lane.b32.xlu0 %v25635_v5, %s25443_s30  ;;  %23396 = vmatpush1.msk.msra.mxu1 %vm236_vm1, %v26551_v4  ;;  %s29921_s30 = smov 47  }
 0x1f7   : > { %23397 = vmatmul.mubr.msk.f32.vlgmr.msra.gmra.mrb[0].mxu1 %vm231_vm2, %v4838_v57  ;;  %v5040_v18 = vpop.permute.xlu1 %5039  ;;  %23394 = vmatmul.mubr.msk.f32.gmra.mrb[2].mxu0 %vm231_vm2, %v4840_v36 }
 0x1f8   : > { %v5038_v59 = vpop.permute.xlu0 %5037  ;;  %5012 = vmatprep.mubr.f32.mxu1 %v29939_v0  ;;  %5123 = vmatprep.mubr.f32.mxu0 %v29939_v0 }
 0x1f9   : > { %6975 = vrot.lane.b32.xlu1 %v26194_v17, %s30014_s20  ;;  %v26563_v27 = vsel %vm29916_vm13, %v5038_v59, %v5040_v18 }
 0x1fa   : > { %30125 = vst [vmem:[#allocation25_spill] sm:$0xff] %v26563_v27  ;;  %6973 = vrot.lane.b32.xlu0 %v25626_v3, %s30014_s20  ;;  %23399 = vmatprep.subr.msk.mxu0 %vm236_vm1, %v26563_v27 }
 0x1fb   : > { %23398 = vmatmul.mubr.msk.f32.gmra.mrb[2].mxu1 %vm231_vm2, %v4840_v36  ;;  %v5032_v57 = vpop.permute.xlu1 %5031 }
 0x1fc   : > { %v5036_v56 = vpop.permute.xlu0 %5035  ;;  %5200 = vmatprep.mubr.f32.mxu1 %v29939_v0 }
 0x1fd   : > { %v5044_v19 = vsel %vm29916_vm13, %v5036_v56, %v5038_v59  ;;  %6967 = vrot.lane.b32.xlu1 %v26508_v13, %s30064_s23 }
 0x1fe   : > { %6971 = vrot.lane.b32.xlu0 %v26216_v23, %s30014_s20  ;;  %23400 = vmatpush1.msk.msra.mxu0 %vm236_vm1, %v5044_v19 }
 0x1ff   : > { %v5034_v4 = vpop.permute.xlu1 %5033  ;;  %23401 = vmatmul.mubr.msk.f32.vlgmr.msra.gmra.mrb[0].mxu0 %vm231_vm2, %v5032_v57 }
 0x200   : > { %v26578_v27 = vpop.permute.xlu0 %5041  ;;  %5129 = vmatprep.mubr.f32.mxu0 %v29939_v0 }
 0x201   : > { %30126 = vst [vmem:[#allocation26_spill] sm:$0xff] %v26578_v27  ;;  %23403 = vmatprep.subr.msk.mxu1 %vm236_vm1, %v26578_v27  ;;  %6969 = vrot.lane.b32.xlu1 %v6964_v29, %s30064_s23  ;;  %v26586_v36 = vsel %vm29916_vm13, %v5040_v18, %v26578_v27  ;;  %v7158_v27 = vld [vmem:[#allocation4 + $0x28] sm:$0xf]  ;;  %vm29925_vm13 = vcmask 580608  }
 0x202   : > { %30127 = vst [vmem:[#allocation27_spill] sm:$0xff] %v26586_v36  ;;  %6977 = vrot.lane.b32.xlu0 %v25635_v5, %s30014_s20  ;;  %23404 = vmatpush1.msk.msra.mxu1 %vm236_vm1, %v26586_v36 }
 0x203   : > { %23405 = vmatmul.mubr.msk.f32.vlgmr.msra.gmra.mrb[0].mxu1 %vm231_vm2, %v5032_v57  ;;  %v5234_v59 = vpop.permute.xlu1 %5233  ;;  %23402 = vmatmul.mubr.msk.f32.gmra.mrb[2].mxu0 %vm231_vm2, %v5034_v4 }
 0x204   : > { %v5232_v56 = vpop.permute.xlu0 %5231  ;;  %5206 = vmatprep.mubr.f32.mxu1 %v29939_v0  ;;  %5317 = vmatprep.mubr.f32.mxu0 %v29939_v0 }
 0x205   : > { %7169 = vrot.lane.b32.xlu1 %v26194_v17, %s29921_s30  ;;  %v26599_v29 = vsel %vm29920_vm12, %v5232_v56, %v5234_v59 }
 0x206   : > { %30128 = vst [vmem:[#allocation28_spill] sm:$0xff] %v26599_v29  ;;  %7167 = vrot.lane.b32.xlu0 %v25626_v3, %s29921_s30  ;;  %23407 = vmatprep.subr.msk.mxu0 %vm236_vm1, %v26599_v29 }
 0x207   : > { %23406 = vmatmul.mubr.msk.f32.gmra.mrb[2].mxu1 %vm231_vm2, %v5034_v4  ;;  %v5226_v18 = vpop.permute.xlu1 %5225 }
 0x208   : > { %v5230_v57 = vpop.permute.xlu0 %5229  ;;  %5394 = vmatprep.mubr.f32.mxu1 %v29939_v0 }
 0x209   : > { %v5238_v19 = vsel %vm29920_vm12, %v5230_v57, %v5232_v56  ;;  %7161 = vrot.lane.b32.xlu1 %v26508_v13, %s30035_s24 }
 0x20a   : > { %7165 = vrot.lane.b32.xlu0 %v26216_v23, %s29921_s30  ;;  %23408 = vmatpush1.msk.msra.mxu0 %vm236_vm1, %v5238_v19 }
 0x20b   : > { %v5228_v36 = vpop.permute.xlu1 %5227  ;;  %23409 = vmatmul.mubr.msk.f32.vlgmr.msra.gmra.mrb[0].mxu0 %vm231_vm2, %v5226_v18 }
 0x20c   : > { %v26614_v29 = vpop.permute.xlu0 %5235  ;;  %5323 = vmatprep.mubr.f32.mxu0 %v29939_v0 }
 0x20d   : > { %30129 = vst [vmem:[#allocation29_spill] sm:$0xff] %v26614_v29  ;;  %23411 = vmatprep.subr.msk.mxu1 %vm236_vm1, %v26614_v29  ;;  %7163 = vrot.lane.b32.xlu1 %v7158_v27, %s30035_s24  ;;  %v26622_v4 = vsel %vm29920_vm12, %v5234_v59, %v26614_v29  ;;  %v7352_v29 = vld [vmem:[#allocation4 + $0x28] sm:$0xf]  ;;  %vm29929_vm12 = vcmask 572416   ;;  %s30208_s24 = smov 119  }
 0x20e   : > { %30130 = vst [vmem:[#allocation30_spill] sm:$0xff] %v26622_v4  ;;  %7171 = vrot.lane.b32.xlu0 %v25635_v5, %s29921_s30  ;;  %23412 = vmatpush1.msk.msra.mxu1 %vm236_vm1, %v26622_v4  ;;  %s29930_s30 = smov 45  }
 0x20f   : > { %23413 = vmatmul.mubr.msk.f32.vlgmr.msra.gmra.mrb[0].mxu1 %vm231_vm2, %v5226_v18  ;;  %v5428_v56 = vpop.permute.xlu1 %5427  ;;  %23410 = vmatmul.mubr.msk.f32.gmra.mrb[2].mxu0 %vm231_vm2, %v5228_v36 }
 0x210   : > { %v5426_v57 = vpop.permute.xlu0 %5425  ;;  %5400 = vmatprep.mubr.f32.mxu1 %v29939_v0  ;;  %5511 = vmatprep.mubr.f32.mxu0 %v29939_v0 }
 0x211   : > { %7363 = vrot.lane.b32.xlu1 %v26194_v17, %s29935_s8  ;;  %v26635_v27 = vsel %vm29925_vm13, %v5426_v57, %v5428_v56 }
 0x212   : > { %30131 = vst [vmem:[#allocation31_spill] sm:$0xff] %v26635_v27  ;;  %7361 = vrot.lane.b32.xlu0 %v25626_v3, %s29935_s8  ;;  %23415 = vmatprep.subr.msk.mxu0 %vm236_vm1, %v26635_v27 }
 0x213   : > { %23414 = vmatmul.mubr.msk.f32.gmra.mrb[2].mxu1 %vm231_vm2, %v5228_v36  ;;  %v5420_v59 = vpop.permute.xlu1 %5419 }
 0x214   : > { %v5424_v18 = vpop.permute.xlu0 %5423  ;;  %5588 = vmatprep.mubr.f32.mxu1 %v29939_v0 }
 0x215   : > { %v5432_v19 = vsel %vm29925_vm13, %v5424_v18, %v5426_v57  ;;  %7355 = vrot.lane.b32.xlu1 %v26508_v13, %s30031_s27 }
 0x216   : > { %7359 = vrot.lane.b32.xlu0 %v26216_v23, %s29935_s8  ;;  %23416 = vmatpush1.msk.msra.mxu0 %vm236_vm1, %v5432_v19 }
 0x217   : > { %v5422_v4 = vpop.permute.xlu1 %5421  ;;  %23417 = vmatmul.mubr.msk.f32.vlgmr.msra.gmra.mrb[0].mxu0 %vm231_vm2, %v5420_v59 }
 0x218   : > { %v26650_v27 = vpop.permute.xlu0 %5429  ;;  %5517 = vmatprep.mubr.f32.mxu0 %v29939_v0 }
 0x219   : > { %30132 = vst [vmem:[#allocation32_spill] sm:$0xff] %v26650_v27  ;;  %23419 = vmatprep.subr.msk.mxu1 %vm236_vm1, %v26650_v27  ;;  %7357 = vrot.lane.b32.xlu1 %v7352_v29, %s30031_s27  ;;  %v26658_v36 = vsel %vm29925_vm13, %v5428_v56, %v26650_v27  ;;  %v7546_v27 = vld [vmem:[#allocation4 + $0x28] sm:$0xf]  ;;  %vm29934_vm13 = vcmask 564224   ;;  %s30204_s27 = smov 12  }
 0x21a   : > { %30133 = vst [vmem:[#allocation33_spill] sm:$0xff] %v26658_v36  ;;  %7365 = vrot.lane.b32.xlu0 %v25635_v5, %s29935_s8  ;;  %23420 = vmatpush1.msk.msra.mxu1 %vm236_vm1, %v26658_v36  ;;  %s29957_s8 = smov 42  }
 0x21b   : > { %23421 = vmatmul.mubr.msk.f32.vlgmr.msra.gmra.mrb[0].mxu1 %vm231_vm2, %v5420_v59  ;;  %v5622_v57 = vpop.permute.xlu1 %5621  ;;  %23418 = vmatmul.mubr.msk.f32.gmra.mrb[2].mxu0 %vm231_vm2, %v5422_v4 }
 0x21c   : > { %v5620_v18 = vpop.permute.xlu0 %5619  ;;  %5594 = vmatprep.mubr.f32.mxu1 %v29939_v0  ;;  %5705 = vmatprep.mubr.f32.mxu0 %v29939_v0 }
 0x21d   : > { %7557 = vrot.lane.b32.xlu1 %v26194_v17, %s29930_s30  ;;  %v26671_v29 = vsel %vm29929_vm12, %v5620_v18, %v5622_v57 }
 0x21e   : > { %30134 = vst [vmem:[#allocation34_spill] sm:$0xff] %v26671_v29  ;;  %7555 = vrot.lane.b32.xlu0 %v25626_v3, %s29930_s30  ;;  %23423 = vmatprep.subr.msk.mxu0 %vm236_vm1, %v26671_v29 }
 0x21f   : > { %23422 = vmatmul.mubr.msk.f32.gmra.mrb[2].mxu1 %vm231_vm2, %v5422_v4  ;;  %v5614_v56 = vpop.permute.xlu1 %5613 }
 0x220   : > { %v5618_v59 = vpop.permute.xlu0 %5617  ;;  %5782 = vmatprep.mubr.f32.mxu1 %v29939_v0 }
 0x221   : > { %v5626_v19 = vsel %vm29929_vm12, %v5618_v59, %v5620_v18  ;;  %7549 = vrot.lane.b32.xlu1 %v26508_v13, %s30019_s29 }
 0x222   : > { %7553 = vrot.lane.b32.xlu0 %v26216_v23, %s29930_s30  ;;  %23424 = vmatpush1.msk.msra.mxu0 %vm236_vm1, %v5626_v19 }
 0x223   : > { %v5616_v36 = vpop.permute.xlu1 %5615  ;;  %23425 = vmatmul.mubr.msk.f32.vlgmr.msra.gmra.mrb[0].mxu0 %vm231_vm2, %v5614_v56 }
 0x224   : > { %v26686_v29 = vpop.permute.xlu0 %5623  ;;  %5711 = vmatprep.mubr.f32.mxu0 %v29939_v0 }
 0x225   : > { %30135 = vst [vmem:[#allocation35_spill] sm:$0xff] %v26686_v29  ;;  %23427 = vmatprep.subr.msk.mxu1 %vm236_vm1, %v26686_v29  ;;  %7551 = vrot.lane.b32.xlu1 %v7546_v27, %s30019_s29  ;;  %v26694_v4 = vsel %vm29929_vm12, %v5622_v57, %v26686_v29  ;;  %v7740_v29 = vld [vmem:[#allocation4 + $0x28] sm:$0xf]  ;;  %vm29937_vm12 = vcmask 556032   ;;  %s30197_s29 = smov 123  }
 0x226   : > { %30136 = vst [vmem:[#allocation36_spill] sm:$0xff] %v26694_v4  ;;  %7559 = vrot.lane.b32.xlu0 %v25635_v5, %s29930_s30  ;;  %23428 = vmatpush1.msk.msra.mxu1 %vm236_vm1, %v26694_v4  ;;  %s29938_s30 = smov 43  }
 0x227   : > { %23429 = vmatmul.mubr.msk.f32.vlgmr.msra.gmra.mrb[0].mxu1 %vm231_vm2, %v5614_v56  ;;  %v5816_v18 = vpop.permute.xlu1 %5815  ;;  %23426 = vmatmul.mubr.msk.f32.gmra.mrb[2].mxu0 %vm231_vm2, %v5616_v36 }
 0x228   : > { %v5814_v59 = vpop.permute.xlu0 %5813  ;;  %5788 = vmatprep.mubr.f32.mxu1 %v29939_v0  ;;  %5899 = vmatprep.mubr.f32.mxu0 %v29939_v0 }
 0x229   : > { %7751 = vrot.lane.b32.xlu1 %v26194_v17, %s30009_s25  ;;  %v26707_v27 = vsel %vm29934_vm13, %v5814_v59, %v5816_v18 }
 0x22a   : > { %30137 = vst [vmem:[#allocation37_spill] sm:$0xff] %v26707_v27  ;;  %7749 = vrot.lane.b32.xlu0 %v25626_v3, %s30009_s25  ;;  %23431 = vmatprep.subr.msk.mxu0 %vm236_vm1, %v26707_v27 }
 0x22b   : > { %23430 = vmatmul.mubr.msk.f32.gmra.mrb[2].mxu1 %vm231_vm2, %v5616_v36  ;;  %v5808_v57 = vpop.permute.xlu1 %5807 }
 0x22c   : > { %v5812_v56 = vpop.permute.xlu0 %5811  ;;  %5976 = vmatprep.mubr.f32.mxu1 %v29939_v0 }
 0x22d   : > { %v5820_v19 = vsel %vm29934_vm13, %v5812_v56, %v5814_v59  ;;  %7743 = vrot.lane.b32.xlu1 %v26508_v13, %s30037_s4 }
 0x22e   : > { %7747 = vrot.lane.b32.xlu0 %v26216_v23, %s30009_s25  ;;  %23432 = vmatpush1.msk.msra.mxu0 %vm236_vm1, %v5820_v19 }
 0x22f   : > { %v5810_v4 = vpop.permute.xlu1 %5809  ;;  %23433 = vmatmul.mubr.msk.f32.vlgmr.msra.gmra.mrb[0].mxu0 %vm231_vm2, %v5808_v57 }
 0x230   : > { %v26722_v27 = vpop.permute.xlu0 %5817  ;;  %5905 = vmatprep.mubr.f32.mxu0 %v29939_v0 }
 0x231   : > { %30138 = vst [vmem:[#allocation38_spill] sm:$0xff] %v26722_v27  ;;  %23435 = vmatprep.subr.msk.mxu1 %vm236_vm1, %v26722_v27  ;;  %7745 = vrot.lane.b32.xlu1 %v7740_v29, %s30037_s4  ;;  %v26730_v36 = vsel %vm29934_vm13, %v5816_v18, %v26722_v27  ;;  %v7934_v27 = vld [vmem:[#allocation4 + $0x28] sm:$0xf]  ;;  %vm29944_vm13 = vcmask 547840   ;;  %s30209_s4 = smov 8  }
 0x232   : > { %30139 = vst [vmem:[#allocation39_spill] sm:$0xff] %v26730_v36  ;;  %7753 = vrot.lane.b32.xlu0 %v25635_v5, %s30009_s25  ;;  %23436 = vmatpush1.msk.msra.mxu1 %vm236_vm1, %v26730_v36 }
 0x233   : > { %23437 = vmatmul.mubr.msk.f32.vlgmr.msra.gmra.mrb[0].mxu1 %vm231_vm2, %v5808_v57  ;;  %v6010_v59 = vpop.permute.xlu1 %6009  ;;  %23434 = vmatmul.mubr.msk.f32.gmra.mrb[2].mxu0 %vm231_vm2, %v5810_v4 }
 0x234   : > { %v6008_v56 = vpop.permute.xlu0 %6007  ;;  %5982 = vmatprep.mubr.f32.mxu1 %v29939_v0  ;;  %6093 = vmatprep.mubr.f32.mxu0 %v29939_v0 }
 0x235   : > { %7945 = vrot.lane.b32.xlu1 %v26194_v17, %s29938_s30  ;;  %v26743_v29 = vsel %vm29937_vm12, %v6008_v56, %v6010_v59 }
 0x236   : > { %30140 = vst [vmem:[#allocation40_spill] sm:$0xff] %v26743_v29  ;;  %7943 = vrot.lane.b32.xlu0 %v25626_v3, %s29938_s30  ;;  %23439 = vmatprep.subr.msk.mxu0 %vm236_vm1, %v26743_v29 }
 0x237   : > { %23438 = vmatmul.mubr.msk.f32.gmra.mrb[2].mxu1 %vm231_vm2, %v5810_v4  ;;  %v6002_v18 = vpop.permute.xlu1 %6001 }
 0x238   : > { %v6006_v57 = vpop.permute.xlu0 %6005  ;;  %6170 = vmatprep.mubr.f32.mxu1 %v29939_v0 }
 0x239   : > { %v6014_v19 = vsel %vm29937_vm12, %v6006_v57, %v6008_v56  ;;  %7937 = vrot.lane.b32.xlu1 %v26508_v13, %s30026_s5 }
 0x23a   : > { %7941 = vrot.lane.b32.xlu0 %v26216_v23, %s29938_s30  ;;  %23440 = vmatpush1.msk.msra.mxu0 %vm236_vm1, %v6014_v19 }
 0x23b   : > { %v6004_v36 = vpop.permute.xlu1 %6003  ;;  %23441 = vmatmul.mubr.msk.f32.vlgmr.msra.gmra.mrb[0].mxu0 %vm231_vm2, %v6002_v18 }
 0x23c   : > { %v26758_v29 = vpop.permute.xlu0 %6011  ;;  %6099 = vmatprep.mubr.f32.mxu0 %v29939_v0 }
 0x23d   : > { %30141 = vst [vmem:[#allocation41_spill] sm:$0xff] %v26758_v29  ;;  %23443 = vmatprep.subr.msk.mxu1 %vm236_vm1, %v26758_v29  ;;  %7939 = vrot.lane.b32.xlu1 %v7934_v27, %s30026_s5  ;;  %v26766_v4 = vsel %vm29937_vm12, %v6010_v59, %v26758_v29  ;;  %vm29948_vm12 = vcmask 539648   ;;  %s30200_s5 = smov 122  }
 0x23e   : > { %30142 = vst [vmem:[#allocation42_spill] sm:$0xff] %v26766_v4  ;;  %7947 = vrot.lane.b32.xlu0 %v25635_v5, %s29938_s30  ;;  %23444 = vmatpush1.msk.msra.mxu1 %vm236_vm1, %v26766_v4  ;;  %s29950_s30 = smov 41  }
 0x23f   : > { %23445 = vmatmul.mubr.msk.f32.vlgmr.msra.gmra.mrb[0].mxu1 %vm231_vm2, %v6002_v18  ;;  %v6204_v56 = vpop.permute.xlu1 %6203  ;;  %23442 = vmatmul.mubr.msk.f32.gmra.mrb[2].mxu0 %vm231_vm2, %v6004_v36 }
 0x240   : > { %v6202_v57 = vpop.permute.xlu0 %6201  ;;  %6176 = vmatprep.mubr.f32.mxu1 %v29939_v0  ;;  %6287 = vmatprep.mubr.f32.mxu0 %v29939_v0 }
 0x241   : > { %8139 = vrot.lane.b32.xlu1 %v26194_v17, %s29957_s8  ;;  %v26779_v27 = vsel %vm29944_vm13, %v6202_v57, %v6204_v56  ;;  %v8128_v17 = vld [vmem:[#allocation4 + $0x28] sm:$0xf] }
 0x242   : > { %30143 = vst [vmem:[#allocation43_spill] sm:$0xff] %v26779_v27  ;;  %8137 = vrot.lane.b32.xlu0 %v25626_v3, %s29957_s8  ;;  %23447 = vmatprep.subr.msk.mxu0 %vm236_vm1, %v26779_v27 }
 0x243   : > { %23446 = vmatmul.mubr.msk.f32.gmra.mrb[2].mxu1 %vm231_vm2, %v6004_v36  ;;  %v6196_v59 = vpop.permute.xlu1 %6195 }
 0x244   : > { %v6200_v18 = vpop.permute.xlu0 %6199  ;;  %6364 = vmatprep.mubr.f32.mxu1 %v29939_v0 }
 0x245   : > { %v6208_v19 = vsel %vm29944_vm13, %v6200_v18, %v6202_v57  ;;  %8131 = vrot.lane.b32.xlu1 %v26508_v13, %s30005_s7 }
 0x246   : > { %8135 = vrot.lane.b32.xlu0 %v26216_v23, %s29957_s8  ;;  %23448 = vmatpush1.msk.msra.mxu0 %vm236_vm1, %v6208_v19 }
 0x247   : > { %v6198_v29 = vpop.permute.xlu1 %6197  ;;  %23449 = vmatmul.mubr.msk.f32.vlgmr.msra.gmra.mrb[0].mxu0 %vm231_vm2, %v6196_v59 }
 0x248   : > { %v26794_v36 = vpop.permute.xlu0 %6205  ;;  %6293 = vmatprep.mubr.f32.mxu0 %v29939_v0 }
 0x249   : > { %30144 = vst [vmem:[#allocation44_spill] sm:$0xff] %v26794_v36  ;;  %23451 = vmatprep.subr.msk.mxu1 %vm236_vm1, %v26794_v36  ;;  %8133 = vrot.lane.b32.xlu1 %v8128_v17, %s30005_s7  ;;  %v26802_v57 = vsel %vm29944_vm13, %v6204_v56, %v26794_v36  ;;  %v26813_v56 = vld [vmem:[%s25604_s26 + $0x8] sm:$0xff]  ;;  %v30149_v36 = vmov 0.0   ;;  %vm6591_vm13 = vcmask 408576   ;;  %s30008_s7 = smov 15  }
 0x24a   : > { %30145 = vst [vmem:[#allocation45_spill] sm:$0xff] %v26802_v57  ;;  %8141 = vrot.lane.b32.xlu0 %v25635_v5, %s29957_s8  ;;  %23452 = vmatpush1.msk.msra.mxu1 %vm236_vm1, %v26802_v57  ;;  %s30157_s8 = smov 72  }
 0x24b   : > { %23453 = vmatmul.mubr.msk.f32.vlgmr.msra.gmra.mrb[0].mxu1 %vm231_vm2, %v6196_v59  ;;  %v6392_v23 = vpop.permute.xlu1 %6391  ;;  %23450 = vmatmul.mubr.msk.f32.gmra.mrb[2].mxu0 %vm231_vm2, %v6198_v29 }
 0x24c   : > { %v6390_v18 = vpop.permute.xlu0 %6389  ;;  %6370 = vmatprep.mubr.f32.mxu1 %v29939_v0  ;;  %6477 = vmatprep.mubr.f32.mxu0 %v29939_v0 }
 0x24d   : > { %8333 = vrot.lane.b32.xlu1 %v26813_v56, %s29950_s30  ;;  %v26818_v19 = vsel %vm29948_vm12, %v6390_v18, %v6392_v23 }
 0x24e   : > { %30146 = vst [vmem:[#allocation46_spill] sm:$0xff] %v26818_v19  ;;  %8331 = vrot.lane.b32.xlu0 %v25626_v3, %s29950_s30  ;;  %23455 = vmatprep.subr.msk.mxu0 %vm236_vm1, %v26818_v19  ;;  %v8322_v19 = vld [vmem:[#allocation4 + $0x28] sm:$0xf] }
 0x24f   : > { %23454 = vmatmul.mubr.msk.f32.gmra.mrb[2].mxu1 %vm231_vm2, %v6198_v29  ;;  %v26825_v59 = vpop.permute.xlu1 %6393  ;;  %v26840_v29 = vld [vmem:[%s25604_s26] sm:$0xff] }
 0x250   : > { %30147 = vst [vmem:[#allocation47_spill] sm:$0xff] %v26825_v59  ;;  %v6388_v17 = vpop.permute.xlu0 %6387  ;;  %23459 = vmatprep.subr.msk.mxu1 %vm236_vm1, %v26825_v59  ;;  %v26831_v0 = vsel %vm29948_vm12, %v6392_v23, %v26825_v59  ;;  %6554 = vmatprep.mubr.f32.mxu1 %v30149_v36 }
 0x251   : > { %30148 = vst [vmem:[#allocation48_spill] sm:$0xff] %v26831_v0  ;;  %v6396_v27 = vsel %vm29948_vm12, %v6388_v17, %v6390_v18  ;;  %8325 = vrot.lane.b32.xlu1 %v26508_v13, %s29990_s9  ;;  %23460 = vmatpush1.msk.msra.mxu1 %vm236_vm1, %v26831_v0  ;;  %v6386_v17 = vld [vmem:[#allocation4 + $0x28] sm:$0xf]  ;;  %vm6785_vm12 = vcmask 400384  }
 0x252   : > { %8329 = vrot.lane.b32.xlu0 %v26840_v29, %s29950_s30  ;;  %23456 = vmatpush1.msk.msra.mxu0 %vm236_vm1, %v6396_v27 }
 0x253   : > { %v6588_v23 = vpop.permute.xlu1 %6587  ;;  %23457 = vmatmul.mubr.msk.f32.vlgmr.msra.gmra.mrb[0].mxu0 %vm231_vm2, %v26508_v13  ;;  %23461 = vmatmul.mubr.msk.f32.vlgmr.msra.gmra.mrb[0].mxu1 %vm231_vm2, %v26508_v13 }
 0x254   : > { %v6586_v18 = vpop.permute.xlu0 %6585  ;;  %6483 = vmatprep.mubr.f32.mxu0 %v30149_v36  ;;  %6560 = vmatprep.mubr.f32.mxu1 %v30149_v36 }
 0x255   : > { %8327 = vrot.lane.b32.xlu1 %v8322_v19, %s29990_s9  ;;  %v6593_v59 = vsel %vm6591_vm13, %v6586_v18, %v6588_v23  ;;  %s30000_s9 = smov 17  }
 0x256   : > { %8335 = vrot.lane.b32.xlu0 %v25635_v5, %s29950_s30  ;;  %23463 = vmatprep.subr.msk.mxu0 %vm236_vm1, %v6593_v59  ;;  %s25450_s30 = smov 23  }
 0x257   : > { %v6580_v27 = vpop.permute.xlu1 %6579  ;;  %23458 = vmatmul.mubr.msk.f32.gmra.mrb[2].mxu0 %vm231_vm2, %v6386_v17  ;;  %23462 = vmatmul.mubr.msk.f32.gmra.mrb[2].mxu1 %vm231_vm2, %v6386_v17 }
 0x258   : > { %v6584_v0 = vpop.permute.xlu0 %6583  ;;  %6671 = vmatprep.mubr.f32.mxu0 %v30149_v36  ;;  %6748 = vmatprep.mubr.f32.mxu1 %v30149_v36 }
 0x259   : > { %v6592_v57 = vsel %vm6591_vm13, %v6584_v0, %v6586_v18  ;;  %8527 = vrot.lane.b32.xlu1 %v26813_v56, %s30012_s28  ;;  %v8516_v0 = vld [vmem:[#allocation4 + $0x28] sm:$0xf] }
 0x25a   : > { %8525 = vrot.lane.b32.xlu0 %v25626_v3, %s30012_s28  ;;  %23464 = vmatpush1.msk.msra.mxu0 %vm236_vm1, %v6592_v57 }
 0x25b   : > { %v6582_v19 = vpop.permute.xlu1 %6581  ;;  %23465 = vmatmul.mubr.msk.f32.vlgmr.msra.gmra.mrb[0].mxu0 %vm231_vm2, %v6580_v27 }
 0x25c   : > { %v6590_v59 = vpop.permute.xlu0 %6589  ;;  %6677 = vmatprep.mubr.f32.mxu0 %v30149_v36 }
 0x25d   : > { %v6594_v17 = vsel %vm6591_vm13, %v6588_v23, %v6590_v59  ;;  %23467 = vmatprep.subr.msk.mxu1 %vm236_vm1, %v6590_v59  ;;  %8519 = vrot.lane.b32.xlu1 %v26508_v13, %s29986_s12  ;;  %vm29956_vm13 = vcmask 392192  }
 0x25e   : > { %8523 = vrot.lane.b32.xlu0 %v26840_v29, %s30012_s28  ;;  %23468 = vmatpush1.msk.msra.mxu1 %vm236_vm1, %v6594_v17 }
 0x25f   : > { %23469 = vmatmul.mubr.msk.f32.vlgmr.msra.gmra.mrb[0].mxu1 %vm231_vm2, %v6580_v27  ;;  %v6782_v57 = vpop.permute.xlu1 %6781  ;;  %23466 = vmatmul.mubr.msk.f32.gmra.mrb[2].mxu0 %vm231_vm2, %v6582_v19 }
 0x260   : > { %v6780_v18 = vpop.permute.xlu0 %6779  ;;  %6754 = vmatprep.mubr.f32.mxu1 %v30149_v36  ;;  %6865 = vmatprep.mubr.f32.mxu0 %v30149_v36 }
 0x261   : > { %8521 = vrot.lane.b32.xlu1 %v8516_v0, %s29986_s12  ;;  %v6787_v23 = vsel %vm6785_vm12, %v6780_v18, %v6782_v57  ;;  %s30175_s12 = smov 56  }
 0x262   : > { %8529 = vrot.lane.b32.xlu0 %v25635_v5, %s30012_s28  ;;  %23471 = vmatprep.subr.msk.mxu0 %vm236_vm1, %v6787_v23 }
 0x263   : > { %23470 = vmatmul.mubr.msk.f32.gmra.mrb[2].mxu1 %vm231_vm2, %v6582_v19  ;;  %v6774_v27 = vpop.permute.xlu1 %6773 }
 0x264   : > { %v6778_v59 = vpop.permute.xlu0 %6777  ;;  %6942 = vmatprep.mubr.f32.mxu1 %v30149_v36 }
 0x265   : > { %v6786_v17 = vsel %vm6785_vm12, %v6778_v59, %v6780_v18  ;;  %8722 = vrot.lane.b32.xlu1 %v26813_v56, %s30028_s6  ;;  %v26904_v59 = vld [vmem:[%s25604_s26 + $0x10] sm:$0xff] }
 0x266   : > { %8720 = vrot.lane.b32.xlu0 %v25626_v3, %s30028_s6  ;;  %23472 = vmatpush1.msk.msra.mxu0 %vm236_vm1, %v6786_v17 }
 0x267   : > { %v6776_v0 = vpop.permute.xlu1 %6775  ;;  %23473 = vmatmul.mubr.msk.f32.vlgmr.msra.gmra.mrb[0].mxu0 %vm231_vm2, %v6774_v27 }
 0x268   : > { %v6784_v23 = vpop.permute.xlu0 %6783  ;;  %6871 = vmatprep.mubr.f32.mxu0 %v30149_v36 }
 0x269   : > { %v6788_v19 = vsel %vm6785_vm12, %v6782_v57, %v6784_v23  ;;  %23475 = vmatprep.subr.msk.mxu1 %vm236_vm1, %v6784_v23  ;;  %8724 = vrot.lane.b32.xlu1 %v25635_v5, %s30028_s6  ;;  %v8710_v23 = vld [vmem:[#allocation4 + $0x28] sm:$0xf]  ;;  %vm29963_vm12 = vcmask 384000  }
 0x26a   : > { %8718 = vrot.lane.b32.xlu0 %v26840_v29, %s30028_s6  ;;  %23476 = vmatpush1.msk.msra.mxu1 %vm236_vm1, %v6788_v19 }
 0x26b   : > { %23477 = vmatmul.mubr.msk.f32.vlgmr.msra.gmra.mrb[0].mxu1 %vm231_vm2, %v6774_v27  ;;  %v6976_v18 = vpop.permute.xlu1 %6975  ;;  %23474 = vmatmul.mubr.msk.f32.gmra.mrb[2].mxu0 %vm231_vm2, %v6776_v0 }
 0x26c   : > { %v6974_v17 = vpop.permute.xlu0 %6973  ;;  %6948 = vmatprep.mubr.f32.mxu1 %v30149_v36  ;;  %7059 = vmatprep.mubr.f32.mxu0 %v30149_v36 }
 0x26d   : > { %8713 = vrot.lane.b32.xlu1 %v26508_v13, %s29979_s18  ;;  %v26911_v57 = vsel %vm29956_vm13, %v6974_v17, %v6976_v18 }
 0x26e   : > { %30150 = vst [vmem:[#allocation49_spill] sm:$0xff] %v26911_v57  ;;  %8726 = vrot.lane.b32.xlu0 %v26904_v59, %s30028_s6  ;;  %23479 = vmatprep.subr.msk.mxu0 %vm236_vm1, %v26911_v57 }
 0x26f   : > { %23478 = vmatmul.mubr.msk.f32.gmra.mrb[2].mxu1 %vm231_vm2, %v6776_v0  ;;  %v6968_v27 = vpop.permute.xlu1 %6967 }
 0x270   : > { %v6972_v19 = vpop.permute.xlu0 %6971  ;;  %7136 = vmatprep.mubr.f32.mxu1 %v30149_v36 }
 0x271   : > { %v6980_v4 = vsel %vm29956_vm13, %v6972_v19, %v6974_v17  ;;  %8917 = vrot.lane.b32.xlu1 %v25626_v3, %s25450_s30 }
 0x272   : > { %8715 = vrot.lane.b32.xlu0 %v8710_v23, %s29979_s18  ;;  %23480 = vmatpush1.msk.msra.mxu0 %vm236_vm1, %v6980_v4  ;;  %v8908_v23 = vld [vmem:[#allocation4 + $0x28] sm:$0xf]  ;;  %s30171_s18 = smov 60  }
 0x273   : > { %v6970_v45 = vpop.permute.xlu1 %6969  ;;  %23481 = vmatmul.mubr.msk.f32.vlgmr.msra.gmra.mrb[0].mxu0 %vm231_vm2, %v6968_v27 }
 0x274   : > { %v26924_v57 = vpop.permute.xlu0 %6977  ;;  %7065 = vmatprep.mubr.f32.mxu0 %v30149_v36 }
 0x275   : > { %30151 = vst [vmem:[#allocation50_spill] sm:$0xff] %v26924_v57  ;;  %23483 = vmatprep.subr.msk.mxu1 %vm236_vm1, %v26924_v57  ;;  %8915 = vrot.lane.b32.xlu1 %v26840_v29, %s25450_s30  ;;  %v26932_v0 = vsel %vm29956_vm13, %v6976_v18, %v26924_v57  ;;  %vm29967_vm13 = vcmask 375808  }
 0x276   : > { %30152 = vst [vmem:[#allocation51_spill] sm:$0xff] %v26932_v0  ;;  %8919 = vrot.lane.b32.xlu0 %v26813_v56, %s25450_s30  ;;  %23484 = vmatpush1.msk.msra.mxu1 %vm236_vm1, %v26932_v0 }
 0x277   : > { %23485 = vmatmul.mubr.msk.f32.vlgmr.msra.gmra.mrb[0].mxu1 %vm231_vm2, %v6968_v27  ;;  %v7170_v4 = vpop.permute.xlu1 %7169  ;;  %23482 = vmatmul.mubr.msk.f32.gmra.mrb[2].mxu0 %vm231_vm2, %v6970_v45 }
 0x278   : > { %v7168_v17 = vpop.permute.xlu0 %7167  ;;  %7142 = vmatprep.mubr.f32.mxu1 %v30149_v36  ;;  %7253 = vmatprep.mubr.f32.mxu0 %v30149_v36 }
 0x279   : > { %8923 = vrot.lane.b32.xlu1 %v26904_v59, %s25450_s30  ;;  %v26943_v18 = vsel %vm29963_vm12, %v7168_v17, %v7170_v4 }
 0x27a   : > { %30153 = vst [vmem:[#allocation52_spill] sm:$0xff] %v26943_v18  ;;  %8921 = vrot.lane.b32.xlu0 %v25635_v5, %s25450_s30  ;;  %23487 = vmatprep.subr.msk.mxu0 %vm236_vm1, %v26943_v18  ;;  %s29971_s30 = smov 22  }
 0x27b   : > { %23486 = vmatmul.mubr.msk.f32.gmra.mrb[2].mxu1 %vm231_vm2, %v6970_v45  ;;  %v7162_v27 = vpop.permute.xlu1 %7161 }
 0x27c   : > { %v7166_v19 = vpop.permute.xlu0 %7165  ;;  %7330 = vmatprep.mubr.f32.mxu1 %v30149_v36 }
 0x27d   : > { %v7174_v57 = vsel %vm29963_vm12, %v7166_v19, %v7168_v17  ;;  %8913 = vrot.lane.b32.xlu1 %v8908_v23, %s29961_s11 }
 0x27e   : > { %8911 = vrot.lane.b32.xlu0 %v26508_v13, %s29961_s11  ;;  %23488 = vmatpush1.msk.msra.mxu0 %vm236_vm1, %v7174_v57  ;;  %s29968_s11 = smov 21  }
 0x27f   : > { %v7164_v0 = vpop.permute.xlu1 %7163  ;;  %23489 = vmatmul.mubr.msk.f32.vlgmr.msra.gmra.mrb[0].mxu0 %vm231_vm2, %v7162_v27 }
 0x280   : > { %v26956_v18 = vpop.permute.xlu0 %7171  ;;  %7259 = vmatprep.mubr.f32.mxu0 %v30149_v36 }
 0x281   : > { %30154 = vst [vmem:[#allocation53_spill] sm:$0xff] %v26956_v18  ;;  %23491 = vmatprep.subr.msk.mxu1 %vm236_vm1, %v26956_v18  ;;  %9116 = vrot.lane.b32.xlu1 %v26813_v56, %s29971_s30  ;;  %v26965_v45 = vsel %vm29963_vm12, %v7170_v4, %v26956_v18  ;;  %vm29972_vm12 = vcmask 367616  }
 0x282   : > { %30155 = vst [vmem:[#allocation54_spill] sm:$0xff] %v26965_v45  ;;  %9114 = vrot.lane.b32.xlu0 %v25626_v3, %s29971_s30  ;;  %23492 = vmatpush1.msk.msra.mxu1 %vm236_vm1, %v26965_v45 }
 0x283   : > { %23493 = vmatmul.mubr.msk.f32.vlgmr.msra.gmra.mrb[0].mxu1 %vm231_vm2, %v7162_v27  ;;  %v7364_v57 = vpop.permute.xlu1 %7363  ;;  %23490 = vmatmul.mubr.msk.f32.gmra.mrb[2].mxu0 %vm231_vm2, %v7164_v0 }
 0x284   : > { %v7362_v17 = vpop.permute.xlu0 %7361  ;;  %7336 = vmatprep.mubr.f32.mxu1 %v30149_v36  ;;  %7447 = vmatprep.mubr.f32.mxu0 %v30149_v36 }
 0x285   : > { %9118 = vrot.lane.b32.xlu1 %v25635_v5, %s29971_s30  ;;  %v26978_v4 = vsel %vm29967_vm13, %v7362_v17, %v7364_v57 }
 0x286   : > { %30156 = vst [vmem:[#allocation55_spill] sm:$0xff] %v26978_v4  ;;  %9112 = vrot.lane.b32.xlu0 %v26840_v29, %s29971_s30  ;;  %23495 = vmatprep.subr.msk.mxu0 %vm236_vm1, %v26978_v4  ;;  %v9105_v4 = vld [vmem:[#allocation4 + $0x28] sm:$0xf] }
 0x287   : > { %23494 = vmatmul.mubr.msk.f32.gmra.mrb[2].mxu1 %vm231_vm2, %v7164_v0  ;;  %v7356_v23 = vpop.permute.xlu1 %7355 }
 0x288   : > { %v7360_v27 = vpop.permute.xlu0 %7359  ;;  %7524 = vmatprep.mubr.f32.mxu1 %v30149_v36 }
 0x289   : > { %v7368_v19 = vsel %vm29967_vm13, %v7360_v27, %v7362_v17  ;;  %9108 = vrot.lane.b32.xlu1 %v26508_v13, %s30157_s8 }
 0x28a   : > { %9120 = vrot.lane.b32.xlu0 %v26904_v59, %s29971_s30  ;;  %23496 = vmatpush1.msk.msra.mxu0 %vm236_vm1, %v7368_v19  ;;  %s30166_s30 = smov 64  }
 0x28b   : > { %v7358_v18 = vpop.permute.xlu1 %7357  ;;  %23497 = vmatmul.mubr.msk.f32.vlgmr.msra.gmra.mrb[0].mxu0 %vm231_vm2, %v7356_v23 }
 0x28c   : > { %v26993_v45 = vpop.permute.xlu0 %7365  ;;  %7453 = vmatprep.mubr.f32.mxu0 %v30149_v36 }
 0x28d   : > { %30158 = vst [vmem:[#allocation56_spill] sm:$0xff] %v26993_v45  ;;  %23499 = vmatprep.subr.msk.mxu1 %vm236_vm1, %v26993_v45  ;;  %9311 = vrot.lane.b32.xlu1 %v25626_v3, %s29968_s11  ;;  %v27002_v0 = vsel %vm29967_vm13, %v7364_v57, %v26993_v45  ;;  %v9302_v45 = vld [vmem:[#allocation4 + $0x28] sm:$0xf]  ;;  %vm29977_vm13 = vcmask 359424  }
 0x28e   : > { %30159 = vst [vmem:[#allocation57_spill] sm:$0xff] %v27002_v0  ;;  %9110 = vrot.lane.b32.xlu0 %v9105_v4, %s30157_s8  ;;  %23500 = vmatpush1.msk.msra.mxu1 %vm236_vm1, %v27002_v0 }
 0x28f   : > { %23501 = vmatmul.mubr.msk.f32.vlgmr.msra.gmra.mrb[0].mxu1 %vm231_vm2, %v7356_v23  ;;  %v7558_v17 = vpop.permute.xlu1 %7557  ;;  %23498 = vmatmul.mubr.msk.f32.gmra.mrb[2].mxu0 %vm231_vm2, %v7358_v18 }
 0x290   : > { %v7556_v27 = vpop.permute.xlu0 %7555  ;;  %7530 = vmatprep.mubr.f32.mxu1 %v30149_v36  ;;  %7641 = vmatprep.mubr.f32.mxu0 %v30149_v36 }
 0x291   : > { %9309 = vrot.lane.b32.xlu1 %v26840_v29, %s29968_s11  ;;  %v27014_v57 = vsel %vm29972_vm12, %v7556_v27, %v7558_v17 }
 0x292   : > { %30160 = vst [vmem:[#allocation58_spill] sm:$0xff] %v27014_v57  ;;  %9313 = vrot.lane.b32.xlu0 %v26813_v56, %s29968_s11  ;;  %23503 = vmatprep.subr.msk.mxu0 %vm236_vm1, %v27014_v57 }
 0x293   : > { %23502 = vmatmul.mubr.msk.f32.gmra.mrb[2].mxu1 %vm231_vm2, %v7358_v18  ;;  %v7550_v4 = vpop.permute.xlu1 %7549 }
 0x294   : > { %v7554_v23 = vpop.permute.xlu0 %7553  ;;  %7718 = vmatprep.mubr.f32.mxu1 %v30149_v36 }
 0x295   : > { %v7562_v19 = vsel %vm29972_vm12, %v7554_v23, %v7556_v27  ;;  %9317 = vrot.lane.b32.xlu1 %v26904_v59, %s29968_s11 }
 0x296   : > { %9315 = vrot.lane.b32.xlu0 %v25635_v5, %s29968_s11  ;;  %23504 = vmatpush1.msk.msra.mxu0 %vm236_vm1, %v7562_v19  ;;  %s30163_s11 = smov 20  }
 0x297   : > { %v7552_v0 = vpop.permute.xlu1 %7551  ;;  %23505 = vmatmul.mubr.msk.f32.vlgmr.msra.gmra.mrb[0].mxu0 %vm231_vm2, %v7550_v4 }
 0x298   : > { %v27029_v57 = vpop.permute.xlu0 %7559  ;;  %7647 = vmatprep.mubr.f32.mxu0 %v30149_v36 }
 0x299   : > { %30161 = vst [vmem:[#allocation59_spill] sm:$0xff] %v27029_v57  ;;  %23507 = vmatprep.subr.msk.mxu1 %vm236_vm1, %v27029_v57  ;;  %9307 = vrot.lane.b32.xlu1 %v9302_v45, %s29973_s19  ;;  %v27037_v18 = vsel %vm29972_vm12, %v7558_v17, %v27029_v57  ;;  %vm29985_vm12 = vcmask 351232  }
 0x29a   : > { %30162 = vst [vmem:[#allocation60_spill] sm:$0xff] %v27037_v18  ;;  %9305 = vrot.lane.b32.xlu0 %v26508_v13, %s29973_s19  ;;  %23508 = vmatpush1.msk.msra.mxu1 %vm236_vm1, %v27037_v18  ;;  %s29983_s19 = smov 19  }
 0x29b   : > { %23509 = vmatmul.mubr.msk.f32.vlgmr.msra.gmra.mrb[0].mxu1 %vm231_vm2, %v7550_v4  ;;  %v7752_v27 = vpop.permute.xlu1 %7751  ;;  %23506 = vmatmul.mubr.msk.f32.gmra.mrb[2].mxu0 %vm231_vm2, %v7552_v0 }
 0x29c   : > { %v7750_v23 = vpop.permute.xlu0 %7749  ;;  %7724 = vmatprep.mubr.f32.mxu1 %v30149_v36  ;;  %7835 = vmatprep.mubr.f32.mxu0 %v30149_v36 }
 0x29d   : > { %9510 = vrot.lane.b32.xlu1 %v26813_v56, %s30163_s11  ;;  %v27050_v45 = vsel %vm29977_vm13, %v7750_v23, %v7752_v27 }
 0x29e   : > { %30164 = vst [vmem:[#allocation61_spill] sm:$0xff] %v27050_v45  ;;  %9508 = vrot.lane.b32.xlu0 %v25626_v3, %s30163_s11  ;;  %23511 = vmatprep.subr.msk.mxu0 %vm236_vm1, %v27050_v45 }
 0x29f   : > { %23510 = vmatmul.mubr.msk.f32.gmra.mrb[2].mxu1 %vm231_vm2, %v7552_v0  ;;  %v7744_v17 = vpop.permute.xlu1 %7743 }
 0x2a0   : > { %v7748_v4 = vpop.permute.xlu0 %7747  ;;  %7912 = vmatprep.mubr.f32.mxu1 %v30149_v36 }
 0x2a1   : > { %v7756_v19 = vsel %vm29977_vm13, %v7748_v4, %v7750_v23  ;;  %9512 = vrot.lane.b32.xlu1 %v25635_v5, %s30163_s11  ;;  %v9499_v4 = vld [vmem:[#allocation4 + $0x28] sm:$0xf] }
 0x2a2   : > { %9506 = vrot.lane.b32.xlu0 %v26840_v29, %s30163_s11  ;;  %23512 = vmatpush1.msk.msra.mxu0 %vm236_vm1, %v7756_v19 }
 0x2a3   : > { %v7746_v57 = vpop.permute.xlu1 %7745  ;;  %23513 = vmatmul.mubr.msk.f32.vlgmr.msra.gmra.mrb[0].mxu0 %vm231_vm2, %v7744_v17 }
 0x2a4   : > { %v27065_v45 = vpop.permute.xlu0 %7753  ;;  %7841 = vmatprep.mubr.f32.mxu0 %v30149_v36 }
 0x2a5   : > { %30165 = vst [vmem:[#allocation62_spill] sm:$0xff] %v27065_v45  ;;  %23515 = vmatprep.subr.msk.mxu1 %vm236_vm1, %v27065_v45  ;;  %9502 = vrot.lane.b32.xlu1 %v26508_v13, %s30166_s30  ;;  %v27074_v0 = vsel %vm29977_vm13, %v7752_v27, %v27065_v45  ;;  %vm29994_vm13 = vcmask 343040  }
 0x2a6   : > { %30167 = vst [vmem:[#allocation63_spill] sm:$0xff] %v27074_v0  ;;  %9514 = vrot.lane.b32.xlu0 %v26904_v59, %s30163_s11  ;;  %23516 = vmatpush1.msk.msra.mxu1 %vm236_vm1, %v27074_v0 }
 0x2a7   : > { %23517 = vmatmul.mubr.msk.f32.vlgmr.msra.gmra.mrb[0].mxu1 %vm231_vm2, %v7744_v17  ;;  %v7946_v23 = vpop.permute.xlu1 %7945  ;;  %23514 = vmatmul.mubr.msk.f32.gmra.mrb[2].mxu0 %vm231_vm2, %v7746_v57 }
 0x2a8   : > { %v7944_v19 = vpop.permute.xlu0 %7943  ;;  %7918 = vmatprep.mubr.f32.mxu1 %v30149_v36  ;;  %8029 = vmatprep.mubr.f32.mxu0 %v30149_v36 }
 0x2a9   : > { %9705 = vrot.lane.b32.xlu1 %v25626_v3, %s29983_s19  ;;  %v27087_v13 = vsel %vm29985_vm12, %v7944_v19, %v7946_v23 }
 0x2aa   : > { %30168 = vst [vmem:[#allocation64_spill] sm:$0xff] %v27087_v13  ;;  %9504 = vrot.lane.b32.xlu0 %v9499_v4, %s30166_s30  ;;  %23519 = vmatprep.subr.msk.mxu0 %vm236_vm1, %v27087_v13 }
 0x2ab   : > { %23518 = vmatmul.mubr.msk.f32.gmra.mrb[2].mxu1 %vm231_vm2, %v7746_v57  ;;  %v7938_v27 = vpop.permute.xlu1 %7937 }
 0x2ac   : > { %v7942_v17 = vpop.permute.xlu0 %7941  ;;  %8106 = vmatprep.mubr.f32.mxu1 %v30149_v36 }
 0x2ad   : > { %v7950_v45 = vsel %vm29985_vm12, %v7942_v17, %v7944_v19  ;;  %9703 = vrot.lane.b32.xlu1 %v26840_v29, %s29983_s19  ;;  %v27118_v17 = vld [vmem:[#allocation4 + $0x8] sm:$0xff] }
 0x2ae   : > { %9707 = vrot.lane.b32.xlu0 %v26813_v56, %s29983_s19  ;;  %23520 = vmatpush1.msk.msra.mxu0 %vm236_vm1, %v7950_v45  ;;  %v9696_v45 = vld [vmem:[#allocation4 + $0x28] sm:$0xf] }
 0x2af   : > { %v7940_v4 = vpop.permute.xlu1 %7939  ;;  %23521 = vmatmul.mubr.msk.f32.vlgmr.msra.gmra.mrb[0].mxu0 %vm231_vm2, %v7938_v27 }
 0x2b0   : > { %v27101_v13 = vpop.permute.xlu0 %7947  ;;  %8035 = vmatprep.mubr.f32.mxu0 %v30149_v36 }
 0x2b1   : > { %30169 = vst [vmem:[#allocation65_spill] sm:$0xff] %v27101_v13  ;;  %23523 = vmatprep.subr.msk.mxu1 %vm236_vm1, %v27101_v13  ;;  %9711 = vrot.lane.b32.xlu1 %v26904_v59, %s29983_s19  ;;  %v27110_v57 = vsel %vm29985_vm12, %v7946_v23, %v27101_v13  ;;  %vm30001_vm12 = vcmask 334848  }
 0x2b2   : > { %30170 = vst [vmem:[#allocation66_spill] sm:$0xff] %v27110_v57  ;;  %9709 = vrot.lane.b32.xlu0 %v25635_v5, %s29983_s19  ;;  %23524 = vmatpush1.msk.msra.mxu1 %vm236_vm1, %v27110_v57  ;;  %s29996_s19 = smov 18  }
 0x2b3   : > { %23525 = vmatmul.mubr.msk.f32.vlgmr.msra.gmra.mrb[0].mxu1 %vm231_vm2, %v7938_v27  ;;  %v8140_v19 = vpop.permute.xlu1 %8139  ;;  %23522 = vmatmul.mubr.msk.f32.gmra.mrb[2].mxu0 %vm231_vm2, %v7940_v4 }
 0x2b4   : > { %v8138_v0 = vpop.permute.xlu0 %8137  ;;  %8112 = vmatprep.mubr.f32.mxu1 %v30149_v36  ;;  %8223 = vmatprep.mubr.f32.mxu0 %v30149_v36 }
 0x2b5   : > { %9701 = vrot.lane.b32.xlu1 %v9696_v45, %s30171_s18  ;;  %v27124_v23 = vsel %vm29994_vm13, %v8138_v0, %v8140_v19 }
 0x2b6   : > { %30172 = vst [vmem:[#allocation67_spill] sm:$0xff] %v27124_v23  ;;  %9699 = vrot.lane.b32.xlu0 %v27118_v17, %s30171_s18  ;;  %23527 = vmatprep.subr.msk.mxu0 %vm236_vm1, %v27124_v23 }
 0x2b7   : > { %23526 = vmatmul.mubr.msk.f32.gmra.mrb[2].mxu1 %vm231_vm2, %v7940_v4  ;;  %v8132_v27 = vpop.permute.xlu1 %8131 }
 0x2b8   : > { %v8136_v13 = vpop.permute.xlu0 %8135  ;;  %8300 = vmatprep.mubr.f32.mxu1 %v30149_v36 }
 0x2b9   : > { %v8144_v57 = vsel %vm29994_vm13, %v8136_v13, %v8138_v0  ;;  %9904 = vrot.lane.b32.xlu1 %v26813_v56, %s29996_s19 }
 0x2ba   : > { %9902 = vrot.lane.b32.xlu0 %v25626_v3, %s29996_s19  ;;  %23528 = vmatpush1.msk.msra.mxu0 %vm236_vm1, %v8144_v57 }
 0x2bb   : > { %v8134_v45 = vpop.permute.xlu1 %8133  ;;  %23529 = vmatmul.mubr.msk.f32.vlgmr.msra.gmra.mrb[0].mxu0 %vm231_vm2, %v8132_v27 }
 0x2bc   : > { %v27139_v23 = vpop.permute.xlu0 %8141  ;;  %8229 = vmatprep.mubr.f32.mxu0 %v30149_v36 }
 0x2bd   : > { %30173 = vst [vmem:[#allocation68_spill] sm:$0xff] %v27139_v23  ;;  %23531 = vmatprep.subr.msk.mxu1 %vm236_vm1, %v27139_v23  ;;  %9906 = vrot.lane.b32.xlu1 %v25635_v5, %s29996_s19  ;;  %v27148_v0 = vsel %vm29994_vm13, %v8140_v19, %v27139_v23  ;;  %vm30007_vm13 = vcmask 326656  }
 0x2be   : > { %30174 = vst [vmem:[#allocation69_spill] sm:$0xff] %v27148_v0  ;;  %9900 = vrot.lane.b32.xlu0 %v26840_v29, %s29996_s19  ;;  %23532 = vmatpush1.msk.msra.mxu1 %vm236_vm1, %v27148_v0 }
 0x2bf   : > { %23533 = vmatmul.mubr.msk.f32.vlgmr.msra.gmra.mrb[0].mxu1 %vm231_vm2, %v8132_v27  ;;  %v8334_v13 = vpop.permute.xlu1 %8333  ;;  %23530 = vmatmul.mubr.msk.f32.gmra.mrb[2].mxu0 %vm231_vm2, %v8134_v45  ;;  %v9893_v27 = vld [vmem:[#allocation4 + $0x28] sm:$0xf] }
 0x2c0   : > { %v8332_v4 = vpop.permute.xlu0 %8331  ;;  %8306 = vmatprep.mubr.f32.mxu1 %v30149_v36  ;;  %8417 = vmatprep.mubr.f32.mxu0 %v30149_v36 }
 0x2c1   : > { %9896 = vrot.lane.b32.xlu1 %v27118_v17, %s30175_s12  ;;  %v27161_v57 = vsel %vm30001_vm12, %v8332_v4, %v8334_v13 }
 0x2c2   : > { %30176 = vst [vmem:[#allocation70_spill] sm:$0xff] %v27161_v57  ;;  %9908 = vrot.lane.b32.xlu0 %v26904_v59, %s29996_s19  ;;  %23535 = vmatprep.subr.msk.mxu0 %vm236_vm1, %v27161_v57  ;;  %s30180_s19 = smov 52  }
 0x2c3   : > { %23534 = vmatmul.mubr.msk.f32.gmra.mrb[2].mxu1 %vm231_vm2, %v8134_v45  ;;  %v8326_v19 = vpop.permute.xlu1 %8325 }
 0x2c4   : > { %v8330_v23 = vpop.permute.xlu0 %8329  ;;  %8494 = vmatprep.mubr.f32.mxu1 %v30149_v36 }
 0x2c5   : > { %v8338_v0 = vsel %vm30001_vm12, %v8330_v23, %v8332_v4  ;;  %10099 = vrot.lane.b32.xlu1 %v25626_v3, %s30000_s9  ;;  %v10090_v4 = vld [vmem:[#allocation4 + $0x28] sm:$0xf] }
 0x2c6   : > { %9898 = vrot.lane.b32.xlu0 %v9893_v27, %s30175_s12  ;;  %23536 = vmatpush1.msk.msra.mxu0 %vm236_vm1, %v8338_v0 }
 0x2c7   : > { %v8328_v18 = vpop.permute.xlu1 %8327  ;;  %23537 = vmatmul.mubr.msk.f32.vlgmr.msra.gmra.mrb[0].mxu0 %vm231_vm2, %v8326_v19 }
 0x2c8   : > { %v27175_v57 = vpop.permute.xlu0 %8335  ;;  %8423 = vmatprep.mubr.f32.mxu0 %v30149_v36 }
 0x2c9   : > { %30177 = vst [vmem:[#allocation71_spill] sm:$0xff] %v27175_v57  ;;  %23539 = vmatprep.subr.msk.mxu1 %vm236_vm1, %v27175_v57  ;;  %10097 = vrot.lane.b32.xlu1 %v26840_v29, %s30000_s9  ;;  %v27184_v23 = vsel %vm30001_vm12, %v8334_v13, %v27175_v57  ;;  %vm8728_vm12 = vcmask 195584  }
 0x2ca   : > { %30178 = vst [vmem:[#allocation72_spill] sm:$0xff] %v27184_v23  ;;  %10101 = vrot.lane.b32.xlu0 %v26813_v56, %s30000_s9  ;;  %23540 = vmatpush1.msk.msra.mxu1 %vm236_vm1, %v27184_v23 }
 0x2cb   : > { %23541 = vmatmul.mubr.msk.f32.vlgmr.msra.gmra.mrb[0].mxu1 %vm231_vm2, %v8326_v19  ;;  %v8528_v45 = vpop.permute.xlu1 %8527  ;;  %23538 = vmatmul.mubr.msk.f32.gmra.mrb[2].mxu0 %vm231_vm2, %v8328_v18 }
 0x2cc   : > { %v8526_v0 = vpop.permute.xlu0 %8525  ;;  %8500 = vmatprep.mubr.f32.mxu1 %v30149_v36  ;;  %8611 = vmatprep.mubr.f32.mxu0 %v30149_v36 }
 0x2cd   : > { %10105 = vrot.lane.b32.xlu1 %v26904_v59, %s30000_s9  ;;  %v27197_v13 = vsel %vm30007_vm13, %v8526_v0, %v8528_v45 }
 0x2ce   : > { %30179 = vst [vmem:[#allocation73_spill] sm:$0xff] %v27197_v13  ;;  %10103 = vrot.lane.b32.xlu0 %v25635_v5, %s30000_s9  ;;  %23543 = vmatprep.subr.msk.mxu0 %vm236_vm1, %v27197_v13  ;;  %s30182_s9 = smov 16  }
 0x2cf   : > { %23542 = vmatmul.mubr.msk.f32.gmra.mrb[2].mxu1 %vm231_vm2, %v8328_v18  ;;  %v8520_v19 = vpop.permute.xlu1 %8519 }
 0x2d0   : > { %v8524_v27 = vpop.permute.xlu0 %8523  ;;  %8688 = vmatprep.mubr.f32.mxu1 %v30149_v36 }
 0x2d1   : > { %v8532_v57 = vsel %vm30007_vm13, %v8524_v27, %v8526_v0  ;;  %10095 = vrot.lane.b32.xlu1 %v10090_v4, %s30180_s19 }
 0x2d2   : > { %10093 = vrot.lane.b32.xlu0 %v27118_v17, %s30180_s19  ;;  %23544 = vmatpush1.msk.msra.mxu0 %vm236_vm1, %v8532_v57 }
 0x2d3   : > { %v8522_v23 = vpop.permute.xlu1 %8521  ;;  %23545 = vmatmul.mubr.msk.f32.vlgmr.msra.gmra.mrb[0].mxu0 %vm231_vm2, %v8520_v19 }
 0x2d4   : > { %v27211_v13 = vpop.permute.xlu0 %8529  ;;  %8617 = vmatprep.mubr.f32.mxu0 %v30149_v36 }
 0x2d5   : > { %30181 = vst [vmem:[#allocation74_spill] sm:$0xff] %v27211_v13  ;;  %23547 = vmatprep.subr.msk.mxu1 %vm236_vm1, %v27211_v13  ;;  %10298 = vrot.lane.b32.xlu1 %v26813_v56, %s30182_s9  ;;  %v27220_v18 = vsel %vm30007_vm13, %v8528_v45, %v27211_v13  ;;  %vm8925_vm13 = vcmask 187392  }
 0x2d6   : > { %30183 = vst [vmem:[#allocation75_spill] sm:$0xff] %v27220_v18  ;;  %10296 = vrot.lane.b32.xlu0 %v25626_v3, %s30182_s9  ;;  %23548 = vmatpush1.msk.msra.mxu1 %vm236_vm1, %v27220_v18  ;;  %v10287_v18 = vld [vmem:[#allocation4 + $0x28] sm:$0xf] }
 0x2d7   : > { %23549 = vmatmul.mubr.msk.f32.vlgmr.msra.gmra.mrb[0].mxu1 %vm231_vm2, %v8520_v19  ;;  %v8723_v57 = vpop.permute.xlu1 %8722  ;;  %23546 = vmatmul.mubr.msk.f32.gmra.mrb[2].mxu0 %vm231_vm2, %v8522_v23 }
 0x2d8   : > { %v8721_v0 = vpop.permute.xlu0 %8720  ;;  %8694 = vmatprep.mubr.f32.mxu1 %v30149_v36  ;;  %8809 = vmatprep.mubr.f32.mxu0 %v30149_v36 }
 0x2d9   : > { %10300 = vrot.lane.b32.xlu1 %v25635_v5, %s30182_s9  ;;  %v8730_v45 = vsel %vm8728_vm12, %v8721_v0, %v8723_v57 }
 0x2da   : > { %10294 = vrot.lane.b32.xlu0 %v26840_v29, %s30182_s9  ;;  %23551 = vmatprep.subr.msk.mxu0 %vm236_vm1, %v8730_v45 }
 0x2db   : > { %23550 = vmatmul.mubr.msk.f32.gmra.mrb[2].mxu1 %vm231_vm2, %v8522_v23  ;;  %v8725_v4 = vpop.permute.xlu1 %8724 }
 0x2dc   : > { %v8719_v19 = vpop.permute.xlu0 %8718  ;;  %8886 = vmatprep.mubr.f32.mxu1 %v30149_v36 }
 0x2dd   : > { %v8729_v27 = vsel %vm8728_vm12, %v8719_v19, %v8721_v0  ;;  %10290 = vrot.lane.b32.xlu1 %v27118_v17, %s30014_s20  ;;  %v8731_v0 = vsel %vm8728_vm12, %v8723_v57, %v8725_v4 }
 0x2de   : > { %10302 = vrot.lane.b32.xlu0 %v26904_v59, %s30182_s9  ;;  %23552 = vmatpush1.msk.msra.mxu0 %vm236_vm1, %v8729_v27 }
 0x2df   : > { %v8714_v13 = vpop.permute.xlu1 %8713 }
 0x2e0   : > { %v8727_v37 = vpop.permute.xlu0 %8726  ;;  %23553 = vmatmul.mubr.msk.f32.vlgmr.msra.gmra.mrb[0].mxu0 %vm231_vm2, %v8714_v13 }
 0x2e1   : > { %v8732_v23 = vsel %vm8728_vm12, %v8725_v4, %v8727_v37  ;;  %10493 = vrot.lane.b32.xlu1 %v25626_v3, %s30008_s7  ;;  %8815 = vmatprep.mubr.f32.mxu0 %v30149_v36  ;;  %v10484_v4 = vld [vmem:[#allocation4 + $0x28] sm:$0xf]  ;;  %vm30018_vm12 = vcmask 171008  }
 0x2e2   : > { %10292 = vrot.lane.b32.xlu0 %v10287_v18, %s30014_s20  ;;  %23555 = vmatprep.subr.msk.mxu1 %vm236_vm1, %v8732_v23  ;;  %s30191_s20 = smov 32  }
 0x2e3   : > { %23556 = vmatpush1.msk.msra.mxu1 %vm236_vm1, %v8731_v0  ;;  %v8918_v45 = vpop.permute.xlu1 %8917 }
 0x2e4   : > { %23557 = vmatmul.mubr.msk.f32.vlgmr.msra.gmra.mrb[0].mxu1 %vm231_vm2, %v8714_v13  ;;  %v8716_v19 = vpop.permute.xlu0 %8715 }
 0x2e5   : > { %23554 = vmatmul.mubr.msk.f32.gmra.mrb[2].mxu0 %vm231_vm2, %v8716_v19  ;;  %10491 = vrot.lane.b32.xlu1 %v26840_v29, %s30008_s7 }
 0x2e6   : > { %10495 = vrot.lane.b32.xlu0 %v26813_v56, %s30008_s7  ;;  %8892 = vmatprep.mubr.f32.mxu1 %v30149_v36 }
 0x2e7   : > { %v8916_v37 = vpop.permute.xlu1 %8915  ;;  %9006 = vmatprep.mubr.f32.mxu0 %v30149_v36 }
 0x2e8   : > { %v8926_v18 = vsel %vm8925_vm13, %v8916_v37, %v8918_v45  ;;  %23558 = vmatmul.mubr.msk.f32.gmra.mrb[2].mxu1 %vm231_vm2, %v8716_v19  ;;  %v8920_v13 = vpop.permute.xlu0 %8919 }
 0x2e9   : > { %10499 = vrot.lane.b32.xlu1 %v26904_v59, %s30008_s7  ;;  %v8927_v57 = vsel %vm8925_vm13, %v8918_v45, %v8920_v13  ;;  %9083 = vmatprep.mubr.f32.mxu1 %v30149_v36 }
 0x2ea   : > { %10497 = vrot.lane.b32.xlu0 %v25635_v5, %s30008_s7  ;;  %23559 = vmatprep.subr.msk.mxu0 %vm236_vm1, %v8927_v57  ;;  %s30011_s7 = smov 14  }
 0x2eb   : > { %23560 = vmatpush1.msk.msra.mxu0 %vm236_vm1, %v8926_v18  ;;  %v8924_v27 = vpop.permute.xlu1 %8923 }
 0x2ec   : > { %v8922_v23 = vpop.permute.xlu0 %8921 }
 0x2ed   : > { %v8928_v0 = vsel %vm8925_vm13, %v8920_v13, %v8922_v23  ;;  %10489 = vrot.lane.b32.xlu1 %v10484_v4, %s30009_s25  ;;  %v8929_v19 = vsel %vm8925_vm13, %v8922_v23, %v8924_v27  ;;  %vm9122_vm13 = vcmask 179200   ;;  %v10681_v23 = vld [vmem:[#allocation4 + $0x28] sm:$0xf] }
 0x2ee   : > { %10487 = vrot.lane.b32.xlu0 %v27118_v17, %s30009_s25  ;;  %23563 = vmatprep.subr.msk.mxu1 %vm236_vm1, %v8929_v19  ;;  %s30187_s25 = smov 36  }
 0x2ef   : > { %23564 = vmatpush1.msk.msra.mxu1 %vm236_vm1, %v8928_v0  ;;  %v8914_v45 = vpop.permute.xlu1 %8913 }
 0x2f0   : > { %v8912_v37 = vpop.permute.xlu0 %8911 }
 0x2f1   : > { %23561 = vmatmul.mubr.msk.f32.vlgmr.msra.gmra.mrb[0].mxu0 %vm231_vm2, %v8912_v37  ;;  %23565 = vmatmul.mubr.msk.f32.vlgmr.msra.gmra.mrb[0].mxu1 %vm231_vm2, %v8912_v37 }
 0x2f2   : > { %10692 = vrot.lane.b32.xlu1 %v26813_v56, %s30011_s7  ;;  %10690 = vrot.lane.b32.xlu0 %v25626_v3, %s30011_s7 }
 0x2f3   : > { %v9117_v18 = vpop.permute.xlu1 %9116  ;;  %9012 = vmatprep.mubr.f32.mxu0 %v30149_v36  ;;  %9089 = vmatprep.mubr.f32.mxu1 %v30149_v36 }
 0x2f4   : > { %v9115_v13 = vpop.permute.xlu0 %9114 }
 0x2f5   : > { %23562 = vmatmul.mubr.msk.f32.gmra.mrb[2].mxu0 %vm231_vm2, %v8914_v45  ;;  %23566 = vmatmul.mubr.msk.f32.gmra.mrb[2].mxu1 %vm231_vm2, %v8914_v45  ;;  %v27289_v57 = vsel %vm9122_vm13, %v9115_v13, %v9117_v18 }
 0x2f6   : > { %30184 = vst [vmem:[#allocation76_spill] sm:$0xff] %v27289_v57  ;;  %10694 = vrot.lane.b32.xlu1 %v25635_v5, %s30011_s7  ;;  %10688 = vrot.lane.b32.xlu0 %v26840_v29, %s30011_s7 }
 0x2f7   : > { %23567 = vmatprep.subr.msk.mxu0 %vm236_vm1, %v27289_v57  ;;  %v9119_v56 = vpop.permute.xlu1 %9118  ;;  %9203 = vmatprep.mubr.f32.mxu0 %v30149_v36 }
 0x2f8   : > { %v9113_v4 = vpop.permute.xlu0 %9112  ;;  %9280 = vmatprep.mubr.f32.mxu1 %v30149_v36  ;;  %v27317_v45 = vsel %vm9122_vm13, %v9117_v18, %v9119_v56 }
 0x2f9   : > { %v9123_v27 = vsel %vm9122_vm13, %v9113_v4, %v9115_v13  ;;  %v10878_v13 = vld [vmem:[#allocation4 + $0x28] sm:$0xf] }
 0x2fa   : > { %10684 = vrot.lane.b32.xlu1 %v27118_v17, %s30012_s28  ;;  %10696 = vrot.lane.b32.xlu0 %v26904_v59, %s30011_s7  ;;  %s30188_s7 = smov 126  }
 0x2fb   : > { %23568 = vmatpush1.msk.msra.mxu0 %vm236_vm1, %v9123_v27  ;;  %v9109_v29 = vpop.permute.xlu1 %9108 }
 0x2fc   : > { %v27305_v0 = vpop.permute.xlu0 %9120  ;;  %23569 = vmatmul.mubr.msk.f32.vlgmr.msra.gmra.mrb[0].mxu0 %vm231_vm2, %v9109_v29 }
 0x2fd   : > { %30185 = vst [vmem:[#allocation77_spill] sm:$0xff] %v27305_v0  ;;  %v27310_v19 = vsel %vm9122_vm13, %v9119_v56, %v27305_v0  ;;  %9209 = vmatprep.mubr.f32.mxu0 %v30149_v36 }
 0x2fe   : > { %30186 = vst [vmem:[#allocation78_spill] sm:$0xff] %v27310_v19  ;;  %10881 = vrot.lane.b32.xlu1 %v27118_v17, %s30187_s25  ;;  %10686 = vrot.lane.b32.xlu0 %v10681_v23, %s30012_s28  ;;  %s30190_s28 = smov 125  }
 0x2ff   : > { %23571 = vmatprep.subr.msk.mxu1 %vm236_vm1, %v27310_v19  ;;  %v9312_v37 = vpop.permute.xlu1 %9311  ;;  %v11240_v19 = vld [vmem:[#allocation4 + $0x28] sm:$0xf] }
 0x300   : > { %23572 = vmatpush1.msk.msra.mxu1 %vm236_vm1, %v27317_v45  ;;  %v9111_v4 = vpop.permute.xlu0 %9110 }
 0x301   : > { %23573 = vmatmul.mubr.msk.f32.vlgmr.msra.gmra.mrb[0].mxu1 %vm231_vm2, %v9109_v29  ;;  %23570 = vmatmul.mubr.msk.f32.gmra.mrb[2].mxu0 %vm231_vm2, %v9111_v4 }
 0x302   : > { %10883 = vrot.lane.b32.xlu1 %v10878_v13, %s30187_s25  ;;  %10885 = vrot.lane.b32.xlu0 %v26904_v59, %s30188_s7  ;;  %v11059_v13 = vld [vmem:[#allocation4 + $0x28] sm:$0xf]  ;;  %s30243_s7 = smov 80  }
 0x303   : > { %9286 = vmatprep.mubr.f32.mxu1 %v30149_v36  ;;  %v9310_v18 = vpop.permute.xlu1 %9309  ;;  %9400 = vmatprep.mubr.f32.mxu0 %v30149_v36 }
 0x304   : > { %v9314_v56 = vpop.permute.xlu0 %9313  ;;  %v9320_v27 = vsel %vm30018_vm12, %v9310_v18, %v9312_v37 }
 0x305   : > { %23574 = vmatmul.mubr.msk.f32.gmra.mrb[2].mxu1 %vm231_vm2, %v9111_v4  ;;  %v27333_v29 = vsel %vm30018_vm12, %v9312_v37, %v9314_v56 }
 0x306   : > { %30189 = vst [vmem:[#allocation79_spill] sm:$0xff] %v27333_v29  ;;  %11066 = vrot.lane.b32.xlu1 %v26904_v59, %s30190_s28  ;;  %11062 = vrot.lane.b32.xlu0 %v27118_v17, %s30191_s20  ;;  %s30195_s28 = smov 28  }
 0x307   : > { %23575 = vmatprep.subr.msk.mxu0 %vm236_vm1, %v27333_v29  ;;  %v27341_v23 = vpop.permute.xlu1 %9317  ;;  %9477 = vmatprep.mubr.f32.mxu1 %v30149_v36 }
 0x308   : > { %30192 = vst [vmem:[#allocation80_spill] sm:$0xff] %v27341_v23  ;;  %23576 = vmatpush1.msk.msra.mxu0 %vm236_vm1, %v9320_v27  ;;  %v9316_v4 = vpop.permute.xlu0 %9315 }
 0x309   : > { %v27346_v37 = vsel %vm30018_vm12, %v9314_v56, %v9316_v4  ;;  %v27350_v18 = vsel %vm30018_vm12, %v9316_v4, %v27341_v23  ;;  %vm30030_vm12 = vcmask 162816  }
 0x30a   : > { %30193 = vst [vmem:[#allocation81_spill] sm:$0xff] %v27346_v37  ;;  %30194 = vst [vmem:[#allocation82_spill] sm:$0xff] %v27350_v18  ;;  %11243 = vrot.lane.b32.xlu1 %v27118_v17, %s30195_s28  ;;  %11064 = vrot.lane.b32.xlu0 %v11059_v13, %s30191_s20 }
 0x30b   : > { %23579 = vmatprep.subr.msk.mxu1 %vm236_vm1, %v27350_v18  ;;  %v9308_v29 = vpop.permute.xlu1 %9307 }
 0x30c   : > { %23580 = vmatpush1.msk.msra.mxu1 %vm236_vm1, %v27346_v37  ;;  %v9306_v27 = vpop.permute.xlu0 %9305  ;;  %v11602_v37 = vld [vmem:[#allocation4 + $0x28] sm:$0xf] }
 0x30d   : > { %23577 = vmatmul.mubr.msk.f32.vlgmr.msra.gmra.mrb[0].mxu0 %vm231_vm2, %v9306_v27  ;;  %23581 = vmatmul.mubr.msk.f32.vlgmr.msra.gmra.mrb[0].mxu1 %vm231_vm2, %v9306_v27  ;;  %v11421_v27 = vld [vmem:[#allocation4 + $0x28] sm:$0xf] }
 0x30e   : > { %11245 = vrot.lane.b32.xlu1 %v11240_v19, %s30195_s28  ;;  %11247 = vrot.lane.b32.xlu0 %v26904_v59, %s30046_s17  ;;  %s30051_s17 = smov 117  }
 0x30f   : > { %v9511_v56 = vpop.permute.xlu1 %9510  ;;  %9406 = vmatprep.mubr.f32.mxu0 %v30149_v36  ;;  %9483 = vmatprep.mubr.f32.mxu1 %v30149_v36 }
 0x310   : > { %v9509_v13 = vpop.permute.xlu0 %9508 }
 0x311   : > { %23578 = vmatmul.mubr.msk.f32.gmra.mrb[2].mxu0 %vm231_vm2, %v9308_v29  ;;  %23582 = vmatmul.mubr.msk.f32.gmra.mrb[2].mxu1 %vm231_vm2, %v9308_v29  ;;  %v27369_v4 = vsel %vm30030_vm12, %v9509_v13, %v9511_v56 }
 0x312   : > { %30196 = vst [vmem:[#allocation83_spill] sm:$0xff] %v27369_v4  ;;  %11428 = vrot.lane.b32.xlu1 %v26904_v59, %s30197_s29  ;;  %11424 = vrot.lane.b32.xlu0 %v27118_v17, %s30028_s6 }
 0x313   : > { %23583 = vmatprep.subr.msk.mxu0 %vm236_vm1, %v27369_v4  ;;  %v9513_v19 = vpop.permute.xlu1 %9512  ;;  %9597 = vmatprep.mubr.f32.mxu0 %v30149_v36 }
 0x314   : > { %v9507_v18 = vpop.permute.xlu0 %9506  ;;  %9674 = vmatprep.mubr.f32.mxu1 %v30149_v36 }
 0x315   : > { %v9517_v29 = vsel %vm30030_vm12, %v9507_v18, %v9509_v13  ;;  %v27396_v18 = vsel %vm30030_vm12, %v9511_v56, %v9513_v19  ;;  %v11783_v56 = vld [vmem:[#allocation4 + $0x28] sm:$0xf] }
 0x316   : > { %11605 = vrot.lane.b32.xlu1 %v27118_v17, %s30163_s11  ;;  %11426 = vrot.lane.b32.xlu0 %v11421_v27, %s30028_s6  ;;  %30201 = vst [vmem:[#allocation86_spill] sm:$0xff] %v27396_v18  ;;  %s30202_s6 = smov 121  }
 0x317   : > { %23584 = vmatpush1.msk.msra.mxu0 %vm236_vm1, %v9517_v29  ;;  %v9503_v23 = vpop.permute.xlu1 %9502 }
 0x318   : > { %v27384_v57 = vpop.permute.xlu0 %9514  ;;  %23585 = vmatmul.mubr.msk.f32.vlgmr.msra.gmra.mrb[0].mxu0 %vm231_vm2, %v9503_v23 }
 0x319   : > { %30198 = vst [vmem:[#allocation84_spill] sm:$0xff] %v27384_v57  ;;  %v27389_v4 = vsel %vm30030_vm12, %v9513_v19, %v27384_v57  ;;  %9603 = vmatprep.mubr.f32.mxu0 %v30149_v36  ;;  %vm30039_vm12 = vcmask 154624   ;;  %v11964_v57 = vld [vmem:[#allocation4 + $0x28] sm:$0xf] }
 0x31a   : > { %30199 = vst [vmem:[#allocation85_spill] sm:$0xff] %v27389_v4  ;;  %11607 = vrot.lane.b32.xlu1 %v11602_v37, %s30163_s11  ;;  %11609 = vrot.lane.b32.xlu0 %v26904_v59, %s30200_s5 }
 0x31b   : > { %23587 = vmatprep.subr.msk.mxu1 %vm236_vm1, %v27389_v4  ;;  %v9706_v13 = vpop.permute.xlu1 %9705 }
 0x31c   : > { %23588 = vmatpush1.msk.msra.mxu1 %vm236_vm1, %v27396_v18  ;;  %v9505_v27 = vpop.permute.xlu0 %9504  ;;  %v13072_v18 = vld [vmem:[#allocation4 + $0x30] sm:$0xf] }
 0x31d   : > { %23589 = vmatmul.mubr.msk.f32.vlgmr.msra.gmra.mrb[0].mxu1 %vm231_vm2, %v9503_v23  ;;  %23586 = vmatmul.mubr.msk.f32.gmra.mrb[2].mxu0 %vm231_vm2, %v9505_v27 }
 0x31e   : > { %11790 = vrot.lane.b32.xlu1 %v26904_v59, %s30202_s6  ;;  %11786 = vrot.lane.b32.xlu0 %v27118_v17, %s30182_s9 }
 0x31f   : > { %9680 = vmatprep.mubr.f32.mxu1 %v30149_v36  ;;  %v9704_v37 = vpop.permute.xlu1 %9703  ;;  %9794 = vmatprep.mubr.f32.mxu0 %v30149_v36 }
 0x320   : > { %v9708_v19 = vpop.permute.xlu0 %9707  ;;  %v9714_v29 = vsel %vm30039_vm12, %v9704_v37, %v9706_v13 }
 0x321   : > { %23590 = vmatmul.mubr.msk.f32.gmra.mrb[2].mxu1 %vm231_vm2, %v9505_v27  ;;  %v27413_v23 = vsel %vm30039_vm12, %v9706_v13, %v9708_v19 }
 0x322   : > { %30203 = vst [vmem:[#allocation87_spill] sm:$0xff] %v27413_v23  ;;  %11967 = vrot.lane.b32.xlu1 %v27118_v17, %s30204_s27  ;;  %11788 = vrot.lane.b32.xlu0 %v11783_v56, %s30182_s9 }
 0x323   : > { %23591 = vmatprep.subr.msk.mxu0 %vm236_vm1, %v27413_v23  ;;  %v27420_v4 = vpop.permute.xlu1 %9711  ;;  %9871 = vmatprep.mubr.f32.mxu1 %v30149_v36  ;;  %v12326_v23 = vld [vmem:[#allocation4 + $0x28] sm:$0xf] }
 0x324   : > { %30205 = vst [vmem:[#allocation88_spill] sm:$0xff] %v27420_v4  ;;  %23592 = vmatpush1.msk.msra.mxu0 %vm236_vm1, %v9714_v29  ;;  %v9710_v37 = vpop.permute.xlu0 %9709 }
 0x325   : > { %v27425_v27 = vsel %vm30039_vm12, %v9708_v19, %v9710_v37  ;;  %v27429_v13 = vsel %vm30039_vm12, %v9710_v37, %v27420_v4  ;;  %vm30048_vm12 = vcmask 146432   ;;  %v12145_v19 = vld [vmem:[#allocation4 + $0x28] sm:$0xf] }
 0x326   : > { %30206 = vst [vmem:[#allocation89_spill] sm:$0xff] %v27425_v27  ;;  %30207 = vst [vmem:[#allocation90_spill] sm:$0xff] %v27429_v13  ;;  %11969 = vrot.lane.b32.xlu1 %v11964_v57, %s30204_s27  ;;  %11971 = vrot.lane.b32.xlu0 %v26904_v59, %s30043_s21  ;;  %s30211_s21 = smov 118  }
 0x327   : > { %23595 = vmatprep.subr.msk.mxu1 %vm236_vm1, %v27429_v13  ;;  %v9702_v56 = vpop.permute.xlu1 %9701 }
 0x328   : > { %23596 = vmatpush1.msk.msra.mxu1 %vm236_vm1, %v27425_v27  ;;  %v9700_v29 = vpop.permute.xlu0 %9699 }
 0x329   : > { %23593 = vmatmul.mubr.msk.f32.vlgmr.msra.gmra.mrb[0].mxu0 %vm231_vm2, %v9700_v29  ;;  %23597 = vmatmul.mubr.msk.f32.vlgmr.msra.gmra.mrb[0].mxu1 %vm231_vm2, %v9700_v29 }
 0x32a   : > { %12152 = vrot.lane.b32.xlu1 %v26904_v59, %s30208_s24  ;;  %12148 = vrot.lane.b32.xlu0 %v27118_v17, %s30209_s4  ;;  %s30253_s24 = smov 69  }
 0x32b   : > { %v9905_v57 = vpop.permute.xlu1 %9904  ;;  %9800 = vmatprep.mubr.f32.mxu0 %v30149_v36  ;;  %9877 = vmatprep.mubr.f32.mxu1 %v30149_v36 }
 0x32c   : > { %v9903_v37 = vpop.permute.xlu0 %9902 }
 0x32d   : > { %23594 = vmatmul.mubr.msk.f32.gmra.mrb[2].mxu0 %vm231_vm2, %v9702_v56  ;;  %23598 = vmatmul.mubr.msk.f32.gmra.mrb[2].mxu1 %vm231_vm2, %v9702_v56  ;;  %v27449_v29 = vsel %vm30048_vm12, %v9903_v37, %v9905_v57 }
 0x32e   : > { %30210 = vst [vmem:[#allocation91_spill] sm:$0xff] %v27449_v29  ;;  %12329 = vrot.lane.b32.xlu1 %v27118_v17, %s30056_s15  ;;  %12150 = vrot.lane.b32.xlu0 %v12145_v19, %s30209_s4 }
 0x32f   : > { %23599 = vmatprep.subr.msk.mxu0 %vm236_vm1, %v27449_v29  ;;  %v9907_v13 = vpop.permute.xlu1 %9906  ;;  %9991 = vmatprep.mubr.f32.mxu0 %v30149_v36 }
 0x330   : > { %v9901_v4 = vpop.permute.xlu0 %9900  ;;  %10068 = vmatprep.mubr.f32.mxu1 %v30149_v36 }
 0x331   : > { %v9911_v56 = vsel %vm30048_vm12, %v9901_v4, %v9903_v37  ;;  %v27474_v4 = vld [vmem:[%s25604_s26 + $0x8] sm:$0xff] }
 0x332   : > { %12331 = vrot.lane.b32.xlu1 %v12326_v23, %s30056_s15  ;;  %12333 = vrot.lane.b32.xlu0 %v26904_v59, %s30211_s21  ;;  %v27479_v23 = vsel %vm30048_vm12, %v9905_v57, %v9907_v13  ;;  %s30221_s15 = smov 100   ;;  %s30247_s21 = smov 73  }
 0x333   : > { %23600 = vmatpush1.msk.msra.mxu0 %vm236_vm1, %v9911_v56  ;;  %v9897_v17 = vpop.permute.xlu1 %9896  ;;  %30214 = vst [vmem:[#allocation94_spill] sm:$0xff] %v27479_v23 }
 0x334   : > { %v27463_v19 = vpop.permute.xlu0 %9908  ;;  %23601 = vmatmul.mubr.msk.f32.vlgmr.msra.gmra.mrb[0].mxu0 %vm231_vm2, %v9897_v17 }
 0x335   : > { %30212 = vst [vmem:[#allocation92_spill] sm:$0xff] %v27463_v19  ;;  %v27468_v29 = vsel %vm30048_vm12, %v9907_v13, %v27463_v19  ;;  %9997 = vmatprep.mubr.f32.mxu0 %v30149_v36  ;;  %vm30054_vm12 = vcmask 138240   ;;  %v27506_v19 = vld [vmem:[#allocation4 + $0x10] sm:$0xff] }
 0x336   : > { %30213 = vst [vmem:[#allocation93_spill] sm:$0xff] %v27468_v29  ;;  %12512 = vrot.lane.b32.xlu1 %v25635_v5, %s30051_s17  ;;  %12510 = vrot.lane.b32.xlu0 %v27474_v4, %s30051_s17 }
 0x337   : > { %23603 = vmatprep.subr.msk.mxu1 %vm236_vm1, %v27468_v29  ;;  %v10100_v37 = vpop.permute.xlu1 %10099 }
 0x338   : > { %23604 = vmatpush1.msk.msra.mxu1 %vm236_vm1, %v27479_v23  ;;  %v9899_v56 = vpop.permute.xlu0 %9898  ;;  %v12697_v23 = vld [vmem:[#allocation4 + $0x30] sm:$0xf] }
 0x339   : > { %23605 = vmatmul.mubr.msk.f32.vlgmr.msra.gmra.mrb[0].mxu1 %vm231_vm2, %v9897_v17  ;;  %23602 = vmatmul.mubr.msk.f32.gmra.mrb[2].mxu0 %vm231_vm2, %v9899_v56 }
 0x33a   : > { %12514 = vrot.lane.b32.xlu1 %v26904_v59, %s30051_s17  ;;  %12508 = vrot.lane.b32.xlu0 %v25626_v3, %s30051_s17  ;;  %s30219_s17 = smov 124  }
 0x33b   : > { %10074 = vmatprep.mubr.f32.mxu1 %v30149_v36  ;;  %v10098_v13 = vpop.permute.xlu1 %10097  ;;  %10188 = vmatprep.mubr.f32.mxu0 %v30149_v36 }
 0x33c   : > { %v10102_v57 = vpop.permute.xlu0 %10101  ;;  %v10108_v29 = vsel %vm30054_vm12, %v10098_v13, %v10100_v37 }
 0x33d   : > { %23606 = vmatmul.mubr.msk.f32.gmra.mrb[2].mxu1 %vm231_vm2, %v9899_v56  ;;  %v27496_v17 = vsel %vm30054_vm12, %v10100_v37, %v10102_v57 }
 0x33e   : > { %30215 = vst [vmem:[#allocation95_spill] sm:$0xff] %v27496_v17  ;;  %12708 = vrot.lane.b32.xlu1 %v25635_v5, %s30064_s23  ;;  %12706 = vrot.lane.b32.xlu0 %v27474_v4, %s30064_s23 }
 0x33f   : > { %23607 = vmatprep.subr.msk.mxu0 %vm236_vm1, %v27496_v17  ;;  %v27504_v59 = vpop.permute.xlu1 %10105  ;;  %10265 = vmatprep.mubr.f32.mxu1 %v30149_v36 }
 0x340   : > { %30216 = vst [vmem:[#allocation96_spill] sm:$0xff] %v27504_v59  ;;  %23608 = vmatpush1.msk.msra.mxu0 %vm236_vm1, %v10108_v29  ;;  %v10104_v37 = vpop.permute.xlu0 %10103 }
 0x341   : > { %v27511_v56 = vsel %vm30054_vm12, %v10102_v57, %v10104_v37  ;;  %v27515_v13 = vsel %vm30054_vm12, %v10104_v37, %v27504_v59  ;;  %v27529_v57 = vld [vmem:[%s25604_s26 + $0x10] sm:$0xff]  ;;  %vm30066_vm12 = vcmask 130048   ;;  %v12891_v59 = vld [vmem:[#allocation4 + $0x30] sm:$0xf] }
 0x342   : > { %30217 = vst [vmem:[#allocation97_spill] sm:$0xff] %v27511_v56  ;;  %30218 = vst [vmem:[#allocation98_spill] sm:$0xff] %v27515_v13  ;;  %12700 = vrot.lane.b32.xlu1 %v27506_v19, %s30219_s17  ;;  %12704 = vrot.lane.b32.xlu0 %v25626_v3, %s30064_s23 }
 0x343   : > { %23611 = vmatprep.subr.msk.mxu1 %vm236_vm1, %v27515_v13  ;;  %v10096_v17 = vpop.permute.xlu1 %10095 }
 0x344   : > { %23612 = vmatpush1.msk.msra.mxu1 %vm236_vm1, %v27511_v56  ;;  %v10094_v29 = vpop.permute.xlu0 %10093 }
 0x345   : > { %23609 = vmatmul.mubr.msk.f32.vlgmr.msra.gmra.mrb[0].mxu0 %vm231_vm2, %v10094_v29  ;;  %23613 = vmatmul.mubr.msk.f32.vlgmr.msra.gmra.mrb[0].mxu1 %vm231_vm2, %v10094_v29 }
 0x346   : > { %12702 = vrot.lane.b32.xlu1 %v12697_v23, %s30219_s17  ;;  %12710 = vrot.lane.b32.xlu0 %v27529_v57, %s30064_s23 }
 0x347   : > { %v10299_v37 = vpop.permute.xlu1 %10298  ;;  %10194 = vmatprep.mubr.f32.mxu0 %v30149_v36  ;;  %10271 = vmatprep.mubr.f32.mxu1 %v30149_v36 }
 0x348   : > { %v10297_v13 = vpop.permute.xlu0 %10296 }
 0x349   : > { %23610 = vmatmul.mubr.msk.f32.gmra.mrb[2].mxu0 %vm231_vm2, %v10096_v17  ;;  %23614 = vmatmul.mubr.msk.f32.gmra.mrb[2].mxu1 %vm231_vm2, %v10096_v17  ;;  %v27538_v29 = vsel %vm30066_vm12, %v10297_v13, %v10299_v37 }
 0x34a   : > { %30220 = vst [vmem:[#allocation99_spill] sm:$0xff] %v27538_v29  ;;  %12898 = vrot.lane.b32.xlu1 %v27529_v57, %s30221_s15  ;;  %12894 = vrot.lane.b32.xlu0 %v27506_v19, %s30222_s0 }
 0x34b   : > { %23615 = vmatprep.subr.msk.mxu0 %vm236_vm1, %v27538_v29  ;;  %v10301_v23 = vpop.permute.xlu1 %10300  ;;  %10385 = vmatprep.mubr.f32.mxu0 %v30149_v36 }
 0x34c   : > { %v10295_v56 = vpop.permute.xlu0 %10294  ;;  %10462 = vmatprep.mubr.f32.mxu1 %v30149_v36 }
 0x34d   : > { %v10305_v17 = vsel %vm30066_vm12, %v10295_v56, %v10297_v13 }
 0x34e   : > { %13075 = vrot.lane.b32.xlu1 %v27506_v19, %s30064_s23  ;;  %12896 = vrot.lane.b32.xlu0 %v12891_v59, %s30222_s0  ;;  %v27565_v59 = vsel %vm30066_vm12, %v10299_v37, %v10301_v23  ;;  %v13253_v37 = vld [vmem:[#allocation4 + $0x30] sm:$0xf] }
 0x34f   : > { %23616 = vmatpush1.msk.msra.mxu0 %vm236_vm1, %v10305_v17  ;;  %v10291_v27 = vpop.permute.xlu1 %10290 }
 0x350   : > { %v27553_v0 = vpop.permute.xlu0 %10302  ;;  %23617 = vmatmul.mubr.msk.f32.vlgmr.msra.gmra.mrb[0].mxu0 %vm231_vm2, %v10291_v27 }
 0x351   : > { %30223 = vst [vmem:[#allocation100_spill] sm:$0xff] %v27553_v0  ;;  %v27558_v29 = vsel %vm30066_vm12, %v10301_v23, %v27553_v0  ;;  %10391 = vmatprep.mubr.f32.mxu0 %v30149_v36  ;;  %vm30073_vm12 = vcmask 121856   ;;  %v13434_v0 = vld [vmem:[#allocation4 + $0x30] sm:$0xf] }
 0x352   : > { %30224 = vst [vmem:[#allocation101_spill] sm:$0xff] %v27558_v29  ;;  %13077 = vrot.lane.b32.xlu1 %v13072_v18, %s30064_s23  ;;  %13079 = vrot.lane.b32.xlu0 %v27529_v57, %s30225_s1  ;;  %s30227_s23 = smov 112   ;;  %s30229_s1 = smov 108  }
 0x353   : > { %23619 = vmatprep.subr.msk.mxu1 %vm236_vm1, %v27558_v29  ;;  %v10494_v56 = vpop.permute.xlu1 %10493 }
 0x354   : > { %23620 = vmatpush1.msk.msra.mxu1 %vm236_vm1, %v27565_v59  ;;  %v10293_v13 = vpop.permute.xlu0 %10292 }
 0x355   : > { %23621 = vmatmul.mubr.msk.f32.vlgmr.msra.gmra.mrb[0].mxu1 %vm231_vm2, %v10291_v27  ;;  %23618 = vmatmul.mubr.msk.f32.gmra.mrb[2].mxu0 %vm231_vm2, %v10293_v13 }
 0x356   : > { %13260 = vrot.lane.b32.xlu1 %v27529_v57, %s30226_s10  ;;  %13256 = vrot.lane.b32.xlu0 %v27506_v19, %s30227_s23  ;;  %s30242_s10 = smov 84  }
 0x357   : > { %10468 = vmatprep.mubr.f32.mxu1 %v30149_v36  ;;  %v10492_v18 = vpop.permute.xlu1 %10491  ;;  %10582 = vmatprep.mubr.f32.mxu0 %v30149_v36 }
 0x358   : > { %v10496_v23 = vpop.permute.xlu0 %10495  ;;  %v10502_v17 = vsel %vm30073_vm12, %v10492_v18, %v10494_v56 }
 0x359   : > { %23622 = vmatmul.mubr.msk.f32.gmra.mrb[2].mxu1 %vm231_vm2, %v10293_v13  ;;  %v27582_v27 = vsel %vm30073_vm12, %v10494_v56, %v10496_v23 }
 0x35a   : > { %30228 = vst [vmem:[#allocation102_spill] sm:$0xff] %v27582_v27  ;;  %13437 = vrot.lane.b32.xlu1 %v27506_v19, %s30229_s1  ;;  %13258 = vrot.lane.b32.xlu0 %v13253_v37, %s30227_s23 }
 0x35b   : > { %23623 = vmatprep.subr.msk.mxu0 %vm236_vm1, %v27582_v27  ;;  %v27589_v29 = vpop.permute.xlu1 %10499  ;;  %10659 = vmatprep.mubr.f32.mxu1 %v30149_v36 }
 0x35c   : > { %30230 = vst [vmem:[#allocation103_spill] sm:$0xff] %v27589_v29  ;;  %23624 = vmatpush1.msk.msra.mxu0 %vm236_vm1, %v10502_v17  ;;  %v10498_v18 = vpop.permute.xlu0 %10497 }
 0x35d   : > { %v27594_v13 = vsel %vm30073_vm12, %v10496_v23, %v10498_v18  ;;  %v27598_v56 = vsel %vm30073_vm12, %v10498_v18, %v27589_v29  ;;  %vm10698_vm12 = vcmask 113664  }
 0x35e   : > { %30231 = vst [vmem:[#allocation104_spill] sm:$0xff] %v27594_v13  ;;  %30232 = vst [vmem:[#allocation105_spill] sm:$0xff] %v27598_v56  ;;  %13439 = vrot.lane.b32.xlu1 %v13434_v0, %s30229_s1  ;;  %13441 = vrot.lane.b32.xlu0 %v27529_v57, %s30233_s14  ;;  %v13615_v0 = vld [vmem:[#allocation4 + $0x30] sm:$0xf]  ;;  %s30237_s14 = smov 95  }
 0x35f   : > { %23627 = vmatprep.subr.msk.mxu1 %vm236_vm1, %v27598_v56  ;;  %v10490_v37 = vpop.permute.xlu1 %10489  ;;  %v13796_v56 = vld [vmem:[#allocation4 + $0x30] sm:$0xf] }
 0x360   : > { %23628 = vmatpush1.msk.msra.mxu1 %vm236_vm1, %v27594_v13  ;;  %v10488_v17 = vpop.permute.xlu0 %10487 }
 0x361   : > { %23625 = vmatmul.mubr.msk.f32.vlgmr.msra.gmra.mrb[0].mxu0 %vm231_vm2, %v10488_v17  ;;  %23629 = vmatmul.mubr.msk.f32.vlgmr.msra.gmra.mrb[0].mxu1 %vm231_vm2, %v10488_v17 }
 0x362   : > { %13622 = vrot.lane.b32.xlu1 %v27529_v57, %s30234_s13  ;;  %13618 = vrot.lane.b32.xlu0 %v27506_v19, %s30235_s22 }
 0x363   : > { %10588 = vmatprep.mubr.f32.mxu0 %v30149_v36  ;;  %10665 = vmatprep.mubr.f32.mxu1 %v30149_v36 }
 0x364   : > { %v10693_v23 = vpop.permute.xlu1 %10692  ;;  %v10691_v18 = vpop.permute.xlu0 %10690 }
 0x365   : > { %23626 = vmatmul.mubr.msk.f32.gmra.mrb[2].mxu0 %vm231_vm2, %v10490_v37  ;;  %23630 = vmatmul.mubr.msk.f32.gmra.mrb[2].mxu1 %vm231_vm2, %v10490_v37  ;;  %v27618_v17 = vsel %vm10698_vm12, %v10691_v18, %v10693_v23 }
 0x366   : > { %30236 = vst [vmem:[#allocation106_spill] sm:$0xff] %v27618_v17  ;;  %13799 = vrot.lane.b32.xlu1 %v27506_v19, %s30221_s15  ;;  %13620 = vrot.lane.b32.xlu0 %v13615_v0, %s30235_s22 }
 0x367   : > { %23631 = vmatprep.subr.msk.mxu0 %vm236_vm1, %v27618_v17  ;;  %10779 = vmatprep.mubr.f32.mxu0 %v30149_v36 }
 0x368   : > { %v10695_v27 = vpop.permute.xlu1 %10694  ;;  %v10689_v29 = vpop.permute.xlu0 %10688  ;;  %10856 = vmatprep.mubr.f32.mxu1 %v30149_v36 }
 0x369   : > { %v10699_v37 = vsel %vm10698_vm12, %v10689_v29, %v10691_v18  ;;  %v27646_v29 = vsel %vm10698_vm12, %v10693_v23, %v10695_v27 }
 0x36a   : > { %13801 = vrot.lane.b32.xlu1 %v13796_v56, %s30221_s15  ;;  %13803 = vrot.lane.b32.xlu0 %v27529_v57, %s30237_s14  ;;  %v13977_v56 = vld [vmem:[#allocation4 + $0x30] sm:$0xf]  ;;  %s30240_s14 = smov 93  }
 0x36b   : > { %23632 = vmatpush1.msk.msra.mxu0 %vm236_vm1, %v10699_v37 }
 0x36c   : > { %23639 = vmatprep.subr.msk.mxu0 %vm236_vm1, %v25791_v34  ;;  %v10685_v0 = vpop.permute.xlu1 %10684  ;;  %v27634_v17 = vpop.permute.xlu0 %10696 }
 0x36d   : > { %23633 = vmatmul.mubr.msk.f32.vlgmr.msra.gmra.mrb[0].mxu0 %vm231_vm2, %v10685_v0  ;;  %v27639_v13 = vsel %vm10698_vm12, %v10695_v27, %v27634_v17 }
 0x36e   : > { %23640 = vmatpush1.msk.msra.mxu0 %vm236_vm1, %v25761_v28  ;;  %13984 = vrot.lane.b32.xlu1 %v27529_v57, %s30238_s3  ;;  %s30239_s3 = smov 92  }
 0x36f   : > { %13980 = vrot.lane.b32.xlu0 %v27506_v19, %s30234_s13  ;;  %23635 = vmatprep.subr.msk.mxu1 %vm236_vm1, %v27639_v13 }
 0x370   : > { %23647 = vmatprep.subr.msk.mxu0 %vm236_vm1, %v25830_v44  ;;  %23636 = vmatpush1.msk.msra.mxu1 %vm236_vm1, %v27646_v29  ;;  %v10882_v34 = vpop.permute.xlu1 %10881  ;;  %v10687_v28 = vpop.permute.xlu0 %10686  ;;  %v14158_v44 = vld [vmem:[#allocation4 + $0x30] sm:$0xf] }
 0x371   : > { %10785 = vmatprep.mubr.f32.mxu0 %v30149_v36  ;;  %23637 = vmatmul.mubr.msk.f32.vlgmr.msra.gmra.mrb[0].mxu1 %vm231_vm2, %v10685_v0 }
 0x372   : > { %23634 = vmatmul.mubr.msk.f32.gmra.mrb[2].mxu0 %vm231_vm2, %v10687_v28  ;;  %14161 = vrot.lane.b32.xlu1 %v27506_v19, %s30239_s3 }
 0x373   : > { %13982 = vrot.lane.b32.xlu0 %v13977_v56, %s30234_s13  ;;  %10862 = vmatprep.mubr.f32.mxu1 %v30149_v36 }
 0x374   : > { %v10884_v27 = vpop.permute.xlu1 %10883  ;;  %10960 = vmatprep.mubr.f32.mxu0 %v30149_v36  ;;  %v10886_v23 = vpop.permute.xlu0 %10885 }
 0x375   : > { %23638 = vmatmul.mubr.msk.f32.gmra.mrb[2].mxu1 %vm231_vm2, %v10687_v28  ;;  %v10887_v18 = vsel %vm581_vm3, %v25783_v33, %v10886_v23  ;;  %23643 = vmatprep.subr.msk.mxu1 %vm236_vm1, %v10886_v23  ;;  %vm12516_vm3 = vcmask 957440  }
 0x376   : > { %23641 = vmatmul.mubr.msk.f32.vlgmr.msra.gmra.mrb[0].mxu0 %vm231_vm2, %v10882_v34  ;;  %14163 = vrot.lane.b32.xlu1 %v14158_v44, %s30239_s3 }
 0x377   : > { %23648 = vmatpush1.msk.msra.mxu0 %vm236_vm1, %v25806_v38  ;;  %14165 = vrot.lane.b32.xlu0 %v27529_v57, %s30240_s14  ;;  %s30241_s14 = smov 88  }
 0x378   : > { %23644 = vmatpush1.msk.msra.mxu1 %vm236_vm1, %v10887_v18  ;;  %23655 = vmatprep.subr.msk.mxu0 %vm236_vm1, %v25870_v54  ;;  %v11067_v37 = vpop.permute.xlu1 %11066  ;;  %v11063_v0 = vpop.permute.xlu0 %11062  ;;  %v14520_v18 = vld [vmem:[#allocation4 + $0x30] sm:$0xf] }
 0x379   : > { %11037 = vmatprep.mubr.f32.mxu1 %v30149_v36  ;;  %v11068_v33 = vsel %vm775_vm4, %v25824_v43, %v11067_v37  ;;  %10966 = vmatprep.mubr.f32.mxu0 %v30149_v36  ;;  %v14339_v43 = vld [vmem:[#allocation4 + $0x30] sm:$0xf]  ;;  %vm12712_vm4 = vcmask 949248  }
 0x37a   : > { %23645 = vmatmul.mubr.msk.f32.vlgmr.msra.gmra.mrb[0].mxu1 %vm231_vm2, %v10882_v34  ;;  %23642 = vmatmul.mubr.msk.f32.gmra.mrb[2].mxu0 %vm231_vm2, %v10884_v27 }
 0x37b   : > { %23651 = vmatprep.subr.msk.mxu1 %vm236_vm1, %v11067_v37  ;;  %14346 = vrot.lane.b32.xlu1 %v27529_v57, %s30239_s3 }
 0x37c   : > { %14342 = vrot.lane.b32.xlu0 %v27506_v19, %s30241_s14  ;;  %23652 = vmatpush1.msk.msra.mxu1 %vm236_vm1, %v11068_v33  ;;  %v11244_v38 = vpop.permute.xlu1 %11243  ;;  %v11065_v28 = vpop.permute.xlu0 %11064 }
 0x37d   : > { %11043 = vmatprep.mubr.f32.mxu1 %v30149_v36  ;;  %11141 = vmatprep.mubr.f32.mxu0 %v30149_v36 }
 0x37e   : > { %23646 = vmatmul.mubr.msk.f32.gmra.mrb[2].mxu1 %vm231_vm2, %v10884_v27  ;;  %23649 = vmatmul.mubr.msk.f32.vlgmr.msra.gmra.mrb[0].mxu0 %vm231_vm2, %v11063_v0 }
 0x37f   : > { %23656 = vmatpush1.msk.msra.mxu0 %vm236_vm1, %v25845_v48  ;;  %14529 = vrot.lane.b32.xlu1 %v27474_v4, %s25459_s16 }
 0x380   : > { %14344 = vrot.lane.b32.xlu0 %v14339_v43, %s30241_s14  ;;  %23663 = vmatprep.subr.msk.mxu0 %vm236_vm1, %v25906_v6  ;;  %v11246_v34 = vpop.permute.xlu1 %11245  ;;  %v27699_v56 = vpop.permute.xlu0 %11247 }
 0x381   : > { %11218 = vmatprep.mubr.f32.mxu1 %v30149_v36  ;;  %11147 = vmatprep.mubr.f32.mxu0 %v30149_v36  ;;  %v27706_v44 = vsel %vm969_vm5, %v25862_v53, %v27699_v56 }
 0x382   : > { %23653 = vmatmul.mubr.msk.f32.vlgmr.msra.gmra.mrb[0].mxu1 %vm231_vm2, %v11063_v0  ;;  %23650 = vmatmul.mubr.msk.f32.gmra.mrb[2].mxu0 %vm231_vm2, %v11065_v28 }
 0x383   : > { %23659 = vmatprep.subr.msk.mxu1 %vm236_vm1, %v27699_v56  ;;  %14527 = vrot.lane.b32.xlu1 %v25626_v3, %s25459_s16 }
 0x384   : > { %14531 = vrot.lane.b32.xlu0 %v25635_v5, %s25459_s16  ;;  %23660 = vmatpush1.msk.msra.mxu1 %vm236_vm1, %v27706_v44  ;;  %v27716_v48 = vpop.permute.xlu1 %11428  ;;  %v11425_v27 = vpop.permute.xlu0 %11424 }
 0x385   : > { %11224 = vmatprep.mubr.f32.mxu1 %v30149_v36  ;;  %11322 = vmatprep.mubr.f32.mxu0 %v30149_v36 }
 0x386   : > { %23654 = vmatmul.mubr.msk.f32.gmra.mrb[2].mxu1 %vm231_vm2, %v11065_v28  ;;  %23657 = vmatmul.mubr.msk.f32.vlgmr.msra.gmra.mrb[0].mxu0 %vm231_vm2, %v11244_v38 }
 0x387   : > { %23664 = vmatpush1.msk.msra.mxu0 %vm236_vm1, %v25882_v58  ;;  %14533 = vrot.lane.b32.xlu1 %v27529_v57, %s25459_s16  ;;  %v27737_v58 = vsel %vm1163_vm6, %v25899_v63, %v27716_v48  ;;  %s25460_s16 = smov 90  }
 0x388   : > { %14523 = vrot.lane.b32.xlu0 %v27506_v19, %s30242_s10  ;;  %23671 = vmatprep.subr.msk.mxu0 %vm236_vm1, %v25942_v16  ;;  %v11606_v53 = vpop.permute.xlu1 %11605  ;;  %v11427_v23 = vpop.permute.xlu0 %11426 }
 0x389   : > { %11399 = vmatprep.mubr.f32.mxu1 %v30149_v36  ;;  %23667 = vmatprep.subr.msk.mxu1 %vm236_vm1, %v27716_v48 }
 0x38a   : > { %11328 = vmatprep.mubr.f32.mxu0 %v30149_v36  ;;  %23661 = vmatmul.mubr.msk.f32.vlgmr.msra.gmra.mrb[0].mxu1 %vm231_vm2, %v11244_v38 }
 0x38b   : > { %23668 = vmatpush1.msk.msra.mxu1 %vm236_vm1, %v27737_v58  ;;  %23658 = vmatmul.mubr.msk.f32.gmra.mrb[2].mxu0 %vm231_vm2, %v11246_v34 }
 0x38c   : > { %14723 = vrot.lane.b32.xlu1 %v27474_v4, %s25460_s16  ;;  %14525 = vrot.lane.b32.xlu0 %v14520_v18, %s30242_s10  ;;  %v11608_v37 = vpop.permute.xlu1 %11607  ;;  %v27744_v0 = vpop.permute.xlu0 %11609 }
 0x38d   : > { %11405 = vmatprep.mubr.f32.mxu1 %v30149_v36  ;;  %11503 = vmatprep.mubr.f32.mxu0 %v30149_v36  ;;  %v27766_v38 = vsel %vm1357_vm7, %v25935_v15, %v27744_v0  ;;  %v14714_v15 = vld [vmem:[#allocation4 + $0x30] sm:$0xf] }
 0x38e   : > { %23662 = vmatmul.mubr.msk.f32.gmra.mrb[2].mxu1 %vm231_vm2, %v11246_v34  ;;  %23675 = vmatprep.subr.msk.mxu1 %vm236_vm1, %v27744_v0 }
 0x38f   : > { %23665 = vmatmul.mubr.msk.f32.vlgmr.msra.gmra.mrb[0].mxu0 %vm231_vm2, %v11425_v27  ;;  %11580 = vmatprep.mubr.f32.mxu1 %v30149_v36 }
 0x390   : > { %23672 = vmatpush1.msk.msra.mxu0 %vm236_vm1, %v25918_v10  ;;  %14721 = vrot.lane.b32.xlu1 %v25626_v3, %s25460_s16  ;;  %v27756_v63 = vpop.permute.xlu1 %11790  ;;  %v11787_v33 = vpop.permute.xlu0 %11786 }
 0x391   : > { %14725 = vrot.lane.b32.xlu0 %v25635_v5, %s25460_s16  ;;  %23679 = vmatprep.subr.msk.mxu0 %vm236_vm1, %v25978_v26 }
 0x392   : > { %11509 = vmatprep.mubr.f32.mxu0 %v30149_v36  ;;  %23669 = vmatmul.mubr.msk.f32.vlgmr.msra.gmra.mrb[0].mxu1 %vm231_vm2, %v11425_v27  ;;  %v14908_v27 = vld [vmem:[#allocation4 + $0x30] sm:$0xf] }
 0x393   : > { %23676 = vmatpush1.msk.msra.mxu1 %vm236_vm1, %v27766_v38  ;;  %23666 = vmatmul.mubr.msk.f32.gmra.mrb[2].mxu0 %vm231_vm2, %v11427_v23 }
 0x394   : > { %14727 = vrot.lane.b32.xlu1 %v27529_v57, %s25460_s16  ;;  %11586 = vmatprep.mubr.f32.mxu1 %v30149_v36  ;;  %v11968_v10 = vpop.permute.xlu1 %11967  ;;  %v11789_v28 = vpop.permute.xlu0 %11788  ;;  %s30244_s16 = smov 76  }
 0x395   : > { %14717 = vrot.lane.b32.xlu0 %v27506_v19, %s30243_s7  ;;  %11684 = vmatprep.mubr.f32.mxu0 %v30149_v36 }
 0x396   : > { %23670 = vmatmul.mubr.msk.f32.gmra.mrb[2].mxu1 %vm231_vm2, %v11427_v23  ;;  %23683 = vmatprep.subr.msk.mxu1 %vm236_vm1, %v27756_v63 }
 0x397   : > { %23673 = vmatmul.mubr.msk.f32.vlgmr.msra.gmra.mrb[0].mxu0 %vm231_vm2, %v11606_v53  ;;  %11761 = vmatprep.mubr.f32.mxu1 %v30149_v36 }
 0x398   : > { %23680 = vmatpush1.msk.msra.mxu0 %vm236_vm1, %v25954_v20  ;;  %14911 = vrot.lane.b32.xlu1 %v27506_v19, %s30244_s16  ;;  %v11970_v43 = vpop.permute.xlu1 %11969  ;;  %v27785_v34 = vpop.permute.xlu0 %11971  ;;  %v27795_v20 = vsel %vm1551_vm8, %v25971_v25, %v27756_v63 }
 0x399   : > { %14719 = vrot.lane.b32.xlu0 %v14714_v15, %s30243_s7  ;;  %23687 = vmatprep.subr.msk.mxu0 %vm236_vm1, %v26014_v40 }
 0x39a   : > { %11690 = vmatprep.mubr.f32.mxu0 %v30149_v36  ;;  %23677 = vmatmul.mubr.msk.f32.vlgmr.msra.gmra.mrb[0].mxu1 %vm231_vm2, %v11606_v53 }
 0x39b   : > { %23684 = vmatpush1.msk.msra.mxu1 %vm236_vm1, %v27795_v20  ;;  %23674 = vmatmul.mubr.msk.f32.gmra.mrb[2].mxu0 %vm231_vm2, %v11608_v37 }
 0x39c   : > { %14913 = vrot.lane.b32.xlu1 %v14908_v27, %s30244_s16  ;;  %11767 = vmatprep.mubr.f32.mxu1 %v30149_v36  ;;  %v27802_v23 = vpop.permute.xlu1 %12152  ;;  %v12149_v18 = vpop.permute.xlu0 %12148 }
 0x39d   : > { %30245 = vst [vmem:[#allocation107_spill] sm:$0xff] %v27802_v23  ;;  %14915 = vrot.lane.b32.xlu0 %v27529_v57, %s30246_s2  ;;  %11865 = vmatprep.mubr.f32.mxu0 %v30149_v36  ;;  %s30248_s2 = smov 68  }
 0x39e   : > { %23678 = vmatmul.mubr.msk.f32.gmra.mrb[2].mxu1 %vm231_vm2, %v11608_v37  ;;  %23691 = vmatprep.subr.msk.mxu1 %vm236_vm1, %v27785_v34  ;;  %v15089_v37 = vld [vmem:[#allocation4 + $0x30] sm:$0xf] }
 0x39f   : > { %23681 = vmatmul.mubr.msk.f32.vlgmr.msra.gmra.mrb[0].mxu0 %vm231_vm2, %v11787_v33  ;;  %11942 = vmatprep.mubr.f32.mxu1 %v30149_v36 }
 0x3a0   : > { %23688 = vmatpush1.msk.msra.mxu0 %vm236_vm1, %v25990_v31  ;;  %15096 = vrot.lane.b32.xlu1 %v27529_v57, %s30247_s21  ;;  %v27816_v25 = vpop.permute.xlu1 %12329  ;;  %v27818_v53 = vpop.permute.xlu0 %12150  ;;  %v27829_v31 = vsel %vm1745_vm9, %v26007_v39, %v27785_v34  ;;  %v15270_v39 = vld [vmem:[#allocation4 + $0x30] sm:$0xf]  ;;  %s30249_s21 = smov 71  }
 0x3a1   : > { %15092 = vrot.lane.b32.xlu0 %v27506_v19, %s30157_s8  ;;  %23695 = vmatprep.subr.msk.mxu0 %vm236_vm1, %v26050_v55 }
 0x3a2   : > { %11871 = vmatprep.mubr.f32.mxu0 %v30149_v36  ;;  %23685 = vmatmul.mubr.msk.f32.vlgmr.msra.gmra.mrb[0].mxu1 %vm231_vm2, %v11787_v33 }
 0x3a3   : > { %23692 = vmatpush1.msk.msra.mxu1 %vm236_vm1, %v27829_v31  ;;  %23682 = vmatmul.mubr.msk.f32.gmra.mrb[2].mxu0 %vm231_vm2, %v11789_v28 }
 0x3a4   : > { %15273 = vrot.lane.b32.xlu1 %v27506_v19, %s30248_s2  ;;  %11948 = vmatprep.mubr.f32.mxu1 %v30149_v36  ;;  %v27837_v15 = vpop.permute.xlu1 %12331  ;;  %v27839_v27 = vpop.permute.xlu0 %12333 }
 0x3a5   : > { %15094 = vrot.lane.b32.xlu0 %v15089_v37, %s30157_s8  ;;  %12046 = vmatprep.mubr.f32.mxu0 %v30149_v36 }
 0x3a6   : > { %23686 = vmatmul.mubr.msk.f32.gmra.mrb[2].mxu1 %vm231_vm2, %v11789_v28  ;;  %23699 = vmatprep.subr.msk.mxu1 %vm236_vm1, %v27802_v23  ;;  %v27860_v28 = vsel %vm1939_vm10, %v26043_v52, %v27802_v23  ;;  %v15451_v52 = vld [vmem:[#allocation4 + $0x30] sm:$0xf]  ;;  %v27891_v23 = vsel %vm2133_vm11, %v26079_v9, %v27839_v27 }
 0x3a7   : > { %23689 = vmatmul.mubr.msk.f32.vlgmr.msra.gmra.mrb[0].mxu0 %vm231_vm2, %v11968_v10  ;;  %12123 = vmatprep.mubr.f32.mxu1 %v30149_v36 }
 0x3a8   : > { %23696 = vmatpush1.msk.msra.mxu0 %vm236_vm1, %v26026_v46  ;;  %15275 = vrot.lane.b32.xlu1 %v15270_v39, %s30248_s2  ;;  %v12513_v33 = vpop.permute.xlu1 %12512  ;;  %v12511_v55 = vpop.permute.xlu0 %12510 }
 0x3a9   : > { %15277 = vrot.lane.b32.xlu0 %v27529_v57, %s30157_s8  ;;  %23703 = vmatprep.subr.msk.mxu0 %vm236_vm1, %v26086_v11 }
 0x3aa   : > { %12052 = vmatprep.mubr.f32.mxu0 %v30149_v36  ;;  %23693 = vmatmul.mubr.msk.f32.vlgmr.msra.gmra.mrb[0].mxu1 %vm231_vm2, %v11968_v10  ;;  %v27879_v10 = vsel %vm12516_vm3, %v12511_v55, %v12513_v33 }
 0x3ab   : > { %23700 = vmatpush1.msk.msra.mxu1 %vm236_vm1, %v27860_v28  ;;  %23690 = vmatmul.mubr.msk.f32.gmra.mrb[2].mxu0 %vm231_vm2, %v11970_v43 }
 0x3ac   : > { %15458 = vrot.lane.b32.xlu1 %v27529_v57, %s30249_s21  ;;  %12129 = vmatprep.mubr.f32.mxu1 %v30149_v36  ;;  %v27868_v46 = vpop.permute.xlu1 %12514  ;;  %v12509_v37 = vpop.permute.xlu0 %12508  ;;  %s30251_s21 = smov 70  }
 0x3ad   : > { %30250 = vst [vmem:[#allocation108_spill] sm:$0xff] %v27868_v46  ;;  %15454 = vrot.lane.b32.xlu0 %v27506_v19, %s30166_s30  ;;  %12227 = vmatprep.mubr.f32.mxu0 %v30149_v36  ;;  %v12517_v9 = vsel %vm12516_vm3, %v12509_v37, %v12511_v55 }
 0x3ae   : > { %23694 = vmatmul.mubr.msk.f32.gmra.mrb[2].mxu1 %vm231_vm2, %v11970_v43  ;;  %23707 = vmatprep.subr.msk.mxu1 %vm236_vm1, %v27839_v27  ;;  %v15632_v43 = vld [vmem:[#allocation4 + $0x30] sm:$0xf] }
 0x3af   : > { %23697 = vmatmul.mubr.msk.f32.vlgmr.msra.gmra.mrb[0].mxu0 %vm231_vm2, %v12149_v18  ;;  %12304 = vmatprep.mubr.f32.mxu1 %v30149_v36 }
 0x3b0   : > { %23704 = vmatpush1.msk.msra.mxu0 %vm236_vm1, %v26062_v60  ;;  %15635 = vrot.lane.b32.xlu1 %v27506_v19, %s30171_s18  ;;  %v12709_v39 = vpop.permute.xlu1 %12708  ;;  %v12707_v11 = vpop.permute.xlu0 %12706 }
 0x3b1   : > { %15456 = vrot.lane.b32.xlu0 %v15451_v52, %s30166_s30  ;;  %12233 = vmatprep.mubr.f32.mxu0 %v30149_v36  ;;  %v27915_v52 = vsel %vm12712_vm4, %v12707_v11, %v12709_v39 }
 0x3b2   : > { %23701 = vmatmul.mubr.msk.f32.vlgmr.msra.gmra.mrb[0].mxu1 %vm231_vm2, %v12149_v18  ;;  %23711 = vmatprep.subr.msk.mxu0 %vm236_vm1, %v27879_v10  ;;  %30252 = vst [vmem:[#allocation109_spill] sm:$0xff] %v27915_v52 }
 0x3b3   : > { %23708 = vmatpush1.msk.msra.mxu1 %vm236_vm1, %v27891_v23  ;;  %23698 = vmatmul.mubr.msk.f32.gmra.mrb[2].mxu0 %vm231_vm2, %v27818_v53 }
 0x3b4   : > { %15637 = vrot.lane.b32.xlu1 %v15632_v43, %s30171_s18  ;;  %12310 = vmatprep.mubr.f32.mxu1 %v30149_v36  ;;  %v27901_v60 = vpop.permute.xlu1 %12700  ;;  %v12705_v18 = vpop.permute.xlu0 %12704  ;;  %v15813_v43 = vld [vmem:[#allocation4 + $0x30] sm:$0xf] }
 0x3b5   : > { %15639 = vrot.lane.b32.xlu0 %v27529_v57, %s30251_s21  ;;  %12408 = vmatprep.mubr.f32.mxu0 %v30149_v36  ;;  %s30256_s21 = smov 48  }
 0x3b6   : > { %23702 = vmatmul.mubr.msk.f32.gmra.mrb[2].mxu1 %vm231_vm2, %v27818_v53  ;;  %23715 = vmatprep.subr.msk.mxu1 %vm236_vm1, %v27868_v46  ;;  %v27926_v53 = vsel %vm12516_vm3, %v12513_v33, %v27868_v46 }
 0x3b7   : > { %23705 = vmatmul.mubr.msk.f32.vlgmr.msra.gmra.mrb[0].mxu0 %vm231_vm2, %v27816_v25  ;;  %12485 = vmatprep.mubr.f32.mxu1 %v30149_v36 }
 0x3b8   : > { %15820 = vrot.lane.b32.xlu1 %v27529_v57, %s30253_s24  ;;  %23712 = vmatpush1.msk.msra.mxu0 %vm236_vm1, %v12517_v9  ;;  %v27920_v55 = vpop.permute.xlu1 %12702  ;;  %v27922_v37 = vpop.permute.xlu0 %12710  ;;  %s30255_s24 = smov 67  }
 0x3b9   : > { %30254 = vst [vmem:[#allocation110_spill] sm:$0xff] %v27922_v37  ;;  %15816 = vrot.lane.b32.xlu0 %v27506_v19, %s30175_s12  ;;  %12414 = vmatprep.mubr.f32.mxu0 %v30149_v36  ;;  %v27960_v46 = vsel %vm12712_vm4, %v12709_v39, %v27922_v37 }
 0x3ba   : > { %23709 = vmatmul.mubr.msk.f32.vlgmr.msra.gmra.mrb[0].mxu1 %vm231_vm2, %v27816_v25  ;;  %23719 = vmatprep.subr.msk.mxu0 %vm236_vm1, %v27915_v52  ;;  %v12713_v25 = vsel %vm12712_vm4, %v12705_v18, %v12707_v11  ;;  %v15994_v52 = vld [vmem:[#allocation4 + $0x30] sm:$0xf] }
 0x3bb   : > { %23706 = vmatmul.mubr.msk.f32.gmra.mrb[2].mxu0 %vm231_vm2, %v27837_v15  ;;  %23716 = vmatpush1.msk.msra.mxu1 %vm236_vm1, %v27926_v53 }
 0x3bc   : > { %15997 = vrot.lane.b32.xlu1 %v27506_v19, %s30180_s19  ;;  %12491 = vmatprep.mubr.f32.mxu1 %v30149_v36  ;;  %v12899_v33 = vpop.permute.xlu1 %12898  ;;  %v27942_v9 = vpop.permute.xlu0 %12894 }
 0x3bd   : > { %15818 = vrot.lane.b32.xlu0 %v15813_v43, %s30175_s12  ;;  %12598 = vmatprep.mubr.f32.mxu0 %v30149_v36  ;;  %v12507_v43 = vld [vmem:[#allocation4 + $0x30] sm:$0xf]  ;;  %s25461_s12 = smov 65  }
 0x3be   : > { %23710 = vmatmul.mubr.msk.f32.gmra.mrb[2].mxu1 %vm231_vm2, %v27837_v15  ;;  %23723 = vmatprep.subr.msk.mxu1 %vm236_vm1, %v27922_v37  ;;  %v12900_v37 = vsel %vm2715_vm14, %v26165_v62, %v12899_v33  ;;  %vm30260_vm14 = vcmask 793600  }
 0x3bf   : > { %23713 = vmatmul.mubr.msk.f32.vlgmr.msra.gmra.mrb[0].mxu0 %vm231_vm2, %v27506_v19  ;;  %12675 = vmatprep.mubr.f32.mxu1 %v30149_v36 }
 0x3c0   : > { %23720 = vmatpush1.msk.msra.mxu0 %vm236_vm1, %v12713_v25  ;;  %15999 = vrot.lane.b32.xlu1 %v15994_v52, %s30180_s19  ;;  %v27956_v11 = vpop.permute.xlu1 %13075  ;;  %v12897_v18 = vpop.permute.xlu0 %12896  ;;  %s30258_s19 = smov 66  }
 0x3c1   : > { %16001 = vrot.lane.b32.xlu0 %v27529_v57, %s30248_s2  ;;  %23727 = vmatprep.subr.msk.mxu0 %vm236_vm1, %v26174_v1  ;;  %v16175_v1 = vld [vmem:[#allocation4 + $0x30] sm:$0xf] }
 0x3c2   : > { %12604 = vmatprep.mubr.f32.mxu0 %v30149_v36  ;;  %23717 = vmatmul.mubr.msk.f32.vlgmr.msra.gmra.mrb[0].mxu1 %vm231_vm2, %v27506_v19 }
 0x3c3   : > { %23714 = vmatmul.mubr.msk.f32.gmra.mrb[2].mxu0 %vm231_vm2, %v12507_v43  ;;  %23724 = vmatpush1.msk.msra.mxu1 %vm236_vm1, %v27960_v46 }
 0x3c4   : > { %16182 = vrot.lane.b32.xlu1 %v27529_v57, %s30255_s24  ;;  %12681 = vmatprep.mubr.f32.mxu1 %v30149_v36  ;;  %v27975_v15 = vpop.permute.xlu1 %13077  ;;  %v13080_v39 = vpop.permute.xlu0 %13079  ;;  %s30257_s24 = smov 44  }
 0x3c5   : > { %16178 = vrot.lane.b32.xlu0 %v27506_v19, %s30256_s21  ;;  %12792 = vmatprep.mubr.f32.mxu0 %v30149_v36 }
 0x3c6   : > { %23718 = vmatmul.mubr.msk.f32.gmra.mrb[2].mxu1 %vm231_vm2, %v12507_v43  ;;  %23731 = vmatprep.subr.msk.mxu1 %vm236_vm1, %v12899_v33  ;;  %v16356_v43 = vld [vmem:[#allocation4 + $0x30] sm:$0xf] }
 0x3c7   : > { %23721 = vmatmul.mubr.msk.f32.vlgmr.msra.gmra.mrb[0].mxu0 %vm231_vm2, %v27901_v60  ;;  %12869 = vmatprep.mubr.f32.mxu1 %v30149_v36 }
 0x3c8   : > { %23728 = vmatpush1.msk.msra.mxu0 %vm236_vm1, %v26152_v51  ;;  %16359 = vrot.lane.b32.xlu1 %v27506_v19, %s30257_s24  ;;  %v13261_v52 = vpop.permute.xlu1 %13260  ;;  %v27989_v25 = vpop.permute.xlu0 %13256 }
 0x3c9   : > { %16180 = vrot.lane.b32.xlu0 %v16175_v1, %s30256_s21  ;;  %23735 = vmatprep.subr.msk.mxu0 %vm236_vm1, %v26213_v22 }
 0x3ca   : > { %12798 = vmatprep.mubr.f32.mxu0 %v30149_v36  ;;  %23725 = vmatmul.mubr.msk.f32.vlgmr.msra.gmra.mrb[0].mxu1 %vm231_vm2, %v27901_v60 }
 0x3cb   : > { %23732 = vmatpush1.msk.msra.mxu1 %vm236_vm1, %v12900_v37  ;;  %23722 = vmatmul.mubr.msk.f32.gmra.mrb[2].mxu0 %vm231_vm2, %v27920_v55 }
 0x3cc   : > { %16361 = vrot.lane.b32.xlu1 %v16356_v43, %s30257_s24  ;;  %12875 = vmatprep.mubr.f32.mxu1 %v30149_v36  ;;  %v28004_v51 = vpop.permute.xlu1 %13437  ;;  %v28006_v22 = vpop.permute.xlu0 %13258  ;;  %v17287_v43 = vld [vmem:[#allocation4 + $0x30] sm:$0xf] }
 0x3cd   : > { %16363 = vrot.lane.b32.xlu0 %v27529_v57, %s30258_s19  ;;  %12973 = vmatprep.mubr.f32.mxu0 %v30149_v36  ;;  %s30259_s19 = smov 40  }
 0x3ce   : > { %23726 = vmatmul.mubr.msk.f32.gmra.mrb[2].mxu1 %vm231_vm2, %v27920_v55  ;;  %23739 = vmatprep.subr.msk.mxu1 %vm236_vm1, %v13080_v39  ;;  %v13081_v55 = vsel %vm2909_vm15, %v26204_v21, %v13080_v39  ;;  %v16537_v21 = vld [vmem:[#allocation4 + $0x30] sm:$0xf]  ;;  %vm30261_vm15 = vcmask 785408  }
 0x3cf   : > { %23729 = vmatmul.mubr.msk.f32.vlgmr.msra.gmra.mrb[0].mxu0 %vm231_vm2, %v27942_v9  ;;  %13050 = vmatprep.mubr.f32.mxu1 %v30149_v36 }
 0x3d0   : > { %23736 = vmatpush1.msk.msra.mxu0 %vm236_vm1, %v26185_v2  ;;  %16548 = vrot.lane.b32.xlu1 %v25635_v5, %s25461_s12  ;;  %v28020_v62 = vpop.permute.xlu1 %13439  ;;  %v13442_v60 = vpop.permute.xlu0 %13441 }
 0x3d1   : > { %16546 = vrot.lane.b32.xlu0 %v27474_v4, %s25461_s12  ;;  %23743 = vmatprep.subr.msk.mxu0 %vm236_vm1, %v26252_v42 }
 0x3d2   : > { %12979 = vmatprep.mubr.f32.mxu0 %v30149_v36  ;;  %23733 = vmatmul.mubr.msk.f32.vlgmr.msra.gmra.mrb[0].mxu1 %vm231_vm2, %v27942_v9  ;;  %v13262_v9 = vsel %vm3103_vm0, %v26243_v41, %v13261_v52  ;;  %vm30263_vm0 = vcmask 777216  }
 0x3d3   : > { %23740 = vmatpush1.msk.msra.mxu1 %vm236_vm1, %v13081_v55  ;;  %23730 = vmatmul.mubr.msk.f32.gmra.mrb[2].mxu0 %vm231_vm2, %v12897_v18 }
 0x3d4   : > { %16540 = vrot.lane.b32.xlu1 %v27506_v19, %s30259_s19  ;;  %13056 = vmatprep.mubr.f32.mxu1 %v30149_v36  ;;  %v13623_v2 = vpop.permute.xlu1 %13622  ;;  %v28035_v37 = vpop.permute.xlu0 %13618 }
 0x3d5   : > { %16544 = vrot.lane.b32.xlu0 %v25626_v3, %s25461_s12  ;;  %13154 = vmatprep.mubr.f32.mxu0 %v30149_v36  ;;  %v13624_v39 = vsel %vm30261_vm15, %v26315_v32, %v13623_v2  ;;  %v17106_v32 = vld [vmem:[#allocation4 + $0x30] sm:$0xf]  ;;  %vm30273_vm15 = vcmask 760832  }
 0x3d6   : > { %23734 = vmatmul.mubr.msk.f32.gmra.mrb[2].mxu1 %vm231_vm2, %v12897_v18  ;;  %23747 = vmatprep.subr.msk.mxu1 %vm236_vm1, %v13261_v52  ;;  %v13443_v18 = vsel %vm30260_vm14, %v26279_v7, %v13442_v60  ;;  %vm30268_vm14 = vcmask 769024  }
 0x3d7   : > { %23737 = vmatmul.mubr.msk.f32.vlgmr.msra.gmra.mrb[0].mxu0 %vm231_vm2, %v27956_v11  ;;  %13231 = vmatprep.mubr.f32.mxu1 %v30149_v36 }
 0x3d8   : > { %23744 = vmatpush1.msk.msra.mxu0 %vm236_vm1, %v26228_v30  ;;  %16542 = vrot.lane.b32.xlu1 %v16537_v21, %s30259_s19  ;;  %v28047_v42 = vpop.permute.xlu1 %13799  ;;  %v28049_v33 = vpop.permute.xlu0 %13620  ;;  %v30270_v21 = vld [vmem:[#allocation16_spill] sm:$0xff] }
 0x3d9   : > { %16550 = vrot.lane.b32.xlu0 %v27529_v57, %s25461_s12  ;;  %23751 = vmatprep.subr.msk.mxu0 %vm236_vm1, %v26288_v8  ;;  %s30262_s12 = smov 47  }
 0x3da   : > { %13160 = vmatprep.mubr.f32.mxu0 %v30149_v36  ;;  %23741 = vmatmul.mubr.msk.f32.vlgmr.msra.gmra.mrb[0].mxu1 %vm231_vm2, %v27956_v11  ;;  %v16731_v11 = vld [vmem:[#allocation4 + $0x30] sm:$0xf] }
 0x3db   : > { %23748 = vmatpush1.msk.msra.mxu1 %vm236_vm1, %v13262_v9  ;;  %23738 = vmatmul.mubr.msk.f32.gmra.mrb[2].mxu0 %vm231_vm2, %v27975_v15 }
 0x3dc   : > { %16742 = vrot.lane.b32.xlu1 %v25635_v5, %s30166_s30  ;;  %13237 = vmatprep.mubr.f32.mxu1 %v30149_v36  ;;  %v28065_v30 = vpop.permute.xlu1 %13801  ;;  %v13804_v8 = vpop.permute.xlu0 %13803 }
 0x3dd   : > { %16740 = vrot.lane.b32.xlu0 %v27474_v4, %s30166_s30  ;;  %13335 = vmatprep.mubr.f32.mxu0 %v30149_v36  ;;  %v13805_v52 = vsel %vm30263_vm0, %v26351_v61, %v13804_v8  ;;  %vm14535_vm0 = vcmask 744448  }
 0x3de   : > { %23742 = vmatmul.mubr.msk.f32.gmra.mrb[2].mxu1 %vm231_vm2, %v27975_v15  ;;  %23755 = vmatprep.subr.msk.mxu1 %vm236_vm1, %v13442_v60  ;;  %v30267_v60 = vld [vmem:[#allocation15_spill] sm:$0xff] }
 0x3df   : > { %23745 = vmatmul.mubr.msk.f32.vlgmr.msra.gmra.mrb[0].mxu0 %vm231_vm2, %v27989_v25  ;;  %13412 = vmatprep.mubr.f32.mxu1 %v30149_v36 }
 0x3e0   : > { %23752 = vmatpush1.msk.msra.mxu0 %vm236_vm1, %v26264_v50  ;;  %16734 = vrot.lane.b32.xlu1 %v27506_v19, %s30187_s25  ;;  %v28080_v41 = vpop.permute.xlu1 %13984 }
 0x3e1   : > { %16738 = vrot.lane.b32.xlu0 %v25626_v3, %s30166_s30  ;;  %23759 = vmatprep.subr.msk.mxu0 %vm236_vm1, %v26324_v35  ;;  %v28086_v4 = vpop.permute.xlu0 %13980  ;;  %v13986_v55 = vsel %vm30268_vm14, %v30267_v60, %v28080_v41  ;;  %vm30277_vm14 = vcmask 752640  }
 0x3e2   : > { %13341 = vmatprep.mubr.f32.mxu0 %v30149_v36  ;;  %23749 = vmatmul.mubr.msk.f32.vlgmr.msra.gmra.mrb[0].mxu1 %vm231_vm2, %v27989_v25 }
 0x3e3   : > { %23756 = vmatpush1.msk.msra.mxu1 %vm236_vm1, %v13443_v18  ;;  %23746 = vmatmul.mubr.msk.f32.gmra.mrb[2].mxu0 %vm231_vm2, %v28006_v22 }
 0x3e4   : > { %16736 = vrot.lane.b32.xlu1 %v16731_v11, %s30187_s25  ;;  %13418 = vmatprep.mubr.f32.mxu1 %v30149_v36  ;;  %v28098_v50 = vpop.permute.xlu1 %14161 }
 0x3e5   : > { %16744 = vrot.lane.b32.xlu0 %v27529_v57, %s30166_s30  ;;  %13516 = vmatprep.mubr.f32.mxu0 %v30149_v36  ;;  %v28103_v7 = vpop.permute.xlu0 %13982 }
 0x3e6   : > { %23750 = vmatmul.mubr.msk.f32.gmra.mrb[2].mxu1 %vm231_vm2, %v28006_v22  ;;  %23763 = vmatprep.subr.msk.mxu1 %vm236_vm1, %v13623_v2 }
 0x3e7   : > { %23753 = vmatmul.mubr.msk.f32.vlgmr.msra.gmra.mrb[0].mxu0 %vm231_vm2, %v28004_v51  ;;  %13593 = vmatprep.mubr.f32.mxu1 %v30149_v36 }
 0x3e8   : > { %23760 = vmatpush1.msk.msra.mxu0 %vm236_vm1, %v26300_v14  ;;  %16932 = vrot.lane.b32.xlu1 %v27529_v57, %s30256_s21  ;;  %v28115_v35 = vpop.permute.xlu1 %14163  ;;  %v16925_v14 = vld [vmem:[#allocation4 + $0x30] sm:$0xf] }
 0x3e9   : > { %16928 = vrot.lane.b32.xlu0 %v27506_v19, %s30191_s20  ;;  %23767 = vmatprep.subr.msk.mxu0 %vm236_vm1, %v26360_v12  ;;  %v28121_v15 = vpop.permute.xlu0 %14165 }
 0x3ea   : > { %13522 = vmatprep.mubr.f32.mxu0 %v30149_v36  ;;  %23757 = vmatmul.mubr.msk.f32.vlgmr.msra.gmra.mrb[0].mxu1 %vm231_vm2, %v28004_v51  ;;  %v30266_v51 = vld [vmem:[#allocation18_spill] sm:$0xff] }
 0x3eb   : > { %23764 = vmatpush1.msk.msra.mxu1 %vm236_vm1, %v13624_v39  ;;  %23754 = vmatmul.mubr.msk.f32.gmra.mrb[2].mxu0 %vm231_vm2, %v28020_v62  ;;  %v30276_v39 = vld [vmem:[#allocation20_spill] sm:$0xff] }
 0x3ec   : > { %17109 = vrot.lane.b32.xlu1 %v27506_v19, %s30195_s28  ;;  %13599 = vmatprep.mubr.f32.mxu1 %v30149_v36 }
 0x3ed   : > { %16930 = vrot.lane.b32.xlu0 %v16925_v14, %s30191_s20  ;;  %v28135_v12 = vpop.permute.xlu1 %14346  ;;  %13697 = vmatprep.mubr.f32.mxu0 %v30149_v36 }
 0x3ee   : > { %23758 = vmatmul.mubr.msk.f32.gmra.mrb[2].mxu1 %vm231_vm2, %v28020_v62  ;;  %v28140_v1 = vpop.permute.xlu0 %14342  ;;  %23771 = vmatprep.subr.msk.mxu1 %vm236_vm1, %v13804_v8  ;;  %v17468_v62 = vld [vmem:[#allocation4 + $0x30] sm:$0xf]  ;;  %v14348_v14 = vsel %vm30277_vm14, %v30276_v39, %v28135_v12  ;;  %v30287_v39 = vld [vmem:[#allocation30_spill] sm:$0xff]  ;;  %vm30289_vm14 = vcmask 596992  }
 0x3ef   : > { %23761 = vmatmul.mubr.msk.f32.vlgmr.msra.gmra.mrb[0].mxu0 %vm231_vm2, %v28035_v37  ;;  %13774 = vmatprep.mubr.f32.mxu1 %v30149_v36  ;;  %v17649_v8 = vld [vmem:[#allocation4 + $0x30] sm:$0xf] }
 0x3f0   : > { %23768 = vmatpush1.msk.msra.mxu0 %vm236_vm1, %v26336_v47  ;;  %17111 = vrot.lane.b32.xlu1 %v17106_v32, %s30195_s28  ;;  %v28162_v47 = vld [vmem:[#allocation4 + $0x10] sm:$0xff]  ;;  %s30265_s28 = smov 24  }
 0x3f1   : > { %17113 = vrot.lane.b32.xlu0 %v27529_v57, %s30262_s12  ;;  %23775 = vmatprep.subr.msk.mxu0 %vm236_vm1, %v26396_v49  ;;  %v28153_v19 = vpop.permute.xlu1 %14529  ;;  %s30264_s12 = smov 46  }
 0x3f2   : > { %13703 = vmatprep.mubr.f32.mxu0 %v30149_v36  ;;  %23765 = vmatmul.mubr.msk.f32.vlgmr.msra.gmra.mrb[0].mxu1 %vm231_vm2, %v28035_v37  ;;  %v28160_v25 = vpop.permute.xlu0 %14344 }
 0x3f3   : > { %23772 = vmatpush1.msk.msra.mxu1 %vm236_vm1, %v13805_v52  ;;  %23762 = vmatmul.mubr.msk.f32.gmra.mrb[2].mxu0 %vm231_vm2, %v28049_v33 }
 0x3f4   : > { %17294 = vrot.lane.b32.xlu1 %v27529_v57, %s30264_s12  ;;  %13780 = vmatprep.mubr.f32.mxu1 %v30149_v36  ;;  %s30275_s12 = smov 43  }
 0x3f5   : > { %17290 = vrot.lane.b32.xlu0 %v28162_v47, %s30265_s28  ;;  %v28172_v61 = vpop.permute.xlu1 %14527  ;;  %13878 = vmatprep.mubr.f32.mxu0 %v30149_v36 }
 0x3f6   : > { %23766 = vmatmul.mubr.msk.f32.gmra.mrb[2].mxu1 %vm231_vm2, %v28049_v33  ;;  %v28177_v49 = vpop.permute.xlu0 %14531  ;;  %23779 = vmatprep.subr.msk.mxu1 %vm236_vm1, %v28080_v41  ;;  %v30272_v33 = vld [vmem:[#allocation17_spill] sm:$0xff]  ;;  %v17830_v41 = vld [vmem:[#allocation4 + $0x30] sm:$0xf] }
 0x3f7   : > { %23769 = vmatmul.mubr.msk.f32.vlgmr.msra.gmra.mrb[0].mxu0 %vm231_vm2, %v28047_v42  ;;  %13955 = vmatprep.mubr.f32.mxu1 %v30149_v36  ;;  %v14167_v9 = vsel %vm30273_vm15, %v30272_v33, %v28121_v15  ;;  %v14537_v18 = vsel %vm14535_vm0, %v28153_v19, %v28177_v49  ;;  %vm14729_vm15 = vcmask 736256  }
 0x3f8   : > { %23776 = vmatpush1.msk.msra.mxu0 %vm236_vm1, %v26372_v24  ;;  %17471 = vrot.lane.b32.xlu1 %v28162_v47, %s30163_s11 }
 0x3f9   : > { %17292 = vrot.lane.b32.xlu0 %v17287_v43, %s30265_s28  ;;  %23783 = vmatprep.subr.msk.mxu0 %vm236_vm1, %v30266_v51  ;;  %v28191_v22 = vpop.permute.xlu1 %14533  ;;  %s30269_s28 = smov 45   ;;  %v18011_v43 = vld [vmem:[#allocation4 + $0x30] sm:$0xf] }
 0x3fa   : > { %13884 = vmatprep.mubr.f32.mxu0 %v30149_v36  ;;  %23773 = vmatmul.mubr.msk.f32.vlgmr.msra.gmra.mrb[0].mxu1 %vm231_vm2, %v28047_v42  ;;  %v28199_v24 = vpop.permute.xlu0 %14523  ;;  %v30271_v42 = vld [vmem:[#allocation21_spill] sm:$0xff] }
 0x3fb   : > { %23780 = vmatpush1.msk.msra.mxu1 %vm236_vm1, %v13986_v55  ;;  %23770 = vmatmul.mubr.msk.f32.gmra.mrb[2].mxu0 %vm231_vm2, %v28065_v30  ;;  %v28338_v55 = vld [vmem:[%s25604_s26 + $0x8] sm:$0xff] }
 0x3fc   : > { %17473 = vrot.lane.b32.xlu1 %v17468_v62, %s30163_s11  ;;  %13961 = vmatprep.mubr.f32.mxu1 %v30149_v36 }
 0x3fd   : > { %17475 = vrot.lane.b32.xlu0 %v27529_v57, %s30269_s28  ;;  %14059 = vmatprep.mubr.f32.mxu0 %v30149_v36  ;;  %s30278_s28 = smov 42  }
 0x3fe   : > { %v28209_v2 = vpop.permute.xlu1 %14723  ;;  %23774 = vmatmul.mubr.msk.f32.gmra.mrb[2].mxu1 %vm231_vm2, %v28065_v30  ;;  %v28213_v37 = vpop.permute.xlu0 %14525  ;;  %23787 = vmatprep.subr.msk.mxu1 %vm236_vm1, %v28121_v15  ;;  %v30274_v15 = vld [vmem:[#allocation19_spill] sm:$0xff] }
 0x3ff   : > { %23777 = vmatmul.mubr.msk.f32.vlgmr.msra.gmra.mrb[0].mxu0 %vm231_vm2, %v28086_v4  ;;  %14136 = vmatprep.mubr.f32.mxu1 %v30149_v36 }
 0x400   : > { %23784 = vmatpush1.msk.msra.mxu0 %vm236_vm1, %v30270_v21  ;;  %17656 = vrot.lane.b32.xlu1 %v27529_v57, %s30257_s24 }
 0x401   : > { %17652 = vrot.lane.b32.xlu0 %v28162_v47, %s30182_s9  ;;  %23791 = vmatprep.subr.msk.mxu0 %vm236_vm1, %v30271_v42 }
 0x402   : > { %v14722_v30 = vpop.permute.xlu1 %14721  ;;  %14065 = vmatprep.mubr.f32.mxu0 %v30149_v36  ;;  %23781 = vmatmul.mubr.msk.f32.vlgmr.msra.gmra.mrb[0].mxu1 %vm231_vm2, %v28086_v4 }
 0x403   : > { %23788 = vmatpush1.msk.msra.mxu1 %vm236_vm1, %v14167_v9  ;;  %v28235_v57 = vpop.permute.xlu0 %14725  ;;  %23778 = vmatmul.mubr.msk.f32.gmra.mrb[2].mxu0 %vm231_vm2, %v28103_v7  ;;  %v30282_v9 = vld [vmem:[#allocation22_spill] sm:$0xff] }
 0x404   : > { %17833 = vrot.lane.b32.xlu1 %v28162_v47, %s30204_s27  ;;  %14142 = vmatprep.mubr.f32.mxu1 %v30149_v36 }
 0x405   : > { %17654 = vrot.lane.b32.xlu0 %v17649_v8, %s30182_s9  ;;  %14240 = vmatprep.mubr.f32.mxu0 %v30149_v36 }
 0x406   : > { %v14728_v4 = vpop.permute.xlu1 %14727  ;;  %23782 = vmatmul.mubr.msk.f32.gmra.mrb[2].mxu1 %vm231_vm2, %v28103_v7  ;;  %23795 = vmatprep.subr.msk.mxu1 %vm236_vm1, %v28135_v12  ;;  %v28260_v7 = vld [vmem:[%s25604_s26 + $0x10] sm:$0xff]  ;;  %v14536_v12 = vsel %vm14535_vm0, %v28172_v61, %v28153_v19  ;;  %v14731_v19 = vsel %vm14729_vm15, %v28209_v2, %v28235_v57  ;;  %v14538_v61 = vsel %vm14535_vm0, %v28177_v49, %v28191_v22  ;;  %vm30285_vm0 = vcmask 605184  }
 0x407   : > { %v28248_v11 = vpop.permute.xlu0 %14717  ;;  %23785 = vmatmul.mubr.msk.f32.vlgmr.msra.gmra.mrb[0].mxu0 %vm231_vm2, %v28098_v50  ;;  %14317 = vmatprep.mubr.f32.mxu1 %v30149_v36  ;;  %v14730_v49 = vsel %vm14729_vm15, %v14722_v30, %v28209_v2  ;;  %v14732_v60 = vsel %vm14729_vm15, %v28235_v57, %v14728_v4  ;;  %v30284_v30 = vld [vmem:[#allocation23_spill] sm:$0xff]  ;;  %vm30294_vm15 = vcmask 588800  }
 0x408   : > { %23792 = vmatpush1.msk.msra.mxu0 %vm236_vm1, %v30274_v15  ;;  %17835 = vrot.lane.b32.xlu1 %v17830_v41, %s30204_s27  ;;  %v18550_v41 = vld [vmem:[#allocation4 + $0x38] sm:$0xf]  ;;  %v30286_v15 = vld [vmem:[#allocation25_spill] sm:$0xff] }
 0x409   : > { %17837 = vrot.lane.b32.xlu0 %v28260_v7, %s30275_s12  ;;  %14246 = vmatprep.mubr.f32.mxu0 %v30149_v36  ;;  %s30279_s12 = smov 4  }
 0x40a   : > { %v28268_v32 = vpop.permute.xlu1 %14911  ;;  %23789 = vmatmul.mubr.msk.f32.vlgmr.msra.gmra.mrb[0].mxu1 %vm231_vm2, %v28098_v50  ;;  %23799 = vmatprep.subr.msk.mxu0 %vm236_vm1, %v14537_v18 }
 0x40b   : > { %23796 = vmatpush1.msk.msra.mxu1 %vm236_vm1, %v14348_v14  ;;  %v28274_v52 = vpop.permute.xlu0 %14719  ;;  %23786 = vmatmul.mubr.msk.f32.gmra.mrb[2].mxu0 %vm231_vm2, %v28115_v35  ;;  %v30288_v14 = vld [vmem:[#allocation26_spill] sm:$0xff] }
 0x40c   : > { %18018 = vrot.lane.b32.xlu1 %v28260_v7, %s30278_s28  ;;  %14323 = vmatprep.mubr.f32.mxu1 %v30149_v36  ;;  %s30280_s28 = smov 41  }
 0x40d   : > { %18014 = vrot.lane.b32.xlu0 %v28162_v47, %s30209_s4  ;;  %14421 = vmatprep.mubr.f32.mxu0 %v30149_v36 }
 0x40e   : > { %v28287_v50 = vpop.permute.xlu1 %14913  ;;  %23790 = vmatmul.mubr.msk.f32.gmra.mrb[2].mxu1 %vm231_vm2, %v28115_v35  ;;  %23803 = vmatprep.subr.msk.mxu1 %vm236_vm1, %v28191_v22  ;;  %v18192_v35 = vld [vmem:[#allocation4 + $0x30] sm:$0xf] }
 0x40f   : > { %v14916_v51 = vpop.permute.xlu0 %14915  ;;  %23793 = vmatmul.mubr.msk.f32.vlgmr.msra.gmra.mrb[0].mxu0 %vm231_vm2, %v28140_v1  ;;  %14498 = vmatprep.mubr.f32.mxu1 %v30149_v36 }
 0x410   : > { %23800 = vmatpush1.msk.msra.mxu0 %vm236_vm1, %v14536_v12  ;;  %18195 = vrot.lane.b32.xlu1 %v28162_v47, %s30279_s12  ;;  %v14917_v8 = vsel %vm30285_vm0, %v30284_v30, %v14916_v51  ;;  %v30299_v30 = vld [vmem:[#allocation32_spill] sm:$0xff]  ;;  %vm30300_vm0 = vcmask 580608  }
 0x411   : > { %18016 = vrot.lane.b32.xlu0 %v18011_v43, %s30209_s4  ;;  %14427 = vmatprep.mubr.f32.mxu0 %v30149_v36 }
 0x412   : > { %v28307_v62 = vpop.permute.xlu1 %15096  ;;  %23797 = vmatmul.mubr.msk.f32.vlgmr.msra.gmra.mrb[0].mxu1 %vm231_vm2, %v28140_v1  ;;  %23807 = vmatprep.subr.msk.mxu0 %vm236_vm1, %v14731_v19  ;;  %v18744_v19 = vld [vmem:[#allocation4 + $0x38] sm:$0xf] }
 0x413   : > { %23804 = vmatpush1.msk.msra.mxu1 %vm236_vm1, %v14538_v61  ;;  %v28313_v47 = vpop.permute.xlu0 %15092  ;;  %23794 = vmatmul.mubr.msk.f32.gmra.mrb[2].mxu0 %vm231_vm2, %v28160_v25  ;;  %v30290_v61 = vld [vmem:[#allocation28_spill] sm:$0xff] }
 0x414   : > { %18197 = vrot.lane.b32.xlu1 %v18192_v35, %s30279_s12  ;;  %14504 = vmatprep.mubr.f32.mxu1 %v30149_v36  ;;  %s25462_s12 = smov 39  }
 0x415   : > { %18199 = vrot.lane.b32.xlu0 %v28260_v7, %s30280_s28  ;;  %14615 = vmatprep.mubr.f32.mxu0 %v30149_v36  ;;  %s30091_s28 = smov 38  }
 0x416   : > { %v28324_v1 = vpop.permute.xlu1 %15273  ;;  %23798 = vmatmul.mubr.msk.f32.gmra.mrb[2].mxu1 %vm231_vm2, %v28160_v25  ;;  %23811 = vmatprep.subr.msk.mxu1 %vm236_vm1, %v14728_v4  ;;  %v30281_v25 = vld [vmem:[#allocation24_spill] sm:$0xff] }
 0x417   : > { %v28329_v22 = vpop.permute.xlu0 %15094  ;;  %23801 = vmatmul.mubr.msk.f32.vlgmr.msra.gmra.mrb[0].mxu0 %vm231_vm2, %v28199_v24  ;;  %14692 = vmatprep.mubr.f32.mxu1 %v30149_v36 }
 0x418   : > { %23808 = vmatpush1.msk.msra.mxu0 %vm236_vm1, %v14730_v49  ;;  %18559 = vrot.lane.b32.xlu1 %v28338_v55, %s25462_s12  ;;  %v30293_v49 = vld [vmem:[#allocation29_spill] sm:$0xff] }
 0x419   : > { %18374 = vrot.lane.b32.xlu0 %v28260_v7, %s30259_s19  ;;  %23815 = vmatprep.subr.msk.mxu0 %vm236_vm1, %v30281_v25 }
 0x41a   : > { %v28345_v2 = vpop.permute.xlu1 %15275  ;;  %14621 = vmatprep.mubr.f32.mxu0 %v30149_v36  ;;  %23805 = vmatmul.mubr.msk.f32.vlgmr.msra.gmra.mrb[0].mxu1 %vm231_vm2, %v28199_v24  ;;  %v28363_v24 = vld [vmem:[#allocation4 + $0x18] sm:$0xff] }
 0x41b   : > { %v28350_v21 = vpop.permute.xlu0 %15277  ;;  %23802 = vmatmul.mubr.msk.f32.gmra.mrb[2].mxu0 %vm231_vm2, %v28213_v37  ;;  %23812 = vmatpush1.msk.msra.mxu1 %vm236_vm1, %v14732_v60 }
 0x41c   : > { %18557 = vrot.lane.b32.xlu1 %v25626_v3, %s25462_s12  ;;  %14698 = vmatprep.mubr.f32.mxu1 %v30149_v36  ;;  %v15279_v60 = vsel %vm30294_vm15, %v30293_v49, %v28350_v21  ;;  %vm30310_vm15 = vcmask 564224  }
 0x41d   : > { %18561 = vrot.lane.b32.xlu0 %v25635_v5, %s25462_s12  ;;  %14809 = vmatprep.mubr.f32.mxu0 %v30149_v36 }
 0x41e   : > { %v28359_v42 = vpop.permute.xlu1 %15458  ;;  %23806 = vmatmul.mubr.msk.f32.gmra.mrb[2].mxu1 %vm231_vm2, %v28213_v37  ;;  %23819 = vmatprep.subr.msk.mxu1 %vm236_vm1, %v14916_v51  ;;  %v30283_v37 = vld [vmem:[#allocation27_spill] sm:$0xff]  ;;  %v28432_v51 = vcombine.high %v28260_v7, %v28260_v7 }
 0x41f   : > { %v28366_v33 = vpop.permute.xlu0 %15454  ;;  %23809 = vmatmul.mubr.msk.f32.vlgmr.msra.gmra.mrb[0].mxu0 %vm231_vm2, %v28248_v11  ;;  %14886 = vmatprep.mubr.f32.mxu1 %v30149_v36 }
 0x420   : > { %23816 = vmatpush1.msk.msra.mxu0 %vm236_vm1, %v30282_v9  ;;  %18563 = vrot.lane.b32.xlu1 %v28260_v7, %s25462_s12  ;;  %s30291_s12 = smov 22  }
 0x421   : > { %18553 = vrot.lane.b32.xlu0 %v28363_v24, %s30219_s17  ;;  %23823 = vmatprep.subr.msk.mxu0 %vm236_vm1, %v30283_v37  ;;  %v30296_v37 = vld [vmem:[#allocation31_spill] sm:$0xff] }
 0x422   : > { %v28380_v57 = vpop.permute.xlu1 %15635  ;;  %14815 = vmatprep.mubr.f32.mxu0 %v30149_v36  ;;  %23813 = vmatmul.mubr.msk.f32.vlgmr.msra.gmra.mrb[0].mxu1 %vm231_vm2, %v28248_v11 }
 0x423   : > { %23820 = vmatpush1.msk.msra.mxu1 %vm236_vm1, %v14917_v8  ;;  %v28386_v4 = vpop.permute.xlu0 %15456  ;;  %23810 = vmatmul.mubr.msk.f32.gmra.mrb[2].mxu0 %vm231_vm2, %v28274_v52  ;;  %v15460_v8 = vsel %vm30300_vm0, %v30299_v30, %v28359_v42  ;;  %vm30315_vm0 = vcmask 556032  }
 0x424   : > { %18753 = vrot.lane.b32.xlu1 %v28338_v55, %s30091_s28  ;;  %14892 = vmatprep.mubr.f32.mxu1 %v30149_v36 }
 0x425   : > { %18555 = vrot.lane.b32.xlu0 %v18550_v41, %s30219_s17  ;;  %14990 = vmatprep.mubr.f32.mxu0 %v30149_v36 }
 0x426   : > { %v28395_v18 = vpop.permute.xlu1 %15637  ;;  %23814 = vmatmul.mubr.msk.f32.gmra.mrb[2].mxu1 %vm231_vm2, %v28274_v52  ;;  %23827 = vmatprep.subr.msk.mxu1 %vm236_vm1, %v28307_v62  ;;  %v15098_v52 = vsel %vm30289_vm14, %v30288_v14, %v28307_v62  ;;  %v18938_v62 = vld [vmem:[#allocation4 + $0x38] sm:$0xf]  ;;  %vm30304_vm14 = vcmask 572416  }
 0x427   : > { %v28401_v11 = vpop.permute.xlu0 %15639  ;;  %23817 = vmatmul.mubr.msk.f32.vlgmr.msra.gmra.mrb[0].mxu0 %vm231_vm2, %v28268_v32  ;;  %15067 = vmatprep.mubr.f32.mxu1 %v30149_v36 }
 0x428   : > { %23824 = vmatpush1.msk.msra.mxu0 %vm236_vm1, %v30286_v15  ;;  %18751 = vrot.lane.b32.xlu1 %v25626_v3, %s30091_s28  ;;  %v19118_v15 = vld [vmem:[#allocation4 + $0x38] sm:$0xf] }
 0x429   : > { %18755 = vrot.lane.b32.xlu0 %v25635_v5, %s30091_s28  ;;  %23831 = vmatprep.subr.msk.mxu0 %vm236_vm1, %v30287_v39 }
 0x42a   : > { %v28417_v12 = vpop.permute.xlu1 %15820  ;;  %14996 = vmatprep.mubr.f32.mxu0 %v30149_v36  ;;  %23821 = vmatmul.mubr.msk.f32.vlgmr.msra.gmra.mrb[0].mxu1 %vm231_vm2, %v28268_v32 }
 0x42b   : > { %23828 = vmatpush1.msk.msra.mxu1 %vm236_vm1, %v15098_v52  ;;  %v28423_v43 = vpop.permute.xlu0 %15816  ;;  %23818 = vmatmul.mubr.msk.f32.gmra.mrb[2].mxu0 %vm231_vm2, %v28287_v50  ;;  %v30301_v52 = vld [vmem:[#allocation34_spill] sm:$0xff] }
 0x42c   : > { %18757 = vrot.lane.b32.xlu1 %v28260_v7, %s30091_s28  ;;  %15073 = vmatprep.mubr.f32.mxu1 %v30149_v36  ;;  %s30297_s28 = smov 21  }
 0x42d   : > { %18747 = vrot.lane.b32.xlu0 %v28363_v24, %s30222_s0  ;;  %15171 = vmatprep.mubr.f32.mxu0 %v30149_v36 }
 0x42e   : > { %v28437_v32 = vpop.permute.xlu1 %15997  ;;  %23822 = vmatmul.mubr.msk.f32.gmra.mrb[2].mxu1 %vm231_vm2, %v28287_v50  ;;  %23835 = vmatprep.subr.msk.mxu1 %vm236_vm1, %v28350_v21  ;;  %v30292_v50 = vld [vmem:[#allocation33_spill] sm:$0xff] }
 0x42f   : > { %v28443_v35 = vpop.permute.xlu0 %15818  ;;  %23825 = vmatmul.mubr.msk.f32.vlgmr.msra.gmra.mrb[0].mxu0 %vm231_vm2, %v28313_v47  ;;  %15248 = vmatprep.mubr.f32.mxu1 %v30149_v36 }
 0x430   : > { %23832 = vmatpush1.msk.msra.mxu0 %vm236_vm1, %v30290_v61  ;;  %18946 = vrot.lane.b32.xlu1 %v28432_v51, %s30291_s12  ;;  %s30295_s12 = smov 116  }
 0x431   : > { %18749 = vrot.lane.b32.xlu0 %v18744_v19, %s30222_s0  ;;  %23839 = vmatprep.subr.msk.mxu0 %vm236_vm1, %v30292_v50  ;;  %v30302_v19 = vld [vmem:[#allocation39_spill] sm:$0xff] }
 0x432   : > { %v28458_v25 = vpop.permute.xlu1 %15999  ;;  %15177 = vmatprep.mubr.f32.mxu0 %v30149_v36  ;;  %23829 = vmatmul.mubr.msk.f32.vlgmr.msra.gmra.mrb[0].mxu1 %vm231_vm2, %v28313_v47 }
 0x433   : > { %23836 = vmatpush1.msk.msra.mxu1 %vm236_vm1, %v15279_v60  ;;  %v28464_v9 = vpop.permute.xlu0 %16001  ;;  %23826 = vmatmul.mubr.msk.f32.gmra.mrb[2].mxu0 %vm231_vm2, %v28329_v22  ;;  %v30306_v60 = vld [vmem:[#allocation37_spill] sm:$0xff] }
 0x434   : > { %18943 = vrot.lane.b32.xlu1 %v18938_v62, %s30295_s12  ;;  %15254 = vmatprep.mubr.f32.mxu1 %v30149_v36 }
 0x435   : > { %18941 = vrot.lane.b32.xlu0 %v28363_v24, %s30295_s12  ;;  %15352 = vmatprep.mubr.f32.mxu0 %v30149_v36 }
 0x436   : > { %v28473_v21 = vpop.permute.xlu1 %16182  ;;  %23830 = vmatmul.mubr.msk.f32.gmra.mrb[2].mxu1 %vm231_vm2, %v28329_v22  ;;  %23843 = vmatprep.subr.msk.mxu1 %vm236_vm1, %v28359_v42  ;;  %v30298_v22 = vld [vmem:[#allocation36_spill] sm:$0xff] }
 0x437   : > { %v28479_v47 = vpop.permute.xlu0 %16178  ;;  %23833 = vmatmul.mubr.msk.f32.vlgmr.msra.gmra.mrb[0].mxu0 %vm231_vm2, %v28324_v1  ;;  %15429 = vmatprep.mubr.f32.mxu1 %v30149_v36  ;;  %v19297_v42 = vld [vmem:[#allocation4 + $0x38] sm:$0xf] }
 0x438   : > { %23840 = vmatpush1.msk.msra.mxu0 %vm236_vm1, %v30296_v37  ;;  %19121 = vrot.lane.b32.xlu1 %v28363_v24, %s30227_s23  ;;  %v19655_v37 = vld [vmem:[#allocation4 + $0x38] sm:$0xf] }
 0x439   : > { %19125 = vrot.lane.b32.xlu0 %v28432_v51, %s30297_s28  ;;  %23847 = vmatprep.subr.msk.mxu0 %vm236_vm1, %v30298_v22  ;;  %v30309_v22 = vld [vmem:[#allocation38_spill] sm:$0xff]  ;;  %s30428_s28 = sld [smem:[#allocation114_spill]] }
 0x43a   : > { %v28495_v41 = vpop.permute.xlu1 %16359  ;;  %15358 = vmatprep.mubr.f32.mxu0 %v30149_v36  ;;  %23837 = vmatmul.mubr.msk.f32.vlgmr.msra.gmra.mrb[0].mxu1 %vm231_vm2, %v28324_v1  ;;  %v15822_v30 = vsel %vm30310_vm15, %v30309_v22, %v28417_v12  ;;  %vm16552_vm15 = vcmask 531456  }
 0x43b   : > { %23844 = vmatpush1.msk.msra.mxu1 %vm236_vm1, %v15460_v8  ;;  %v28501_v39 = vpop.permute.xlu0 %16180  ;;  %23834 = vmatmul.mubr.msk.f32.gmra.mrb[2].mxu0 %vm231_vm2, %v28345_v2 }
 0x43c   : > { %19304 = vrot.lane.b32.xlu1 %v28432_v51, %s30163_s11  ;;  %15435 = vmatprep.mubr.f32.mxu1 %v30149_v36  ;;  %s30307_s11 = smov 18  }
 0x43d   : > { %19123 = vrot.lane.b32.xlu0 %v19118_v15, %s30227_s23  ;;  %15533 = vmatprep.mubr.f32.mxu0 %v30149_v36  ;;  %s30305_s23 = smov 19  }
 0x43e   : > { %v28510_v14 = vpop.permute.xlu1 %16361  ;;  %23838 = vmatmul.mubr.msk.f32.gmra.mrb[2].mxu1 %vm231_vm2, %v28345_v2  ;;  %23851 = vmatprep.subr.msk.mxu1 %vm236_vm1, %v28401_v11  ;;  %v30303_v2 = vld [vmem:[#allocation35_spill] sm:$0xff] }
 0x43f   : > { %v28516_v1 = vpop.permute.xlu0 %16363  ;;  %23841 = vmatmul.mubr.msk.f32.vlgmr.msra.gmra.mrb[0].mxu0 %vm231_vm2, %v28366_v33  ;;  %15610 = vmatprep.mubr.f32.mxu1 %v30149_v36  ;;  %v15641_v61 = vsel %vm30304_vm14, %v30303_v2, %v28401_v11  ;;  %vm30319_vm14 = vcmask 547840  }
 0x440   : > { %23848 = vmatpush1.msk.msra.mxu0 %vm236_vm1, %v30301_v52  ;;  %19302 = vrot.lane.b32.xlu1 %v19297_v42, %s30229_s1  ;;  %v30311_v42 = vld [vmem:[#allocation40_spill] sm:$0xff]  ;;  %v30314_v52 = vld [vmem:[#allocation41_spill] sm:$0xff] }
 0x441   : > { %19300 = vrot.lane.b32.xlu0 %v28363_v24, %s30229_s1  ;;  %23855 = vmatprep.subr.msk.mxu0 %vm236_vm1, %v30302_v19  ;;  %v16003_v19 = vsel %vm30315_vm0, %v30314_v52, %v28464_v9  ;;  %vm30324_vm0 = vcmask 539648  }
 0x442   : > { %v28531_v50 = vpop.permute.xlu1 %16548  ;;  %15539 = vmatprep.mubr.f32.mxu0 %v30149_v36  ;;  %23845 = vmatmul.mubr.msk.f32.vlgmr.msra.gmra.mrb[0].mxu1 %vm231_vm2, %v28366_v33  ;;  %v19476_v33 = vld [vmem:[#allocation4 + $0x38] sm:$0xf] }
 0x443   : > { %23852 = vmatpush1.msk.msra.mxu1 %vm236_vm1, %v15641_v61  ;;  %v28537_v62 = vpop.permute.xlu0 %16546  ;;  %23842 = vmatmul.mubr.msk.f32.gmra.mrb[2].mxu0 %vm231_vm2, %v28386_v4  ;;  %v19834_v61 = vld [vmem:[#allocation4 + $0x38] sm:$0xf] }
 0x444   : > { %19479 = vrot.lane.b32.xlu1 %v28363_v24, %s30235_s22  ;;  %15616 = vmatprep.mubr.f32.mxu1 %v30149_v36  ;;  %v16554_v52 = vsel %vm16552_vm15, %v28537_v62, %v28531_v50 }
 0x445   : > { %19483 = vrot.lane.b32.xlu0 %v28432_v51, %s30305_s23  ;;  %15714 = vmatprep.mubr.f32.mxu0 %v30149_v36 }
 0x446   : > { %v28547_v11 = vpop.permute.xlu1 %16540  ;;  %23846 = vmatmul.mubr.msk.f32.gmra.mrb[2].mxu1 %vm231_vm2, %v28386_v4  ;;  %23859 = vmatprep.subr.msk.mxu1 %vm236_vm1, %v28417_v12  ;;  %v30308_v4 = vld [vmem:[#allocation42_spill] sm:$0xff] }
 0x447   : > { %v28553_v49 = vpop.permute.xlu0 %16544  ;;  %23849 = vmatmul.mubr.msk.f32.vlgmr.msra.gmra.mrb[0].mxu0 %vm231_vm2, %v28380_v57  ;;  %15791 = vmatprep.mubr.f32.mxu1 %v30149_v36 }
 0x448   : > { %23856 = vmatpush1.msk.msra.mxu0 %vm236_vm1, %v30306_v60  ;;  %19662 = vrot.lane.b32.xlu1 %v28432_v51, %s30307_s11 }
 0x449   : > { %19481 = vrot.lane.b32.xlu0 %v19476_v33, %s30235_s22  ;;  %23863 = vmatprep.subr.msk.mxu0 %vm236_vm1, %v30308_v4  ;;  %s30312_s22 = smov 17   ;;  %v30316_v4 = vld [vmem:[#allocation43_spill] sm:$0xff] }
 0x44a   : > { %v28568_v8 = vpop.permute.xlu1 %16542  ;;  %15720 = vmatprep.mubr.f32.mxu0 %v30149_v36  ;;  %23853 = vmatmul.mubr.msk.f32.vlgmr.msra.gmra.mrb[0].mxu1 %vm231_vm2, %v28380_v57 }
 0x44b   : > { %23860 = vmatpush1.msk.msra.mxu1 %vm236_vm1, %v15822_v30  ;;  %v28574_v15 = vpop.permute.xlu0 %16550  ;;  %23850 = vmatmul.mubr.msk.f32.gmra.mrb[2].mxu0 %vm231_vm2, %v28395_v18 }
 0x44c   : > { %19660 = vrot.lane.b32.xlu1 %v19655_v37, %s30221_s15  ;;  %15797 = vmatprep.mubr.f32.mxu1 %v30149_v36  ;;  %v30317_v37 = vld [vmem:[#allocation48_spill] sm:$0xff] }
 0x44d   : > { %19658 = vrot.lane.b32.xlu0 %v28363_v24, %s30221_s15  ;;  %15895 = vmatprep.mubr.f32.mxu0 %v30149_v36 }
 0x44e   : > { %v28583_v12 = vpop.permute.xlu1 %16742  ;;  %23854 = vmatmul.mubr.msk.f32.gmra.mrb[2].mxu1 %vm231_vm2, %v28395_v18  ;;  %23867 = vmatprep.subr.msk.mxu1 %vm236_vm1, %v28464_v9  ;;  %v30313_v18 = vld [vmem:[#allocation45_spill] sm:$0xff]  ;;  %v20013_v9 = vld [vmem:[#allocation4 + $0x38] sm:$0xf] }
 0x44f   : > { %v28589_v57 = vpop.permute.xlu0 %16740  ;;  %23857 = vmatmul.mubr.msk.f32.vlgmr.msra.gmra.mrb[0].mxu0 %vm231_vm2, %v28423_v43  ;;  %15972 = vmatprep.mubr.f32.mxu1 %v30149_v36 }
 0x450   : > { %23864 = vmatpush1.msk.msra.mxu0 %vm236_vm1, %v30311_v42  ;;  %19837 = vrot.lane.b32.xlu1 %v28363_v24, %s30234_s13 }
 0x451   : > { %19841 = vrot.lane.b32.xlu0 %v28432_v51, %s30312_s22  ;;  %23871 = vmatprep.subr.msk.mxu0 %vm236_vm1, %v30313_v18 }
 0x452   : > { %v28605_v2 = vpop.permute.xlu1 %16734  ;;  %15901 = vmatprep.mubr.f32.mxu0 %v30149_v36  ;;  %23861 = vmatmul.mubr.msk.f32.vlgmr.msra.gmra.mrb[0].mxu1 %vm231_vm2, %v28423_v43 }
 0x453   : > { %23868 = vmatpush1.msk.msra.mxu1 %vm236_vm1, %v16003_v19  ;;  %v28611_v33 = vpop.permute.xlu0 %16738  ;;  %23858 = vmatmul.mubr.msk.f32.gmra.mrb[2].mxu0 %vm231_vm2, %v28443_v35  ;;  %v30321_v19 = vld [vmem:[#allocation46_spill] sm:$0xff] }
 0x454   : > { %20020 = vrot.lane.b32.xlu1 %v28432_v51, %s30182_s9  ;;  %15978 = vmatprep.mubr.f32.mxu1 %v30149_v36  ;;  %s30322_s9 = smov 14  }
 0x455   : > { %19839 = vrot.lane.b32.xlu0 %v19834_v61, %s30234_s13  ;;  %16076 = vmatprep.mubr.f32.mxu0 %v30149_v36  ;;  %s30320_s13 = smov 15   ;;  %v30323_v61 = vld [vmem:[#allocation47_spill] sm:$0xff] }
 0x456   : > { %v28620_v60 = vpop.permute.xlu1 %16736  ;;  %23862 = vmatmul.mubr.msk.f32.gmra.mrb[2].mxu1 %vm231_vm2, %v28443_v35  ;;  %23875 = vmatprep.subr.msk.mxu1 %vm236_vm1, %v28473_v21  ;;  %v30318_v35 = vld [vmem:[#allocation44_spill] sm:$0xff] }
 0x457   : > { %v28626_v43 = vpop.permute.xlu0 %16744  ;;  %23865 = vmatmul.mubr.msk.f32.vlgmr.msra.gmra.mrb[0].mxu0 %vm231_vm2, %v28437_v32  ;;  %16153 = vmatprep.mubr.f32.mxu1 %v30149_v36  ;;  %v16184_v22 = vsel %vm30319_vm14, %v30318_v35, %v28473_v21  ;;  %vm30093_vm14 = vcmask 523264  }
 0x458   : > { %23872 = vmatpush1.msk.msra.mxu0 %vm236_vm1, %v30316_v4  ;;  %20018 = vrot.lane.b32.xlu1 %v20013_v9, %s30239_s3  ;;  %v16365_v9 = vsel %vm30324_vm0, %v30323_v61, %v28516_v1  ;;  %vm30333_vm0 = vcmask 384000  }
 0x459   : > { %20016 = vrot.lane.b32.xlu0 %v28363_v24, %s30239_s3  ;;  %23879 = vmatprep.subr.msk.mxu0 %vm236_vm1, %v30317_v37  ;;  %s30413_s3 = smov 126  }
 0x45a   : > { %v28641_v30 = vpop.permute.xlu1 %16932  ;;  %16082 = vmatprep.mubr.f32.mxu0 %v30149_v36  ;;  %23869 = vmatmul.mubr.msk.f32.vlgmr.msra.gmra.mrb[0].mxu1 %vm231_vm2, %v28437_v32  ;;  %v20192_v32 = vld [vmem:[#allocation4 + $0x38] sm:$0xf] }
 0x45b   : > { %23876 = vmatpush1.msk.msra.mxu1 %vm236_vm1, %v16184_v22  ;;  %v28647_v42 = vpop.permute.xlu0 %16928  ;;  %23866 = vmatmul.mubr.msk.f32.gmra.mrb[2].mxu0 %vm231_vm2, %v28458_v25 }
 0x45c   : > { %20195 = vrot.lane.b32.xlu1 %v28363_v24, %s30241_s14  ;;  %16159 = vmatprep.mubr.f32.mxu1 %v30149_v36 }
 0x45d   : > { %20199 = vrot.lane.b32.xlu0 %v28432_v51, %s30320_s13  ;;  %16257 = vmatprep.mubr.f32.mxu0 %v30149_v36 }
 0x45e   : > { %v28657_v21 = vpop.permute.xlu1 %17109  ;;  %23870 = vmatmul.mubr.msk.f32.gmra.mrb[2].mxu1 %vm231_vm2, %v28458_v25  ;;  %23883 = vmatprep.subr.msk.mxu1 %vm236_vm1, %v28516_v1  ;;  %v20371_v25 = vld [vmem:[#allocation4 + $0x38] sm:$0xf]  ;;  %v16553_v1 = vsel %vm16552_vm15, %v28553_v49, %v28537_v62  ;;  %v16748_v62 = vsel %vm30093_vm14, %v28589_v57, %v28583_v12 }
 0x45f   : > { %v28663_v18 = vpop.permute.xlu0 %16930  ;;  %23873 = vmatmul.mubr.msk.f32.vlgmr.msra.gmra.mrb[0].mxu0 %vm231_vm2, %v28479_v47  ;;  %16334 = vmatprep.mubr.f32.mxu1 %v30149_v36 }
 0x460   : > { %23880 = vmatpush1.msk.msra.mxu0 %vm236_vm1, %v30321_v19  ;;  %20378 = vrot.lane.b32.xlu1 %v28432_v51, %s30322_s9  ;;  %v30328_v19 = vld [vmem:[#allocation50_spill] sm:$0xff] }
 0x461   : > { %20197 = vrot.lane.b32.xlu0 %v20192_v32, %s30241_s14  ;;  %16263 = vmatprep.mubr.f32.mxu0 %v30149_v36  ;;  %v20550_v32 = vld [vmem:[#allocation4 + $0x38] sm:$0xf] }
 0x462   : > { %v28680_v4 = vpop.permute.xlu1 %17111  ;;  %23877 = vmatmul.mubr.msk.f32.vlgmr.msra.gmra.mrb[0].mxu1 %vm231_vm2, %v28479_v47  ;;  %23887 = vmatprep.subr.msk.mxu0 %vm236_vm1, %v16554_v52 }
 0x463   : > { %23884 = vmatpush1.msk.msra.mxu1 %vm236_vm1, %v16365_v9  ;;  %v28686_v37 = vpop.permute.xlu0 %17113  ;;  %23874 = vmatmul.mubr.msk.f32.gmra.mrb[2].mxu0 %vm231_vm2, %v28501_v39 }
 0x464   : > { %20376 = vrot.lane.b32.xlu1 %v20371_v25, %s30242_s10  ;;  %16340 = vmatprep.mubr.f32.mxu1 %v30149_v36 }
 0x465   : > { %20374 = vrot.lane.b32.xlu0 %v28363_v24, %s30242_s10  ;;  %16438 = vmatprep.mubr.f32.mxu0 %v30149_v36  ;;  %s25464_s10 = smov 13  }
 0x466   : > { %v28698_v47 = vpop.permute.xlu1 %17294  ;;  %23878 = vmatmul.mubr.msk.f32.gmra.mrb[2].mxu1 %vm231_vm2, %v28501_v39  ;;  %23891 = vmatprep.subr.msk.mxu1 %vm236_vm1, %v28574_v15  ;;  %v16555_v39 = vsel %vm16552_vm15, %v28531_v50, %v28574_v15  ;;  %v16747_v50 = vsel %vm30093_vm14, %v28611_v33, %v28589_v57  ;;  %v16749_v57 = vsel %vm30093_vm14, %v28583_v12, %v28626_v43  ;;  %vm30329_vm15 = vcmask 392192  }
 0x467   : > { %v28704_v35 = vpop.permute.xlu0 %17290  ;;  %23881 = vmatmul.mubr.msk.f32.vlgmr.msra.gmra.mrb[0].mxu0 %vm231_vm2, %v28495_v41  ;;  %16515 = vmatprep.mubr.f32.mxu1 %v30149_v36  ;;  %v16934_v25 = vsel %vm30329_vm15, %v30328_v19, %v28641_v30  ;;  %vm30337_vm15 = vcmask 375808   ;;  %vm18759_vm14 = vcmask 310272  }
 0x468   : > { %23888 = vmatpush1.msk.msra.mxu0 %vm236_vm1, %v16553_v1  ;;  %20561 = vrot.lane.b32.xlu1 %v25635_v5, %s25464_s10  ;;  %v30330_v1 = vld [vmem:[#allocation52_spill] sm:$0xff] }
 0x469   : > { %20559 = vrot.lane.b32.xlu0 %v28338_v55, %s25464_s10  ;;  %16444 = vmatprep.mubr.f32.mxu0 %v30149_v36 }
 0x46a   : > { %v28719_v49 = vpop.permute.xlu1 %17471  ;;  %23885 = vmatmul.mubr.msk.f32.vlgmr.msra.gmra.mrb[0].mxu1 %vm231_vm2, %v28495_v41  ;;  %23895 = vmatprep.subr.msk.mxu0 %vm236_vm1, %v16748_v62 }
 0x46b   : > { %23892 = vmatpush1.msk.msra.mxu1 %vm236_vm1, %v16555_v39  ;;  %v28725_v22 = vpop.permute.xlu0 %17292  ;;  %23882 = vmatmul.mubr.msk.f32.gmra.mrb[2].mxu0 %vm231_vm2, %v28510_v14 }
 0x46c   : > { %20563 = vrot.lane.b32.xlu1 %v28260_v7, %s25464_s10  ;;  %16521 = vmatprep.mubr.f32.mxu1 %v30149_v36 }
 0x46d   : > { %20557 = vrot.lane.b32.xlu0 %v25626_v3, %s25464_s10  ;;  %16632 = vmatprep.mubr.f32.mxu0 %v30149_v36 }
 0x46e   : > { %v28736_v41 = vpop.permute.xlu1 %17473  ;;  %23886 = vmatmul.mubr.msk.f32.gmra.mrb[2].mxu1 %vm231_vm2, %v28510_v14  ;;  %23899 = vmatprep.subr.msk.mxu1 %vm236_vm1, %v28626_v43  ;;  %v30325_v14 = vld [vmem:[#allocation51_spill] sm:$0xff]  ;;  %v30326_v43 = vld [vmem:[#allocation49_spill] sm:$0xff] }
 0x46f   : > { %v28742_v15 = vpop.permute.xlu0 %17475  ;;  %23889 = vmatmul.mubr.msk.f32.vlgmr.msra.gmra.mrb[0].mxu0 %vm231_vm2, %v28547_v11  ;;  %16709 = vmatprep.mubr.f32.mxu1 %v30149_v36 }
 0x470   : > { %23896 = vmatpush1.msk.msra.mxu0 %vm236_vm1, %v16747_v50  ;;  %20553 = vrot.lane.b32.xlu1 %v28363_v24, %s30243_s7 }
 0x471   : > { %20565 = vrot.lane.b32.xlu0 %v28432_v51, %s25464_s10  ;;  %23903 = vmatprep.subr.msk.mxu0 %vm236_vm1, %v30325_v14  ;;  %v30334_v14 = vld [vmem:[#allocation55_spill] sm:$0xff] }
 0x472   : > { %v28756_v33 = vpop.permute.xlu1 %17656  ;;  %16638 = vmatprep.mubr.f32.mxu0 %v30149_v36  ;;  %23893 = vmatmul.mubr.msk.f32.vlgmr.msra.gmra.mrb[0].mxu1 %vm231_vm2, %v28547_v11 }
 0x473   : > { %v28761_v52 = vpop.permute.xlu0 %17652  ;;  %23890 = vmatmul.mubr.msk.f32.gmra.mrb[2].mxu0 %vm231_vm2, %v28568_v8  ;;  %23900 = vmatpush1.msk.msra.mxu1 %vm236_vm1, %v16749_v57 }
 0x474   : > { %20756 = vrot.lane.b32.xlu1 %v28338_v55, %s30204_s27  ;;  %16715 = vmatprep.mubr.f32.mxu1 %v30149_v36 }
 0x475   : > { %20555 = vrot.lane.b32.xlu0 %v20550_v32, %s30243_s7  ;;  %16826 = vmatprep.mubr.f32.mxu0 %v30149_v36  ;;  %v21125_v32 = vld [vmem:[#allocation4 + $0x38] sm:$0xf]  ;;  %s30401_s7 = sld [smem:[#allocation113_spill]] }
 0x476   : > { %v28771_v12 = vpop.permute.xlu1 %17833  ;;  %23894 = vmatmul.mubr.msk.f32.gmra.mrb[2].mxu1 %vm231_vm2, %v28568_v8  ;;  %23907 = vmatprep.subr.msk.mxu1 %vm236_vm1, %v28641_v30  ;;  %v30327_v8 = vld [vmem:[#allocation54_spill] sm:$0xff]  ;;  %v20747_v30 = vld [vmem:[#allocation4 + $0x38] sm:$0xf] }
 0x477   : > { %v28777_v11 = vpop.permute.xlu0 %17654  ;;  %23897 = vmatmul.mubr.msk.f32.vlgmr.msra.gmra.mrb[0].mxu0 %vm231_vm2, %v28605_v2  ;;  %16903 = vmatprep.mubr.f32.mxu1 %v30149_v36 }
 0x478   : > { %23904 = vmatpush1.msk.msra.mxu0 %vm236_vm1, %v30326_v43  ;;  %20754 = vrot.lane.b32.xlu1 %v25626_v3, %s30204_s27  ;;  %v30336_v43 = vld [vmem:[#allocation56_spill] sm:$0xff] }
 0x479   : > { %20758 = vrot.lane.b32.xlu0 %v25635_v5, %s30204_s27  ;;  %23911 = vmatprep.subr.msk.mxu0 %vm236_vm1, %v30327_v8  ;;  %v17296_v8 = vsel %vm30337_vm15, %v30336_v43, %v28698_v47  ;;  %vm30345_vm15 = vcmask 359424  }
 0x47a   : > { %v28793_v61 = vpop.permute.xlu1 %17835  ;;  %16832 = vmatprep.mubr.f32.mxu0 %v30149_v36  ;;  %23901 = vmatmul.mubr.msk.f32.vlgmr.msra.gmra.mrb[0].mxu1 %vm231_vm2, %v28605_v2 }
 0x47b   : > { %23908 = vmatpush1.msk.msra.mxu1 %vm236_vm1, %v16934_v25  ;;  %v28799_v3 = vpop.permute.xlu0 %17837  ;;  %23898 = vmatmul.mubr.msk.f32.gmra.mrb[2].mxu0 %vm231_vm2, %v28620_v60 }
 0x47c   : > { %20762 = vrot.lane.b32.xlu1 %v28432_v51, %s30204_s27  ;;  %16909 = vmatprep.mubr.f32.mxu1 %v30149_v36 }
 0x47d   : > { %20760 = vrot.lane.b32.xlu0 %v28260_v7, %s30204_s27  ;;  %17007 = vmatprep.mubr.f32.mxu0 %v30149_v36  ;;  %v30331_v7 = vld [vmem:[#allocation57_spill] sm:$0xff]  ;;  %s30352_s27 = smov 119  }
 0x47e   : > { %v28809_v9 = vpop.permute.xlu1 %18018  ;;  %23902 = vmatmul.mubr.msk.f32.gmra.mrb[2].mxu1 %vm231_vm2, %v28620_v60  ;;  %23915 = vmatprep.subr.msk.mxu1 %vm236_vm1, %v28686_v37  ;;  %v30332_v60 = vld [vmem:[#allocation53_spill] sm:$0xff] }
 0x47f   : > { %v28815_v2 = vpop.permute.xlu0 %18014  ;;  %23905 = vmatmul.mubr.msk.f32.vlgmr.msra.gmra.mrb[0].mxu0 %vm231_vm2, %v28647_v42  ;;  %17084 = vmatprep.mubr.f32.mxu1 %v30149_v36  ;;  %v17115_v62 = vsel %vm30333_vm0, %v30332_v60, %v28686_v37  ;;  %vm30341_vm0 = vcmask 367616  }
 0x480   : > { %23912 = vmatpush1.msk.msra.mxu0 %vm236_vm1, %v30330_v1  ;;  %20752 = vrot.lane.b32.xlu1 %v20747_v30, %s30244_s16  ;;  %v30338_v30 = vld [vmem:[#allocation58_spill] sm:$0xff]  ;;  %v30340_v1 = vld [vmem:[#allocation59_spill] sm:$0xff] }
 0x481   : > { %20750 = vrot.lane.b32.xlu0 %v28363_v24, %s30244_s16  ;;  %23919 = vmatprep.subr.msk.mxu0 %vm236_vm1, %v30331_v7  ;;  %v17477_v7 = vsel %vm30341_vm0, %v30340_v1, %v28742_v15  ;;  %v30347_v1 = vld [vmem:[#allocation64_spill] sm:$0xff]  ;;  %vm30351_vm0 = vcmask 351232   ;;  %s30414_s16 = smov 98  }
 0x482   : > { %v28830_v39 = vpop.permute.xlu1 %18195  ;;  %17013 = vmatprep.mubr.f32.mxu0 %v30149_v36  ;;  %23909 = vmatmul.mubr.msk.f32.vlgmr.msra.gmra.mrb[0].mxu1 %vm231_vm2, %v28647_v42  ;;  %v20944_v42 = vld [vmem:[#allocation4 + $0x38] sm:$0xf] }
 0x483   : > { %23916 = vmatpush1.msk.msra.mxu1 %vm236_vm1, %v17115_v62  ;;  %v28836_v50 = vpop.permute.xlu0 %18016  ;;  %23906 = vmatmul.mubr.msk.f32.gmra.mrb[2].mxu0 %vm231_vm2, %v28663_v18  ;;  %v21306_v62 = vld [vmem:[#allocation4 + $0x38] sm:$0xf] }
 0x484   : > { %20951 = vrot.lane.b32.xlu1 %v28432_v51, %s30219_s17  ;;  %17090 = vmatprep.mubr.f32.mxu1 %v30149_v36  ;;  %s30346_s17 = smov 56  }
 0x485   : > { %20947 = vrot.lane.b32.xlu0 %v28363_v24, %s30157_s8  ;;  %17188 = vmatprep.mubr.f32.mxu0 %v30149_v36 }
 0x486   : > { %v28846_v37 = vpop.permute.xlu1 %18197  ;;  %23910 = vmatmul.mubr.msk.f32.gmra.mrb[2].mxu1 %vm231_vm2, %v28663_v18  ;;  %23923 = vmatprep.subr.msk.mxu1 %vm236_vm1, %v28698_v47  ;;  %v30335_v18 = vld [vmem:[#allocation60_spill] sm:$0xff] }
 0x487   : > { %v28852_v57 = vpop.permute.xlu0 %18199  ;;  %23913 = vmatmul.mubr.msk.f32.vlgmr.msra.gmra.mrb[0].mxu0 %vm231_vm2, %v28657_v21  ;;  %17265 = vmatprep.mubr.f32.mxu1 %v30149_v36 }
 0x488   : > { %23920 = vmatpush1.msk.msra.mxu0 %vm236_vm1, %v30334_v14  ;;  %21128 = vrot.lane.b32.xlu1 %v28363_v24, %s30248_s2 }
 0x489   : > { %20949 = vrot.lane.b32.xlu0 %v20944_v42, %s30157_s8  ;;  %23927 = vmatprep.subr.msk.mxu0 %vm236_vm1, %v30335_v18  ;;  %v30342_v18 = vld [vmem:[#allocation61_spill] sm:$0xff]  ;;  %s30411_s8 = smov 28  }
 0x48a   : > { %v28867_v19 = vpop.permute.xlu1 %18559  ;;  %17194 = vmatprep.mubr.f32.mxu0 %v30149_v36  ;;  %23917 = vmatmul.mubr.msk.f32.vlgmr.msra.gmra.mrb[0].mxu1 %vm231_vm2, %v28657_v21 }
 0x48b   : > { %23924 = vmatpush1.msk.msra.mxu1 %vm236_vm1, %v17296_v8  ;;  %v28873_v25 = vpop.permute.xlu0 %18374  ;;  %23914 = vmatmul.mubr.msk.f32.gmra.mrb[2].mxu0 %vm231_vm2, %v28680_v4 }
 0x48c   : > { %21130 = vrot.lane.b32.xlu1 %v21125_v32, %s30248_s2  ;;  %17271 = vmatprep.mubr.f32.mxu1 %v30149_v36  ;;  %v30343_v32 = vld [vmem:[#allocation66_spill] sm:$0xff] }
 0x48d   : > { %21132 = vrot.lane.b32.xlu0 %v28432_v51, %s30197_s29  ;;  %17369 = vmatprep.mubr.f32.mxu0 %v30149_v36  ;;  %s30354_s29 = smov 118  }
 0x48e   : > { %v28882_v47 = vpop.permute.xlu1 %18557  ;;  %23918 = vmatmul.mubr.msk.f32.gmra.mrb[2].mxu1 %vm231_vm2, %v28680_v4  ;;  %23931 = vmatprep.subr.msk.mxu1 %vm236_vm1, %v28742_v15  ;;  %v30339_v4 = vld [vmem:[#allocation63_spill] sm:$0xff]  ;;  %v21487_v15 = vld [vmem:[#allocation4 + $0x38] sm:$0xf] }
 0x48f   : > { %v28888_v21 = vpop.permute.xlu0 %18561  ;;  %23921 = vmatmul.mubr.msk.f32.vlgmr.msra.gmra.mrb[0].mxu0 %vm231_vm2, %v28704_v35  ;;  %17446 = vmatprep.mubr.f32.mxu1 %v30149_v36 }
 0x490   : > { %23928 = vmatpush1.msk.msra.mxu0 %vm236_vm1, %v30338_v30  ;;  %21313 = vrot.lane.b32.xlu1 %v28432_v51, %s30200_s5  ;;  %s30359_s5 = smov 117  }
 0x491   : > { %21309 = vrot.lane.b32.xlu0 %v28363_v24, %s30166_s30  ;;  %23935 = vmatprep.subr.msk.mxu0 %vm236_vm1, %v30339_v4 }
 0x492   : > { %v28904_v60 = vpop.permute.xlu1 %18563  ;;  %17375 = vmatprep.mubr.f32.mxu0 %v30149_v36  ;;  %23925 = vmatmul.mubr.msk.f32.vlgmr.msra.gmra.mrb[0].mxu1 %vm231_vm2, %v28704_v35 }
 0x493   : > { %23932 = vmatpush1.msk.msra.mxu1 %vm236_vm1, %v17477_v7  ;;  %v28910_v42 = vpop.permute.xlu0 %18553  ;;  %23922 = vmatmul.mubr.msk.f32.gmra.mrb[2].mxu0 %vm231_vm2, %v28725_v22  ;;  %v21849_v7 = vld [vmem:[#allocation4 + $0x38] sm:$0xf] }
 0x494   : > { %21490 = vrot.lane.b32.xlu1 %v28363_v24, %s30171_s18  ;;  %17452 = vmatprep.mubr.f32.mxu1 %v30149_v36 }
 0x495   : > { %21311 = vrot.lane.b32.xlu0 %v21306_v62, %s30166_s30  ;;  %17550 = vmatprep.mubr.f32.mxu0 %v30149_v36  ;;  %v30350_v62 = vld [vmem:[#allocation65_spill] sm:$0xff]  ;;  %s30412_s30 = smov 38  }
 0x496   : > { %v28919_v14 = vpop.permute.xlu1 %18753  ;;  %23926 = vmatmul.mubr.msk.f32.gmra.mrb[2].mxu1 %vm231_vm2, %v28725_v22  ;;  %23939 = vmatprep.subr.msk.mxu1 %vm236_vm1, %v28756_v33  ;;  %v30344_v22 = vld [vmem:[#allocation62_spill] sm:$0xff] }
 0x497   : > { %v28925_v35 = vpop.permute.xlu0 %18555  ;;  %23929 = vmatmul.mubr.msk.f32.vlgmr.msra.gmra.mrb[0].mxu0 %vm231_vm2, %v28719_v49  ;;  %17627 = vmatprep.mubr.f32.mxu1 %v30149_v36  ;;  %v17658_v43 = vsel %vm30345_vm15, %v30344_v22, %v28756_v33  ;;  %v30353_v22 = vld [vmem:[#allocation67_spill] sm:$0xff]  ;;  %vm30357_vm15 = vcmask 343040  }
 0x498   : > { %23936 = vmatpush1.msk.msra.mxu0 %vm236_vm1, %v30342_v18  ;;  %21492 = vrot.lane.b32.xlu1 %v21487_v15, %s30171_s18  ;;  %v17839_v15 = vsel %vm30351_vm0, %v30350_v62, %v28799_v3  ;;  %vm30362_vm0 = vcmask 334848  }
 0x499   : > { %21494 = vrot.lane.b32.xlu0 %v28432_v51, %s30202_s6  ;;  %23943 = vmatprep.subr.msk.mxu0 %vm236_vm1, %v30343_v32  ;;  %s25465_s6 = smov 115  }
 0x49a   : > { %v28940_v8 = vpop.permute.xlu1 %18751  ;;  %17556 = vmatprep.mubr.f32.mxu0 %v30149_v36  ;;  %23933 = vmatmul.mubr.msk.f32.vlgmr.msra.gmra.mrb[0].mxu1 %vm231_vm2, %v28719_v49  ;;  %v21668_v49 = vld [vmem:[#allocation4 + $0x38] sm:$0xf] }
 0x49b   : > { %23940 = vmatpush1.msk.msra.mxu1 %vm236_vm1, %v17658_v43  ;;  %v28946_v30 = vpop.permute.xlu0 %18755  ;;  %23930 = vmatmul.mubr.msk.f32.gmra.mrb[2].mxu0 %vm231_vm2, %v28736_v41  ;;  %v30356_v43 = vld [vmem:[#allocation68_spill] sm:$0xff] }
 0x49c   : > { %21675 = vrot.lane.b32.xlu1 %v28432_v51, %s30222_s0  ;;  %17633 = vmatprep.mubr.f32.mxu1 %v30149_v36  ;;  %s30348_s0 = smov 52  }
 0x49d   : > { %21671 = vrot.lane.b32.xlu0 %v28363_v24, %s30346_s17  ;;  %17731 = vmatprep.mubr.f32.mxu0 %v30149_v36 }
 0x49e   : > { %v28956_v33 = vpop.permute.xlu1 %18757  ;;  %23934 = vmatmul.mubr.msk.f32.gmra.mrb[2].mxu1 %vm231_vm2, %v28736_v41  ;;  %23947 = vmatprep.subr.msk.mxu1 %vm236_vm1, %v28799_v3  ;;  %v30349_v41 = vld [vmem:[#allocation69_spill] sm:$0xff] }
 0x49f   : > { %v28962_v4 = vpop.permute.xlu0 %18747  ;;  %23937 = vmatmul.mubr.msk.f32.vlgmr.msra.gmra.mrb[0].mxu0 %vm231_vm2, %v28761_v52  ;;  %17808 = vmatprep.mubr.f32.mxu1 %v30149_v36 }
 0x4a0   : > { %23944 = vmatpush1.msk.msra.mxu0 %vm236_vm1, %v30347_v1  ;;  %21852 = vrot.lane.b32.xlu1 %v28363_v24, %s30348_s0 }
 0x4a1   : > { %21673 = vrot.lane.b32.xlu0 %v21668_v49, %s30346_s17  ;;  %23951 = vmatprep.subr.msk.mxu0 %vm236_vm1, %v30349_v41  ;;  %v18020_v49 = vsel %vm30357_vm15, %v30356_v43, %v28809_v9  ;;  %v22030_v41 = vld [vmem:[#allocation4 + $0x38] sm:$0xf]  ;;  %vm18565_vm15 = vcmask 318464  }
 0x4a2   : > { %v28977_v18 = vpop.permute.xlu1 %18946  ;;  %17737 = vmatprep.mubr.f32.mxu0 %v30149_v36  ;;  %23941 = vmatmul.mubr.msk.f32.vlgmr.msra.gmra.mrb[0].mxu1 %vm231_vm2, %v28761_v52 }
 0x4a3   : > { %23948 = vmatpush1.msk.msra.mxu1 %vm236_vm1, %v17839_v15  ;;  %v28983_v32 = vpop.permute.xlu0 %18749  ;;  %23938 = vmatmul.mubr.msk.f32.gmra.mrb[2].mxu0 %vm231_vm2, %v28777_v11  ;;  %v30358_v15 = vld [vmem:[#allocation70_spill] sm:$0xff] }
 0x4a4   : > { %21854 = vrot.lane.b32.xlu1 %v21849_v7, %s30348_s0  ;;  %17814 = vmatprep.mubr.f32.mxu1 %v30149_v36 }
 0x4a5   : > { %21856 = vrot.lane.b32.xlu0 %v28432_v51, %s30352_s27  ;;  %17912 = vmatprep.mubr.f32.mxu0 %v30149_v36 }
 0x4a6   : > { %v28992_v3 = vpop.permute.xlu1 %18943  ;;  %23942 = vmatmul.mubr.msk.f32.gmra.mrb[2].mxu1 %vm231_vm2, %v28777_v11  ;;  %23955 = vmatprep.subr.msk.mxu1 %vm236_vm1, %v28809_v9  ;;  %v30355_v11 = vld [vmem:[#allocation72_spill] sm:$0xff] }
 0x4a7   : > { %v28998_v52 = vpop.permute.xlu0 %18941  ;;  %23945 = vmatmul.mubr.msk.f32.vlgmr.msra.gmra.mrb[0].mxu0 %vm231_vm2, %v28771_v12  ;;  %17989 = vmatprep.mubr.f32.mxu1 %v30149_v36  ;;  %v22211_v9 = vld [vmem:[#allocation4 + $0x38] sm:$0xf] }
 0x4a8   : > { %23952 = vmatpush1.msk.msra.mxu0 %vm236_vm1, %v30353_v22  ;;  %22037 = vrot.lane.b32.xlu1 %v28432_v51, %s30354_s29  ;;  %v30360_v22 = vld [vmem:[#allocation75_spill] sm:$0xff] }
 0x4a9   : > { %22033 = vrot.lane.b32.xlu0 %v28363_v24, %s30256_s21  ;;  %23959 = vmatprep.subr.msk.mxu0 %vm236_vm1, %v30355_v11 }
 0x4aa   : > { %v29014_v1 = vpop.permute.xlu1 %19121  ;;  %17918 = vmatprep.mubr.f32.mxu0 %v30149_v36  ;;  %23949 = vmatmul.mubr.msk.f32.vlgmr.msra.gmra.mrb[0].mxu1 %vm231_vm2, %v28771_v12 }
 0x4ab   : > { %23956 = vmatpush1.msk.msra.mxu1 %vm236_vm1, %v18020_v49  ;;  %v29020_v7 = vpop.permute.xlu0 %19125  ;;  %23946 = vmatmul.mubr.msk.f32.gmra.mrb[2].mxu0 %vm231_vm2, %v28793_v61 }
 0x4ac   : > { %22214 = vrot.lane.b32.xlu1 %v28363_v24, %s30257_s24  ;;  %17995 = vmatprep.mubr.f32.mxu1 %v30149_v36 }
 0x4ad   : > { %22035 = vrot.lane.b32.xlu0 %v22030_v41, %s30256_s21  ;;  %18093 = vmatprep.mubr.f32.mxu0 %v30149_v36  ;;  %v29060_v41 = vld [vmem:[#allocation4 + $0x18] sm:$0xff] }
 0x4ae   : > { %v29029_v62 = vpop.permute.xlu1 %19304  ;;  %23950 = vmatmul.mubr.msk.f32.gmra.mrb[2].mxu1 %vm231_vm2, %v28793_v61  ;;  %23963 = vmatprep.subr.msk.mxu1 %vm236_vm1, %v28852_v57  ;;  %v30361_v61 = vld [vmem:[#allocation71_spill] sm:$0xff] }
 0x4af   : > { %v29035_v12 = vpop.permute.xlu0 %19123  ;;  %23953 = vmatmul.mubr.msk.f32.vlgmr.msra.gmra.mrb[0].mxu0 %vm231_vm2, %v28815_v2  ;;  %18170 = vmatprep.mubr.f32.mxu1 %v30149_v36  ;;  %v18201_v11 = vsel %vm30362_vm0, %v30361_v61, %v28852_v57  ;;  %v18567_v57 = vsel %vm18565_vm15, %v28867_v19, %v28888_v21  ;;  %vm30365_vm0 = vcmask 326656  }
 0x4b0   : > { %23960 = vmatpush1.msk.msra.mxu0 %vm236_vm1, %v30358_v15  ;;  %22216 = vrot.lane.b32.xlu1 %v22211_v9, %s30257_s24  ;;  %v22392_v15 = vld [vmem:[#allocation4 + $0x38] sm:$0xf]  ;;  %s25468_s24 = smov 78  }
 0x4b1   : > { %22218 = vrot.lane.b32.xlu0 %v28432_v51, %s30359_s5  ;;  %23967 = vmatprep.subr.msk.mxu0 %vm236_vm1, %v30360_v22  ;;  %v30363_v22 = vld [vmem:[#allocation73_spill] sm:$0xff] }
 0x4b2   : > { %v29050_v43 = vpop.permute.xlu1 %19302  ;;  %18099 = vmatprep.mubr.f32.mxu0 %v30149_v36  ;;  %23957 = vmatmul.mubr.msk.f32.vlgmr.msra.gmra.mrb[0].mxu1 %vm231_vm2, %v28815_v2 }
 0x4b3   : > { %23964 = vmatpush1.msk.msra.mxu1 %vm236_vm1, %v18201_v11  ;;  %v29056_v49 = vpop.permute.xlu0 %19300  ;;  %23954 = vmatmul.mubr.msk.f32.gmra.mrb[2].mxu0 %vm231_vm2, %v28836_v50 }
 0x4b4   : > { %22399 = vrot.lane.b32.xlu1 %v28432_v51, %s30295_s12  ;;  %18176 = vmatprep.mubr.f32.mxu1 %v30149_v36 }
 0x4b5   : > { %18274 = vmatprep.mubr.f32.mxu0 %v30149_v36  ;;  %23971 = vmatprep.subr.msk.mxu1 %vm236_vm1, %v28873_v25 }
 0x4b6   : > { %v29068_v2 = vpop.permute.xlu1 %19479  ;;  %23958 = vmatmul.mubr.msk.f32.gmra.mrb[2].mxu1 %vm231_vm2, %v28836_v50  ;;  %22395 = vrot.lane.b32.xlu0 %v29060_v41, %s30259_s19  ;;  %v30364_v50 = vld [vmem:[#allocation74_spill] sm:$0xff] }
 0x4b7   : > { %v29077_v9 = vpop.permute.xlu0 %19483  ;;  %23961 = vmatmul.mubr.msk.f32.vlgmr.msra.gmra.mrb[0].mxu0 %vm231_vm2, %v28830_v39  ;;  %18351 = vmatprep.mubr.f32.mxu1 %v30149_v36  ;;  %v18376_v61 = vsel %vm30365_vm0, %v30364_v50, %v28873_v25  ;;  %v18566_v25 = vsel %vm18565_vm15, %v28882_v47, %v28867_v19  ;;  %v18373_v19 = vld [vmem:[#allocation4 + $0x38] sm:$0xf]  ;;  %vm30385_vm0 = vcmask 146432  }
 0x4b8   : > { %23968 = vmatpush1.msk.msra.mxu0 %vm236_vm1, %v30363_v22  ;;  %18280 = vmatprep.mubr.f32.mxu0 %v30149_v36 }
 0x4b9   : > { %23975 = vmatprep.subr.msk.mxu0 %vm236_vm1, %v18567_v57  ;;  %22582 = vrot.lane.b32.xlu1 %v25635_v5, %s25465_s6  ;;  %v18761_v57 = vsel %vm18759_vm14, %v28919_v14, %v28946_v30 }
 0x4ba   : > { %v29090_v11 = vpop.permute.xlu1 %19662  ;;  %23965 = vmatmul.mubr.msk.f32.vlgmr.msra.gmra.mrb[0].mxu1 %vm231_vm2, %v28830_v39  ;;  %22397 = vrot.lane.b32.xlu0 %v22392_v15, %s30259_s19  ;;  %v25283_v15 = vld [vmem:[%s25604_s26 + $0x10] sm:$0xff]  ;;  %s25466_s26 = smov 114   ;;  %s25470_s19 = smov 106  }
 0x4bb   : > { %23972 = vmatpush1.msk.msra.mxu1 %vm236_vm1, %v18376_v61  ;;  %v29096_v22 = vpop.permute.xlu0 %19481  ;;  %23962 = vmatmul.mubr.msk.f32.gmra.mrb[2].mxu0 %vm231_vm2, %v28846_v37 }
 0x4bc   : > { %18357 = vmatprep.mubr.f32.mxu1 %v30149_v36  ;;  %18451 = vmatprep.mubr.f32.mxu0 %v30149_v36 }
 0x4bd   : > { %23979 = vmatprep.subr.msk.mxu1 %vm236_vm1, %v28904_v60  ;;  %22580 = vrot.lane.b32.xlu1 %v28338_v55, %s25465_s6 }
 0x4be   : > { %v29108_v39 = vpop.permute.xlu1 %19660  ;;  %23966 = vmatmul.mubr.msk.f32.gmra.mrb[2].mxu1 %vm231_vm2, %v28846_v37  ;;  %22584 = vrot.lane.b32.xlu0 %v25283_v15, %s25465_s6  ;;  %v18568_v37 = vsel %vm18565_vm15, %v28888_v21, %v28904_v60  ;;  %v18760_v21 = vsel %vm18759_vm14, %v28940_v8, %v28919_v14  ;;  %v18762_v14 = vsel %vm18759_vm14, %v28946_v30, %v28956_v33  ;;  %v30366_v8 = vld [vmem:[#allocation77_spill] sm:$0xff]  ;;  %vm30375_vm14 = vcmask 162816  }
 0x4bf   : > { %v29116_v50 = vpop.permute.xlu0 %19658  ;;  %23969 = vmatmul.mubr.msk.f32.vlgmr.msra.gmra.mrb[0].mxu0 %vm231_vm2, %v28363_v24  ;;  %18528 = vmatprep.mubr.f32.mxu1 %v30149_v36  ;;  %vm30380_vm15 = vcmask 154624  }
 0x4c0   : > { %23976 = vmatpush1.msk.msra.mxu0 %vm236_vm1, %v18566_v25  ;;  %18457 = vmatprep.mubr.f32.mxu0 %v30149_v36  ;;  %v22573_v25 = vld [vmem:[#allocation4 + $0x38] sm:$0xf] }
 0x4c1   : > { %23983 = vmatprep.subr.msk.mxu0 %vm236_vm1, %v18761_v57  ;;  %22586 = vrot.lane.b32.xlu1 %v28432_v51, %s25465_s6  ;;  %v18948_v57 = vsel %vm9122_vm13, %v30366_v8, %v28977_v18  ;;  %v30369_v18 = vld [vmem:[#allocation80_spill] sm:$0xff]  ;;  %vm30370_vm13 = vcmask 171008  }
 0x4c2   : > { %v29128_v47 = vpop.permute.xlu1 %19837  ;;  %23973 = vmatmul.mubr.msk.f32.vlgmr.msra.gmra.mrb[0].mxu1 %vm231_vm2, %v28363_v24  ;;  %22576 = vrot.lane.b32.xlu0 %v29060_v41, %s30187_s25 }
 0x4c3   : > { %23980 = vmatpush1.msk.msra.mxu1 %vm236_vm1, %v18568_v37  ;;  %v29135_v61 = vpop.permute.xlu0 %19841  ;;  %23970 = vmatmul.mubr.msk.f32.gmra.mrb[2].mxu0 %vm231_vm2, %v18373_v19  ;;  %v30372_v37 = vld [vmem:[#allocation79_spill] sm:$0xff] }
 0x4c4   : > { %18534 = vmatprep.mubr.f32.mxu1 %v30149_v36  ;;  %18645 = vmatprep.mubr.f32.mxu0 %v30149_v36 }
 0x4c5   : > { %23987 = vmatprep.subr.msk.mxu1 %vm236_vm1, %v28956_v33  ;;  %22776 = vrot.lane.b32.xlu1 %v25635_v5, %s25466_s26  ;;  %v30367_v33 = vld [vmem:[#allocation76_spill] sm:$0xff] }
 0x4c6   : > { %v29146_v24 = vpop.permute.xlu1 %20020  ;;  %23974 = vmatmul.mubr.msk.f32.gmra.mrb[2].mxu1 %vm231_vm2, %v18373_v19  ;;  %22578 = vrot.lane.b32.xlu0 %v22573_v25, %s30187_s25  ;;  %v30373_v25 = vld [vmem:[#allocation86_spill] sm:$0xff] }
 0x4c7   : > { %v29150_v60 = vpop.permute.xlu0 %19839  ;;  %23977 = vmatmul.mubr.msk.f32.vlgmr.msra.gmra.mrb[0].mxu0 %vm231_vm2, %v28910_v42  ;;  %18722 = vmatprep.mubr.f32.mxu1 %v30149_v36 }
 0x4c8   : > { %23984 = vmatpush1.msk.msra.mxu0 %vm236_vm1, %v18760_v21  ;;  %18651 = vmatprep.mubr.f32.mxu0 %v30149_v36 }
 0x4c9   : > { %23991 = vmatprep.subr.msk.mxu0 %vm236_vm1, %v27317_v45  ;;  %22774 = vrot.lane.b32.xlu1 %v28338_v55, %s25466_s26 }
 0x4ca   : > { %v29163_v5 = vpop.permute.xlu1 %20018  ;;  %23981 = vmatmul.mubr.msk.f32.vlgmr.msra.gmra.mrb[0].mxu1 %vm231_vm2, %v28910_v42  ;;  %22778 = vrot.lane.b32.xlu0 %v25283_v15, %s25466_s26  ;;  %v22767_v42 = vld [vmem:[#allocation4 + $0x38] sm:$0xf]  ;;  %v30371_v15 = vld [vmem:[#allocation78_spill] sm:$0xff] }
 0x4cb   : > { %23988 = vmatpush1.msk.msra.mxu1 %vm236_vm1, %v18762_v14  ;;  %v29171_v30 = vpop.permute.xlu0 %20016  ;;  %23978 = vmatmul.mubr.msk.f32.gmra.mrb[2].mxu0 %vm231_vm2, %v28925_v35  ;;  %v30376_v14 = vld [vmem:[#allocation82_spill] sm:$0xff] }
 0x4cc   : > { %23995 = vmatprep.subr.msk.mxu1 %vm236_vm1, %v18948_v57  ;;  %18728 = vmatprep.mubr.f32.mxu1 %v30149_v36 }
 0x4cd   : > { %18839 = vmatprep.mubr.f32.mxu0 %v30149_v36  ;;  %22780 = vrot.lane.b32.xlu1 %v28432_v51, %s25466_s26  ;;  %v30368_v51 = vld [vmem:[#allocation81_spill] sm:$0xff] }
 0x4ce   : > { %v29179_v45 = vpop.permute.xlu1 %20195  ;;  %23982 = vmatmul.mubr.msk.f32.gmra.mrb[2].mxu1 %vm231_vm2, %v28925_v35  ;;  %22770 = vrot.lane.b32.xlu0 %v29060_v41, %s30191_s20  ;;  %v19127_v41 = vsel %vm30370_vm13, %v30369_v18, %v29020_v7  ;;  %vm30390_vm13 = vcmask 138240  }
 0x4cf   : > { %v29185_v55 = vpop.permute.xlu0 %20199  ;;  %23985 = vmatmul.mubr.msk.f32.vlgmr.msra.gmra.mrb[0].mxu0 %vm231_vm2, %v28962_v4  ;;  %18916 = vmatprep.mubr.f32.mxu1 %v30149_v36 }
 0x4d0   : > { %23992 = vmatpush1.msk.msra.mxu0 %vm236_vm1, %v30367_v33  ;;  %18845 = vmatprep.mubr.f32.mxu0 %v30149_v36 }
 0x4d1   : > { %23999 = vmatprep.subr.msk.mxu0 %vm236_vm1, %v30368_v51  ;;  %v30381_v51 = vld [vmem:[#allocation85_spill] sm:$0xff] }
 0x4d2   : > { %v29195_v35 = vpop.permute.xlu1 %20378  ;;  %23989 = vmatmul.mubr.msk.f32.vlgmr.msra.gmra.mrb[0].mxu1 %vm231_vm2, %v28962_v4  ;;  %22772 = vrot.lane.b32.xlu0 %v22767_v42, %s30191_s20  ;;  %v30379_v42 = vld [vmem:[#allocation88_spill] sm:$0xff] }
 0x4d3   : > { %23996 = vmatpush1.msk.msra.mxu1 %vm236_vm1, %v30371_v15  ;;  %v29205_v19 = vpop.permute.xlu0 %20197  ;;  %23986 = vmatmul.mubr.msk.f32.gmra.mrb[2].mxu0 %vm231_vm2, %v28983_v32 }
 0x4d4   : > { %24003 = vmatprep.subr.msk.mxu1 %vm236_vm1, %v19127_v41  ;;  %18922 = vmatprep.mubr.f32.mxu1 %v30149_v36  ;;  %v30383_v41 = vld [vmem:[#allocation94_spill] sm:$0xff] }
 0x4d5   : > { %19019 = vmatprep.mubr.f32.mxu0 %v30149_v36 }
 0x4d6   : > { %23990 = vmatmul.mubr.msk.f32.gmra.mrb[2].mxu1 %vm231_vm2, %v28983_v32  ;;  %v29219_v7 = vpop.permute.xlu1 %20376  ;;  %v30374_v32 = vld [vmem:[#allocation84_spill] sm:$0xff] }
 0x4d7   : > { %v29214_v4 = vpop.permute.xlu0 %20374  ;;  %23993 = vmatmul.mubr.msk.f32.vlgmr.msra.gmra.mrb[0].mxu0 %vm231_vm2, %v28998_v52  ;;  %19096 = vmatprep.mubr.f32.mxu1 %v30149_v36  ;;  %v19306_v21 = vsel %vm30375_vm14, %v30374_v32, %v29029_v62  ;;  %v30378_v62 = vld [vmem:[#allocation89_spill] sm:$0xff]  ;;  %v30387_v32 = vld [vmem:[#allocation91_spill] sm:$0xff]  ;;  %vm30394_vm14 = vcmask 130048  }
 0x4d8   : > { %24000 = vmatpush1.msk.msra.mxu0 %vm236_vm1, %v30372_v37  ;;  %19025 = vmatprep.mubr.f32.mxu0 %v30149_v36 }
 0x4d9   : > { %24007 = vmatprep.subr.msk.mxu0 %vm236_vm1, %v30373_v25  ;;  %v30386_v25 = vld [vmem:[#allocation90_spill] sm:$0xff] }
 0x4da   : > { %23997 = vmatmul.mubr.msk.f32.vlgmr.msra.gmra.mrb[0].mxu1 %vm231_vm2, %v28998_v52  ;;  %v29240_v57 = vpop.permute.xlu1 %20561  ;;  %v30377_v52 = vld [vmem:[#allocation83_spill] sm:$0xff] }
 0x4db   : > { %24004 = vmatpush1.msk.msra.mxu1 %vm236_vm1, %v30376_v14  ;;  %23994 = vmatmul.mubr.msk.f32.gmra.mrb[2].mxu0 %vm231_vm2, %v28992_v3  ;;  %v29237_v8 = vpop.permute.xlu0 %20559 }
 0x4dc   : > { %24011 = vmatprep.subr.msk.mxu1 %vm236_vm1, %v19306_v21  ;;  %19102 = vmatprep.mubr.f32.mxu1 %v30149_v36  ;;  %v30388_v21 = vld [vmem:[#allocation97_spill] sm:$0xff] }
 0x4dd   : > { %19198 = vmatprep.mubr.f32.mxu0 %v30149_v36 }
 0x4de   : > { %23998 = vmatmul.mubr.msk.f32.gmra.mrb[2].mxu1 %vm231_vm2, %v28992_v3  ;;  %v19485_v3 = vsel %vm30380_vm15, %v30379_v42, %v29077_v9  ;;  %v29263_v18 = vpop.permute.xlu1 %20563  ;;  %vm30399_vm15 = vcmask 121856  }
 0x4df   : > { %24001 = vmatmul.mubr.msk.f32.vlgmr.msra.gmra.mrb[0].mxu0 %vm231_vm2, %v29014_v1  ;;  %19275 = vmatprep.mubr.f32.mxu1 %v30149_v36  ;;  %v29257_v33 = vpop.permute.xlu0 %20557 }
 0x4e0   : > { %24008 = vmatpush1.msk.msra.mxu0 %vm236_vm1, %v30377_v52  ;;  %19204 = vmatprep.mubr.f32.mxu0 %v30149_v36  ;;  %v30391_v52 = vld [vmem:[#allocation93_spill] sm:$0xff] }
 0x4e1   : > { %24015 = vmatprep.subr.msk.mxu0 %vm236_vm1, %v30378_v62 }
 0x4e2   : > { %24005 = vmatmul.mubr.msk.f32.vlgmr.msra.gmra.mrb[0].mxu1 %vm231_vm2, %v29014_v1  ;;  %v30382_v1 = vld [vmem:[#allocation87_spill] sm:$0xff]  ;;  %v29280_v15 = vpop.permute.xlu1 %20553 }
 0x4e3   : > { %24012 = vmatpush1.msk.msra.mxu1 %vm236_vm1, %v30381_v51  ;;  %24002 = vmatmul.mubr.msk.f32.gmra.mrb[2].mxu0 %vm231_vm2, %v29035_v12  ;;  %v29276_v9 = vpop.permute.xlu0 %20565  ;;  %v30395_v51 = vld [vmem:[#allocation98_spill] sm:$0xff] }
 0x4e4   : > { %24019 = vmatprep.subr.msk.mxu1 %vm236_vm1, %v19485_v3  ;;  %19281 = vmatprep.mubr.f32.mxu1 %v30149_v36 }
 0x4e5   : > { %19377 = vmatprep.mubr.f32.mxu0 %v30149_v36 }
 0x4e6   : > { %24006 = vmatmul.mubr.msk.f32.gmra.mrb[2].mxu1 %vm231_vm2, %v29035_v12  ;;  %v30384_v12 = vld [vmem:[#allocation92_spill] sm:$0xff] }
 0x4e7   : > { %24009 = vmatmul.mubr.msk.f32.vlgmr.msra.gmra.mrb[0].mxu0 %vm231_vm2, %v29056_v49  ;;  %19454 = vmatprep.mubr.f32.mxu1 %v30149_v36  ;;  %v19664_v37 = vsel %vm30385_vm0, %v30384_v12, %v29090_v11  ;;  %v29301_v11 = vpop.permute.xlu1 %20756  ;;  %vm20567_vm0 = vcmask 105472  }
 0x4e8   : > { %24016 = vmatpush1.msk.msra.mxu0 %vm236_vm1, %v30382_v1  ;;  %19383 = vmatprep.mubr.f32.mxu0 %v30149_v36 }
 0x4e9   : > { %24023 = vmatprep.subr.msk.mxu0 %vm236_vm1, %v30383_v41 }
 0x4ea   : > { %24013 = vmatmul.mubr.msk.f32.vlgmr.msra.gmra.mrb[0].mxu1 %vm231_vm2, %v29056_v49  ;;  %v29296_v49 = vpop.permute.xlu0 %20555 }
 0x4eb   : > { %24020 = vmatpush1.msk.msra.mxu1 %vm236_vm1, %v30386_v25  ;;  %24010 = vmatmul.mubr.msk.f32.gmra.mrb[2].mxu0 %vm231_vm2, %v29050_v43  ;;  %v29322_v42 = vpop.permute.xlu1 %20754 }
 0x4ec   : > { %24027 = vmatprep.subr.msk.mxu1 %vm236_vm1, %v19664_v37  ;;  %19460 = vmatprep.mubr.f32.mxu1 %v30149_v36  ;;  %v30400_v37 = vld [vmem:[#allocation101_spill] sm:$0xff] }
 0x4ed   : > { %19556 = vmatprep.mubr.f32.mxu0 %v30149_v36 }
 0x4ee   : > { %24014 = vmatmul.mubr.msk.f32.gmra.mrb[2].mxu1 %vm231_vm2, %v29050_v43  ;;  %v30389_v43 = vld [vmem:[#allocation96_spill] sm:$0xff]  ;;  %v29319_v62 = vpop.permute.xlu0 %20758 }
 0x4ef   : > { %24017 = vmatmul.mubr.msk.f32.vlgmr.msra.gmra.mrb[0].mxu0 %vm231_vm2, %v29068_v2  ;;  %19633 = vmatprep.mubr.f32.mxu1 %v30149_v36  ;;  %v19843_v14 = vsel %vm30390_vm13, %v30389_v43, %v29135_v61  ;;  %v30393_v61 = vld [vmem:[#allocation100_spill] sm:$0xff]  ;;  %v29345_v1 = vpop.permute.xlu1 %20762  ;;  %v30403_v43 = vld [vmem:[#allocation105_spill] sm:$0xff]  ;;  %vm23072_vm13 = vcmask 916480  }
 0x4f0   : > { %24024 = vmatpush1.msk.msra.mxu0 %vm236_vm1, %v30387_v32  ;;  %19562 = vmatprep.mubr.f32.mxu0 %v30149_v36  ;;  %v30402_v32 = vld [vmem:[#allocation102_spill] sm:$0xff] }
 0x4f1   : > { %24031 = vmatprep.subr.msk.mxu0 %vm236_vm1, %v30388_v21  ;;  %v20380_v21 = vsel %vm10698_vm12, %v27634_v17, %v29195_v35  ;;  %v20569_v17 = vsel %vm20567_vm0, %v29237_v8, %v29240_v57  ;;  %vm20764_vm12 = vcmask 97280  }
 0x4f2   : > { %24021 = vmatmul.mubr.msk.f32.vlgmr.msra.gmra.mrb[0].mxu1 %vm231_vm2, %v29068_v2  ;;  %v30392_v2 = vld [vmem:[#allocation95_spill] sm:$0xff]  ;;  %v29339_v3 = vpop.permute.xlu0 %20760 }
 0x4f3   : > { %24028 = vmatpush1.msk.msra.mxu1 %vm236_vm1, %v30391_v52  ;;  %24018 = vmatmul.mubr.msk.f32.gmra.mrb[2].mxu0 %vm231_vm2, %v29096_v22  ;;  %v29362_v41 = vpop.permute.xlu1 %20752  ;;  %v20571_v52 = vsel %vm20567_vm0, %v29263_v18, %v29276_v9 }
 0x4f4   : > { %24035 = vmatprep.subr.msk.mxu1 %vm236_vm1, %v19843_v14  ;;  %19639 = vmatprep.mubr.f32.mxu1 %v30149_v36  ;;  %v30404_v14 = vld [vmem:[#allocation106_spill] sm:$0xff] }
 0x4f5   : > { %19735 = vmatprep.mubr.f32.mxu0 %v30149_v36 }
 0x4f6   : > { %24022 = vmatmul.mubr.msk.f32.gmra.mrb[2].mxu1 %vm231_vm2, %v29096_v22  ;;  %v20022_v22 = vsel %vm30394_vm14, %v30393_v61, %v29146_v24  ;;  %v30397_v24 = vld [vmem:[#allocation104_spill] sm:$0xff] }
 0x4f7   : > { %24025 = vmatmul.mubr.msk.f32.vlgmr.msra.gmra.mrb[0].mxu0 %vm231_vm2, %v29116_v50  ;;  %19812 = vmatprep.mubr.f32.mxu1 %v30149_v36  ;;  %v29386_v25 = vpop.permute.xlu1 %20951 }
 0x4f8   : > { %24032 = vmatpush1.msk.msra.mxu0 %vm236_vm1, %v30392_v2  ;;  %19741 = vmatprep.mubr.f32.mxu0 %v30149_v36 }
 0x4f9   : > { %24039 = vmatprep.subr.msk.mxu0 %vm236_vm1, %v27565_v59  ;;  %v30396_v59 = vld [vmem:[#allocation99_spill] sm:$0xff] }
 0x4fa   : > { %24029 = vmatmul.mubr.msk.f32.vlgmr.msra.gmra.mrb[0].mxu1 %vm231_vm2, %v29116_v50  ;;  %v29358_v50 = vpop.permute.xlu0 %20750 }
 0x4fb   : > { %24036 = vmatpush1.msk.msra.mxu1 %vm236_vm1, %v30395_v51  ;;  %24026 = vmatmul.mubr.msk.f32.gmra.mrb[2].mxu0 %vm231_vm2, %v29108_v39  ;;  %v29413_v35 = vpop.permute.xlu1 %21128 }
 0x4fc   : > { %24043 = vmatprep.subr.msk.mxu1 %vm236_vm1, %v20022_v22  ;;  %19818 = vmatprep.mubr.f32.mxu1 %v30149_v36  ;;  %v30406_v22 = vld [vmem:[#allocation107_spill] sm:$0xff] }
 0x4fd   : > { %19914 = vmatprep.mubr.f32.mxu0 %v30149_v36 }
 0x4fe   : > { %24030 = vmatmul.mubr.msk.f32.gmra.mrb[2].mxu1 %vm231_vm2, %v29108_v39  ;;  %v30398_v39 = vld [vmem:[#allocation103_spill] sm:$0xff] }
 0x4ff   : > { %24033 = vmatmul.mubr.msk.f32.vlgmr.msra.gmra.mrb[0].mxu0 %vm231_vm2, %v29128_v47  ;;  %19991 = vmatprep.mubr.f32.mxu1 %v30149_v36  ;;  %v20201_v12 = vsel %vm30399_vm15, %v30398_v39, %v29185_v55  ;;  %v23089_v55 = vld [vmem:[%s30401_s7] sm:$0xff]  ;;  %v29435_v2 = vpop.permute.xlu1 %21130  ;;  %vm30424_vm15 = vcmask 785408  }
 0x500   : > { %24040 = vmatpush1.msk.msra.mxu0 %vm236_vm1, %v30396_v59  ;;  %19920 = vmatprep.mubr.f32.mxu0 %v30149_v36 }
 0x501   : > { %24047 = vmatprep.subr.msk.mxu0 %vm236_vm1, %v30397_v24 }
 0x502   : > { %24037 = vmatmul.mubr.msk.f32.vlgmr.msra.gmra.mrb[0].mxu1 %vm231_vm2, %v29128_v47  ;;  %v29378_v47 = vpop.permute.xlu0 %20947 }
 0x503   : > { %24044 = vmatpush1.msk.msra.mxu1 %vm236_vm1, %v30400_v37  ;;  %24034 = vmatmul.mubr.msk.f32.gmra.mrb[2].mxu0 %vm231_vm2, %v29150_v60  ;;  %v30409_v37 = vld [vmem:[#allocation109_spill] sm:$0xff] }
 0x504   : > { %24051 = vmatprep.subr.msk.mxu1 %vm236_vm1, %v20201_v12  ;;  %19997 = vmatprep.mubr.f32.mxu1 %v30149_v36 }
 0x505   : > { %20093 = vmatprep.mubr.f32.mxu0 %v30149_v36 }
 0x506   : > { %24038 = vmatmul.mubr.msk.f32.gmra.mrb[2].mxu1 %vm231_vm2, %v29150_v60  ;;  %v25467_v60 = vmov 0  }
 0x507   : > { %24041 = vmatmul.mubr.msk.f32.vlgmr.msra.gmra.mrb[0].mxu0 %vm231_vm2, %v29171_v30  ;;  %20170 = vmatprep.mubr.f32.mxu1 %v30149_v36 }
 0x508   : > { %24048 = vmatpush1.msk.msra.mxu0 %vm236_vm1, %v30402_v32  ;;  %20099 = vmatprep.mubr.f32.mxu0 %v30149_v36 }
 0x509   : > { %24055 = vmatprep.subr.msk.mxu0 %vm236_vm1, %v27646_v29  ;;  %25270 = vset.pattern.permute.xlu1 %v25467_v60  ;;  %v23090_v29 = vld [vmem:[%s30401_s7 + $0x8] sm:$0xf] }
 0x50a   : > { %24045 = vmatmul.mubr.msk.f32.vlgmr.msra.gmra.mrb[0].mxu1 %vm231_vm2, %v29171_v30  ;;  %23093 = vperm.xlu1 %25270, %v23089_v55   ;;  %v29407_v30 = vpop.permute.xlu0 %20949 }
 0x50b   : > { %24052 = vmatpush1.msk.msra.mxu1 %vm236_vm1, %v30403_v43  ;;  %24042 = vmatmul.mubr.msk.f32.gmra.mrb[2].mxu0 %vm231_vm2, %v29163_v5 }
 0x50c   : > { %24059 = vmatprep.subr.msk.mxu1 %vm236_vm1, %v20380_v21  ;;  %20176 = vmatprep.mubr.f32.mxu1 %v30149_v36 }
 0x50d   : > { %20272 = vmatprep.mubr.f32.mxu0 %v30149_v36  ;;  %25271 = vset.pattern.permute.xlu0 %v25467_v60 }
 0x50e   : > { %24046 = vmatmul.mubr.msk.f32.gmra.mrb[2].mxu1 %vm231_vm2, %v29163_v5  ;;  %23098 = vperm.xlu0 %25271, %v23090_v29   ;;  %v29429_v5 = vpop.permute.xlu0 %21132 }
 0x50f   : > { %24049 = vmatmul.mubr.msk.f32.vlgmr.msra.gmra.mrb[0].mxu0 %vm231_vm2, %v29179_v45  ;;  %20349 = vmatprep.mubr.f32.mxu1 %v30149_v36 }
 0x510   : > { %24056 = vmatpush1.msk.msra.mxu0 %vm236_vm1, %v30404_v14  ;;  %20278 = vmatprep.mubr.f32.mxu0 %v30149_v36 }
 0x511   : > { %24063 = vmatprep.subr.msk.mxu0 %vm236_vm1, %v20569_v17 }
 0x512   : > { %24053 = vmatmul.mubr.msk.f32.vlgmr.msra.gmra.mrb[0].mxu1 %vm231_vm2, %v29179_v45  ;;  %v20766_v45 = vsel %vm20764_vm12, %v29301_v11, %v29319_v62  ;;  %v29453_v9 = vpop.permute.xlu0 %21309 }
 0x513   : > { %24060 = vmatpush1.msk.msra.mxu1 %vm236_vm1, %v27639_v13  ;;  %24050 = vmatmul.mubr.msk.f32.gmra.mrb[2].mxu0 %vm231_vm2, %v29205_v19  ;;  %v20568_v13 = vsel %vm20567_vm0, %v29257_v33, %v29237_v8  ;;  %v20768_v8 = vsel %vm20764_vm12, %v29339_v3, %v29345_v1  ;;  %v29462_v33 = vpop.permute.xlu1 %21313 }
 0x514   : > { %20355 = vmatprep.mubr.f32.mxu1 %v30149_v36  ;;  %20451 = vmatprep.mubr.f32.mxu0 %v30149_v36 }
 0x515   : > { %24067 = vmatprep.subr.msk.mxu1 %vm236_vm1, %v20571_v52 }
 0x516   : > { %24054 = vmatmul.mubr.msk.f32.gmra.mrb[2].mxu1 %vm231_vm2, %v29205_v19  ;;  %v20570_v19 = vsel %vm20567_vm0, %v29240_v57, %v29263_v18  ;;  %v20765_v57 = vsel %vm20764_vm12, %v29322_v42, %v29301_v11  ;;  %v29477_v18 = vpop.permute.xlu0 %21311 }
 0x517   : > { %24057 = vmatmul.mubr.msk.f32.vlgmr.msra.gmra.mrb[0].mxu0 %vm231_vm2, %v29214_v4  ;;  %20528 = vmatprep.mubr.f32.mxu1 %v30149_v36 }
 0x518   : > { %24064 = vmatpush1.msk.msra.mxu0 %vm236_vm1, %v20568_v13  ;;  %20457 = vmatprep.mubr.f32.mxu0 %v30149_v36 }
 0x519   : > { %24071 = vmatprep.subr.msk.mxu0 %vm236_vm1, %v20766_v45 }
 0x51a   : > { %24061 = vmatmul.mubr.msk.f32.vlgmr.msra.gmra.mrb[0].mxu1 %vm231_vm2, %v29214_v4  ;;  %v29482_v4 = vpop.permute.xlu1 %21490  ;;  %v21495_v11 = vpop.permute.xlu0 %21494 }
 0x51b   : > { %24068 = vmatpush1.msk.msra.mxu1 %vm236_vm1, %v20570_v19  ;;  %24058 = vmatmul.mubr.msk.f32.gmra.mrb[2].mxu0 %vm231_vm2, %v29219_v7 }
 0x51c   : > { %20534 = vmatprep.mubr.f32.mxu1 %v30149_v36  ;;  %20648 = vmatprep.mubr.f32.mxu0 %v30149_v36 }
 0x51d   : > { %24075 = vmatprep.subr.msk.mxu1 %vm236_vm1, %v20768_v8 }
 0x51e   : > { %24062 = vmatmul.mubr.msk.f32.gmra.mrb[2].mxu1 %vm231_vm2, %v29219_v7  ;;  %v20767_v7 = vsel %vm20764_vm12, %v29319_v62, %v29339_v3 }
 0x51f   : > { %24065 = vmatmul.mubr.msk.f32.vlgmr.msra.gmra.mrb[0].mxu0 %vm231_vm2, %v29280_v15  ;;  %20725 = vmatprep.mubr.f32.mxu1 %v30149_v36 }
 0x520   : > { %24072 = vmatpush1.msk.msra.mxu0 %vm236_vm1, %v20765_v57  ;;  %20654 = vmatprep.mubr.f32.mxu0 %v30149_v36 }
 0x521   : > { %24079 = vmatprep.subr.msk.mxu0 %vm236_vm1, %v27706_v44  ;;  %v29500_v44 = vpop.permute.xlu1 %21492 }
 0x522   : > { %24069 = vmatmul.mubr.msk.f32.vlgmr.msra.gmra.mrb[0].mxu1 %vm231_vm2, %v29280_v15  ;;  %v20953_v15 = vsel %vm969_vm5, %v27699_v56, %v29386_v25  ;;  %vm22588_vm5 = vcmask 941056  }
 0x523   : > { %24066 = vmatmul.mubr.msk.f32.gmra.mrb[2].mxu0 %vm231_vm2, %v29296_v49  ;;  %24076 = vmatpush1.msk.msra.mxu1 %vm236_vm1, %v20767_v7 }
 0x524   : > { %20731 = vmatprep.mubr.f32.mxu1 %v30149_v36  ;;  %20845 = vmatprep.mubr.f32.mxu0 %v30149_v36 }
 0x525   : > { %24083 = vmatprep.subr.msk.mxu1 %vm236_vm1, %v29386_v25 }
 0x526   : > { %24070 = vmatmul.mubr.msk.f32.gmra.mrb[2].mxu1 %vm231_vm2, %v29296_v49  ;;  %v29517_v49 = vpop.permute.xlu0 %21671 }
 0x527   : > { %24073 = vmatmul.mubr.msk.f32.vlgmr.msra.gmra.mrb[0].mxu0 %vm231_vm2, %v29358_v50  ;;  %20922 = vmatprep.mubr.f32.mxu1 %v30149_v36 }
 0x528   : > { %24080 = vmatpush1.msk.msra.mxu0 %vm236_vm1, %v25870_v54  ;;  %20851 = vmatprep.mubr.f32.mxu0 %v30149_v36  ;;  %v21676_v54 = vpop.permute.xlu1 %21675 }
 0x529   : > { %24087 = vmatprep.subr.msk.mxu0 %vm236_vm1, %v27737_v58  ;;  %v21134_v58 = vsel %vm1163_vm6, %v27716_v48, %v29429_v5  ;;  %vm22782_vm6 = vcmask 932864  }
 0x52a   : > { %24077 = vmatmul.mubr.msk.f32.vlgmr.msra.gmra.mrb[0].mxu1 %vm231_vm2, %v29358_v50  ;;  %v29534_v56 = vpop.permute.xlu0 %21673 }
 0x52b   : > { %24084 = vmatpush1.msk.msra.mxu1 %vm236_vm1, %v20953_v15  ;;  %24074 = vmatmul.mubr.msk.f32.gmra.mrb[2].mxu0 %vm231_vm2, %v29362_v41 }
 0x52c   : > { %20928 = vmatprep.mubr.f32.mxu1 %v30149_v36  ;;  %21026 = vmatprep.mubr.f32.mxu0 %v30149_v36  ;;  %v29541_v62 = vpop.permute.xlu1 %21852 }
 0x52d   : > { %24091 = vmatprep.subr.msk.mxu1 %vm236_vm1, %v29429_v5 }
 0x52e   : > { %24078 = vmatmul.mubr.msk.f32.gmra.mrb[2].mxu1 %vm231_vm2, %v29362_v41  ;;  %v30408_v41 = vld [vmem:[#allocation108_spill] sm:$0xff] }
 0x52f   : > { %24081 = vmatmul.mubr.msk.f32.vlgmr.msra.gmra.mrb[0].mxu0 %vm231_vm2, %v29378_v47  ;;  %21103 = vmatprep.mubr.f32.mxu1 %v30149_v36 }
 0x530   : > { %24088 = vmatpush1.msk.msra.mxu0 %vm236_vm1, %v25906_v6  ;;  %21032 = vmatprep.mubr.f32.mxu0 %v30149_v36  ;;  %v21857_v6 = vpop.permute.xlu0 %21856  ;;  %v29557_v48 = vpop.permute.xlu1 %21854 }
 0x531   : > { %24095 = vmatprep.subr.msk.mxu0 %vm236_vm1, %v27766_v38  ;;  %v21315_v38 = vsel %vm1357_vm7, %v27744_v0, %v29462_v33  ;;  %v21496_v0 = vsel %vm1551_vm8, %v27756_v63, %v21495_v11  ;;  %v21677_v63 = vsel %vm1745_vm9, %v27785_v34, %v21676_v54  ;;  %v21858_v3 = vsel %vm1939_vm10, %v30406_v22, %v21857_v6 }
 0x532   : > { %24085 = vmatmul.mubr.msk.f32.vlgmr.msra.gmra.mrb[0].mxu1 %vm231_vm2, %v29378_v47  ;;  %v30410_v47 = vld [vmem:[#allocation110_spill] sm:$0xff]  ;;  %vm30419_vm9 = vcmask 392192  }
 0x533   : > { %24092 = vmatpush1.msk.msra.mxu1 %vm236_vm1, %v21134_v58  ;;  %24082 = vmatmul.mubr.msk.f32.gmra.mrb[2].mxu0 %vm231_vm2, %v29407_v30  ;;  %vm30420_vm10 = vmmov %vm30419_vm9 }
 0x534   : > { %21109 = vmatprep.mubr.f32.mxu1 %v30149_v36  ;;  %21207 = vmatprep.mubr.f32.mxu0 %v30149_v36  ;;  %vm30425_vm0 = vmmov %vm30419_vm9 }
 0x535   : > { %24099 = vmatprep.subr.msk.mxu1 %vm236_vm1, %v29462_v33  ;;  %vm30426_vm12 = vmmov %vm30425_vm0 }
 0x536   : > { %24086 = vmatmul.mubr.msk.f32.gmra.mrb[2].mxu1 %vm231_vm2, %v29407_v30 }
 0x537   : > { %24089 = vmatmul.mubr.msk.f32.vlgmr.msra.gmra.mrb[0].mxu0 %vm231_vm2, %v29413_v35  ;;  %21284 = vmatprep.mubr.f32.mxu1 %v30149_v36 }
 0x538   : > { %24096 = vmatpush1.msk.msra.mxu0 %vm236_vm1, %v25942_v16  ;;  %21213 = vmatprep.mubr.f32.mxu0 %v30149_v36  ;;  %v29574_v16 = vpop.permute.xlu0 %22033 }
 0x539   : > { %24103 = vmatprep.subr.msk.mxu0 %vm236_vm1, %v27795_v20  ;;  %v22038_v20 = vpop.permute.xlu1 %22037 }
 0x53a   : > { %24093 = vmatmul.mubr.msk.f32.vlgmr.msra.gmra.mrb[0].mxu1 %vm231_vm2, %v29413_v35  ;;  %v22039_v50 = vsel %vm2133_vm11, %v27839_v27, %v22038_v20 }
 0x53b   : > { %24100 = vmatpush1.msk.msra.mxu1 %vm236_vm1, %v21315_v38  ;;  %24090 = vmatmul.mubr.msk.f32.gmra.mrb[2].mxu0 %vm231_vm2, %v29435_v2 }
 0x53c   : > { %21290 = vmatprep.mubr.f32.mxu1 %v30149_v36  ;;  %21388 = vmatprep.mubr.f32.mxu0 %v30149_v36  ;;  %v29591_v42 = vpop.permute.xlu0 %22035 }
 0x53d   : > { %24107 = vmatprep.subr.msk.mxu1 %vm236_vm1, %v21495_v11  ;;  %v29596_v61 = vpop.permute.xlu1 %22214 }
 0x53e   : > { %24094 = vmatmul.mubr.msk.f32.gmra.mrb[2].mxu1 %vm231_vm2, %v29435_v2 }
 0x53f   : > { %24097 = vmatmul.mubr.msk.f32.vlgmr.msra.gmra.mrb[0].mxu0 %vm231_vm2, %v29453_v9  ;;  %21465 = vmatprep.mubr.f32.mxu1 %v30149_v36 }
 0x540   : > { %24104 = vmatpush1.msk.msra.mxu0 %vm236_vm1, %v25978_v26  ;;  %21394 = vmatprep.mubr.f32.mxu0 %v30149_v36  ;;  %v22219_v26 = vpop.permute.xlu0 %22218 }
 0x541   : > { %24111 = vmatprep.subr.msk.mxu0 %vm236_vm1, %v27829_v31  ;;  %v29613_v31 = vpop.permute.xlu1 %22216  ;;  %v22220_v39 = vsel %vm12516_vm3, %v30408_v41, %v22219_v26  ;;  %vm23067_vm3 = vcmask 654336  }
 0x542   : > { %24101 = vmatmul.mubr.msk.f32.vlgmr.msra.gmra.mrb[0].mxu1 %vm231_vm2, %v29453_v9 }
 0x543   : > { %24108 = vmatpush1.msk.msra.mxu1 %vm236_vm1, %v21496_v0  ;;  %24098 = vmatmul.mubr.msk.f32.gmra.mrb[2].mxu0 %vm231_vm2, %v29477_v18 }
 0x544   : > { %21471 = vmatprep.mubr.f32.mxu1 %v30149_v36  ;;  %21569 = vmatprep.mubr.f32.mxu0 %v30149_v36 }
 0x545   : > { %24115 = vmatprep.subr.msk.mxu1 %vm236_vm1, %v21676_v54  ;;  %v22400_v34 = vpop.permute.xlu1 %22399 }
 0x546   : > { %24102 = vmatmul.mubr.msk.f32.gmra.mrb[2].mxu1 %vm231_vm2, %v29477_v18  ;;  %v22401_v55 = vsel %vm12712_vm4, %v30410_v47, %v22400_v34  ;;  %vm30422_vm4 = vcmask 523264  }
 0x547   : > { %24105 = vmatmul.mubr.msk.f32.vlgmr.msra.gmra.mrb[0].mxu0 %vm231_vm2, %v29482_v4  ;;  %21646 = vmatprep.mubr.f32.mxu1 %v30149_v36 }
 0x548   : > { %24112 = vmatpush1.msk.msra.mxu0 %vm236_vm1, %v26014_v40  ;;  %21575 = vmatprep.mubr.f32.mxu0 %v30149_v36  ;;  %v29623_v40 = vpop.permute.xlu0 %22395 }
 0x549   : > { %24119 = vmatprep.subr.msk.mxu0 %vm236_vm1, %v27860_v28  ;;  %v30405_v28 = vld [vmem:[#allocation13_spill] sm:$0xff]  ;;  %v22583_v1 = vpop.permute.xlu1 %22582 }
 0x54a   : > { %24109 = vmatmul.mubr.msk.f32.vlgmr.msra.gmra.mrb[0].mxu1 %vm231_vm2, %v29482_v4 }
 0x54b   : > { %24116 = vmatpush1.msk.msra.mxu1 %vm236_vm1, %v21677_v63  ;;  %24106 = vmatmul.mubr.msk.f32.gmra.mrb[2].mxu0 %vm231_vm2, %v29500_v44 }
 0x54c   : > { %21652 = vmatprep.mubr.f32.mxu1 %v30149_v36  ;;  %21750 = vmatprep.mubr.f32.mxu0 %v30149_v36  ;;  %v29642_v51 = vpop.permute.xlu0 %22397 }
 0x54d   : > { %24123 = vmatprep.subr.msk.mxu1 %vm236_vm1, %v21857_v6  ;;  %v22581_v24 = vpop.permute.xlu1 %22580 }
 0x54e   : > { %24110 = vmatmul.mubr.msk.f32.gmra.mrb[2].mxu1 %vm231_vm2, %v29500_v44  ;;  %v22589_v60 = vsel %vm22588_vm5, %v22581_v24, %v22583_v1 }
 0x54f   : > { %24113 = vmatmul.mubr.msk.f32.vlgmr.msra.gmra.mrb[0].mxu0 %vm231_vm2, %v29517_v49  ;;  %21827 = vmatprep.mubr.f32.mxu1 %v30149_v36 }
 0x550   : > { %24120 = vmatpush1.msk.msra.mxu0 %vm236_vm1, %v30405_v28  ;;  %21756 = vmatprep.mubr.f32.mxu0 %v30149_v36  ;;  %v22585_v59 = vpop.permute.xlu0 %22584 }
 0x551   : > { %24127 = vmatprep.subr.msk.mxu0 %vm236_vm1, %v27891_v23  ;;  %v30407_v23 = vld [vmem:[#allocation14_spill] sm:$0xff] }
 0x552   : > { %24117 = vmatmul.mubr.msk.f32.vlgmr.msra.gmra.mrb[0].mxu1 %vm231_vm2, %v29517_v49 }
 0x553   : > { %24124 = vmatpush1.msk.msra.mxu1 %vm236_vm1, %v21858_v3  ;;  %24114 = vmatmul.mubr.msk.f32.gmra.mrb[2].mxu0 %vm231_vm2, %v29534_v56 }
 0x554   : > { %21833 = vmatprep.mubr.f32.mxu1 %v30149_v36  ;;  %21931 = vmatprep.mubr.f32.mxu0 %v30149_v36  ;;  %v22577_v27 = vpop.permute.xlu0 %22576 }
 0x555   : > { %24131 = vmatprep.subr.msk.mxu1 %vm236_vm1, %v22038_v20 }
 0x556   : > { %24118 = vmatmul.mubr.msk.f32.gmra.mrb[2].mxu1 %vm231_vm2, %v29534_v56 }
 0x557   : > { %24121 = vmatmul.mubr.msk.f32.vlgmr.msra.gmra.mrb[0].mxu0 %vm231_vm2, %v29541_v62  ;;  %22008 = vmatprep.mubr.f32.mxu1 %v30149_v36 }
 0x558   : > { %24128 = vmatpush1.msk.msra.mxu0 %vm236_vm1, %v30407_v23  ;;  %21937 = vmatprep.mubr.f32.mxu0 %v30149_v36 }
 0x559   : > { %24135 = vmatprep.subr.msk.mxu0 %vm236_vm1, %v27926_v53  ;;  %v22587_v53 = vpop.permute.xlu1 %22586 }
 0x55a   : > { %24125 = vmatmul.mubr.msk.f32.vlgmr.msra.gmra.mrb[0].mxu1 %vm231_vm2, %v29541_v62  ;;  %v22591_v43 = vsel %vm22588_vm5, %v22585_v59, %v22587_v53 }
 0x55b   : > { %24132 = vmatpush1.msk.msra.mxu1 %vm236_vm1, %v22039_v50  ;;  %24122 = vmatmul.mubr.msk.f32.gmra.mrb[2].mxu0 %vm231_vm2, %v29557_v48 }
 0x55c   : > { %22014 = vmatprep.mubr.f32.mxu1 %v30149_v36  ;;  %22112 = vmatprep.mubr.f32.mxu0 %v30149_v36 }
 0x55d   : > { %24139 = vmatprep.subr.msk.mxu1 %vm236_vm1, %v22219_v26  ;;  %v22777_v12 = vpop.permute.xlu1 %22776 }
 0x55e   : > { %24126 = vmatmul.mubr.msk.f32.gmra.mrb[2].mxu1 %vm231_vm2, %v29557_v48 }
 0x55f   : > { %24129 = vmatmul.mubr.msk.f32.vlgmr.msra.gmra.mrb[0].mxu0 %vm231_vm2, %v29574_v16  ;;  %22189 = vmatprep.mubr.f32.mxu1 %v30149_v36 }
 0x560   : > { %24136 = vmatpush1.msk.msra.mxu0 %vm236_vm1, %v27879_v10  ;;  %22118 = vmatprep.mubr.f32.mxu0 %v30149_v36  ;;  %v22579_v10 = vpop.permute.xlu0 %22578 }
 0x561   : > { %24143 = vmatprep.subr.msk.mxu0 %vm236_vm1, %v27960_v46  ;;  %v22590_v46 = vsel %vm22588_vm5, %v22583_v1, %v22585_v59  ;;  %v22775_v32 = vpop.permute.xlu1 %22774  ;;  %vm30427_vm5 = vmmov %vm30422_vm4 }
 0x562   : > { %24133 = vmatmul.mubr.msk.f32.vlgmr.msra.gmra.mrb[0].mxu1 %vm231_vm2, %v29574_v16  ;;  %v22783_v30 = vsel %vm22782_vm6, %v22775_v32, %v22777_v12 }
 0x563   : > { %24140 = vmatpush1.msk.msra.mxu1 %vm236_vm1, %v22220_v39  ;;  %24130 = vmatmul.mubr.msk.f32.gmra.mrb[2].mxu0 %vm231_vm2, %v29591_v42 }
 0x564   : > { %22195 = vmatprep.mubr.f32.mxu1 %v30149_v36  ;;  %22293 = vmatprep.mubr.f32.mxu0 %v30149_v36  ;;  %v22779_v25 = vpop.permute.xlu0 %22778 }
 0x565   : > { %24147 = vmatprep.subr.msk.mxu1 %vm236_vm1, %v22400_v34  ;;  %v22784_v21 = vsel %vm22782_vm6, %v22777_v12, %v22779_v25  ;;  %v22781_v29 = vpop.permute.xlu1 %22780 }
 0x566   : > { %24134 = vmatmul.mubr.msk.f32.gmra.mrb[2].mxu1 %vm231_vm2, %v29591_v42  ;;  %v22785_v17 = vsel %vm22782_vm6, %v22779_v25, %v22781_v29  ;;  %vm30429_vm6 = vmmov %vm30422_vm4 }
 0x567   : > { %24137 = vmatmul.mubr.msk.f32.vlgmr.msra.gmra.mrb[0].mxu0 %vm231_vm2, %v29596_v61  ;;  %22370 = vmatprep.mubr.f32.mxu1 %v30149_v36 }
 0x568   : > { %24144 = vmatpush1.msk.msra.mxu0 %vm236_vm1, %v30409_v37  ;;  %22299 = vmatprep.mubr.f32.mxu0 %v30149_v36  ;;  %v22771_v35 = vpop.permute.xlu0 %22770 }
 0x569   : > { %24151 = vmatprep.subr.msk.mxu0 %vm236_vm1, %v22590_v46 }
 0x56a   : > { %24141 = vmatmul.mubr.msk.f32.vlgmr.msra.gmra.mrb[0].mxu1 %vm231_vm2, %v29596_v61 }
 0x56b   : > { %24148 = vmatpush1.msk.msra.mxu1 %vm236_vm1, %v22401_v55  ;;  %24138 = vmatmul.mubr.msk.f32.gmra.mrb[2].mxu0 %vm231_vm2, %v29613_v31 }
 0x56c   : > { %22376 = vmatprep.mubr.f32.mxu1 %v30149_v36  ;;  %22474 = vmatprep.mubr.f32.mxu0 %v30149_v36  ;;  %v22773_v14 = vpop.permute.xlu0 %22772 }
 0x56d   : > { %24155 = vmatprep.subr.msk.mxu1 %vm236_vm1, %v22587_v53 }
 0x56e   : > { %24142 = vmatmul.mubr.msk.f32.gmra.mrb[2].mxu1 %vm231_vm2, %v29613_v31 }
 0x56f   : > { %24145 = vmatmul.mubr.msk.f32.vlgmr.msra.gmra.mrb[0].mxu0 %vm231_vm2, %v29623_v40  ;;  %22551 = vmatprep.mubr.f32.mxu1 %v30149_v36 }
 0x570   : > { %24152 = vmatpush1.msk.msra.mxu0 %vm236_vm1, %v22589_v60  ;;  %22480 = vmatprep.mubr.f32.mxu0 %v30149_v36 }
 0x571   : > { %24159 = vmatprep.subr.msk.mxu0 %vm236_vm1, %v22784_v21 }
 0x572   : > { %24149 = vmatmul.mubr.msk.f32.vlgmr.msra.gmra.mrb[0].mxu1 %vm231_vm2, %v29623_v40 }
 0x573   : > { %24156 = vmatpush1.msk.msra.mxu1 %vm236_vm1, %v22591_v43  ;;  %24146 = vmatmul.mubr.msk.f32.gmra.mrb[2].mxu0 %vm231_vm2, %v29642_v51 }
 0x574   : > { %22557 = vmatprep.mubr.f32.mxu1 %v30149_v36  ;;  %22668 = vmatprep.mubr.f32.mxu0 %v30149_v36 }
 0x575   : > { %24163 = vmatprep.subr.msk.mxu1 %vm236_vm1, %v22781_v29 }
 0x576   : > { %24150 = vmatmul.mubr.msk.f32.gmra.mrb[2].mxu1 %vm231_vm2, %v29642_v51 }
 0x577   : > { %24153 = vmatmul.mubr.msk.f32.vlgmr.msra.gmra.mrb[0].mxu0 %vm231_vm2, %v22577_v27  ;;  %22745 = vmatprep.mubr.f32.mxu1 %v30149_v36 }
 0x578   : > { %24160 = vmatpush1.msk.msra.mxu0 %vm236_vm1, %v22783_v30  ;;  %22674 = vmatprep.mubr.f32.mxu0 %v30149_v36 }
 0x57a   : > { %24157 = vmatmul.mubr.msk.f32.vlgmr.msra.gmra.mrb[0].mxu1 %vm231_vm2, %v22577_v27 }
 0x57b   : > { %24154 = vmatmul.mubr.msk.f32.gmra.mrb[2].mxu0 %vm231_vm2, %v22579_v10  ;;  %24164 = vmatpush1.msk.msra.mxu1 %vm236_vm1, %v22785_v17  ;;  %vm30416_vm1 = vmmov %vm30394_vm14 }
 0x57c   : > { %22751 = vmatprep.mubr.f32.mxu1 %v30149_v36  ;;  %22862 = vmatprep.mubr.f32.mxu0 %v30149_v36  ;;  %vm30417_vm7 = vmmov %vm30416_vm1 }
 0x57d   : > { %vm30418_vm8 = vmmov %vm30416_vm1 }
 0x57e   : > { %24158 = vmatmul.mubr.msk.f32.gmra.mrb[2].mxu1 %vm231_vm2, %v22579_v10  ;;  %vm30421_vm11 = vmmov %vm30416_vm1 }
 0x57f   : > { %24161 = vmatmul.mubr.msk.f32.vlgmr.msra.gmra.mrb[0].mxu0 %vm231_vm2, %v22771_v35  ;;  %22939 = vmatprep.mubr.f32.mxu1 %v30149_v36  ;;  %vm30423_vm14 = vmmov %vm30422_vm4 }
 0x580   : > { %22868 = vmatprep.mubr.f32.mxu0 %v30149_v36 }
 0x582   : > { %24165 = vmatmul.mubr.msk.f32.vlgmr.msra.gmra.mrb[0].mxu1 %vm231_vm2, %v22771_v35 }
 0x583   : > { %24162 = vmatmul.mubr.msk.f32.gmra.mrb[2].mxu0 %vm231_vm2, %v22773_v14  ;;  %22945 = vmatprep.mubr.f32.mxu1 %v30149_v36 }
 0x586   : > { %24166 = vmatmul.mubr.msk.f32.gmra.mrb[2].mxu1 %vm231_vm2, %v22773_v14  ;;  %vm23060_vm2 = vcmask 261120  }
 0x589   : > { %v29783_v8 = vpop.permute.xlu1 %23093 }
 0x58d   : > { %v29785_v33 = vpop.permute.xlu0 %23098 }
 0x652   : > { %v29747_v52 = vpop.f32.mrb[0].mxu0 }
 0x653   : > { %22962 = vrot.lane.b32.xlu1 %v29747_v52, %s30354_s29  ;;  %v22866_v5 = vpop.f32.mrb[1].mxu0 }
 0x655   : > { %v22941_v2 = vpop.f32.mrb[0].mxu1 }
 0x656   : > { %23020 = vrot.lane.b32.xlu0 %v22941_v2, %s30411_s8  ;;  %v29752_v45 = vpop.f32.mrb[2].mxu0  ;;  %v22943_v13 = vpop.f32.mrb[1].mxu1 }
 0x657   : > { %22968 = vrot.lane.b32.xlu1 %v29747_v52, %s30229_s1  ;;  %v22872_v9 = vpop.f32.mrb[3].mxu0 }
 0x659   : > { %v22947_v19 = vpop.f32.mrb[2].mxu1 }
 0x65a   : > { %23026 = vrot.lane.b32.xlu0 %v22941_v2, %s30307_s11  ;;  %v22949_v36 = vpop.f32.mrb[3].mxu1 }
 0x65b   : > { %23006 = vrot.lane.b32.xlu1 %v22866_v5, %s30256_s21 }
 0x65e   : > { %23032 = vrot.lane.b32.xlu0 %v22941_v2, %s30209_s4 }
 0x65f   : > { %23012 = vrot.lane.b32.xlu1 %v22866_v5, %s30412_s30 }
 0x662   : > { %23038 = vrot.lane.b32.xlu0 %v22941_v2, %s30413_s3 }
 0x663   : > { %23022 = vrot.lane.b32.xlu1 %v22947_v19, %s30411_s8 }
 0x666   : > { %23044 = vrot.lane.b32.xlu0 %v22941_v2, %s30295_s12 }
 0x667   : > { %23028 = vrot.lane.b32.xlu1 %v22947_v19, %s30307_s11 }
 0x66a   : > { %22974 = vrot.lane.b32.xlu0 %v29747_v52, %s30414_s16 }
 0x66b   : > { %23034 = vrot.lane.b32.xlu1 %v22947_v19, %s30209_s4  ;;  %s25469_s4 = smov 58  }
 0x66e   : > { %22980 = vrot.lane.b32.xlu0 %v29747_v52, %s30241_s14 }
 0x66f   : > { %23040 = vrot.lane.b32.xlu1 %v22947_v19, %s30413_s3 }
 0x672   : > { %22988 = vrot.lane.b32.xlu0 %v22866_v5, %s25468_s24 }
 0x673   : > { %23046 = vrot.lane.b32.xlu1 %v22947_v19, %s30295_s12 }
 0x676   : > { %22994 = vrot.lane.b32.xlu0 %v22866_v5, %s30248_s2 }
 0x677   : > { %22970 = vrot.lane.b32.xlu1 %v29752_v45, %s30229_s1  ;;  %s30415_s1 = sld [smem:[#allocation10_spill]] }
 0x67a   : > { %22964 = vrot.lane.b32.xlu0 %v29752_v45, %s30354_s29 }
 0x67b   : > { %22976 = vrot.lane.b32.xlu1 %v29752_v45, %s30414_s16 }
 0x67d   : > { %p199_p6 = scmp.lt.s32.totalorder %s30415_s1, 1 }
 0x67e   : > { %23008 = vrot.lane.b32.xlu0 %v22872_v9, %s30256_s21 }
 0x67f   : > { %22982 = vrot.lane.b32.xlu1 %v29752_v45, %s30241_s14  ;;  %s30438_s1 = smov (!%p199_p6, %s30415_s1), 1 }
 0x680   : > { %s24169_s14 = sshll.u32 %s30438_s1, 5 }
 0x681   : > { %s203_s12 = scalar_lea.vmem %s30428_s28, %s24169_s14 }
 0x682   : > { %23014 = vrot.lane.b32.xlu0 %v22872_v9, %s30412_s30 }
 0x683   : > { %22990 = vrot.lane.b32.xlu1 %v22872_v9, %s25468_s24 }
 0x686   : > { %23000 = vrot.lane.b32.xlu0 %v22866_v5, %s25469_s4 }
 0x687   : > { %22996 = vrot.lane.b32.xlu1 %v22872_v9, %s30248_s2 }
 0x68a   : > { %23052 = vrot.lane.b32.xlu0 %v22943_v13, %s25470_s19 }
 0x68b   : > { %23002 = vrot.lane.b32.xlu1 %v22872_v9, %s25469_s4 }
 0x68f   : > { %23054 = vrot.lane.b32.xlu1 %v22949_v36, %s25470_s19 }
 0x6c5   : > { %v22963_v57 = vpop.permute.xlu1 %22962 }
 0x6c6   : > { %v23058_v28 = vsel %vm30417_vm7, %v29747_v52, %v22963_v57 }
 0x6c8   : > { %v23021_v18 = vpop.permute.xlu0 %23020 }
 0x6c9   : > { %v22969_v4 = vpop.permute.xlu1 %22968 }
 0x6ca   : > { %v23061_v22 = vsel %vm23060_vm2, %v23058_v28, %v22969_v4 }
 0x6cc   : > { %v23027_v7 = vpop.permute.xlu0 %23026 }
 0x6cd   : > { %v23007_v11 = vpop.permute.xlu1 %23006 }
 0x6d0   : > { %v23033_v44 = vpop.permute.xlu0 %23032 }
 0x6d1   : > { %v23013_v15 = vpop.permute.xlu1 %23012 }
 0x6d2   : > { %v23075_v63 = vsel %vm30416_vm1, %v23007_v11, %v23013_v15  ;;  %vm30430_vm1 = vmmov %vm30424_vm15 }
 0x6d3   : > { %v23077_v34 = vsel %vm23060_vm2, %v23075_v63, %v23021_v18  ;;  %vm30432_vm7 = vmmov %vm30430_vm1 }
 0x6d4   : > { %v23039_v49 = vpop.permute.xlu0 %23038  ;;  %v23079_v1 = vsel %vm30419_vm9, %v23077_v34, %v23027_v7 }
 0x6d5   : > { %v23023_v54 = vpop.permute.xlu1 %23022  ;;  %v23081_v39 = vsel %vm30423_vm14, %v23079_v1, %v23033_v44 }
 0x6d6   : > { %v23083_v32 = vsel %vm23067_vm3, %v23081_v39, %v23039_v49 }
 0x6d8   : > { %v23045_v56 = vpop.permute.xlu0 %23044 }
 0x6d9   : > { %v23029_v58 = vpop.permute.xlu1 %23028  ;;  %v23085_v43 = vsel %vm30430_vm1, %v23083_v32, %v23045_v56 }
 0x6dc   : > { %v22975_v62 = vpop.permute.xlu0 %22974 }
 0x6dd   : > { %v23035_v6 = vpop.permute.xlu1 %23034  ;;  %v23063_v23 = vsel %vm30420_vm10, %v23061_v22, %v22975_v62 }
 0x6e0   : > { %v22981_v48 = vpop.permute.xlu0 %22980 }
 0x6e1   : > { %v23041_v38 = vpop.permute.xlu1 %23040  ;;  %v23065_v24 = vsel %vm30422_vm4, %v23063_v23, %v22981_v48 }
 0x6e4   : > { %v22989_v16 = vpop.permute.xlu0 %22988 }
 0x6e5   : > { %v23047_v20 = vpop.permute.xlu1 %23046  ;;  %v23068_v53 = vsel %vm23067_vm3, %v23065_v24, %v22989_v16 }
 0x6e8   : > { %v22995_v0 = vpop.permute.xlu0 %22994 }
 0x6e9   : > { %v22971_v42 = vpop.permute.xlu1 %22970  ;;  %v23070_v10 = vsel %vm30424_vm15, %v23068_v53, %v22995_v0 }
 0x6ec   : > { %v22965_v61 = vpop.permute.xlu0 %22964 }
 0x6ed   : > { %v22977_v26 = vpop.permute.xlu1 %22976  ;;  %v23059_v3 = vsel %vm30418_vm8, %v29752_v45, %v22965_v61 }
 0x6ee   : > { %v23062_v41 = vsel %vm23060_vm2, %v23059_v3, %v22971_v42 }
 0x6ef   : > { %v23064_v55 = vsel %vm30426_vm12, %v23062_v41, %v22977_v26 }
 0x6f0   : > { %v23009_v31 = vpop.permute.xlu0 %23008 }
 0x6f1   : > { %v22983_v40 = vpop.permute.xlu1 %22982 }
 0x6f2   : > { %v23066_v60 = vsel %vm30427_vm5, %v23064_v55, %v22983_v40 }
 0x6f4   : > { %v23015_v51 = vpop.permute.xlu0 %23014 }
 0x6f5   : > { %v23076_v59 = vsel %vm30421_vm11, %v23009_v31, %v23015_v51  ;;  %v22991_v50 = vpop.permute.xlu1 %22990 }
 0x6f6   : > { %v23078_v27 = vsel %vm23060_vm2, %v23076_v59, %v23023_v54  ;;  %v23069_v29 = vsel %vm23067_vm3, %v23066_v60, %v22991_v50  ;;  %vm30431_vm2 = vmmov %vm30430_vm1 }
 0x6f7   : > { %v23080_v46 = vsel %vm30425_vm0, %v23078_v27, %v23029_v58 }
 0x6f8   : > { %v23001_v12 = vpop.permute.xlu0 %23000  ;;  %v23082_v21 = vsel %vm30429_vm6, %v23080_v46, %v23035_v6 }
 0x6f9   : > { %v23073_v37 = vsel %vm23072_vm13, %v23070_v10, %v23001_v12  ;;  %v22997_v47 = vpop.permute.xlu1 %22996  ;;  %v23084_v45 = vsel %vm23067_vm3, %v23082_v21, %v23041_v38 }
 0x6fa   : > { %v23101_v25 = vadd.f32 %v29783_v8, %v23073_v37  ;;  %v23071_v35 = vsel %vm30431_vm2, %v23069_v29, %v22997_v47  ;;  %v23086_v57 = vsel %vm30432_vm7, %v23084_v45, %v23047_v20 }
 0x6fc   : > { %v23105_v30 = vmax.f32 %v23101_v25, 0.0  ;;  %v23053_v17 = vpop.permute.xlu0 %23052 }
 0x6fd   : > { %v23087_v14 = vsel %vm23072_vm13, %v23085_v43, %v23053_v17  ;;  %v23003_v52 = vpop.permute.xlu1 %23002 }
 0x6fe   : > { %23109 = vst [vmem:[%s203_s12] sm:$0xff] %v23105_v30  ;;  %v23102_v5 = vadd.f32 %v29783_v8, %v23087_v14  ;;  %v23074_v2 = vsel %vm23072_vm13, %v23071_v35, %v23003_v52 }
 0x6ff   : > { %v23103_v13 = vadd.f32 %v29785_v33, %v23074_v2 }
 0x700   : > { %v23106_v9 = vmax.f32 %v23102_v5, 0.0 }
 0x701   : > { %v23107_v19 = vmax.f32 %v23103_v13, 0.0  ;;  %v23055_v36 = vpop.permute.xlu1 %23054 }
 0x702   : > { %23110 = vst [vmem:[%s203_s12 + $0x8] sm:$0xff] %v23106_v9  ;;  %v23088_v18 = vsel %vm23072_vm13, %v23086_v57, %v23055_v36 }
 0x703   : > { %23111 = vst [vmem:[%s203_s12 + $0x10] sm:$0xf] %v23107_v19  ;;  %v23104_v4 = vadd.f32 %v29785_v33, %v23088_v18 }
 0x705   : > { %v23108_v7 = vmax.f32 %v23104_v4, 0.0 }
 0x707   : > { %23112 = vst [vmem:[%s203_s12 + $0x18] sm:$0xf] %v23108_v7 }
 0x708 PF: > { %s30433_s15 = sld [smem:[#allocation11_spill]]  ;;  %s30434_s12 = sld [smem:[#allocation8_spill]] }
 0x709   : > { %s30435_s13 = sld [smem:[#allocation9_spill]]  ;;  %s30436_s14 = sld [smem:[#allocation12_spill]] }
 0x70e   : > { %p14_p8 = scmp.ge.s32.totalorder %s30433_s15, 4  }
 0x710   :  { %16 = sbr.rel (!%p14_p8) target bundleno = 9 (0x9), region = 76 }
 0x717   :  { %23134 = vsyncpa [#allocation3], 1 }
 0x718   :  { %23136 = vsyncpa [#allocation3 + $0x1], 1 }
 0x719   :  { %23137 = vsyncpa [#allocation5], 1 }

</bundles_post_ra>
